<compile_context>
chip_gen: v7x
topology: tpu7x:2x2x1
jax: 0.10.0
libtpu: 0.0.40
codegen_flags: <defaults>
</compile_context>

<pallas_src>
import functools

import numpy as np
import jax
import jax.numpy as jnp
from jax import lax
from jax.experimental import pallas as pl
from jax.experimental.pallas import tpu as pltpu


# ---------------------------------------------------------------------------
# Pallas kernels
# ---------------------------------------------------------------------------

def _conv_bn_kernel(w_ref, x_ref, s_ref, b_ref, o_ref, *, relu):
    """(Cout,K) @ (K,TM) on the MXU -> folded-BN affine -> optional ReLU."""
    acc = jnp.dot(w_ref[...], x_ref[...], preferred_element_type=jnp.float32)
    y = acc * s_ref[...] + b_ref[...]
    if relu:
        y = jnp.maximum(y, 0.0)
    o_ref[...] = y.astype(o_ref.dtype)


def _conv_bn_res_kernel(w_ref, x_ref, s_ref, b_ref, r_ref, o_ref, *, relu):
    """Same as above, additionally fusing the residual add (BasicBlock tail)."""
    acc = jnp.dot(w_ref[...], x_ref[...], preferred_element_type=jnp.float32)
    y = acc * s_ref[...] + b_ref[...] + r_ref[...].astype(jnp.float32)
    if relu:
        y = jnp.maximum(y, 0.0)
    o_ref[...] = y.astype(o_ref.dtype)


def _head_kernel(x_ref, p_ref, w_ref, b_ref, o_ref):
    """Fused global average pool (as a matmul) + fully connected layer."""
    pooled = jnp.dot(x_ref[...], p_ref[...], preferred_element_type=jnp.float32)
    logits = jnp.dot(w_ref[...], pooled, preferred_element_type=jnp.float32)
    o_ref[...] = (logits + b_ref[...]).astype(o_ref.dtype)


# ---------------------------------------------------------------------------
# Pallas wrappers
# ---------------------------------------------------------------------------

def _round_up(x, m):
    return (x + m - 1) // m * m


def _pick_tm(m_padded, max_tm):
    tm = min(m_padded, max_tm)
    tm -= tm % 128
    tm = max(tm, 128)
    while m_padded % tm:
        tm -= 128
    return tm


def _fused_conv_matmul(wmat, xcol, scale, bias, residual=None, relu=True,
                       out_dtype=jnp.float32, max_tm=1024):
    """y = act(wmat @ xcol * scale + bias (+ residual)); lane axis = pixels."""
    cout, k = wmat.shape
    m = xcol.shape[1]

    mp = _round_up(m, 128)
    if mp != m:
        xcol = jnp.pad(xcol, ((0, 0), (0, mp - m)))
        if residual is not None:
            residual = jnp.pad(residual, ((0, 0), (0, mp - m)))
    tm = _pick_tm(mp, max_tm)

    scale = scale.reshape(cout, 1).astype(jnp.float32)
    bias = bias.reshape(cout, 1).astype(jnp.float32)

    w_spec = pl.BlockSpec((cout, k), lambda i: (0, 0))
    x_spec = pl.BlockSpec((k, tm), lambda i: (0, i))
    v_spec = pl.BlockSpec((cout, 1), lambda i: (0, 0))
    o_spec = pl.BlockSpec((cout, tm), lambda i: (0, i))

    if residual is None:
        kernel = functools.partial(_conv_bn_kernel, relu=relu)
        in_specs = [w_spec, x_spec, v_spec, v_spec]
        args = (wmat, xcol, scale, bias)
    else:
        kernel = functools.partial(_conv_bn_res_kernel, relu=relu)
        in_specs = [w_spec, x_spec, v_spec, v_spec, o_spec]
        args = (wmat, xcol, scale, bias, residual)

    out = pl.pallas_call(
        kernel,
        out_shape=jax.ShapeDtypeStruct((cout, mp), out_dtype),
        grid_spec=pltpu.PrefetchScalarGridSpec(
            num_scalar_prefetch=0,
            grid=(mp // tm,),
            in_specs=in_specs,
            out_specs=o_spec,
        ),
        compiler_params=pltpu.CompilerParams(
            dimension_semantics=("parallel",)),
    )(*args)
    return out[:, :m] if mp != m else out


def _im2col(a, ksize, stride, padding):
    """(C, N, H, W) -> (C*k*k, N*Ho*Wo) column matrix (rows ordered ci, dh, dw)."""
    c, n, h, w = a.shape
    ho = (h + 2 * padding - ksize) // stride + 1
    wo = (w + 2 * padding - ksize) // stride + 1
    if padding:
        a = jnp.pad(a, ((0, 0), (0, 0), (padding, padding), (padding, padding)))
    taps = []
    for dh in range(ksize):
        for dw in range(ksize):
            taps.append(a[:, :, dh:dh + stride * ho:stride,
                          dw:dw + stride * wo:stride])
    xcol = jnp.stack(taps, axis=1).reshape(c * ksize * ksize, n * ho * wo)
    return xcol, n, ho, wo


def _expand_grouped(weight, groups):
    """(Cout, Cin/g, kh, kw) -> dense block-diagonal (Cout, Cin, kh, kw)."""
    if groups == 1:
        return weight
    cout, cig, kh, kw = weight.shape
    cog = cout // groups
    full = jnp.zeros((cout, cig * groups, kh, kw), weight.dtype)
    for g in range(groups):
        full = full.at[g * cog:(g + 1) * cog, g * cig:(g + 1) * cig].set(
            weight[g * cog:(g + 1) * cog])
    return full


def _conv_bn_pallas(a, weight, scale, bias, *, stride, groups, relu,
                    residual=None):
    """a: (C_in, N, H, W); weight: (C_out, C_in//groups, kh, kw)."""
    cout, _, ksize, _ = weight.shape
    padding = (ksize - 1) // 2
    wmat = _expand_grouped(weight, groups).reshape(cout, -1).astype(jnp.float32)
    xcol, n, ho, wo = _im2col(a, ksize, stride, padding)
    res = None if residual is None else residual.reshape(cout, n * ho * wo)
    y = _fused_conv_matmul(wmat, xcol, scale, bias, residual=res, relu=relu,
                           out_dtype=a.dtype)
    return y.reshape(cout, n, ho, wo)


def _head_pallas(a, fc_w, fc_b):
    """a: (C, N, H, W) -> logits (N, num_classes); avgpool + fc in one kernel."""
    c, n, h, w = a.shape
    hw = h * w
    x = a.reshape(c, n * hw)
    pool = jnp.repeat(jnp.eye(n, dtype=jnp.float32), hw, axis=0) / float(hw)
    nc = fc_w.shape[0]
    out = pl.pallas_call(
        _head_kernel,
        out_shape=jax.ShapeDtypeStruct((nc, n), jnp.float32),
        grid_spec=pltpu.PrefetchScalarGridSpec(
            num_scalar_prefetch=0,
            grid=(1,),
            in_specs=[pl.BlockSpec((c, n * hw), lambda i: (0, 0)),
                      pl.BlockSpec((n * hw, n), lambda i: (0, 0)),
                      pl.BlockSpec((nc, c), lambda i: (0, 0)),
                      pl.BlockSpec((nc, 1), lambda i: (0, 0))],
            out_specs=pl.BlockSpec((nc, n), lambda i: (0, 0)),
        ),
    )(x, pool, fc_w.astype(jnp.float32),
      fc_b.reshape(nc, 1).astype(jnp.float32))
    return out.T


# ---------------------------------------------------------------------------
# Pure-JAX reference backend (for correctness checking)
# ---------------------------------------------------------------------------

def _conv_bn_ref(a, weight, scale, bias, *, stride, groups, relu,
                 residual=None):
    ksize = weight.shape[2]
    pad = (ksize - 1) // 2
    y = lax.conv_general_dilated(
        a, weight, window_strides=(stride, stride),
        padding=[(pad, pad), (pad, pad)],
        feature_group_count=groups,
        dimension_numbers=("NCHW", "OIHW", "NCHW"))
    y = y * scale.reshape(1, -1, 1, 1) + bias.reshape(1, -1, 1, 1)
    if residual is not None:
        y = y + residual
    if relu:
        y = jnp.maximum(y, 0.0)
    return y


def _head_ref(a, fc_w, fc_b):
    pooled = jnp.mean(a, axis=(2, 3))
    return pooled @ fc_w.T + fc_b


# ---------------------------------------------------------------------------
# Architecture / parameters (mirrors CifarResNet + SequentialMixer)
# ---------------------------------------------------------------------------

def _butterfly_perm(c, a_sz, b_sz):
    """Channel perm of x.view(B,-1,a_sz,b_sz,H,W).transpose(2,3).view(B,-1,H,W)."""
    idx = np.arange(c, dtype=np.int32).reshape(c // (a_sz * b_sz), a_sz, b_sz)
    return idx.transpose(0, 2, 1).reshape(c)


def build_arch(planes, layers, group_sizes):
    arch = []
    inplanes = planes
    stage_planes = [planes, planes * 2, planes * 4]
    strides = [1, 2, 2]
    for s in range(3):
        pls, stride, gsz = stage_planes[s], strides[s], group_sizes[s]
        groups = 1 if gsz <= 0 else inplanes // gsz
        blocks = [dict(inplanes=inplanes, planes=pls, stride=stride,
                       groups=groups,
                       downsample=(stride != 1 or inplanes != pls))]
        inplanes = pls  # BasicBlock.expansion == 1
        for _ in range(1, layers[s]):
            blocks.append(dict(inplanes=inplanes, planes=pls, stride=1,
                               groups=groups, downsample=False))
        if gsz <= 0:
            group_sz, gaps = 1, [1] * len(blocks)   # degenerate: identity shuffle
        else:
            group_sz = gsz
            num_layers = int(np.ceil(np.log(inplanes) / np.log(gsz)))
            gaps = []
            for i in range(len(blocks)):
                gap = gsz ** (i % num_layers)
                if gap * gsz > inplanes:
                    gap = int(np.ceil(inplanes / gsz))
                gaps.append(gap)
        arch.append(dict(group_sz=group_sz, gaps=gaps, blocks=blocks))
    return arch


def _bn_fold(c, eps=1e-5):
    gamma = jnp.ones((c,), jnp.float32)      # nn.init.constant_(bn.weight, 1)
    beta = jnp.zeros((c,), jnp.float32)      # nn.init.constant_(bn.bias, 0)
    running_mean = jnp.zeros((c,), jnp.float32)
    running_var = jnp.ones((c,), jnp.float32)
    scale = gamma / jnp.sqrt(running_var + eps)
    return scale, beta - running_mean * scale


def init_params(key, arch, planes, num_classes, in_ch=3):
    def conv_w(k, cout, cin_g, ks):
        std = float(np.sqrt(2.0 / (cout * ks * ks)))   # kaiming_normal_ fan_out
        return std * jax.random.normal(k, (cout, cin_g, ks, ks), jnp.float32)

    n_keys = 4 + 3 * sum(len(s["blocks"]) for s in arch)
    keys = iter(jax.random.split(key, n_keys))

    params = {"conv1": conv_w(next(keys), planes, in_ch, 3),
              "bn1": _bn_fold(planes),
              "stages": []}
    for stage in arch:
        sp = []
        for b in stage["blocks"]:
            cin, cpl, g = b["inplanes"], b["planes"], b["groups"]
            bp = {"conv1": conv_w(next(keys), cpl, cin // g, 3),
                  "bn1": _bn_fold(cpl),
                  "conv2": conv_w(next(keys), cpl, cpl // g, 3),
                  "bn2": _bn_fold(cpl),
                  "ds_conv": None, "ds_bn": None}
            if b["downsample"]:
                bp["ds_conv"] = conv_w(next(keys), cpl, cin // g, 1)
                bp["ds_bn"] = _bn_fold(cpl)
            sp.append(bp)
        params["stages"].append(sp)

    final_c = arch[-1]["blocks"][-1]["planes"]
    bound = 1.0 / float(np.sqrt(final_c))
    params["fc_w"] = jax.random.uniform(next(keys), (num_classes, final_c),
                                        jnp.float32, -bound, bound)
    params["fc_b"] = jax.random.uniform(next(keys), (num_classes,),
                                        jnp.float32, -bound, bound)
    return params


def forward(params, x, arch, *, use_pallas):
    if use_pallas:
        conv_bn, head, perm_axis = _conv_bn_pallas, _head_pallas, 0
        a = jnp.transpose(x, (1, 0, 2, 3))        # (C, N, H, W): pixels -> lanes
    else:
        conv_bn, head, perm_axis = _conv_bn_ref, _head_ref, 1
        a = x

    # conv1 + bn1 + relu (fused)
    a = conv_bn(a, params["conv1"], *params["bn1"], stride=1, groups=1,
                relu=True)

    for stage, sparams in zip(arch, params["stages"]):
        gsz = stage["group_sz"]
        for gap, bcfg, bp in zip(stage["gaps"], stage["blocks"], sparams):
            # SequentialMixer pre-shuffle
            a = jnp.take(a, _butterfly_perm(a.shape[perm_axis], gsz, gap),
                         axis=perm_axis)
            # BasicBlock
            identity = a
            out = conv_bn(a, bp["conv1"], *bp["bn1"], stride=bcfg["stride"],
                          groups=bcfg["groups"], relu=True)
            if bcfg["downsample"]:
                identity = conv_bn(a, bp["ds_conv"], *bp["ds_bn"],
                                   stride=bcfg["stride"],
                                   groups=bcfg["groups"], relu=False)
            a = conv_bn(out, bp["conv2"], *bp["bn2"], stride=1,
                        groups=bcfg["groups"], relu=True, residual=identity)
            # SequentialMixer post-shuffle (gap / group_sz swapped)
            a = jnp.take(a, _butterfly_perm(a.shape[perm_axis], gap, gsz),
                         axis=perm_axis)

    return head(a, params["fc_w"], params["fc_b"])


if __name__ == "__main__":
    planes, layers, group_sizes, num_classes = 16, [2, 2, 2], [4, 4, 4], 10
    batch, in_ch, size = 2, 3, 32

    arch = build_arch(planes, layers, group_sizes)
    key = jax.random.PRNGKey(0)
    k_params, k_x = jax.random.split(key)
    params = init_params(k_params, arch, planes, num_classes, in_ch=in_ch)
    x = jax.random.normal(k_x, (batch, in_ch, size, size), dtype=jnp.float32)

    pallas_fwd = jax.jit(functools.partial(forward, arch=arch, use_pallas=True))
    logits = jax.block_until_ready(pallas_fwd(params, x))

    ref_fwd = jax.jit(functools.partial(forward, arch=arch, use_pallas=False))
    logits_ref = jax.block_until_ready(ref_fwd(params, x))

    assert logits.shape == (batch, num_classes)
    max_err = float(jnp.max(jnp.abs(logits - logits_ref)))
    assert jnp.allclose(logits, logits_ref, rtol=2e-2, atol=2e-2), max_err
    print("KERNEL_OK")
</pallas_src>

<mosaic_0001>
module attributes {stable_mosaic.version = 11 : i64} {
  func.func @_conv_bn_kernel(%arg0: i32, %arg1: memref<16x27xf32, #tpu.memory_space<vmem>>, %arg2: memref<27x1024xf32, #tpu.memory_space<vmem>>, %arg3: memref<16x1xf32, #tpu.memory_space<vmem>>, %arg4: memref<16x1xf32, #tpu.memory_space<vmem>>, %arg5: memref<16x1024xf32, #tpu.memory_space<vmem>>) attributes {dimension_semantics = [#tpu.dimension_semantics<parallel>], iteration_bounds = array<i64: 2>, scalar_prefetch = 0 : i64, scratch_operands = 0 : i64, tpu.core_type = #tpu.core_type<tc>, window_params = [{pipeline_mode = #tpu.pipeline_mode<synchronous>, transform_indices = @transform_0, window_bounds = array<i64: 16, 27>}, {transform_indices = @transform_1, window_bounds = array<i64: 27, 1024>}, {pipeline_mode = #tpu.pipeline_mode<synchronous>, transform_indices = @transform_2, window_bounds = array<i64: 16, 1>}, {pipeline_mode = #tpu.pipeline_mode<synchronous>, transform_indices = @transform_3, window_bounds = array<i64: 16, 1>}, {transform_indices = @transform_4, window_bounds = array<i64: 16, 1024>}]} {
    %c0 = arith.constant 0 : index
    %c0_0 = arith.constant 0 : index
    %0 = vector.load %arg1[%c0, %c0_0] : memref<16x27xf32, #tpu.memory_space<vmem>>, vector<16x27xf32>
    %c0_1 = arith.constant 0 : index
    %c0_2 = arith.constant 0 : index
    %1 = vector.load %arg2[%c0_1, %c0_2] : memref<27x1024xf32, #tpu.memory_space<vmem>>, vector<27x1024xf32>
    %cst = arith.constant dense<0.000000e+00> : vector<16x1024xf32>
    %2 = tpu.matmul %0, %1, %cst {dimension_numbers = #tpu.dot_dimension_numbers<[1], [0], [0], [1], [0, 0, 1, 1], [], []>} : vector<16x27xf32>, vector<27x1024xf32>, vector<16x1024xf32> -> vector<16x1024xf32>
    %c0_3 = arith.constant 0 : index
    %c0_4 = arith.constant 0 : index
    %3 = vector.load %arg3[%c0_3, %c0_4] : memref<16x1xf32, #tpu.memory_space<vmem>>, vector<16x1xf32>
    %4 = vector.broadcast %3 : vector<16x1xf32> to vector<16x1024xf32>
    %5 = arith.mulf %2, %4 : vector<16x1024xf32>
    %c0_5 = arith.constant 0 : index
    %c0_6 = arith.constant 0 : index
    %6 = vector.load %arg4[%c0_5, %c0_6] : memref<16x1xf32, #tpu.memory_space<vmem>>, vector<16x1xf32>
    %7 = vector.broadcast %6 : vector<16x1xf32> to vector<16x1024xf32>
    %8 = arith.addf %5, %7 : vector<16x1024xf32>
    %cst_7 = arith.constant 0.000000e+00 : f32
    %9 = vector.broadcast %cst_7 : f32 to vector<16x1024xf32>
    %10 = arith.maximumf %8, %9 : vector<16x1024xf32>
    %c0_8 = arith.constant 0 : index
    %c0_9 = arith.constant 0 : index
    %11 = vector.load %arg5[%c0_8, %c0_9] : memref<16x1024xf32, #tpu.memory_space<vmem>>, vector<16x1024xf32>
    tpu.vector_store %arg5[%c0_8, %c0_9], %10 {strides = array<i32>} : memref<16x1024xf32, #tpu.memory_space<vmem>>, vector<16x1024xf32>,
    return
  }
  func.func @transform_0(%arg0: i32) -> (i32, i32) {
    %c0_i32 = arith.constant 0 : i32
    %c0_i32_0 = arith.constant 0 : i32
    %c0_i32_1 = arith.constant 0 : i32
    return %c0_i32, %c0_i32_0 : i32, i32
  }
  func.func @transform_1(%arg0: i32) -> (i32, i32) {
    %c0_i32 = arith.constant 0 : i32
    %c0_i32_0 = arith.constant 0 : i32
    return %c0_i32, %arg0 : i32, i32
  }
  func.func @transform_2(%arg0: i32) -> (i32, i32) {
    %c0_i32 = arith.constant 0 : i32
    %c0_i32_0 = arith.constant 0 : i32
    %c0_i32_1 = arith.constant 0 : i32
    return %c0_i32, %c0_i32_0 : i32, i32
  }
  func.func @transform_3(%arg0: i32) -> (i32, i32) {
    %c0_i32 = arith.constant 0 : i32
    %c0_i32_0 = arith.constant 0 : i32
    %c0_i32_1 = arith.constant 0 : i32
    return %c0_i32, %c0_i32_0 : i32, i32
  }
  func.func @transform_4(%arg0: i32) -> (i32, i32) {
    %c0_i32 = arith.constant 0 : i32
    %c0_i32_0 = arith.constant 0 : i32
    return %c0_i32, %arg0 : i32, i32
  }
}

module attributes {stable_mosaic.version = 11 : i64} {
  func.func @_conv_bn_kernel(%arg0: i32, %arg1: memref<16x144xf32, #tpu.memory_space<vmem>>, %arg2: memref<144x1024xf32, #tpu.memory_space<vmem>>, %arg3: memref<16x1xf32, #tpu.memory_space<vmem>>, %arg4: memref<16x1xf32, #tpu.memory_space<vmem>>, %arg5: memref<16x1024xf32, #tpu.memory_space<vmem>>) attributes {dimension_semantics = [#tpu.dimension_semantics<parallel>], iteration_bounds = array<i64: 2>, scalar_prefetch = 0 : i64, scratch_operands = 0 : i64, tpu.core_type = #tpu.core_type<tc>, window_params = [{pipeline_mode = #tpu.pipeline_mode<synchronous>, transform_indices = @transform_0, window_bounds = array<i64: 16, 144>}, {transform_indices = @transform_1, window_bounds = array<i64: 144, 1024>}, {pipeline_mode = #tpu.pipeline_mode<synchronous>, transform_indices = @transform_2, window_bounds = array<i64: 16, 1>}, {pipeline_mode = #tpu.pipeline_mode<synchronous>, transform_indices = @transform_3, window_bounds = array<i64: 16, 1>}, {transform_indices = @transform_4, window_bounds = array<i64: 16, 1024>}]} {
    %c0 = arith.constant 0 : index
    %c0_0 = arith.constant 0 : index
    %0 = vector.load %arg1[%c0, %c0_0] : memref<16x144xf32, #tpu.memory_space<vmem>>, vector<16x144xf32>
    %c0_1 = arith.constant 0 : index
    %c0_2 = arith.constant 0 : index
    %1 = vector.load %arg2[%c0_1, %c0_2] : memref<144x1024xf32, #tpu.memory_space<vmem>>, vector<144x1024xf32>
    %cst = arith.constant dense<0.000000e+00> : vector<16x1024xf32>
    %2 = tpu.matmul %0, %1, %cst {dimension_numbers = #tpu.dot_dimension_numbers<[1], [0], [0], [1], [0, 0, 1, 1], [], []>} : vector<16x144xf32>, vector<144x1024xf32>, vector<16x1024xf32> -> vector<16x1024xf32>
    %c0_3 = arith.constant 0 : index
    %c0_4 = arith.constant 0 : index
    %3 = vector.load %arg3[%c0_3, %c0_4] : memref<16x1xf32, #tpu.memory_space<vmem>>, vector<16x1xf32>
    %4 = vector.broadcast %3 : vector<16x1xf32> to vector<16x1024xf32>
    %5 = arith.mulf %2, %4 : vector<16x1024xf32>
    %c0_5 = arith.constant 0 : index
    %c0_6 = arith.constant 0 : index
    %6 = vector.load %arg4[%c0_5, %c0_6] : memref<16x1xf32, #tpu.memory_space<vmem>>, vector<16x1xf32>
    %7 = vector.broadcast %6 : vector<16x1xf32> to vector<16x1024xf32>
    %8 = arith.addf %5, %7 : vector<16x1024xf32>
    %cst_7 = arith.constant 0.000000e+00 : f32
    %9 = vector.broadcast %cst_7 : f32 to vector<16x1024xf32>
    %10 = arith.maximumf %8, %9 : vector<16x1024xf32>
    %c0_8 = arith.constant 0 : index
    %c0_9 = arith.constant 0 : index
    %11 = vector.load %arg5[%c0_8, %c0_9] : memref<16x1024xf32, #tpu.memory_space<vmem>>, vector<16x1024xf32>
    tpu.vector_store %arg5[%c0_8, %c0_9], %10 {strides = array<i32>} : memref<16x1024xf32, #tpu.memory_space<vmem>>, vector<16x1024xf32>,
    return
  }
  func.func @transform_0(%arg0: i32) -> (i32, i32) {
    %c0_i32 = arith.constant 0 : i32
    %c0_i32_0 = arith.constant 0 : i32
    %c0_i32_1 = arith.constant 0 : i32
    return %c0_i32, %c0_i32_0 : i32, i32
  }
  func.func @transform_1(%arg0: i32) -> (i32, i32) {
    %c0_i32 = arith.constant 0 : i32
    %c0_i32_0 = arith.constant 0 : i32
    return %c0_i32, %arg0 : i32, i32
  }
  func.func @transform_2(%arg0: i32) -> (i32, i32) {
    %c0_i32 = arith.constant 0 : i32
    %c0_i32_0 = arith.constant 0 : i32
    %c0_i32_1 = arith.constant 0 : i32
    return %c0_i32, %c0_i32_0 : i32, i32
  }
  func.func @transform_3(%arg0: i32) -> (i32, i32) {
    %c0_i32 = arith.constant 0 : i32
    %c0_i32_0 = arith.constant 0 : i32
    %c0_i32_1 = arith.constant 0 : i32
    return %c0_i32, %c0_i32_0 : i32, i32
  }
  func.func @transform_4(%arg0: i32) -> (i32, i32) {
    %c0_i32 = arith.constant 0 : i32
    %c0_i32_0 = arith.constant 0 : i32
    return %c0_i32, %arg0 : i32, i32
  }
}

module attributes {stable_mosaic.version = 11 : i64} {
  func.func @_conv_bn_res_kernel(%arg0: i32, %arg1: memref<16x144xf32, #tpu.memory_space<vmem>>, %arg2: memref<144x1024xf32, #tpu.memory_space<vmem>>, %arg3: memref<16x1xf32, #tpu.memory_space<vmem>>, %arg4: memref<16x1xf32, #tpu.memory_space<vmem>>, %arg5: memref<16x1024xf32, #tpu.memory_space<vmem>>, %arg6: memref<16x1024xf32, #tpu.memory_space<vmem>>) attributes {dimension_semantics = [#tpu.dimension_semantics<parallel>], iteration_bounds = array<i64: 2>, scalar_prefetch = 0 : i64, scratch_operands = 0 : i64, tpu.core_type = #tpu.core_type<tc>, window_params = [{pipeline_mode = #tpu.pipeline_mode<synchronous>, transform_indices = @transform_0, window_bounds = array<i64: 16, 144>}, {transform_indices = @transform_1, window_bounds = array<i64: 144, 1024>}, {pipeline_mode = #tpu.pipeline_mode<synchronous>, transform_indices = @transform_2, window_bounds = array<i64: 16, 1>}, {pipeline_mode = #tpu.pipeline_mode<synchronous>, transform_indices = @transform_3, window_bounds = array<i64: 16, 1>}, {transform_indices = @transform_4, window_bounds = array<i64: 16, 1024>}, {transform_indices = @transform_5, window_bounds = array<i64: 16, 1024>}]} {
    %c0 = arith.constant 0 : index
    %c0_0 = arith.constant 0 : index
    %0 = vector.load %arg1[%c0, %c0_0] : memref<16x144xf32, #tpu.memory_space<vmem>>, vector<16x144xf32>
    %c0_1 = arith.constant 0 : index
    %c0_2 = arith.constant 0 : index
    %1 = vector.load %arg2[%c0_1, %c0_2] : memref<144x1024xf32, #tpu.memory_space<vmem>>, vector<144x1024xf32>
    %cst = arith.constant dense<0.000000e+00> : vector<16x1024xf32>
    %2 = tpu.matmul %0, %1, %cst {dimension_numbers = #tpu.dot_dimension_numbers<[1], [0], [0], [1], [0, 0, 1, 1], [], []>} : vector<16x144xf32>, vector<144x1024xf32>, vector<16x1024xf32> -> vector<16x1024xf32>
    %c0_3 = arith.constant 0 : index
    %c0_4 = arith.constant 0 : index
    %3 = vector.load %arg3[%c0_3, %c0_4] : memref<16x1xf32, #tpu.memory_space<vmem>>, vector<16x1xf32>
    %4 = vector.broadcast %3 : vector<16x1xf32> to vector<16x1024xf32>
    %5 = arith.mulf %2, %4 : vector<16x1024xf32>
    %c0_5 = arith.constant 0 : index
    %c0_6 = arith.constant 0 : index
    %6 = vector.load %arg4[%c0_5, %c0_6] : memref<16x1xf32, #tpu.memory_space<vmem>>, vector<16x1xf32>
    %7 = vector.broadcast %6 : vector<16x1xf32> to vector<16x1024xf32>
    %8 = arith.addf %5, %7 : vector<16x1024xf32>
    %c0_7 = arith.constant 0 : index
    %c0_8 = arith.constant 0 : index
    %9 = vector.load %arg5[%c0_7, %c0_8] : memref<16x1024xf32, #tpu.memory_space<vmem>>, vector<16x1024xf32>
    %10 = arith.addf %8, %9 : vector<16x1024xf32>
    %cst_9 = arith.constant 0.000000e+00 : f32
    %11 = vector.broadcast %cst_9 : f32 to vector<16x1024xf32>
    %12 = arith.maximumf %10, %11 : vector<16x1024xf32>
    %c0_10 = arith.constant 0 : index
    %c0_11 = arith.constant 0 : index
    %13 = vector.load %arg6[%c0_10, %c0_11] : memref<16x1024xf32, #tpu.memory_space<vmem>>, vector<16x1024xf32>
    tpu.vector_store %arg6[%c0_10, %c0_11], %12 {strides = array<i32>} : memref<16x1024xf32, #tpu.memory_space<vmem>>, vector<16x1024xf32>,
    return
  }
  func.func @transform_0(%arg0: i32) -> (i32, i32) {
    %c0_i32 = arith.constant 0 : i32
    %c0_i32_0 = arith.constant 0 : i32
    %c0_i32_1 = arith.constant 0 : i32
    return %c0_i32, %c0_i32_0 : i32, i32
  }
  func.func @transform_1(%arg0: i32) -> (i32, i32) {
    %c0_i32 = arith.constant 0 : i32
    %c0_i32_0 = arith.constant 0 : i32
    return %c0_i32, %arg0 : i32, i32
  }
  func.func @transform_2(%arg0: i32) -> (i32, i32) {
    %c0_i32 = arith.constant 0 : i32
    %c0_i32_0 = arith.constant 0 : i32
    %c0_i32_1 = arith.constant 0 : i32
    return %c0_i32, %c0_i32_0 : i32, i32
  }
  func.func @transform_3(%arg0: i32) -> (i32, i32) {
    %c0_i32 = arith.constant 0 : i32
    %c0_i32_0 = arith.constant 0 : i32
    %c0_i32_1 = arith.constant 0 : i32
    return %c0_i32, %c0_i32_0 : i32, i32
  }
  func.func @transform_4(%arg0: i32) -> (i32, i32) {
    %c0_i32 = arith.constant 0 : i32
    %c0_i32_0 = arith.constant 0 : i32
    return %c0_i32, %arg0 : i32, i32
  }
  func.func @transform_5(%arg0: i32) -> (i32, i32) {
    %c0_i32 = arith.constant 0 : i32
    %c0_i32_0 = arith.constant 0 : i32
    return %c0_i32, %arg0 : i32, i32
  }
}

module attributes {stable_mosaic.version = 11 : i64} {
  func.func @_conv_bn_kernel(%arg0: i32, %arg1: memref<32x144xf32, #tpu.memory_space<vmem>>, %arg2: memref<144x512xf32, #tpu.memory_space<vmem>>, %arg3: memref<32x1xf32, #tpu.memory_space<vmem>>, %arg4: memref<32x1xf32, #tpu.memory_space<vmem>>, %arg5: memref<32x512xf32, #tpu.memory_space<vmem>>) attributes {dimension_semantics = [#tpu.dimension_semantics<parallel>], iteration_bounds = array<i64: 1>, scalar_prefetch = 0 : i64, scratch_operands = 0 : i64, tpu.core_type = #tpu.core_type<tc>, window_params = [{pipeline_mode = #tpu.pipeline_mode<synchronous>, transform_indices = @transform_0, window_bounds = array<i64: 32, 144>}, {transform_indices = @transform_1, window_bounds = array<i64: 144, 512>}, {pipeline_mode = #tpu.pipeline_mode<synchronous>, transform_indices = @transform_2, window_bounds = array<i64: 32, 1>}, {pipeline_mode = #tpu.pipeline_mode<synchronous>, transform_indices = @transform_3, window_bounds = array<i64: 32, 1>}, {transform_indices = @transform_4, window_bounds = array<i64: 32, 512>}]} {
    %c0 = arith.constant 0 : index
    %c0_0 = arith.constant 0 : index
    %0 = vector.load %arg1[%c0, %c0_0] : memref<32x144xf32, #tpu.memory_space<vmem>>, vector<32x144xf32>
    %c0_1 = arith.constant 0 : index
    %c0_2 = arith.constant 0 : index
    %1 = vector.load %arg2[%c0_1, %c0_2] : memref<144x512xf32, #tpu.memory_space<vmem>>, vector<144x512xf32>
    %cst = arith.constant dense<0.000000e+00> : vector<32x512xf32>
    %2 = tpu.matmul %0, %1, %cst {dimension_numbers = #tpu.dot_dimension_numbers<[1], [0], [0], [1], [0, 0, 1, 1], [], []>} : vector<32x144xf32>, vector<144x512xf32>, vector<32x512xf32> -> vector<32x512xf32>
    %c0_3 = arith.constant 0 : index
    %c0_4 = arith.constant 0 : index
    %3 = vector.load %arg3[%c0_3, %c0_4] : memref<32x1xf32, #tpu.memory_space<vmem>>, vector<32x1xf32>
    %4 = vector.broadcast %3 : vector<32x1xf32> to vector<32x512xf32>
    %5 = arith.mulf %2, %4 : vector<32x512xf32>
    %c0_5 = arith.constant 0 : index
    %c0_6 = arith.constant 0 : index
    %6 = vector.load %arg4[%c0_5, %c0_6] : memref<32x1xf32, #tpu.memory_space<vmem>>, vector<32x1xf32>
    %7 = vector.broadcast %6 : vector<32x1xf32> to vector<32x512xf32>
    %8 = arith.addf %5, %7 : vector<32x512xf32>
    %cst_7 = arith.constant 0.000000e+00 : f32
    %9 = vector.broadcast %cst_7 : f32 to vector<32x512xf32>
    %10 = arith.maximumf %8, %9 : vector<32x512xf32>
    %c0_8 = arith.constant 0 : index
    %c0_9 = arith.constant 0 : index
    %11 = vector.load %arg5[%c0_8, %c0_9] : memref<32x512xf32, #tpu.memory_space<vmem>>, vector<32x512xf32>
    tpu.vector_store %arg5[%c0_8, %c0_9], %10 {strides = array<i32>} : memref<32x512xf32, #tpu.memory_space<vmem>>, vector<32x512xf32>,
    return
  }
  func.func @transform_0(%arg0: i32) -> (i32, i32) {
    %c0_i32 = arith.constant 0 : i32
    %c0_i32_0 = arith.constant 0 : i32
    %c0_i32_1 = arith.constant 0 : i32
    return %c0_i32, %c0_i32_0 : i32, i32
  }
  func.func @transform_1(%arg0: i32) -> (i32, i32) {
    %c0_i32 = arith.constant 0 : i32
    %c0_i32_0 = arith.constant 0 : i32
    return %c0_i32, %arg0 : i32, i32
  }
  func.func @transform_2(%arg0: i32) -> (i32, i32) {
    %c0_i32 = arith.constant 0 : i32
    %c0_i32_0 = arith.constant 0 : i32
    %c0_i32_1 = arith.constant 0 : i32
    return %c0_i32, %c0_i32_0 : i32, i32
  }
  func.func @transform_3(%arg0: i32) -> (i32, i32) {
    %c0_i32 = arith.constant 0 : i32
    %c0_i32_0 = arith.constant 0 : i32
    %c0_i32_1 = arith.constant 0 : i32
    return %c0_i32, %c0_i32_0 : i32, i32
  }
  func.func @transform_4(%arg0: i32) -> (i32, i32) {
    %c0_i32 = arith.constant 0 : i32
    %c0_i32_0 = arith.constant 0 : i32
    return %c0_i32, %arg0 : i32, i32
  }
}

module attributes {stable_mosaic.version = 11 : i64} {
  func.func @_conv_bn_kernel(%arg0: i32, %arg1: memref<32x16xf32, #tpu.memory_space<vmem>>, %arg2: memref<16x512xf32, #tpu.memory_space<vmem>>, %arg3: memref<32x1xf32, #tpu.memory_space<vmem>>, %arg4: memref<32x1xf32, #tpu.memory_space<vmem>>, %arg5: memref<32x512xf32, #tpu.memory_space<vmem>>) attributes {dimension_semantics = [#tpu.dimension_semantics<parallel>], iteration_bounds = array<i64: 1>, scalar_prefetch = 0 : i64, scratch_operands = 0 : i64, tpu.core_type = #tpu.core_type<tc>, window_params = [{pipeline_mode = #tpu.pipeline_mode<synchronous>, transform_indices = @transform_0, window_bounds = array<i64: 32, 16>}, {transform_indices = @transform_1, window_bounds = array<i64: 16, 512>}, {pipeline_mode = #tpu.pipeline_mode<synchronous>, transform_indices = @transform_2, window_bounds = array<i64: 32, 1>}, {pipeline_mode = #tpu.pipeline_mode<synchronous>, transform_indices = @transform_3, window_bounds = array<i64: 32, 1>}, {transform_indices = @transform_4, window_bounds = array<i64: 32, 512>}]} {
    %c0 = arith.constant 0 : index
    %c0_0 = arith.constant 0 : index
    %0 = vector.load %arg1[%c0, %c0_0] : memref<32x16xf32, #tpu.memory_space<vmem>>, vector<32x16xf32>
    %c0_1 = arith.constant 0 : index
    %c0_2 = arith.constant 0 : index
    %1 = vector.load %arg2[%c0_1, %c0_2] : memref<16x512xf32, #tpu.memory_space<vmem>>, vector<16x512xf32>
    %cst = arith.constant dense<0.000000e+00> : vector<32x512xf32>
    %2 = tpu.matmul %0, %1, %cst {dimension_numbers = #tpu.dot_dimension_numbers<[1], [0], [0], [1], [0, 0, 1, 1], [], []>} : vector<32x16xf32>, vector<16x512xf32>, vector<32x512xf32> -> vector<32x512xf32>
    %c0_3 = arith.constant 0 : index
    %c0_4 = arith.constant 0 : index
    %3 = vector.load %arg3[%c0_3, %c0_4] : memref<32x1xf32, #tpu.memory_space<vmem>>, vector<32x1xf32>
    %4 = vector.broadcast %3 : vector<32x1xf32> to vector<32x512xf32>
    %5 = arith.mulf %2, %4 : vector<32x512xf32>
    %c0_5 = arith.constant 0 : index
    %c0_6 = arith.constant 0 : index
    %6 = vector.load %arg4[%c0_5, %c0_6] : memref<32x1xf32, #tpu.memory_space<vmem>>, vector<32x1xf32>
    %7 = vector.broadcast %6 : vector<32x1xf32> to vector<32x512xf32>
    %8 = arith.addf %5, %7 : vector<32x512xf32>
    %c0_7 = arith.constant 0 : index
    %c0_8 = arith.constant 0 : index
    %9 = vector.load %arg5[%c0_7, %c0_8] : memref<32x512xf32, #tpu.memory_space<vmem>>, vector<32x512xf32>
    tpu.vector_store %arg5[%c0_7, %c0_8], %8 {strides = array<i32>} : memref<32x512xf32, #tpu.memory_space<vmem>>, vector<32x512xf32>,
    return
  }
  func.func @transform_0(%arg0: i32) -> (i32, i32) {
    %c0_i32 = arith.constant 0 : i32
    %c0_i32_0 = arith.constant 0 : i32
    %c0_i32_1 = arith.constant 0 : i32
    return %c0_i32, %c0_i32_0 : i32, i32
  }
  func.func @transform_1(%arg0: i32) -> (i32, i32) {
    %c0_i32 = arith.constant 0 : i32
    %c0_i32_0 = arith.constant 0 : i32
    return %c0_i32, %arg0 : i32, i32
  }
  func.func @transform_2(%arg0: i32) -> (i32, i32) {
    %c0_i32 = arith.constant 0 : i32
    %c0_i32_0 = arith.constant 0 : i32
    %c0_i32_1 = arith.constant 0 : i32
    return %c0_i32, %c0_i32_0 : i32, i32
  }
  func.func @transform_3(%arg0: i32) -> (i32, i32) {
    %c0_i32 = arith.constant 0 : i32
    %c0_i32_0 = arith.constant 0 : i32
    %c0_i32_1 = arith.constant 0 : i32
    return %c0_i32, %c0_i32_0 : i32, i32
  }
  func.func @transform_4(%arg0: i32) -> (i32, i32) {
    %c0_i32 = arith.constant 0 : i32
    %c0_i32_0 = arith.constant 0 : i32
    return %c0_i32, %arg0 : i32, i32
  }
}

module attributes {stable_mosaic.version = 11 : i64} {
  func.func @_conv_bn_res_kernel(%arg0: i32, %arg1: memref<32x288xf32, #tpu.memory_space<vmem>>, %arg2: memref<288x512xf32, #tpu.memory_space<vmem>>, %arg3: memref<32x1xf32, #tpu.memory_space<vmem>>, %arg4: memref<32x1xf32, #tpu.memory_space<vmem>>, %arg5: memref<32x512xf32, #tpu.memory_space<vmem>>, %arg6: memref<32x512xf32, #tpu.memory_space<vmem>>) attributes {dimension_semantics = [#tpu.dimension_semantics<parallel>], iteration_bounds = array<i64: 1>, scalar_prefetch = 0 : i64, scratch_operands = 0 : i64, tpu.core_type = #tpu.core_type<tc>, window_params = [{pipeline_mode = #tpu.pipeline_mode<synchronous>, transform_indices = @transform_0, window_bounds = array<i64: 32, 288>}, {transform_indices = @transform_1, window_bounds = array<i64: 288, 512>}, {pipeline_mode = #tpu.pipeline_mode<synchronous>, transform_indices = @transform_2, window_bounds = array<i64: 32, 1>}, {pipeline_mode = #tpu.pipeline_mode<synchronous>, transform_indices = @transform_3, window_bounds = array<i64: 32, 1>}, {transform_indices = @transform_4, window_bounds = array<i64: 32, 512>}, {transform_indices = @transform_5, window_bounds = array<i64: 32, 512>}]} {
    %c0 = arith.constant 0 : index
    %c0_0 = arith.constant 0 : index
    %0 = vector.load %arg1[%c0, %c0_0] : memref<32x288xf32, #tpu.memory_space<vmem>>, vector<32x288xf32>
    %c0_1 = arith.constant 0 : index
    %c0_2 = arith.constant 0 : index
    %1 = vector.load %arg2[%c0_1, %c0_2] : memref<288x512xf32, #tpu.memory_space<vmem>>, vector<288x512xf32>
    %cst = arith.constant dense<0.000000e+00> : vector<32x512xf32>
    %2 = tpu.matmul %0, %1, %cst {dimension_numbers = #tpu.dot_dimension_numbers<[1], [0], [0], [1], [0, 0, 1, 1], [], []>} : vector<32x288xf32>, vector<288x512xf32>, vector<32x512xf32> -> vector<32x512xf32>
    %c0_3 = arith.constant 0 : index
    %c0_4 = arith.constant 0 : index
    %3 = vector.load %arg3[%c0_3, %c0_4] : memref<32x1xf32, #tpu.memory_space<vmem>>, vector<32x1xf32>
    %4 = vector.broadcast %3 : vector<32x1xf32> to vector<32x512xf32>
    %5 = arith.mulf %2, %4 : vector<32x512xf32>
    %c0_5 = arith.constant 0 : index
    %c0_6 = arith.constant 0 : index
    %6 = vector.load %arg4[%c0_5, %c0_6] : memref<32x1xf32, #tpu.memory_space<vmem>>, vector<32x1xf32>
    %7 = vector.broadcast %6 : vector<32x1xf32> to vector<32x512xf32>
    %8 = arith.addf %5, %7 : vector<32x512xf32>
    %c0_7 = arith.constant 0 : index
    %c0_8 = arith.constant 0 : index
    %9 = vector.load %arg5[%c0_7, %c0_8] : memref<32x512xf32, #tpu.memory_space<vmem>>, vector<32x512xf32>
    %10 = arith.addf %8, %9 : vector<32x512xf32>
    %cst_9 = arith.constant 0.000000e+00 : f32
    %11 = vector.broadcast %cst_9 : f32 to vector<32x512xf32>
    %12 = arith.maximumf %10, %11 : vector<32x512xf32>
    %c0_10 = arith.constant 0 : index
    %c0_11 = arith.constant 0 : index
    %13 = vector.load %arg6[%c0_10, %c0_11] : memref<32x512xf32, #tpu.memory_space<vmem>>, vector<32x512xf32>
    tpu.vector_store %arg6[%c0_10, %c0_11], %12 {strides = array<i32>} : memref<32x512xf32, #tpu.memory_space<vmem>>, vector<32x512xf32>,
    return
  }
  func.func @transform_0(%arg0: i32) -> (i32, i32) {
    %c0_i32 = arith.constant 0 : i32
    %c0_i32_0 = arith.constant 0 : i32
    %c0_i32_1 = arith.constant 0 : i32
    return %c0_i32, %c0_i32_0 : i32, i32
  }
  func.func @transform_1(%arg0: i32) -> (i32, i32) {
    %c0_i32 = arith.constant 0 : i32
    %c0_i32_0 = arith.constant 0 : i32
    return %c0_i32, %arg0 : i32, i32
  }
  func.func @transform_2(%arg0: i32) -> (i32, i32) {
    %c0_i32 = arith.constant 0 : i32
    %c0_i32_0 = arith.constant 0 : i32
    %c0_i32_1 = arith.constant 0 : i32
    return %c0_i32, %c0_i32_0 : i32, i32
  }
  func.func @transform_3(%arg0: i32) -> (i32, i32) {
    %c0_i32 = arith.constant 0 : i32
    %c0_i32_0 = arith.constant 0 : i32
    %c0_i32_1 = arith.constant 0 : i32
    return %c0_i32, %c0_i32_0 : i32, i32
  }
  func.func @transform_4(%arg0: i32) -> (i32, i32) {
    %c0_i32 = arith.constant 0 : i32
    %c0_i32_0 = arith.constant 0 : i32
    return %c0_i32, %arg0 : i32, i32
  }
  func.func @transform_5(%arg0: i32) -> (i32, i32) {
    %c0_i32 = arith.constant 0 : i32
    %c0_i32_0 = arith.constant 0 : i32
    return %c0_i32, %arg0 : i32, i32
  }
}

module attributes {stable_mosaic.version = 11 : i64} {
  func.func @_conv_bn_kernel(%arg0: i32, %arg1: memref<32x288xf32, #tpu.memory_space<vmem>>, %arg2: memref<288x512xf32, #tpu.memory_space<vmem>>, %arg3: memref<32x1xf32, #tpu.memory_space<vmem>>, %arg4: memref<32x1xf32, #tpu.memory_space<vmem>>, %arg5: memref<32x512xf32, #tpu.memory_space<vmem>>) attributes {dimension_semantics = [#tpu.dimension_semantics<parallel>], iteration_bounds = array<i64: 1>, scalar_prefetch = 0 : i64, scratch_operands = 0 : i64, tpu.core_type = #tpu.core_type<tc>, window_params = [{pipeline_mode = #tpu.pipeline_mode<synchronous>, transform_indices = @transform_0, window_bounds = array<i64: 32, 288>}, {transform_indices = @transform_1, window_bounds = array<i64: 288, 512>}, {pipeline_mode = #tpu.pipeline_mode<synchronous>, transform_indices = @transform_2, window_bounds = array<i64: 32, 1>}, {pipeline_mode = #tpu.pipeline_mode<synchronous>, transform_indices = @transform_3, window_bounds = array<i64: 32, 1>}, {transform_indices = @transform_4, window_bounds = array<i64: 32, 512>}]} {
    %c0 = arith.constant 0 : index
    %c0_0 = arith.constant 0 : index
    %0 = vector.load %arg1[%c0, %c0_0] : memref<32x288xf32, #tpu.memory_space<vmem>>, vector<32x288xf32>
    %c0_1 = arith.constant 0 : index
    %c0_2 = arith.constant 0 : index
    %1 = vector.load %arg2[%c0_1, %c0_2] : memref<288x512xf32, #tpu.memory_space<vmem>>, vector<288x512xf32>
    %cst = arith.constant dense<0.000000e+00> : vector<32x512xf32>
    %2 = tpu.matmul %0, %1, %cst {dimension_numbers = #tpu.dot_dimension_numbers<[1], [0], [0], [1], [0, 0, 1, 1], [], []>} : vector<32x288xf32>, vector<288x512xf32>, vector<32x512xf32> -> vector<32x512xf32>
    %c0_3 = arith.constant 0 : index
    %c0_4 = arith.constant 0 : index
    %3 = vector.load %arg3[%c0_3, %c0_4] : memref<32x1xf32, #tpu.memory_space<vmem>>, vector<32x1xf32>
    %4 = vector.broadcast %3 : vector<32x1xf32> to vector<32x512xf32>
    %5 = arith.mulf %2, %4 : vector<32x512xf32>
    %c0_5 = arith.constant 0 : index
    %c0_6 = arith.constant 0 : index
    %6 = vector.load %arg4[%c0_5, %c0_6] : memref<32x1xf32, #tpu.memory_space<vmem>>, vector<32x1xf32>
    %7 = vector.broadcast %6 : vector<32x1xf32> to vector<32x512xf32>
    %8 = arith.addf %5, %7 : vector<32x512xf32>
    %cst_7 = arith.constant 0.000000e+00 : f32
    %9 = vector.broadcast %cst_7 : f32 to vector<32x512xf32>
    %10 = arith.maximumf %8, %9 : vector<32x512xf32>
    %c0_8 = arith.constant 0 : index
    %c0_9 = arith.constant 0 : index
    %11 = vector.load %arg5[%c0_8, %c0_9] : memref<32x512xf32, #tpu.memory_space<vmem>>, vector<32x512xf32>
    tpu.vector_store %arg5[%c0_8, %c0_9], %10 {strides = array<i32>} : memref<32x512xf32, #tpu.memory_space<vmem>>, vector<32x512xf32>,
    return
  }
  func.func @transform_0(%arg0: i32) -> (i32, i32) {
    %c0_i32 = arith.constant 0 : i32
    %c0_i32_0 = arith.constant 0 : i32
    %c0_i32_1 = arith.constant 0 : i32
    return %c0_i32, %c0_i32_0 : i32, i32
  }
  func.func @transform_1(%arg0: i32) -> (i32, i32) {
    %c0_i32 = arith.constant 0 : i32
    %c0_i32_0 = arith.constant 0 : i32
    return %c0_i32, %arg0 : i32, i32
  }
  func.func @transform_2(%arg0: i32) -> (i32, i32) {
    %c0_i32 = arith.constant 0 : i32
    %c0_i32_0 = arith.constant 0 : i32
    %c0_i32_1 = arith.constant 0 : i32
    return %c0_i32, %c0_i32_0 : i32, i32
  }
  func.func @transform_3(%arg0: i32) -> (i32, i32) {
    %c0_i32 = arith.constant 0 : i32
    %c0_i32_0 = arith.constant 0 : i32
    %c0_i32_1 = arith.constant 0 : i32
    return %c0_i32, %c0_i32_0 : i32, i32
  }
  func.func @transform_4(%arg0: i32) -> (i32, i32) {
    %c0_i32 = arith.constant 0 : i32
    %c0_i32_0 = arith.constant 0 : i32
    return %c0_i32, %arg0 : i32, i32
  }
}

module attributes {stable_mosaic.version = 11 : i64} {
  func.func @_conv_bn_kernel(%arg0: i32, %arg1: memref<64x288xf32, #tpu.memory_space<vmem>>, %arg2: memref<288x128xf32, #tpu.memory_space<vmem>>, %arg3: memref<64x1xf32, #tpu.memory_space<vmem>>, %arg4: memref<64x1xf32, #tpu.memory_space<vmem>>, %arg5: memref<64x128xf32, #tpu.memory_space<vmem>>) attributes {dimension_semantics = [#tpu.dimension_semantics<parallel>], iteration_bounds = array<i64: 1>, scalar_prefetch = 0 : i64, scratch_operands = 0 : i64, tpu.core_type = #tpu.core_type<tc>, window_params = [{pipeline_mode = #tpu.pipeline_mode<synchronous>, transform_indices = @transform_0, window_bounds = array<i64: 64, 288>}, {transform_indices = @transform_1, window_bounds = array<i64: 288, 128>}, {pipeline_mode = #tpu.pipeline_mode<synchronous>, transform_indices = @transform_2, window_bounds = array<i64: 64, 1>}, {pipeline_mode = #tpu.pipeline_mode<synchronous>, transform_indices = @transform_3, window_bounds = array<i64: 64, 1>}, {transform_indices = @transform_4, window_bounds = array<i64: 64, 128>}]} {
    %c0 = arith.constant 0 : index
    %c0_0 = arith.constant 0 : index
    %0 = vector.load %arg1[%c0, %c0_0] : memref<64x288xf32, #tpu.memory_space<vmem>>, vector<64x288xf32>
    %c0_1 = arith.constant 0 : index
    %c0_2 = arith.constant 0 : index
    %1 = vector.load %arg2[%c0_1, %c0_2] : memref<288x128xf32, #tpu.memory_space<vmem>>, vector<288x128xf32>
    %cst = arith.constant dense<0.000000e+00> : vector<64x128xf32>
    %2 = tpu.matmul %0, %1, %cst {dimension_numbers = #tpu.dot_dimension_numbers<[1], [0], [0], [1], [0, 0, 1, 1], [], []>} : vector<64x288xf32>, vector<288x128xf32>, vector<64x128xf32> -> vector<64x128xf32>
    %c0_3 = arith.constant 0 : index
    %c0_4 = arith.constant 0 : index
    %3 = vector.load %arg3[%c0_3, %c0_4] : memref<64x1xf32, #tpu.memory_space<vmem>>, vector<64x1xf32>
    %4 = vector.broadcast %3 : vector<64x1xf32> to vector<64x128xf32>
    %5 = arith.mulf %2, %4 : vector<64x128xf32>
    %c0_5 = arith.constant 0 : index
    %c0_6 = arith.constant 0 : index
    %6 = vector.load %arg4[%c0_5, %c0_6] : memref<64x1xf32, #tpu.memory_space<vmem>>, vector<64x1xf32>
    %7 = vector.broadcast %6 : vector<64x1xf32> to vector<64x128xf32>
    %8 = arith.addf %5, %7 : vector<64x128xf32>
    %cst_7 = arith.constant 0.000000e+00 : f32
    %9 = vector.broadcast %cst_7 : f32 to vector<64x128xf32>
    %10 = arith.maximumf %8, %9 : vector<64x128xf32>
    %c0_8 = arith.constant 0 : index
    %c0_9 = arith.constant 0 : index
    %11 = vector.load %arg5[%c0_8, %c0_9] : memref<64x128xf32, #tpu.memory_space<vmem>>, vector<64x128xf32>
    tpu.vector_store %arg5[%c0_8, %c0_9], %10 {strides = array<i32>} : memref<64x128xf32, #tpu.memory_space<vmem>>, vector<64x128xf32>,
    return
  }
  func.func @transform_0(%arg0: i32) -> (i32, i32) {
    %c0_i32 = arith.constant 0 : i32
    %c0_i32_0 = arith.constant 0 : i32
    %c0_i32_1 = arith.constant 0 : i32
    return %c0_i32, %c0_i32_0 : i32, i32
  }
  func.func @transform_1(%arg0: i32) -> (i32, i32) {
    %c0_i32 = arith.constant 0 : i32
    %c0_i32_0 = arith.constant 0 : i32
    return %c0_i32, %arg0 : i32, i32
  }
  func.func @transform_2(%arg0: i32) -> (i32, i32) {
    %c0_i32 = arith.constant 0 : i32
    %c0_i32_0 = arith.constant 0 : i32
    %c0_i32_1 = arith.constant 0 : i32
    return %c0_i32, %c0_i32_0 : i32, i32
  }
  func.func @transform_3(%arg0: i32) -> (i32, i32) {
    %c0_i32 = arith.constant 0 : i32
    %c0_i32_0 = arith.constant 0 : i32
    %c0_i32_1 = arith.constant 0 : i32
    return %c0_i32, %c0_i32_0 : i32, i32
  }
  func.func @transform_4(%arg0: i32) -> (i32, i32) {
    %c0_i32 = arith.constant 0 : i32
    %c0_i32_0 = arith.constant 0 : i32
    return %c0_i32, %arg0 : i32, i32
  }
}

module attributes {stable_mosaic.version = 11 : i64} {
  func.func @_conv_bn_kernel(%arg0: i32, %arg1: memref<64x32xf32, #tpu.memory_space<vmem>>, %arg2: memref<32x128xf32, #tpu.memory_space<vmem>>, %arg3: memref<64x1xf32, #tpu.memory_space<vmem>>, %arg4: memref<64x1xf32, #tpu.memory_space<vmem>>, %arg5: memref<64x128xf32, #tpu.memory_space<vmem>>) attributes {dimension_semantics = [#tpu.dimension_semantics<parallel>], iteration_bounds = array<i64: 1>, scalar_prefetch = 0 : i64, scratch_operands = 0 : i64, tpu.core_type = #tpu.core_type<tc>, window_params = [{pipeline_mode = #tpu.pipeline_mode<synchronous>, transform_indices = @transform_0, window_bounds = array<i64: 64, 32>}, {transform_indices = @transform_1, window_bounds = array<i64: 32, 128>}, {pipeline_mode = #tpu.pipeline_mode<synchronous>, transform_indices = @transform_2, window_bounds = array<i64: 64, 1>}, {pipeline_mode = #tpu.pipeline_mode<synchronous>, transform_indices = @transform_3, window_bounds = array<i64: 64, 1>}, {transform_indices = @transform_4, window_bounds = array<i64: 64, 128>}]} {
    %c0 = arith.constant 0 : index
    %c0_0 = arith.constant 0 : index
    %0 = vector.load %arg1[%c0, %c0_0] : memref<64x32xf32, #tpu.memory_space<vmem>>, vector<64x32xf32>
    %c0_1 = arith.constant 0 : index
    %c0_2 = arith.constant 0 : index
    %1 = vector.load %arg2[%c0_1, %c0_2] : memref<32x128xf32, #tpu.memory_space<vmem>>, vector<32x128xf32>
    %cst = arith.constant dense<0.000000e+00> : vector<64x128xf32>
    %2 = tpu.matmul %0, %1, %cst {dimension_numbers = #tpu.dot_dimension_numbers<[1], [0], [0], [1], [0, 0, 1, 1], [], []>} : vector<64x32xf32>, vector<32x128xf32>, vector<64x128xf32> -> vector<64x128xf32>
    %c0_3 = arith.constant 0 : index
    %c0_4 = arith.constant 0 : index
    %3 = vector.load %arg3[%c0_3, %c0_4] : memref<64x1xf32, #tpu.memory_space<vmem>>, vector<64x1xf32>
    %4 = vector.broadcast %3 : vector<64x1xf32> to vector<64x128xf32>
    %5 = arith.mulf %2, %4 : vector<64x128xf32>
    %c0_5 = arith.constant 0 : index
    %c0_6 = arith.constant 0 : index
    %6 = vector.load %arg4[%c0_5, %c0_6] : memref<64x1xf32, #tpu.memory_space<vmem>>, vector<64x1xf32>
    %7 = vector.broadcast %6 : vector<64x1xf32> to vector<64x128xf32>
    %8 = arith.addf %5, %7 : vector<64x128xf32>
    %c0_7 = arith.constant 0 : index
    %c0_8 = arith.constant 0 : index
    %9 = vector.load %arg5[%c0_7, %c0_8] : memref<64x128xf32, #tpu.memory_space<vmem>>, vector<64x128xf32>
    tpu.vector_store %arg5[%c0_7, %c0_8], %8 {strides = array<i32>} : memref<64x128xf32, #tpu.memory_space<vmem>>, vector<64x128xf32>,
    return
  }
  func.func @transform_0(%arg0: i32) -> (i32, i32) {
    %c0_i32 = arith.constant 0 : i32
    %c0_i32_0 = arith.constant 0 : i32
    %c0_i32_1 = arith.constant 0 : i32
    return %c0_i32, %c0_i32_0 : i32, i32
  }
  func.func @transform_1(%arg0: i32) -> (i32, i32) {
    %c0_i32 = arith.constant 0 : i32
    %c0_i32_0 = arith.constant 0 : i32
    return %c0_i32, %arg0 : i32, i32
  }
  func.func @transform_2(%arg0: i32) -> (i32, i32) {
    %c0_i32 = arith.constant 0 : i32
    %c0_i32_0 = arith.constant 0 : i32
    %c0_i32_1 = arith.constant 0 : i32
    return %c0_i32, %c0_i32_0 : i32, i32
  }
  func.func @transform_3(%arg0: i32) -> (i32, i32) {
    %c0_i32 = arith.constant 0 : i32
    %c0_i32_0 = arith.constant 0 : i32
    %c0_i32_1 = arith.constant 0 : i32
    return %c0_i32, %c0_i32_0 : i32, i32
  }
  func.func @transform_4(%arg0: i32) -> (i32, i32) {
    %c0_i32 = arith.constant 0 : i32
    %c0_i32_0 = arith.constant 0 : i32
    return %c0_i32, %arg0 : i32, i32
  }
}

module attributes {stable_mosaic.version = 11 : i64} {
  func.func @_conv_bn_res_kernel(%arg0: i32, %arg1: memref<64x576xf32, #tpu.memory_space<vmem>>, %arg2: memref<576x128xf32, #tpu.memory_space<vmem>>, %arg3: memref<64x1xf32, #tpu.memory_space<vmem>>, %arg4: memref<64x1xf32, #tpu.memory_space<vmem>>, %arg5: memref<64x128xf32, #tpu.memory_space<vmem>>, %arg6: memref<64x128xf32, #tpu.memory_space<vmem>>) attributes {dimension_semantics = [#tpu.dimension_semantics<parallel>], iteration_bounds = array<i64: 1>, scalar_prefetch = 0 : i64, scratch_operands = 0 : i64, tpu.core_type = #tpu.core_type<tc>, window_params = [{pipeline_mode = #tpu.pipeline_mode<synchronous>, transform_indices = @transform_0, window_bounds = array<i64: 64, 576>}, {transform_indices = @transform_1, window_bounds = array<i64: 576, 128>}, {pipeline_mode = #tpu.pipeline_mode<synchronous>, transform_indices = @transform_2, window_bounds = array<i64: 64, 1>}, {pipeline_mode = #tpu.pipeline_mode<synchronous>, transform_indices = @transform_3, window_bounds = array<i64: 64, 1>}, {transform_indices = @transform_4, window_bounds = array<i64: 64, 128>}, {transform_indices = @transform_5, window_bounds = array<i64: 64, 128>}]} {
    %c0 = arith.constant 0 : index
    %c0_0 = arith.constant 0 : index
    %0 = vector.load %arg1[%c0, %c0_0] : memref<64x576xf32, #tpu.memory_space<vmem>>, vector<64x576xf32>
    %c0_1 = arith.constant 0 : index
    %c0_2 = arith.constant 0 : index
    %1 = vector.load %arg2[%c0_1, %c0_2] : memref<576x128xf32, #tpu.memory_space<vmem>>, vector<576x128xf32>
    %cst = arith.constant dense<0.000000e+00> : vector<64x128xf32>
    %2 = tpu.matmul %0, %1, %cst {dimension_numbers = #tpu.dot_dimension_numbers<[1], [0], [0], [1], [0, 0, 1, 1], [], []>} : vector<64x576xf32>, vector<576x128xf32>, vector<64x128xf32> -> vector<64x128xf32>
    %c0_3 = arith.constant 0 : index
    %c0_4 = arith.constant 0 : index
    %3 = vector.load %arg3[%c0_3, %c0_4] : memref<64x1xf32, #tpu.memory_space<vmem>>, vector<64x1xf32>
    %4 = vector.broadcast %3 : vector<64x1xf32> to vector<64x128xf32>
    %5 = arith.mulf %2, %4 : vector<64x128xf32>
    %c0_5 = arith.constant 0 : index
    %c0_6 = arith.constant 0 : index
    %6 = vector.load %arg4[%c0_5, %c0_6] : memref<64x1xf32, #tpu.memory_space<vmem>>, vector<64x1xf32>
    %7 = vector.broadcast %6 : vector<64x1xf32> to vector<64x128xf32>
    %8 = arith.addf %5, %7 : vector<64x128xf32>
    %c0_7 = arith.constant 0 : index
    %c0_8 = arith.constant 0 : index
    %9 = vector.load %arg5[%c0_7, %c0_8] : memref<64x128xf32, #tpu.memory_space<vmem>>, vector<64x128xf32>
    %10 = arith.addf %8, %9 : vector<64x128xf32>
    %cst_9 = arith.constant 0.000000e+00 : f32
    %11 = vector.broadcast %cst_9 : f32 to vector<64x128xf32>
    %12 = arith.maximumf %10, %11 : vector<64x128xf32>
    %c0_10 = arith.constant 0 : index
    %c0_11 = arith.constant 0 : index
    %13 = vector.load %arg6[%c0_10, %c0_11] : memref<64x128xf32, #tpu.memory_space<vmem>>, vector<64x128xf32>
    tpu.vector_store %arg6[%c0_10, %c0_11], %12 {strides = array<i32>} : memref<64x128xf32, #tpu.memory_space<vmem>>, vector<64x128xf32>,
    return
  }
  func.func @transform_0(%arg0: i32) -> (i32, i32) {
    %c0_i32 = arith.constant 0 : i32
    %c0_i32_0 = arith.constant 0 : i32
    %c0_i32_1 = arith.constant 0 : i32
    return %c0_i32, %c0_i32_0 : i32, i32
  }
  func.func @transform_1(%arg0: i32) -> (i32, i32) {
    %c0_i32 = arith.constant 0 : i32
    %c0_i32_0 = arith.constant 0 : i32
    return %c0_i32, %arg0 : i32, i32
  }
  func.func @transform_2(%arg0: i32) -> (i32, i32) {
    %c0_i32 = arith.constant 0 : i32
    %c0_i32_0 = arith.constant 0 : i32
    %c0_i32_1 = arith.constant 0 : i32
    return %c0_i32, %c0_i32_0 : i32, i32
  }
  func.func @transform_3(%arg0: i32) -> (i32, i32) {
    %c0_i32 = arith.constant 0 : i32
    %c0_i32_0 = arith.constant 0 : i32
    %c0_i32_1 = arith.constant 0 : i32
    return %c0_i32, %c0_i32_0 : i32, i32
  }
  func.func @transform_4(%arg0: i32) -> (i32, i32) {
    %c0_i32 = arith.constant 0 : i32
    %c0_i32_0 = arith.constant 0 : i32
    return %c0_i32, %arg0 : i32, i32
  }
  func.func @transform_5(%arg0: i32) -> (i32, i32) {
    %c0_i32 = arith.constant 0 : i32
    %c0_i32_0 = arith.constant 0 : i32
    return %c0_i32, %arg0 : i32, i32
  }
}

module attributes {stable_mosaic.version = 11 : i64} {
  func.func @_conv_bn_kernel(%arg0: i32, %arg1: memref<64x576xf32, #tpu.memory_space<vmem>>, %arg2: memref<576x128xf32, #tpu.memory_space<vmem>>, %arg3: memref<64x1xf32, #tpu.memory_space<vmem>>, %arg4: memref<64x1xf32, #tpu.memory_space<vmem>>, %arg5: memref<64x128xf32, #tpu.memory_space<vmem>>) attributes {dimension_semantics = [#tpu.dimension_semantics<parallel>], iteration_bounds = array<i64: 1>, scalar_prefetch = 0 : i64, scratch_operands = 0 : i64, tpu.core_type = #tpu.core_type<tc>, window_params = [{pipeline_mode = #tpu.pipeline_mode<synchronous>, transform_indices = @transform_0, window_bounds = array<i64: 64, 576>}, {transform_indices = @transform_1, window_bounds = array<i64: 576, 128>}, {pipeline_mode = #tpu.pipeline_mode<synchronous>, transform_indices = @transform_2, window_bounds = array<i64: 64, 1>}, {pipeline_mode = #tpu.pipeline_mode<synchronous>, transform_indices = @transform_3, window_bounds = array<i64: 64, 1>}, {transform_indices = @transform_4, window_bounds = array<i64: 64, 128>}]} {
    %c0 = arith.constant 0 : index
    %c0_0 = arith.constant 0 : index
    %0 = vector.load %arg1[%c0, %c0_0] : memref<64x576xf32, #tpu.memory_space<vmem>>, vector<64x576xf32>
    %c0_1 = arith.constant 0 : index
    %c0_2 = arith.constant 0 : index
    %1 = vector.load %arg2[%c0_1, %c0_2] : memref<576x128xf32, #tpu.memory_space<vmem>>, vector<576x128xf32>
    %cst = arith.constant dense<0.000000e+00> : vector<64x128xf32>
    %2 = tpu.matmul %0, %1, %cst {dimension_numbers = #tpu.dot_dimension_numbers<[1], [0], [0], [1], [0, 0, 1, 1], [], []>} : vector<64x576xf32>, vector<576x128xf32>, vector<64x128xf32> -> vector<64x128xf32>
    %c0_3 = arith.constant 0 : index
    %c0_4 = arith.constant 0 : index
    %3 = vector.load %arg3[%c0_3, %c0_4] : memref<64x1xf32, #tpu.memory_space<vmem>>, vector<64x1xf32>
    %4 = vector.broadcast %3 : vector<64x1xf32> to vector<64x128xf32>
    %5 = arith.mulf %2, %4 : vector<64x128xf32>
    %c0_5 = arith.constant 0 : index
    %c0_6 = arith.constant 0 : index
    %6 = vector.load %arg4[%c0_5, %c0_6] : memref<64x1xf32, #tpu.memory_space<vmem>>, vector<64x1xf32>
    %7 = vector.broadcast %6 : vector<64x1xf32> to vector<64x128xf32>
    %8 = arith.addf %5, %7 : vector<64x128xf32>
    %cst_7 = arith.constant 0.000000e+00 : f32
    %9 = vector.broadcast %cst_7 : f32 to vector<64x128xf32>
    %10 = arith.maximumf %8, %9 : vector<64x128xf32>
    %c0_8 = arith.constant 0 : index
    %c0_9 = arith.constant 0 : index
    %11 = vector.load %arg5[%c0_8, %c0_9] : memref<64x128xf32, #tpu.memory_space<vmem>>, vector<64x128xf32>
    tpu.vector_store %arg5[%c0_8, %c0_9], %10 {strides = array<i32>} : memref<64x128xf32, #tpu.memory_space<vmem>>, vector<64x128xf32>,
    return
  }
  func.func @transform_0(%arg0: i32) -> (i32, i32) {
    %c0_i32 = arith.constant 0 : i32
    %c0_i32_0 = arith.constant 0 : i32
    %c0_i32_1 = arith.constant 0 : i32
    return %c0_i32, %c0_i32_0 : i32, i32
  }
  func.func @transform_1(%arg0: i32) -> (i32, i32) {
    %c0_i32 = arith.constant 0 : i32
    %c0_i32_0 = arith.constant 0 : i32
    return %c0_i32, %arg0 : i32, i32
  }
  func.func @transform_2(%arg0: i32) -> (i32, i32) {
    %c0_i32 = arith.constant 0 : i32
    %c0_i32_0 = arith.constant 0 : i32
    %c0_i32_1 = arith.constant 0 : i32
    return %c0_i32, %c0_i32_0 : i32, i32
  }
  func.func @transform_3(%arg0: i32) -> (i32, i32) {
    %c0_i32 = arith.constant 0 : i32
    %c0_i32_0 = arith.constant 0 : i32
    %c0_i32_1 = arith.constant 0 : i32
    return %c0_i32, %c0_i32_0 : i32, i32
  }
  func.func @transform_4(%arg0: i32) -> (i32, i32) {
    %c0_i32 = arith.constant 0 : i32
    %c0_i32_0 = arith.constant 0 : i32
    return %c0_i32, %arg0 : i32, i32
  }
}

module attributes {stable_mosaic.version = 11 : i64} {
  func.func @_head_kernel(%arg0: i32, %arg1: memref<64x128xf32, #tpu.memory_space<vmem>>, %arg2: memref<128x2xf32, #tpu.memory_space<vmem>>, %arg3: memref<10x64xf32, #tpu.memory_space<vmem>>, %arg4: memref<10x1xf32, #tpu.memory_space<vmem>>, %arg5: memref<10x2xf32, #tpu.memory_space<vmem>>) attributes {dimension_semantics = [#tpu.dimension_semantics<arbitrary>], iteration_bounds = array<i64: 1>, scalar_prefetch = 0 : i64, scratch_operands = 0 : i64, tpu.core_type = #tpu.core_type<tc>, window_params = [{pipeline_mode = #tpu.pipeline_mode<synchronous>, transform_indices = @transform_0, window_bounds = array<i64: 64, 128>}, {pipeline_mode = #tpu.pipeline_mode<synchronous>, transform_indices = @transform_1, window_bounds = array<i64: 128, 2>}, {pipeline_mode = #tpu.pipeline_mode<synchronous>, transform_indices = @transform_2, window_bounds = array<i64: 10, 64>}, {pipeline_mode = #tpu.pipeline_mode<synchronous>, transform_indices = @transform_3, window_bounds = array<i64: 10, 1>}, {pipeline_mode = #tpu.pipeline_mode<synchronous>, transform_indices = @transform_4, window_bounds = array<i64: 10, 2>}]} {
    %c0 = arith.constant 0 : index
    %c0_0 = arith.constant 0 : index
    %0 = vector.load %arg1[%c0, %c0_0] : memref<64x128xf32, #tpu.memory_space<vmem>>, vector<64x128xf32>
    %c0_1 = arith.constant 0 : index
    %c0_2 = arith.constant 0 : index
    %1 = vector.load %arg2[%c0_1, %c0_2] : memref<128x2xf32, #tpu.memory_space<vmem>>, vector<128x2xf32>
    %cst = arith.constant dense<0.000000e+00> : vector<64x2xf32>
    %2 = tpu.matmul %0, %1, %cst {dimension_numbers = #tpu.dot_dimension_numbers<[1], [0], [0], [1], [0, 0, 1, 1], [], []>} : vector<64x128xf32>, vector<128x2xf32>, vector<64x2xf32> -> vector<64x2xf32>
    %c0_3 = arith.constant 0 : index
    %c0_4 = arith.constant 0 : index
    %3 = vector.load %arg3[%c0_3, %c0_4] : memref<10x64xf32, #tpu.memory_space<vmem>>, vector<10x64xf32>
    %cst_5 = arith.constant dense<0.000000e+00> : vector<10x2xf32>
    %4 = tpu.matmul %3, %2, %cst_5 {dimension_numbers = #tpu.dot_dimension_numbers<[1], [0], [0], [1], [0, 0, 1, 1], [], []>} : vector<10x64xf32>, vector<64x2xf32>, vector<10x2xf32> -> vector<10x2xf32>
    %c0_6 = arith.constant 0 : index
    %c0_7 = arith.constant 0 : index
    %5 = vector.load %arg4[%c0_6, %c0_7] : memref<10x1xf32, #tpu.memory_space<vmem>>, vector<10x1xf32>
    %6 = vector.broadcast %5 : vector<10x1xf32> to vector<10x2xf32>
    %7 = arith.addf %4, %6 : vector<10x2xf32>
    %c0_8 = arith.constant 0 : index
    %c0_9 = arith.constant 0 : index
    %8 = vector.load %arg5[%c0_8, %c0_9] : memref<10x2xf32, #tpu.memory_space<vmem>>, vector<10x2xf32>
    tpu.vector_store %arg5[%c0_8, %c0_9], %7 {strides = array<i32>} : memref<10x2xf32, #tpu.memory_space<vmem>>, vector<10x2xf32>,
    return
  }
  func.func @transform_0(%arg0: i32) -> (i32, i32) {
    %c0_i32 = arith.constant 0 : i32
    %c0_i32_0 = arith.constant 0 : i32
    %c0_i32_1 = arith.constant 0 : i32
    return %c0_i32, %c0_i32_0 : i32, i32
  }
  func.func @transform_1(%arg0: i32) -> (i32, i32) {
    %c0_i32 = arith.constant 0 : i32
    %c0_i32_0 = arith.constant 0 : i32
    %c0_i32_1 = arith.constant 0 : i32
    return %c0_i32, %c0_i32_0 : i32, i32
  }
  func.func @transform_2(%arg0: i32) -> (i32, i32) {
    %c0_i32 = arith.constant 0 : i32
    %c0_i32_0 = arith.constant 0 : i32
    %c0_i32_1 = arith.constant 0 : i32
    return %c0_i32, %c0_i32_0 : i32, i32
  }
  func.func @transform_3(%arg0: i32) -> (i32, i32) {
    %c0_i32 = arith.constant 0 : i32
    %c0_i32_0 = arith.constant 0 : i32
    %c0_i32_1 = arith.constant 0 : i32
    return %c0_i32, %c0_i32_0 : i32, i32
  }
  func.func @transform_4(%arg0: i32) -> (i32, i32) {
    %c0_i32 = arith.constant 0 : i32
    %c0_i32_0 = arith.constant 0 : i32
    %c0_i32_1 = arith.constant 0 : i32
    return %c0_i32, %c0_i32_0 : i32, i32
  }
}

</mosaic_0001>

<bundles_post_ra>
// kernel: forward.16
= control target key start
LH: loop header
LB: loop body
LE: loop exit
PB: predicated region body
PF: predicated region fallthrough
CT: control target
= control target key end

     0   :  { %s1005_s15 = smov 0   ;;  %s1007_s16 = smov 0   ;;  %s1259_s0 = inlined_call_operand.vmem [shape: f32[16,27], index: 0, kind: input, shape index: {}]   ;;  %s1260_s1 = inlined_call_operand.vmem [shape: f32[27,2048], index: 1, kind: input, shape index: {}]   ;;  %s1261_s2 = inlined_call_operand.vmem [shape: f32[16,1], index: 2, kind: input, shape index: {}]   ;;  %s1262_s3 = inlined_call_operand.vmem [shape: f32[16,1], index: 3, kind: input, shape index: {}]   ;;  %s1263_s4 = inlined_call_operand.vmem [shape: f32[16,2048], index: 4, kind: output, shape index: {}]  }
   0x1   :  { %s1009_s17 = smov 0  }
   0x2 LB: > { %s851_s18 = sadd.s32 4294967295, %s975_s17   ;;  %s1022_s19 = sadd.s32 1, %s975_s17   ;;  %s975_s17 = sphi %s1009_s17, %s1269_s17   ;;  %s971_s16 = sphi %s1007_s16, %s1268_s16   ;;  %s967_s15 = sphi %s1005_s15, %s1267_s15  }
   0x3   : > { %s39_s20 = ssub.s32 %s975_s17, %s1022_s19  ;;  %s42_s21 = sadd.s32 1, %s971_s16 }
   0x4   : > { %p40_p0 = scmp.eq.s32.totalorder %s39_s20, 0  ;;  %p49_p1 = scmp.ne.s32.totalorder %s971_s16, %s967_s15 }
   0x5   : > { %p50_p2 = scmp.eq.s32.totalorder %s975_s17, 0  ;;  %p121_p3 = scmp.eq.s32.totalorder %s851_s18, 1 }
   0x6   : > { %s1033_s22 = scalar_select %p40_p0, %s971_s16, %s42_s21  }
   0x7   : > { %p51_p4 = por %p50_p2, %p49_p1  ;;  %p1035_p5 = por %p121_p3, %p49_p1 }
   0x8   : > { %p854_p6 = scmp.ge.s32.totalorder %s975_s17, 2 }
   0xa   : > { %152 = sbr.rel (%p854_p6) target bundleno = 37 (0x25), region = 28 }
  0x11   : > { %155 = sbr.rel (!%p51_p4) target bundleno = 37 (0x25), region = 32  ;;  %s157_s24 = sand.u32 (%p51_p4), 1, %s971_s16  }
  0x12   : > { %s882_s25 = sshll.u32 (%p51_p4), %s975_s17, 6  ;;  %s855_s26 = sshll.u32 (%p51_p4), %s157_s24, 8 }
  0x13   : > { %s1045_s29 = scalar_lea.vmem (%p51_p4), %s1260_s1, %s882_s25  ;;  %s1050_s30 = scalar_lea.vmem (%p51_p4), [#allocation2], %s855_s26 }
  0x14   : > { %v175_v0 = vld [vmem:[%s1045_s29] sm:$0xff] (%p51_p4)  ;;  %v177_v1 = vld [vmem:[%s1045_s29 + $0x8] sm:$0xff] (%p51_p4)  ;;  %v179_v2 = vld [vmem:[%s1045_s29 + $0x10] sm:$0xff] (%p51_p4) }
  0x15   : > { %176 = vst [vmem:[%s1050_s30] sm:$0xff] (%p51_p4), %v175_v0  ;;  %178 = vst [vmem:[%s1050_s30 + $0x8] sm:$0xff] (%p51_p4), %v177_v1  ;;  %v181_v3 = vld [vmem:[%s1045_s29 + $0x18] sm:$0xff] (%p51_p4)  ;;  %v183_v4 = vld [vmem:[%s1045_s29 + $0x20] sm:$0xff] (%p51_p4) }
  0x16   : > { %180 = vst [vmem:[%s1050_s30 + $0x10] sm:$0xff] (%p51_p4), %v179_v2  ;;  %v185_v5 = vld [vmem:[%s1045_s29 + $0x28] sm:$0xff] (%p51_p4)  ;;  %182 = vst [vmem:[%s1050_s30 + $0x18] sm:$0xff] (%p51_p4), %v181_v3  ;;  %v187_v6 = vld [vmem:[%s1045_s29 + $0x30] sm:$0xff] (%p51_p4) }
  0x17   : > { %184 = vst [vmem:[%s1050_s30 + $0x20] sm:$0xff] (%p51_p4), %v183_v4  ;;  %186 = vst [vmem:[%s1050_s30 + $0x28] sm:$0xff] (%p51_p4), %v185_v5  ;;  %v189_v7 = vld [vmem:[%s1045_s29 + $0x38] sm:$0xff] (%p51_p4)  ;;  %v191_v8 = vld [vmem:[%s1045_s29 + $0x80] sm:$0xff] (%p51_p4) }
  0x18   : > { %188 = vst [vmem:[%s1050_s30 + $0x30] sm:$0xff] %v187_v6  ;;  %190 = vst [vmem:[%s1050_s30 + $0x38] sm:$0xff] %v189_v7  ;;  %v193_v9 = vld [vmem:[%s1045_s29 + $0x88] sm:$0xff]  ;;  %v195_v10 = vld [vmem:[%s1045_s29 + $0x90] sm:$0xff] }
  0x19   : > { %192 = vst [vmem:[%s1050_s30 + $0x40] sm:$0xff] %v191_v8  ;;  %v197_v11 = vld [vmem:[%s1045_s29 + $0x98] sm:$0xff]  ;;  %194 = vst [vmem:[%s1050_s30 + $0x48] sm:$0xff] %v193_v9  ;;  %v199_v12 = vld [vmem:[%s1045_s29 + $0xa0] sm:$0xff] }
  0x1a   : > { %196 = vst [vmem:[%s1050_s30 + $0x50] sm:$0xff] %v195_v10  ;;  %198 = vst [vmem:[%s1050_s30 + $0x58] sm:$0xff] %v197_v11  ;;  %v201_v13 = vld [vmem:[%s1045_s29 + $0xa8] sm:$0xff]  ;;  %v203_v14 = vld [vmem:[%s1045_s29 + $0xb0] sm:$0xff] }
  0x1b   : > { %200 = vst [vmem:[%s1050_s30 + $0x60] sm:$0xff] %v199_v12  ;;  %202 = vst [vmem:[%s1050_s30 + $0x68] sm:$0xff] %v201_v13  ;;  %v205_v15 = vld [vmem:[%s1045_s29 + $0xb8] sm:$0xff]  ;;  %v207_v16 = vld [vmem:[%s1045_s29 + $0x100] sm:$0xff] }
  0x1c   : > { %204 = vst [vmem:[%s1050_s30 + $0x70] sm:$0xff] %v203_v14  ;;  %v209_v17 = vld [vmem:[%s1045_s29 + $0x108] sm:$0xff]  ;;  %206 = vst [vmem:[%s1050_s30 + $0x78] sm:$0xff] %v205_v15  ;;  %v211_v18 = vld [vmem:[%s1045_s29 + $0x110] sm:$0xff] }
  0x1d   : > { %208 = vst [vmem:[%s1050_s30 + $0x80] sm:$0xff] %v207_v16  ;;  %210 = vst [vmem:[%s1050_s30 + $0x88] sm:$0xff] %v209_v17  ;;  %v213_v19 = vld [vmem:[%s1045_s29 + $0x118] sm:$0xff]  ;;  %v215_v20 = vld [vmem:[%s1045_s29 + $0x120] sm:$0xff] }
  0x1e   : > { %212 = vst [vmem:[%s1050_s30 + $0x90] sm:$0xff] %v211_v18  ;;  %214 = vst [vmem:[%s1050_s30 + $0x98] sm:$0xff] %v213_v19  ;;  %v217_v21 = vld [vmem:[%s1045_s29 + $0x128] sm:$0xff]  ;;  %v219_v22 = vld [vmem:[%s1045_s29 + $0x130] sm:$0xff] }
  0x1f   : > { %216 = vst [vmem:[%s1050_s30 + $0xa0] sm:$0xff] %v215_v20  ;;  %v221_v23 = vld [vmem:[%s1045_s29 + $0x138] sm:$0xff]  ;;  %218 = vst [vmem:[%s1050_s30 + $0xa8] sm:$0xff] %v217_v21  ;;  %v223_v24 = vld [vmem:[%s1045_s29 + $0x180] sm:$0xff] }
  0x20   : > { %220 = vst [vmem:[%s1050_s30 + $0xb0] sm:$0xff] %v219_v22  ;;  %222 = vst [vmem:[%s1050_s30 + $0xb8] sm:$0xff] %v221_v23  ;;  %v225_v25 = vld [vmem:[%s1045_s29 + $0x188] sm:$0xff]  ;;  %v227_v26 = vld [vmem:[%s1045_s29 + $0x190] sm:$0xff] }
  0x21   : > { %224 = vst [vmem:[%s1050_s30 + $0xc0] sm:$0xff] %v223_v24  ;;  %226 = vst [vmem:[%s1050_s30 + $0xc8] sm:$0xff] %v225_v25  ;;  %v229_v27 = vld [vmem:[%s1045_s29 + $0x198] sm:$0xff]  ;;  %v231_v28 = vld [vmem:[%s1045_s29 + $0x1a0] sm:$0xff] }
  0x22   : > { %228 = vst [vmem:[%s1050_s30 + $0xd0] sm:$0xff] %v227_v26  ;;  %v233_v29 = vld [vmem:[%s1045_s29 + $0x1a8] sm:$0xff]  ;;  %230 = vst [vmem:[%s1050_s30 + $0xd8] sm:$0xff] %v229_v27  ;;  %v235_v30 = vld [vmem:[%s1045_s29 + $0x1b0] sm:$0xff] }
  0x23   : > { %232 = vst [vmem:[%s1050_s30 + $0xe0] sm:$0xff] %v231_v28  ;;  %234 = vst [vmem:[%s1050_s30 + $0xe8] sm:$0xff] %v233_v29  ;;  %v237_v31 = vld [vmem:[%s1045_s29 + $0x1b8] sm:$0xff] }
  0x24   : > { %236 = vst [vmem:[%s1050_s30 + $0xf0] sm:$0xff] %v235_v30  ;;  %238 = vst [vmem:[%s1050_s30 + $0xf8] sm:$0xff] %v237_v31 }
  0x25 PF: > { %p858_p7 = scmp.ge.s32.totalorder %s975_s17, 1  ;;  %p243_p8 = scmp.lt.s32.totalorder %s975_s17, 3 }
  0x27   : > { %p244_p9 = pnand %p858_p7, %p243_p8 }
  0x28   : > { %s250_s5 = sand.u32 (!%p244_p9), 1, %s967_s15   ;;  %vm317_vm0 = vcmask (!%p244_p9), 1042432   ;;  %v977_v32 = vmov (!%p244_p9), 0.0   ;;  %v650_v33 = vld [vmem:[%s1261_s2] sm:$0xff] (!%p244_p9)  ;;  %vm978_vm1 = vmmov (!%p244_p9), 1   ;;  %v979_v35 = vmov (!%p244_p9), 0  }
  0x29   : > { %247 = sbr.rel (%p244_p9) target bundleno = 296 (0x128), region = 55  ;;  %s859_s6 = sshll.u32 (!%p244_p9), %s250_s5, 8  ;;  %406 = vmatprep.mubr.f32.mxu0 (!%p244_p9), %v977_v32  ;;  %483 = vmatprep.mubr.f32.mxu1 (!%p244_p9), %v977_v32  ;;  %vm1123_vm2 = vmpackc.low (!%p244_p9), %vm317_vm0, %vm978_vm1  ;;  %v678_v36 = vld [vmem:[%s1262_s3] sm:$0xff] (!%p244_p9)  ;;  %v651_v40 = vld [vmem:[%s1261_s2 + $0x8] sm:$0xff] (!%p244_p9)  ;;  %vm310_vm3 = vcmask (!%p244_p9), 220160  }
  0x2a   : > { %951 = vset.pattern.permute.xlu0 (!%p244_p9), %v979_v35  ;;  %952 = vset.pattern.permute.xlu1 (!%p244_p9), %v979_v35  ;;  %s1130_s11 = scalar_lea.vmem (!%p244_p9), [#allocation2], %s859_s6  ;;  %v679_v50 = vld [vmem:[%s1262_s3 + $0x8] sm:$0xff] (!%p244_p9)  ;;  %v276_v1 = vld [vmem:[%s1259_s0] sm:$0xff] (!%p244_p9)  ;;  %s860_s27 = sshll.u32 (!%p244_p9), %s250_s5, 7 }
  0x2b   : > { %v279_v37 = vld [vmem:[%s1130_s11 + $0x8] sm:$0xff] (!%p244_p9)  ;;  %v281_v39 = vld [vmem:[%s1130_s11 + $0x18] sm:$0xff] (!%p244_p9)  ;;  %654 = vperm.xlu0 (!%p244_p9), %951, %v650_v33   ;;  %682 = vperm.xlu1 (!%p244_p9), %952, %v678_v36   ;;  %v278_v43 = vld [vmem:[%s1130_s11] sm:$0xff] (!%p244_p9)  ;;  %s1208_s15 = scalar_lea.vmem (!%p244_p9), [#allocation3], %s860_s27 }
  0x2c   : > { %v287_v38 = vld [vmem:[%s1130_s11 + $0x48] sm:$0xff] (!%p244_p9)  ;;  %v289_v42 = vld [vmem:[%s1130_s11 + $0x58] sm:$0xff] (!%p244_p9)  ;;  %v286_v44 = vld [vmem:[%s1130_s11 + $0x40] sm:$0xff] (!%p244_p9) }
  0x2d   : > { %v884_v41 = vpack.c.bf16 (!%p244_p9), %v287_v38, %v279_v37  ;;  %v894_v45 = vpack.c.bf16 (!%p244_p9), %v289_v42, %v281_v39  ;;  %v886_v46 = vpack.c.bf16 (!%p244_p9), %v286_v44, %v278_v43  ;;  %v280_v47 = vld [vmem:[%s1130_s11 + $0x10] sm:$0xff] (!%p244_p9)  ;;  %v295_v49 = vld [vmem:[%s1130_s11 + $0x88] sm:$0xff] (!%p244_p9)  ;;  %v297_v53 = vld [vmem:[%s1130_s11 + $0x98] sm:$0xff] (!%p244_p9) }
  0x2e   : > { %v288_v48 = vld [vmem:[%s1130_s11 + $0x50] sm:$0xff] (!%p244_p9)  ;;  %v303_v52 = vld [vmem:[%s1130_s11 + $0xc8] sm:$0x7] (!%p244_p9)  ;;  %v305_v54 = vld [vmem:[%s1130_s11 + $0xd8] sm:$0x7] (!%p244_p9) }
  0x2f   : > { %885 = vmatprep.subr.bf16.mxu0 (!%p244_p9), %v884_v41  ;;  %v896_v51 = vpack.c.bf16 (!%p244_p9), %v288_v48, %v280_v47  ;;  %895 = vmatprep.subr.bf16.mxu1 (!%p244_p9), %v894_v45  ;;  %v888_v55 = vpack.c.bf16 (!%p244_p9), %v303_v52, %v295_v49  ;;  %v898_v56 = vpack.c.bf16 (!%p244_p9), %v305_v54, %v297_v53  ;;  %v294_v57 = vld [vmem:[%s1130_s11 + $0x80] sm:$0xff] (!%p244_p9)  ;;  %v296_v59 = vld [vmem:[%s1130_s11 + $0x90] sm:$0xff] (!%p244_p9)  ;;  %v283_v62 = vld [vmem:[%s1130_s11 + $0x28] sm:$0xff] (!%p244_p9) }
  0x30   : > { %887 = vmatpush1.bf16.msra.mxu0 %v886_v46  ;;  %v302_v58 = vld [vmem:[%s1130_s11 + $0xc0] sm:$0x7]  ;;  %v304_v61 = vld [vmem:[%s1130_s11 + $0xd0] sm:$0x7]  ;;  %v291_v63 = vld [vmem:[%s1130_s11 + $0x68] sm:$0xff]  ;;  %659 = vperm.xlu0 %951, %v651_v40   ;;  %s883_s28 = sshll.u32 (%p1035_p5), %s851_s18, 6 }
  0x31   : > { %897 = vmatpush1.bf16.msra.mxu1 %v896_v51  ;;  %v891_v60 = vpack.c.bf16 %v302_v58, %v294_v57  ;;  %890 = vmatprep.subr.msk.bf16.mxu0 %vm1123_vm2, %v888_v55  ;;  %v901_v0 = vpack.c.bf16 %v304_v61, %v296_v59  ;;  %v904_v2 = vpack.c.bf16 %v291_v63, %v283_v62  ;;  %v285_v3 = vld [vmem:[%s1130_s11 + $0x38] sm:$0xff]  ;;  %v282_v5 = vld [vmem:[%s1130_s11 + $0x20] sm:$0xff]  ;;  %v284_v8 = vld [vmem:[%s1130_s11 + $0x30] sm:$0xff]  ;;  %s747_s23 = scalar_lea.vmem (%p1035_p5), %s1263_s4, %s883_s28 }
  0x32   : > { %900 = vmatprep.subr.msk.bf16.mxu1 %vm1123_vm2, %v898_v56  ;;  %v293_v4 = vld [vmem:[%s1130_s11 + $0x78] sm:$0xff]  ;;  %v290_v7 = vld [vmem:[%s1130_s11 + $0x60] sm:$0xff]  ;;  %v292_v9 = vld [vmem:[%s1130_s11 + $0x70] sm:$0xff]  ;;  %687 = vperm.xlu1 %952, %v679_v50  }
  0x33   : > { %v914_v6 = vpack.c.bf16 %v293_v4, %v285_v3  ;;  %v906_v10 = vpack.c.bf16 %v290_v7, %v282_v5  ;;  %v299_v11 = vld [vmem:[%s1130_s11 + $0xa8] sm:$0xff]  ;;  %v301_v13 = vld [vmem:[%s1130_s11 + $0xb8] sm:$0xff]  ;;  %v916_v14 = vpack.c.bf16 %v292_v9, %v284_v8  ;;  %v298_v16 = vld [vmem:[%s1130_s11 + $0xa0] sm:$0xff] }
  0x34   : > { %893 = vmatpush1.bf16.msk.msra.mxu0 %vm1123_vm2, %v891_v60  ;;  %v307_v12 = vld [vmem:[%s1130_s11 + $0xe8] sm:$0x7]  ;;  %v309_v15 = vld [vmem:[%s1130_s11 + $0xf8] sm:$0x7]  ;;  %v306_v17 = vld [vmem:[%s1130_s11 + $0xe0] sm:$0x7] }
  0x35   : > { %903 = vmatpush1.bf16.msk.msra.mxu1 %vm1123_vm2, %v901_v0  ;;  %905 = vmatprep.subr.bf16.mxu0 %v904_v2  ;;  %v908_v18 = vpack.c.bf16 %v307_v12, %v299_v11  ;;  %v300_v19 = vld [vmem:[%s1130_s11 + $0xb0] sm:$0xff]  ;;  %v918_v21 = vpack.c.bf16 %v309_v15, %v301_v13  ;;  %v277_v22 = vld [vmem:[%s1259_s0 + $0x8] sm:$0xff]  ;;  %v911_v23 = vpack.c.bf16 %v306_v17, %v298_v16 }
  0x36   : > { %915 = vmatprep.subr.bf16.mxu1 %v914_v6  ;;  %v308_v20 = vld [vmem:[%s1130_s11 + $0xf0] sm:$0x7] }
  0x37   : > { %863 = vmatmul.mubr.msk.f32.vlgmr.msra.gmra.mrb[0].mxu0 %vm310_vm3, %v276_v1  ;;  %v921_v24 = vpack.c.bf16 %v308_v20, %v300_v19 }
  0x38   : > { %867 = vmatmul.mubr.msk.f32.vlgmr.msra.gmra.mrb[0].mxu1 %vm310_vm3, %v276_v1  ;;  %907 = vmatpush1.bf16.msra.mxu0 %v906_v10 }
  0x39   : > { %917 = vmatpush1.bf16.msra.mxu1 %v916_v14  ;;  %412 = vmatprep.mubr.f32.mxu0 %v977_v32 }
  0x3a   : > { %489 = vmatprep.mubr.f32.mxu1 %v977_v32  ;;  %910 = vmatprep.subr.msk.bf16.mxu0 %vm1123_vm2, %v908_v18 }
  0x3b   : > { %864 = vmatmul.mubr.msk.f32.gmra.mrb[2].mxu0 %vm310_vm3, %v277_v22  ;;  %920 = vmatprep.subr.msk.bf16.mxu1 %vm1123_vm2, %v918_v21 }
  0x3c   : > { %868 = vmatmul.mubr.msk.f32.gmra.mrb[2].mxu1 %vm310_vm3, %v277_v22  ;;  %913 = vmatpush1.bf16.msk.msra.mxu0 %vm1123_vm2, %v911_v23 }
  0x3d   : > { %923 = vmatpush1.bf16.msk.msra.mxu1 %vm1123_vm2, %v921_v24  ;;  %560 = vmatprep.mubr.f32.mxu0 %v977_v32 }
  0x3e   : > { %637 = vmatprep.mubr.f32.mxu1 %v977_v32 }
  0x3f   : > { %871 = vmatmul.mubr.msk.f32.vlgmr.msra.gmra.mrb[4].mxu0 %vm310_vm3, %v276_v1 }
  0x40   : > { %875 = vmatmul.mubr.msk.f32.vlgmr.msra.gmra.mrb[4].mxu1 %vm310_vm3, %v276_v1  ;;  %566 = vmatprep.mubr.f32.mxu0 %v977_v32 }
  0x41   : > { %643 = vmatprep.mubr.f32.mxu1 %v977_v32 }
  0x43   : > { %872 = vmatmul.mubr.msk.f32.gmra.mrb[6].mxu0 %vm310_vm3, %v277_v22 }
  0x44   : > { %876 = vmatmul.mubr.msk.f32.gmra.mrb[6].mxu1 %vm310_vm3, %v277_v22 }
  0xaa   : > { %v655_v25 = vpop.permute.xlu0 %654  ;;  %v683_v26 = vpop.permute.xlu1 %682 }
  0xaf   : > { %v660_v35 = vpop.permute.xlu0 %659 }
  0xb1   : > { %v688_v40 = vpop.permute.xlu1 %687 }
 0x10a   : > { %v408_v27 = vpop.f32.mrb[0].mxu0 }
 0x10b   : > { %v485_v28 = vpop.f32.mrb[0].mxu1  ;;  %v662_v29 = vmul.f32 %v655_v25, %v408_v27  ;;  %v410_v30 = vpop.f32.mrb[1].mxu0 }
 0x10c   : > { %v664_v31 = vmul.f32 %v655_v25, %v485_v28  ;;  %v663_v33 = vmul.f32 %v655_v25, %v410_v30  ;;  %v487_v34 = vpop.f32.mrb[1].mxu1 }
 0x10d   : > { %v665_v36 = vmul.f32 %v655_v25, %v487_v34  ;;  %v690_v37 = vadd.f32 %v683_v26, %v662_v29 }
 0x10e   : > { %v691_v38 = vadd.f32 %v683_v26, %v663_v33  ;;  %v692_v32 = vadd.f32 %v683_v26, %v664_v31  ;;  %v414_v39 = vpop.f32.mrb[2].mxu0 }
 0x10f   : > { %v693_v41 = vadd.f32 %v683_v26, %v665_v36  ;;  %v706_v42 = vmax.f32 %v690_v37, 0.0  ;;  %v491_v43 = vpop.f32.mrb[2].mxu1  ;;  %v670_v44 = vmul.f32 %v660_v35, %v414_v39  ;;  %v416_v45 = vpop.f32.mrb[3].mxu0 }
 0x110   : > { %v707_v46 = vmax.f32 %v691_v38, 0.0  ;;  %v708_v47 = vmax.f32 %v692_v32, 0.0  ;;  %v672_v48 = vmul.f32 %v660_v35, %v491_v43  ;;  %v671_v49 = vmul.f32 %v660_v35, %v416_v45  ;;  %v493_v50 = vpop.f32.mrb[3].mxu1 }
 0x111   : > { %v709_v51 = vmax.f32 %v693_v41, 0.0  ;;  %722 = vst [vmem:[%s1208_s15] sm:$0xff] %v706_v42  ;;  %v673_v52 = vmul.f32 %v660_v35, %v493_v50  ;;  %v698_v53 = vadd.f32 %v688_v40, %v670_v44 }
 0x112   : > { %723 = vst [vmem:[%s1208_s15 + $0x8] sm:$0xff] %v707_v46  ;;  %724 = vst [vmem:[%s1208_s15 + $0x10] sm:$0xff] %v708_v47  ;;  %v699_v54 = vadd.f32 %v688_v40, %v671_v49  ;;  %v700_v55 = vadd.f32 %v688_v40, %v672_v48  ;;  %v562_v56 = vpop.f32.mrb[4].mxu0 }
 0x113   : > { %725 = vst [vmem:[%s1208_s15 + $0x18] sm:$0xff] %v709_v51  ;;  %v701_v57 = vadd.f32 %v688_v40, %v673_v52  ;;  %v714_v58 = vmax.f32 %v698_v53, 0.0  ;;  %v666_v59 = vmul.f32 %v655_v25, %v562_v56  ;;  %v639_v60 = vpop.f32.mrb[4].mxu1  ;;  %v564_v61 = vpop.f32.mrb[5].mxu0 }
 0x114   : > { %v715_v62 = vmax.f32 %v699_v54, 0.0  ;;  %v716_v63 = vmax.f32 %v700_v55, 0.0  ;;  %v668_v0 = vmul.f32 %v655_v25, %v639_v60  ;;  %v667_v1 = vmul.f32 %v655_v25, %v564_v61  ;;  %v641_v2 = vpop.f32.mrb[5].mxu1 }
 0x115   : > { %v717_v3 = vmax.f32 %v701_v57, 0.0  ;;  %730 = vst [vmem:[%s1208_s15 + $0x40] sm:$0xff] %v714_v58  ;;  %v694_v4 = vadd.f32 %v683_v26, %v666_v59  ;;  %v669_v5 = vmul.f32 %v655_v25, %v641_v2 }
 0x116   : > { %731 = vst [vmem:[%s1208_s15 + $0x48] sm:$0xff] %v715_v62  ;;  %732 = vst [vmem:[%s1208_s15 + $0x50] sm:$0xff] %v716_v63  ;;  %v696_v6 = vadd.f32 %v683_v26, %v668_v0  ;;  %v695_v7 = vadd.f32 %v683_v26, %v667_v1  ;;  %v568_v8 = vpop.f32.mrb[6].mxu0 }
 0x117   : > { %733 = vst [vmem:[%s1208_s15 + $0x58] sm:$0xff] %v717_v3  ;;  %v710_v9 = vmax.f32 %v694_v4, 0.0  ;;  %v697_v10 = vadd.f32 %v683_v26, %v669_v5  ;;  %v674_v11 = vmul.f32 %v660_v35, %v568_v8  ;;  %v645_v12 = vpop.f32.mrb[6].mxu1  ;;  %v570_v13 = vpop.f32.mrb[7].mxu0 }
 0x118   : > { %v712_v14 = vmax.f32 %v696_v6, 0.0  ;;  %v711_v15 = vmax.f32 %v695_v7, 0.0  ;;  %v676_v16 = vmul.f32 %v660_v35, %v645_v12  ;;  %v675_v17 = vmul.f32 %v660_v35, %v570_v13  ;;  %v647_v18 = vpop.f32.mrb[7].mxu1  ;;  %v760_v29 = vld [vmem:[%s1208_s15] sm:$0xff] (%p1035_p5) }
 0x119   : > { %726 = vst [vmem:[%s1208_s15 + $0x20] sm:$0xff] %v710_v9  ;;  %v713_v19 = vmax.f32 %v697_v10, 0.0  ;;  %v702_v20 = vadd.f32 %v688_v40, %v674_v11  ;;  %v677_v21 = vmul.f32 %v660_v35, %v647_v18  ;;  %744 = sbr.rel (!%p1035_p5) target bundleno = 296 (0x128), region = 63  ;;  %v762_v30 = vld [vmem:[%s1208_s15 + $0x8] sm:$0xff] (%p1035_p5)  ;;  %v764_v31 = vld [vmem:[%s1208_s15 + $0x10] sm:$0xff] (%p1035_p5)  ;;  %761 = vst [vmem:[%s747_s23] sm:$0xff] (%p1035_p5), %v760_v29 }
 0x11a   : > { %728 = vst [vmem:[%s1208_s15 + $0x30] sm:$0xff] %v712_v14  ;;  %727 = vst [vmem:[%s1208_s15 + $0x28] sm:$0xff] %v711_v15  ;;  %v704_v22 = vadd.f32 %v688_v40, %v676_v16  ;;  %v703_v23 = vadd.f32 %v688_v40, %v675_v17  ;;  %v766_v33 = vld [vmem:[%s1208_s15 + $0x18] sm:$0xff] (%p1035_p5) }
 0x11b   : > { %729 = vst [vmem:[%s1208_s15 + $0x38] sm:$0xff] %v713_v19  ;;  %v718_v24 = vmax.f32 %v702_v20, 0.0  ;;  %v705_v25 = vadd.f32 %v688_v40, %v677_v21  ;;  %763 = vst [vmem:[%s747_s23 + $0x8] sm:$0xff] (%p1035_p5), %v762_v30 }
 0x11c   : > { %v720_v26 = vmax.f32 %v704_v22, 0.0  ;;  %v719_v27 = vmax.f32 %v703_v23, 0.0  ;;  %765 = vst [vmem:[%s747_s23 + $0x10] sm:$0xff] (%p1035_p5), %v764_v31  ;;  %767 = vst [vmem:[%s747_s23 + $0x18] sm:$0xff] (%p1035_p5), %v766_v33  ;;  %v776_v38 = vld [vmem:[%s1208_s15 + $0x40] sm:$0xff] (%p1035_p5) }
 0x11d   : > { %734 = vst [vmem:[%s1208_s15 + $0x60] sm:$0xff] %v718_v24  ;;  %v721_v28 = vmax.f32 %v705_v25, 0.0  ;;  %777 = vst [vmem:[%s747_s23 + $0x80] sm:$0xff] (%p1035_p5), %v776_v38  ;;  %v778_v32 = vld [vmem:[%s1208_s15 + $0x48] sm:$0xff] (%p1035_p5)  ;;  %v780_v39 = vld [vmem:[%s1208_s15 + $0x50] sm:$0xff] (%p1035_p5) }
 0x11e   : > { %736 = vst [vmem:[%s1208_s15 + $0x70] sm:$0xff] %v720_v26  ;;  %735 = vst [vmem:[%s1208_s15 + $0x68] sm:$0xff] %v719_v27  ;;  %v782_v40 = vld [vmem:[%s1208_s15 + $0x58] sm:$0xff] (%p1035_p5) }
 0x11f   : > { %737 = vst [vmem:[%s1208_s15 + $0x78] sm:$0xff] %v721_v28  ;;  %779 = vst [vmem:[%s747_s23 + $0x88] sm:$0xff] (%p1035_p5), %v778_v32 }
 0x120   : > { %v768_v34 = vld [vmem:[%s1208_s15 + $0x20] sm:$0xff]  ;;  %781 = vst [vmem:[%s747_s23 + $0x90] sm:$0xff] %v780_v39  ;;  %783 = vst [vmem:[%s747_s23 + $0x98] sm:$0xff] %v782_v40 }
 0x121   : > { %v770_v35 = vld [vmem:[%s1208_s15 + $0x28] sm:$0xff]  ;;  %769 = vst [vmem:[%s747_s23 + $0x20] sm:$0xff] %v768_v34  ;;  %v772_v36 = vld [vmem:[%s1208_s15 + $0x30] sm:$0xff] }
 0x122   : > { %771 = vst [vmem:[%s747_s23 + $0x28] sm:$0xff] %v770_v35  ;;  %v774_v37 = vld [vmem:[%s1208_s15 + $0x38] sm:$0xff]  ;;  %773 = vst [vmem:[%s747_s23 + $0x30] sm:$0xff] %v772_v36 }
 0x123   : > { %775 = vst [vmem:[%s747_s23 + $0x38] sm:$0xff] %v774_v37 }
 0x124   : > { %v784_v41 = vld [vmem:[%s1208_s15 + $0x60] sm:$0xff] }
 0x125   : > { %v786_v42 = vld [vmem:[%s1208_s15 + $0x68] sm:$0xff]  ;;  %v788_v43 = vld [vmem:[%s1208_s15 + $0x70] sm:$0xff]  ;;  %785 = vst [vmem:[%s747_s23 + $0xa0] sm:$0xff] %v784_v41 }
 0x126   : > { %787 = vst [vmem:[%s747_s23 + $0xa8] sm:$0xff] %v786_v42  ;;  %789 = vst [vmem:[%s747_s23 + $0xb0] sm:$0xff] %v788_v43  ;;  %v790_v44 = vld [vmem:[%s1208_s15 + $0x78] sm:$0xff] }
 0x127   : > { %791 = vst [vmem:[%s747_s23 + $0xb8] sm:$0xff] %v790_v44 }
 0x128 PF: > { %p11_p10 = scmp.ge.s32.totalorder %s1022_s19, 4   ;;  %s1267_s15 = smov %s971_s16 }
 0x129   : > { %s1268_s16 = smov %s1033_s22  ;;  %s1269_s17 = smov %s1022_s19 }
 0x12a   :  { %13 = sbr.rel (!%p11_p10) target bundleno = 2 (0x2), region = 117 }

// kernel: forward.17
= control target key start
LH: loop header
LB: loop body
LE: loop exit
PB: predicated region body
PF: predicated region fallthrough
CT: control target
= control target key end

     0   :  { %s1410_s15 = smov 0   ;;  %s1412_s16 = smov 0   ;;  %s2002_s0 = inlined_call_operand.vmem [shape: f32[16,144], index: 0, kind: input, shape index: {}]   ;;  %s2003_s1 = inlined_call_operand.vmem [shape: f32[144,2048], index: 1, kind: input, shape index: {}]   ;;  %s2004_s2 = inlined_call_operand.vmem [shape: f32[16,1], index: 2, kind: input, shape index: {}]   ;;  %s2005_s3 = inlined_call_operand.vmem [shape: f32[16,1], index: 3, kind: input, shape index: {}]   ;;  %s2006_s4 = inlined_call_operand.vmem [shape: f32[16,2048], index: 4, kind: output, shape index: {}]  }
   0x1   :  { %s1414_s17 = smov 0  }
   0x2 LB: > { %s1164_s18 = sadd.s32 4294967295, %s1382_s17   ;;  %s1427_s19 = sadd.s32 1, %s1382_s17   ;;  %s1382_s17 = sphi %s1414_s17, %s2010_s17   ;;  %s1378_s16 = sphi %s1412_s16, %s2009_s16   ;;  %s1374_s15 = sphi %s1410_s15, %s2008_s15  }
   0x3   : > { %s39_s20 = ssub.s32 %s1382_s17, %s1427_s19  ;;  %s42_s21 = sadd.s32 1, %s1378_s16 }
   0x4   : > { %p40_p0 = scmp.eq.s32.totalorder %s39_s20, 0  ;;  %p49_p1 = scmp.ne.s32.totalorder %s1378_s16, %s1374_s15 }
   0x5   : > { %p50_p2 = scmp.eq.s32.totalorder %s1382_s17, 0  ;;  %p121_p3 = scmp.eq.s32.totalorder %s1164_s18, 1 }
   0x6   : > { %s1438_s22 = scalar_select %p40_p0, %s1378_s16, %s42_s21  }
   0x7   : > { %p51_p4 = por %p50_p2, %p49_p1  ;;  %p1440_p5 = por %p121_p3, %p49_p1 }
   0x8   : > { %p1167_p6 = scmp.ge.s32.totalorder %s1382_s17, 2 }
   0xa   : > { %152 = sbr.rel (%p1167_p6) target bundleno = 94 (0x5e), region = 28 }
  0x11   : > { %155 = sbr.rel (!%p51_p4) target bundleno = 94 (0x5e), region = 32  ;;  %s157_s24 = sand.u32 (%p51_p4), 1, %s1378_s16  }
  0x12   : > { %s1185_s25 = sshll.u32 (%p51_p4), %s1382_s17, 6  ;;  %s1331_s26 = smul.u32 (%p51_p4), 1152, %s157_s24 }
  0x13   : > { %s1450_s29 = scalar_lea.vmem (%p51_p4), %s2003_s1, %s1185_s25 }
  0x14   : > { %v175_v0 = vld [vmem:[%s1450_s29] sm:$0xff] (%p51_p4)  ;;  %v177_v1 = vld [vmem:[%s1450_s29 + $0x8] sm:$0xff] (%p51_p4)  ;;  %v179_v2 = vld [vmem:[%s1450_s29 + $0x10] sm:$0xff] (%p51_p4)  ;;  %s1458_s30 = scalar_lea.vmem (%p51_p4), [#allocation2], %s1331_s26 }
  0x15   : > { %v181_v3 = vld [vmem:[%s1450_s29 + $0x18] sm:$0xff] (%p51_p4)  ;;  %v183_v4 = vld [vmem:[%s1450_s29 + $0x20] sm:$0xff] (%p51_p4)  ;;  %v185_v5 = vld [vmem:[%s1450_s29 + $0x28] sm:$0xff] (%p51_p4)  ;;  %176 = vst [vmem:[%s1458_s30] sm:$0xff] (%p51_p4), %v175_v0 }
  0x16   : > { %178 = vst [vmem:[%s1458_s30 + $0x8] sm:$0xff] (%p51_p4), %v177_v1  ;;  %180 = vst [vmem:[%s1458_s30 + $0x10] sm:$0xff] (%p51_p4), %v179_v2  ;;  %v187_v6 = vld [vmem:[%s1450_s29 + $0x30] sm:$0xff] (%p51_p4)  ;;  %v189_v7 = vld [vmem:[%s1450_s29 + $0x38] sm:$0xff] (%p51_p4) }
  0x17   : > { %182 = vst [vmem:[%s1458_s30 + $0x18] sm:$0xff] (%p51_p4), %v181_v3  ;;  %184 = vst [vmem:[%s1458_s30 + $0x20] sm:$0xff] (%p51_p4), %v183_v4  ;;  %v191_v8 = vld [vmem:[%s1450_s29 + $0x80] sm:$0xff] (%p51_p4)  ;;  %v193_v9 = vld [vmem:[%s1450_s29 + $0x88] sm:$0xff] (%p51_p4) }
  0x18   : > { %186 = vst [vmem:[%s1458_s30 + $0x28] sm:$0xff] %v185_v5  ;;  %188 = vst [vmem:[%s1458_s30 + $0x30] sm:$0xff] %v187_v6  ;;  %v195_v10 = vld [vmem:[%s1450_s29 + $0x90] sm:$0xff]  ;;  %v197_v11 = vld [vmem:[%s1450_s29 + $0x98] sm:$0xff] }
  0x19   : > { %190 = vst [vmem:[%s1458_s30 + $0x38] sm:$0xff] %v189_v7  ;;  %192 = vst [vmem:[%s1458_s30 + $0x40] sm:$0xff] %v191_v8  ;;  %v199_v12 = vld [vmem:[%s1450_s29 + $0xa0] sm:$0xff]  ;;  %v201_v13 = vld [vmem:[%s1450_s29 + $0xa8] sm:$0xff] }
  0x1a   : > { %194 = vst [vmem:[%s1458_s30 + $0x48] sm:$0xff] %v193_v9  ;;  %196 = vst [vmem:[%s1458_s30 + $0x50] sm:$0xff] %v195_v10  ;;  %v203_v14 = vld [vmem:[%s1450_s29 + $0xb0] sm:$0xff]  ;;  %v205_v15 = vld [vmem:[%s1450_s29 + $0xb8] sm:$0xff] }
  0x1b   : > { %198 = vst [vmem:[%s1458_s30 + $0x58] sm:$0xff] %v197_v11  ;;  %200 = vst [vmem:[%s1458_s30 + $0x60] sm:$0xff] %v199_v12  ;;  %v207_v16 = vld [vmem:[%s1450_s29 + $0x100] sm:$0xff]  ;;  %v209_v17 = vld [vmem:[%s1450_s29 + $0x108] sm:$0xff] }
  0x1c   : > { %202 = vst [vmem:[%s1458_s30 + $0x68] sm:$0xff] %v201_v13  ;;  %204 = vst [vmem:[%s1458_s30 + $0x70] sm:$0xff] %v203_v14  ;;  %v211_v18 = vld [vmem:[%s1450_s29 + $0x110] sm:$0xff]  ;;  %v213_v19 = vld [vmem:[%s1450_s29 + $0x118] sm:$0xff] }
  0x1d   : > { %206 = vst [vmem:[%s1458_s30 + $0x78] sm:$0xff] %v205_v15  ;;  %208 = vst [vmem:[%s1458_s30 + $0x80] sm:$0xff] %v207_v16  ;;  %v215_v20 = vld [vmem:[%s1450_s29 + $0x120] sm:$0xff]  ;;  %v217_v21 = vld [vmem:[%s1450_s29 + $0x128] sm:$0xff] }
  0x1e   : > { %210 = vst [vmem:[%s1458_s30 + $0x88] sm:$0xff] %v209_v17  ;;  %212 = vst [vmem:[%s1458_s30 + $0x90] sm:$0xff] %v211_v18  ;;  %v219_v22 = vld [vmem:[%s1450_s29 + $0x130] sm:$0xff]  ;;  %v221_v23 = vld [vmem:[%s1450_s29 + $0x138] sm:$0xff] }
  0x1f   : > { %214 = vst [vmem:[%s1458_s30 + $0x98] sm:$0xff] %v213_v19  ;;  %216 = vst [vmem:[%s1458_s30 + $0xa0] sm:$0xff] %v215_v20  ;;  %v223_v24 = vld [vmem:[%s1450_s29 + $0x180] sm:$0xff]  ;;  %v225_v25 = vld [vmem:[%s1450_s29 + $0x188] sm:$0xff] }
  0x20   : > { %218 = vst [vmem:[%s1458_s30 + $0xa8] sm:$0xff] %v217_v21  ;;  %220 = vst [vmem:[%s1458_s30 + $0xb0] sm:$0xff] %v219_v22  ;;  %v227_v26 = vld [vmem:[%s1450_s29 + $0x190] sm:$0xff]  ;;  %v229_v27 = vld [vmem:[%s1450_s29 + $0x198] sm:$0xff] }
  0x21   : > { %222 = vst [vmem:[%s1458_s30 + $0xb8] sm:$0xff] %v221_v23  ;;  %224 = vst [vmem:[%s1458_s30 + $0xc0] sm:$0xff] %v223_v24  ;;  %v231_v28 = vld [vmem:[%s1450_s29 + $0x1a0] sm:$0xff]  ;;  %v233_v29 = vld [vmem:[%s1450_s29 + $0x1a8] sm:$0xff] }
  0x22   : > { %226 = vst [vmem:[%s1458_s30 + $0xc8] sm:$0xff] %v225_v25  ;;  %228 = vst [vmem:[%s1458_s30 + $0xd0] sm:$0xff] %v227_v26  ;;  %v235_v30 = vld [vmem:[%s1450_s29 + $0x1b0] sm:$0xff]  ;;  %v237_v31 = vld [vmem:[%s1450_s29 + $0x1b8] sm:$0xff] }
  0x23   : > { %230 = vst [vmem:[%s1458_s30 + $0xd8] sm:$0xff] %v229_v27  ;;  %232 = vst [vmem:[%s1458_s30 + $0xe0] sm:$0xff] %v231_v28  ;;  %v239_v32 = vld [vmem:[%s1450_s29 + $0x200] sm:$0xff]  ;;  %v241_v33 = vld [vmem:[%s1450_s29 + $0x208] sm:$0xff] }
  0x24   : > { %234 = vst [vmem:[%s1458_s30 + $0xe8] sm:$0xff] %v233_v29  ;;  %236 = vst [vmem:[%s1458_s30 + $0xf0] sm:$0xff] %v235_v30  ;;  %v243_v34 = vld [vmem:[%s1450_s29 + $0x210] sm:$0xff]  ;;  %v245_v35 = vld [vmem:[%s1450_s29 + $0x218] sm:$0xff] }
  0x25   : > { %238 = vst [vmem:[%s1458_s30 + $0xf8] sm:$0xff] %v237_v31  ;;  %240 = vst [vmem:[%s1458_s30 + $0x100] sm:$0xff] %v239_v32  ;;  %v247_v36 = vld [vmem:[%s1450_s29 + $0x220] sm:$0xff]  ;;  %v249_v37 = vld [vmem:[%s1450_s29 + $0x228] sm:$0xff] }
  0x26   : > { %242 = vst [vmem:[%s1458_s30 + $0x108] sm:$0xff] %v241_v33  ;;  %244 = vst [vmem:[%s1458_s30 + $0x110] sm:$0xff] %v243_v34  ;;  %v251_v38 = vld [vmem:[%s1450_s29 + $0x230] sm:$0xff]  ;;  %v253_v39 = vld [vmem:[%s1450_s29 + $0x238] sm:$0xff] }
  0x27   : > { %246 = vst [vmem:[%s1458_s30 + $0x118] sm:$0xff] %v245_v35  ;;  %248 = vst [vmem:[%s1458_s30 + $0x120] sm:$0xff] %v247_v36  ;;  %v255_v40 = vld [vmem:[%s1450_s29 + $0x280] sm:$0xff]  ;;  %v257_v41 = vld [vmem:[%s1450_s29 + $0x288] sm:$0xff] }
  0x28   : > { %250 = vst [vmem:[%s1458_s30 + $0x128] sm:$0xff] %v249_v37  ;;  %252 = vst [vmem:[%s1458_s30 + $0x130] sm:$0xff] %v251_v38  ;;  %v259_v42 = vld [vmem:[%s1450_s29 + $0x290] sm:$0xff]  ;;  %v261_v43 = vld [vmem:[%s1450_s29 + $0x298] sm:$0xff] }
  0x29   : > { %254 = vst [vmem:[%s1458_s30 + $0x138] sm:$0xff] %v253_v39  ;;  %256 = vst [vmem:[%s1458_s30 + $0x140] sm:$0xff] %v255_v40  ;;  %v263_v44 = vld [vmem:[%s1450_s29 + $0x2a0] sm:$0xff]  ;;  %v265_v45 = vld [vmem:[%s1450_s29 + $0x2a8] sm:$0xff] }
  0x2a   : > { %258 = vst [vmem:[%s1458_s30 + $0x148] sm:$0xff] %v257_v41  ;;  %260 = vst [vmem:[%s1458_s30 + $0x150] sm:$0xff] %v259_v42  ;;  %v267_v46 = vld [vmem:[%s1450_s29 + $0x2b0] sm:$0xff]  ;;  %v269_v47 = vld [vmem:[%s1450_s29 + $0x2b8] sm:$0xff] }
  0x2b   : > { %262 = vst [vmem:[%s1458_s30 + $0x158] sm:$0xff] %v261_v43  ;;  %264 = vst [vmem:[%s1458_s30 + $0x160] sm:$0xff] %v263_v44  ;;  %v271_v48 = vld [vmem:[%s1450_s29 + $0x300] sm:$0xff]  ;;  %v273_v49 = vld [vmem:[%s1450_s29 + $0x308] sm:$0xff] }
  0x2c   : > { %266 = vst [vmem:[%s1458_s30 + $0x168] sm:$0xff] %v265_v45  ;;  %268 = vst [vmem:[%s1458_s30 + $0x170] sm:$0xff] %v267_v46  ;;  %v275_v50 = vld [vmem:[%s1450_s29 + $0x310] sm:$0xff]  ;;  %v277_v51 = vld [vmem:[%s1450_s29 + $0x318] sm:$0xff] }
  0x2d   : > { %270 = vst [vmem:[%s1458_s30 + $0x178] sm:$0xff] %v269_v47  ;;  %272 = vst [vmem:[%s1458_s30 + $0x180] sm:$0xff] %v271_v48  ;;  %v279_v52 = vld [vmem:[%s1450_s29 + $0x320] sm:$0xff]  ;;  %v281_v53 = vld [vmem:[%s1450_s29 + $0x328] sm:$0xff] }
  0x2e   : > { %274 = vst [vmem:[%s1458_s30 + $0x188] sm:$0xff] %v273_v49  ;;  %276 = vst [vmem:[%s1458_s30 + $0x190] sm:$0xff] %v275_v50  ;;  %v283_v54 = vld [vmem:[%s1450_s29 + $0x330] sm:$0xff]  ;;  %v285_v55 = vld [vmem:[%s1450_s29 + $0x338] sm:$0xff] }
  0x2f   : > { %278 = vst [vmem:[%s1458_s30 + $0x198] sm:$0xff] %v277_v51  ;;  %280 = vst [vmem:[%s1458_s30 + $0x1a0] sm:$0xff] %v279_v52  ;;  %v287_v56 = vld [vmem:[%s1450_s29 + $0x380] sm:$0xff]  ;;  %v289_v57 = vld [vmem:[%s1450_s29 + $0x388] sm:$0xff] }
  0x30   : > { %282 = vst [vmem:[%s1458_s30 + $0x1a8] sm:$0xff] %v281_v53  ;;  %284 = vst [vmem:[%s1458_s30 + $0x1b0] sm:$0xff] %v283_v54  ;;  %v291_v58 = vld [vmem:[%s1450_s29 + $0x390] sm:$0xff]  ;;  %v293_v59 = vld [vmem:[%s1450_s29 + $0x398] sm:$0xff] }
  0x31   : > { %286 = vst [vmem:[%s1458_s30 + $0x1b8] sm:$0xff] %v285_v55  ;;  %288 = vst [vmem:[%s1458_s30 + $0x1c0] sm:$0xff] %v287_v56  ;;  %v295_v60 = vld [vmem:[%s1450_s29 + $0x3a0] sm:$0xff]  ;;  %v297_v61 = vld [vmem:[%s1450_s29 + $0x3a8] sm:$0xff] }
  0x32   : > { %290 = vst [vmem:[%s1458_s30 + $0x1c8] sm:$0xff] %v289_v57  ;;  %292 = vst [vmem:[%s1458_s30 + $0x1d0] sm:$0xff] %v291_v58  ;;  %v299_v62 = vld [vmem:[%s1450_s29 + $0x3b0] sm:$0xff]  ;;  %v301_v63 = vld [vmem:[%s1450_s29 + $0x3b8] sm:$0xff] }
  0x33   : > { %294 = vst [vmem:[%s1458_s30 + $0x1d8] sm:$0xff] %v293_v59  ;;  %296 = vst [vmem:[%s1458_s30 + $0x1e0] sm:$0xff] %v295_v60  ;;  %v303_v0 = vld [vmem:[%s1450_s29 + $0x400] sm:$0xff]  ;;  %v305_v1 = vld [vmem:[%s1450_s29 + $0x408] sm:$0xff] }
  0x34   : > { %298 = vst [vmem:[%s1458_s30 + $0x1e8] sm:$0xff] %v297_v61  ;;  %300 = vst [vmem:[%s1458_s30 + $0x1f0] sm:$0xff] %v299_v62  ;;  %v307_v2 = vld [vmem:[%s1450_s29 + $0x410] sm:$0xff]  ;;  %v309_v3 = vld [vmem:[%s1450_s29 + $0x418] sm:$0xff] }
  0x35   : > { %302 = vst [vmem:[%s1458_s30 + $0x1f8] sm:$0xff] %v301_v63  ;;  %304 = vst [vmem:[%s1458_s30 + $0x200] sm:$0xff] %v303_v0  ;;  %v311_v4 = vld [vmem:[%s1450_s29 + $0x420] sm:$0xff]  ;;  %v313_v5 = vld [vmem:[%s1450_s29 + $0x428] sm:$0xff] }
  0x36   : > { %306 = vst [vmem:[%s1458_s30 + $0x208] sm:$0xff] %v305_v1  ;;  %308 = vst [vmem:[%s1458_s30 + $0x210] sm:$0xff] %v307_v2  ;;  %v315_v6 = vld [vmem:[%s1450_s29 + $0x430] sm:$0xff]  ;;  %v317_v7 = vld [vmem:[%s1450_s29 + $0x438] sm:$0xff] }
  0x37   : > { %310 = vst [vmem:[%s1458_s30 + $0x218] sm:$0xff] %v309_v3  ;;  %312 = vst [vmem:[%s1458_s30 + $0x220] sm:$0xff] %v311_v4  ;;  %v319_v8 = vld [vmem:[%s1450_s29 + $0x480] sm:$0xff]  ;;  %v321_v9 = vld [vmem:[%s1450_s29 + $0x488] sm:$0xff] }
  0x38   : > { %314 = vst [vmem:[%s1458_s30 + $0x228] sm:$0xff] %v313_v5  ;;  %316 = vst [vmem:[%s1458_s30 + $0x230] sm:$0xff] %v315_v6  ;;  %v323_v10 = vld [vmem:[%s1450_s29 + $0x490] sm:$0xff]  ;;  %v325_v11 = vld [vmem:[%s1450_s29 + $0x498] sm:$0xff] }
  0x39   : > { %318 = vst [vmem:[%s1458_s30 + $0x238] sm:$0xff] %v317_v7  ;;  %320 = vst [vmem:[%s1458_s30 + $0x240] sm:$0xff] %v319_v8  ;;  %v327_v12 = vld [vmem:[%s1450_s29 + $0x4a0] sm:$0xff]  ;;  %v329_v13 = vld [vmem:[%s1450_s29 + $0x4a8] sm:$0xff] }
  0x3a   : > { %322 = vst [vmem:[%s1458_s30 + $0x248] sm:$0xff] %v321_v9  ;;  %324 = vst [vmem:[%s1458_s30 + $0x250] sm:$0xff] %v323_v10  ;;  %v331_v14 = vld [vmem:[%s1450_s29 + $0x4b0] sm:$0xff]  ;;  %v333_v15 = vld [vmem:[%s1450_s29 + $0x4b8] sm:$0xff] }
  0x3b   : > { %326 = vst [vmem:[%s1458_s30 + $0x258] sm:$0xff] %v325_v11  ;;  %328 = vst [vmem:[%s1458_s30 + $0x260] sm:$0xff] %v327_v12  ;;  %v335_v16 = vld [vmem:[%s1450_s29 + $0x500] sm:$0xff]  ;;  %v337_v17 = vld [vmem:[%s1450_s29 + $0x508] sm:$0xff] }
  0x3c   : > { %330 = vst [vmem:[%s1458_s30 + $0x268] sm:$0xff] %v329_v13  ;;  %332 = vst [vmem:[%s1458_s30 + $0x270] sm:$0xff] %v331_v14  ;;  %v339_v18 = vld [vmem:[%s1450_s29 + $0x510] sm:$0xff]  ;;  %v341_v19 = vld [vmem:[%s1450_s29 + $0x518] sm:$0xff] }
  0x3d   : > { %334 = vst [vmem:[%s1458_s30 + $0x278] sm:$0xff] %v333_v15  ;;  %336 = vst [vmem:[%s1458_s30 + $0x280] sm:$0xff] %v335_v16  ;;  %v343_v20 = vld [vmem:[%s1450_s29 + $0x520] sm:$0xff]  ;;  %v345_v21 = vld [vmem:[%s1450_s29 + $0x528] sm:$0xff] }
  0x3e   : > { %338 = vst [vmem:[%s1458_s30 + $0x288] sm:$0xff] %v337_v17  ;;  %340 = vst [vmem:[%s1458_s30 + $0x290] sm:$0xff] %v339_v18  ;;  %v347_v22 = vld [vmem:[%s1450_s29 + $0x530] sm:$0xff]  ;;  %v349_v23 = vld [vmem:[%s1450_s29 + $0x538] sm:$0xff] }
  0x3f   : > { %342 = vst [vmem:[%s1458_s30 + $0x298] sm:$0xff] %v341_v19  ;;  %344 = vst [vmem:[%s1458_s30 + $0x2a0] sm:$0xff] %v343_v20  ;;  %v351_v24 = vld [vmem:[%s1450_s29 + $0x580] sm:$0xff]  ;;  %v353_v25 = vld [vmem:[%s1450_s29 + $0x588] sm:$0xff] }
  0x40   : > { %346 = vst [vmem:[%s1458_s30 + $0x2a8] sm:$0xff] %v345_v21  ;;  %348 = vst [vmem:[%s1458_s30 + $0x2b0] sm:$0xff] %v347_v22  ;;  %v355_v26 = vld [vmem:[%s1450_s29 + $0x590] sm:$0xff]  ;;  %v357_v27 = vld [vmem:[%s1450_s29 + $0x598] sm:$0xff] }
  0x41   : > { %350 = vst [vmem:[%s1458_s30 + $0x2b8] sm:$0xff] %v349_v23  ;;  %352 = vst [vmem:[%s1458_s30 + $0x2c0] sm:$0xff] %v351_v24  ;;  %v359_v28 = vld [vmem:[%s1450_s29 + $0x5a0] sm:$0xff]  ;;  %v361_v29 = vld [vmem:[%s1450_s29 + $0x5a8] sm:$0xff] }
  0x42   : > { %354 = vst [vmem:[%s1458_s30 + $0x2c8] sm:$0xff] %v353_v25  ;;  %356 = vst [vmem:[%s1458_s30 + $0x2d0] sm:$0xff] %v355_v26  ;;  %v363_v30 = vld [vmem:[%s1450_s29 + $0x5b0] sm:$0xff]  ;;  %v365_v31 = vld [vmem:[%s1450_s29 + $0x5b8] sm:$0xff] }
  0x43   : > { %358 = vst [vmem:[%s1458_s30 + $0x2d8] sm:$0xff] %v357_v27  ;;  %360 = vst [vmem:[%s1458_s30 + $0x2e0] sm:$0xff] %v359_v28  ;;  %v367_v32 = vld [vmem:[%s1450_s29 + $0x600] sm:$0xff]  ;;  %v369_v33 = vld [vmem:[%s1450_s29 + $0x608] sm:$0xff] }
  0x44   : > { %362 = vst [vmem:[%s1458_s30 + $0x2e8] sm:$0xff] %v361_v29  ;;  %364 = vst [vmem:[%s1458_s30 + $0x2f0] sm:$0xff] %v363_v30  ;;  %v371_v34 = vld [vmem:[%s1450_s29 + $0x610] sm:$0xff]  ;;  %v373_v35 = vld [vmem:[%s1450_s29 + $0x618] sm:$0xff] }
  0x45   : > { %366 = vst [vmem:[%s1458_s30 + $0x2f8] sm:$0xff] %v365_v31  ;;  %368 = vst [vmem:[%s1458_s30 + $0x300] sm:$0xff] %v367_v32  ;;  %v375_v36 = vld [vmem:[%s1450_s29 + $0x620] sm:$0xff]  ;;  %v377_v37 = vld [vmem:[%s1450_s29 + $0x628] sm:$0xff] }
  0x46   : > { %370 = vst [vmem:[%s1458_s30 + $0x308] sm:$0xff] %v369_v33  ;;  %372 = vst [vmem:[%s1458_s30 + $0x310] sm:$0xff] %v371_v34  ;;  %v379_v38 = vld [vmem:[%s1450_s29 + $0x630] sm:$0xff]  ;;  %v381_v39 = vld [vmem:[%s1450_s29 + $0x638] sm:$0xff] }
  0x47   : > { %374 = vst [vmem:[%s1458_s30 + $0x318] sm:$0xff] %v373_v35  ;;  %376 = vst [vmem:[%s1458_s30 + $0x320] sm:$0xff] %v375_v36  ;;  %v383_v40 = vld [vmem:[%s1450_s29 + $0x680] sm:$0xff]  ;;  %v385_v41 = vld [vmem:[%s1450_s29 + $0x688] sm:$0xff] }
  0x48   : > { %378 = vst [vmem:[%s1458_s30 + $0x328] sm:$0xff] %v377_v37  ;;  %380 = vst [vmem:[%s1458_s30 + $0x330] sm:$0xff] %v379_v38  ;;  %v387_v42 = vld [vmem:[%s1450_s29 + $0x690] sm:$0xff]  ;;  %v389_v43 = vld [vmem:[%s1450_s29 + $0x698] sm:$0xff] }
  0x49   : > { %382 = vst [vmem:[%s1458_s30 + $0x338] sm:$0xff] %v381_v39  ;;  %384 = vst [vmem:[%s1458_s30 + $0x340] sm:$0xff] %v383_v40  ;;  %v391_v44 = vld [vmem:[%s1450_s29 + $0x6a0] sm:$0xff]  ;;  %v393_v45 = vld [vmem:[%s1450_s29 + $0x6a8] sm:$0xff] }
  0x4a   : > { %386 = vst [vmem:[%s1458_s30 + $0x348] sm:$0xff] %v385_v41  ;;  %388 = vst [vmem:[%s1458_s30 + $0x350] sm:$0xff] %v387_v42  ;;  %v395_v46 = vld [vmem:[%s1450_s29 + $0x6b0] sm:$0xff]  ;;  %v397_v47 = vld [vmem:[%s1450_s29 + $0x6b8] sm:$0xff] }
  0x4b   : > { %390 = vst [vmem:[%s1458_s30 + $0x358] sm:$0xff] %v389_v43  ;;  %392 = vst [vmem:[%s1458_s30 + $0x360] sm:$0xff] %v391_v44  ;;  %v399_v48 = vld [vmem:[%s1450_s29 + $0x700] sm:$0xff]  ;;  %v401_v49 = vld [vmem:[%s1450_s29 + $0x708] sm:$0xff] }
  0x4c   : > { %394 = vst [vmem:[%s1458_s30 + $0x368] sm:$0xff] %v393_v45  ;;  %396 = vst [vmem:[%s1458_s30 + $0x370] sm:$0xff] %v395_v46  ;;  %v403_v50 = vld [vmem:[%s1450_s29 + $0x710] sm:$0xff]  ;;  %v405_v51 = vld [vmem:[%s1450_s29 + $0x718] sm:$0xff] }
  0x4d   : > { %398 = vst [vmem:[%s1458_s30 + $0x378] sm:$0xff] %v397_v47  ;;  %400 = vst [vmem:[%s1458_s30 + $0x380] sm:$0xff] %v399_v48  ;;  %v407_v52 = vld [vmem:[%s1450_s29 + $0x720] sm:$0xff]  ;;  %v409_v53 = vld [vmem:[%s1450_s29 + $0x728] sm:$0xff] }
  0x4e   : > { %402 = vst [vmem:[%s1458_s30 + $0x388] sm:$0xff] %v401_v49  ;;  %404 = vst [vmem:[%s1458_s30 + $0x390] sm:$0xff] %v403_v50  ;;  %v411_v54 = vld [vmem:[%s1450_s29 + $0x730] sm:$0xff]  ;;  %v413_v55 = vld [vmem:[%s1450_s29 + $0x738] sm:$0xff] }
  0x4f   : > { %406 = vst [vmem:[%s1458_s30 + $0x398] sm:$0xff] %v405_v51  ;;  %408 = vst [vmem:[%s1458_s30 + $0x3a0] sm:$0xff] %v407_v52  ;;  %v415_v56 = vld [vmem:[%s1450_s29 + $0x780] sm:$0xff]  ;;  %v417_v57 = vld [vmem:[%s1450_s29 + $0x788] sm:$0xff] }
  0x50   : > { %410 = vst [vmem:[%s1458_s30 + $0x3a8] sm:$0xff] %v409_v53  ;;  %412 = vst [vmem:[%s1458_s30 + $0x3b0] sm:$0xff] %v411_v54  ;;  %v419_v58 = vld [vmem:[%s1450_s29 + $0x790] sm:$0xff]  ;;  %v421_v59 = vld [vmem:[%s1450_s29 + $0x798] sm:$0xff] }
  0x51   : > { %414 = vst [vmem:[%s1458_s30 + $0x3b8] sm:$0xff] %v413_v55  ;;  %416 = vst [vmem:[%s1458_s30 + $0x3c0] sm:$0xff] %v415_v56  ;;  %v423_v60 = vld [vmem:[%s1450_s29 + $0x7a0] sm:$0xff]  ;;  %v425_v61 = vld [vmem:[%s1450_s29 + $0x7a8] sm:$0xff] }
  0x52   : > { %418 = vst [vmem:[%s1458_s30 + $0x3c8] sm:$0xff] %v417_v57  ;;  %420 = vst [vmem:[%s1458_s30 + $0x3d0] sm:$0xff] %v419_v58  ;;  %v427_v62 = vld [vmem:[%s1450_s29 + $0x7b0] sm:$0xff]  ;;  %v429_v63 = vld [vmem:[%s1450_s29 + $0x7b8] sm:$0xff] }
  0x53   : > { %422 = vst [vmem:[%s1458_s30 + $0x3d8] sm:$0xff] %v421_v59  ;;  %424 = vst [vmem:[%s1458_s30 + $0x3e0] sm:$0xff] %v423_v60  ;;  %v431_v0 = vld [vmem:[%s1450_s29 + $0x800] sm:$0xff]  ;;  %v433_v1 = vld [vmem:[%s1450_s29 + $0x808] sm:$0xff] }
  0x54   : > { %426 = vst [vmem:[%s1458_s30 + $0x3e8] sm:$0xff] %v425_v61  ;;  %428 = vst [vmem:[%s1458_s30 + $0x3f0] sm:$0xff] %v427_v62  ;;  %v435_v2 = vld [vmem:[%s1450_s29 + $0x810] sm:$0xff]  ;;  %v437_v3 = vld [vmem:[%s1450_s29 + $0x818] sm:$0xff] }
  0x55   : > { %430 = vst [vmem:[%s1458_s30 + $0x3f8] sm:$0xff] %v429_v63  ;;  %432 = vst [vmem:[%s1458_s30 + $0x400] sm:$0xff] %v431_v0  ;;  %v439_v4 = vld [vmem:[%s1450_s29 + $0x820] sm:$0xff]  ;;  %v441_v5 = vld [vmem:[%s1450_s29 + $0x828] sm:$0xff] }
  0x56   : > { %434 = vst [vmem:[%s1458_s30 + $0x408] sm:$0xff] %v433_v1  ;;  %436 = vst [vmem:[%s1458_s30 + $0x410] sm:$0xff] %v435_v2  ;;  %v443_v6 = vld [vmem:[%s1450_s29 + $0x830] sm:$0xff]  ;;  %v445_v7 = vld [vmem:[%s1450_s29 + $0x838] sm:$0xff] }
  0x57   : > { %438 = vst [vmem:[%s1458_s30 + $0x418] sm:$0xff] %v437_v3  ;;  %440 = vst [vmem:[%s1458_s30 + $0x420] sm:$0xff] %v439_v4  ;;  %v447_v8 = vld [vmem:[%s1450_s29 + $0x880] sm:$0xff]  ;;  %v449_v9 = vld [vmem:[%s1450_s29 + $0x888] sm:$0xff] }
  0x58   : > { %442 = vst [vmem:[%s1458_s30 + $0x428] sm:$0xff] %v441_v5  ;;  %444 = vst [vmem:[%s1458_s30 + $0x430] sm:$0xff] %v443_v6  ;;  %v451_v10 = vld [vmem:[%s1450_s29 + $0x890] sm:$0xff]  ;;  %v453_v11 = vld [vmem:[%s1450_s29 + $0x898] sm:$0xff] }
  0x59   : > { %446 = vst [vmem:[%s1458_s30 + $0x438] sm:$0xff] %v445_v7  ;;  %448 = vst [vmem:[%s1458_s30 + $0x440] sm:$0xff] %v447_v8  ;;  %v455_v12 = vld [vmem:[%s1450_s29 + $0x8a0] sm:$0xff]  ;;  %v457_v13 = vld [vmem:[%s1450_s29 + $0x8a8] sm:$0xff] }
  0x5a   : > { %450 = vst [vmem:[%s1458_s30 + $0x448] sm:$0xff] %v449_v9  ;;  %452 = vst [vmem:[%s1458_s30 + $0x450] sm:$0xff] %v451_v10  ;;  %v459_v14 = vld [vmem:[%s1450_s29 + $0x8b0] sm:$0xff]  ;;  %v461_v15 = vld [vmem:[%s1450_s29 + $0x8b8] sm:$0xff] }
  0x5b   : > { %454 = vst [vmem:[%s1458_s30 + $0x458] sm:$0xff] %v453_v11  ;;  %456 = vst [vmem:[%s1458_s30 + $0x460] sm:$0xff] %v455_v12 }
  0x5c   : > { %458 = vst [vmem:[%s1458_s30 + $0x468] sm:$0xff] %v457_v13  ;;  %460 = vst [vmem:[%s1458_s30 + $0x470] sm:$0xff] %v459_v14 }
  0x5d   : > { %462 = vst [vmem:[%s1458_s30 + $0x478] sm:$0xff] %v461_v15 }
  0x5e PF: > { %p1170_p7 = scmp.ge.s32.totalorder %s1382_s17, 1  ;;  %p467_p8 = scmp.lt.s32.totalorder %s1382_s17, 3 }
  0x60   : > { %p468_p9 = pnand %p1170_p7, %p467_p8 }
  0x61   : > { %s474_s5 = sand.u32 (!%p468_p9), 1, %s1374_s15   ;;  %v1748_v16 = vld [vmem:[%s2002_s0 + $0x8] sm:$0xff] (!%p468_p9)  ;;  %vm648_vm0 = vcmask (!%p468_p9), 130048   ;;  %v963_v17 = vld [vmem:[%s2004_s2] sm:$0xff] (!%p468_p9)  ;;  %v1384_v19 = vmov (!%p468_p9), 0  }
  0x62   : > { %471 = sbr.rel (%p468_p9) target bundleno = 411 (0x19b), region = 55  ;;  %1172 = vmatprep.mubr.msk.f32.mxu0 (!%p468_p9), %vm648_vm0, %v1748_v16  ;;  %1174 = vmatprep.mubr.msk.f32.mxu1 (!%p468_p9), %vm648_vm0, %v1748_v16  ;;  %v991_v18 = vld [vmem:[%s2005_s3] sm:$0xff] (!%p468_p9)  ;;  %v964_v20 = vld [vmem:[%s2004_s2 + $0x8] sm:$0xff] (!%p468_p9)  ;;  %s1171_s6 = sshll.u32 (!%p468_p9), %s474_s5, 7 }
  0x63   : > { %s1332_s8 = smul.u32 (!%p468_p9), 1152, %s474_s5  ;;  %1358 = vset.pattern.permute.xlu0 (!%p468_p9), %v1384_v19  ;;  %1359 = vset.pattern.permute.xlu1 (!%p468_p9), %v1384_v19  ;;  %v992_v24 = vld [vmem:[%s2005_s3 + $0x8] sm:$0xff] (!%p468_p9)  ;;  %s1951_s15 = scalar_lea.vmem (!%p468_p9), [#allocation3], %s1171_s6 }
  0x64   : > { %967 = vperm.xlu0 (!%p468_p9), %1358, %v963_v17   ;;  %995 = vperm.xlu1 (!%p468_p9), %1359, %v991_v18  }
  0x65   : > { %s1765_s20 = scalar_lea.vmem (!%p468_p9), [#allocation2], %s1332_s8 }
  0x66   : > { %v505_v21 = vld [vmem:[%s1765_s20 + $0x8] sm:$0xff] (!%p468_p9)  ;;  %v507_v23 = vld [vmem:[%s1765_s20 + $0x18] sm:$0xff] (!%p468_p9)  ;;  %v504_v27 = vld [vmem:[%s1765_s20] sm:$0xff] (!%p468_p9) }
  0x67   : > { %v513_v22 = vld [vmem:[%s1765_s20 + $0x48] sm:$0xff] (!%p468_p9)  ;;  %v515_v26 = vld [vmem:[%s1765_s20 + $0x58] sm:$0xff] (!%p468_p9)  ;;  %v512_v28 = vld [vmem:[%s1765_s20 + $0x40] sm:$0xff] (!%p468_p9) }
  0x68   : > { %v1187_v25 = vpack.c.bf16 (!%p468_p9), %v513_v22, %v505_v21  ;;  %v1223_v29 = vpack.c.bf16 (!%p468_p9), %v515_v26, %v507_v23  ;;  %v1189_v30 = vpack.c.bf16 (!%p468_p9), %v512_v28, %v504_v27  ;;  %v506_v31 = vld [vmem:[%s1765_s20 + $0x10] sm:$0xff] (!%p468_p9)  ;;  %v521_v33 = vld [vmem:[%s1765_s20 + $0x88] sm:$0xff] (!%p468_p9)  ;;  %v523_v36 = vld [vmem:[%s1765_s20 + $0x98] sm:$0xff] (!%p468_p9)  ;;  %972 = vperm.xlu0 (!%p468_p9), %1358, %v964_v20   ;;  %1000 = vperm.xlu1 (!%p468_p9), %1359, %v992_v24  }
  0x69   : > { %v514_v32 = vld [vmem:[%s1765_s20 + $0x50] sm:$0xff]  ;;  %v529_v35 = vld [vmem:[%s1765_s20 + $0xc8] sm:$0xff]  ;;  %v531_v37 = vld [vmem:[%s1765_s20 + $0xd8] sm:$0xff]  ;;  %s1186_s5 = sshll.u32 (%p1440_p5), %s1164_s18, 6 }
  0x6a   : > { %1188 = vmatprep.subr.bf16.mxu0 %v1187_v25  ;;  %v1225_v34 = vpack.c.bf16 %v514_v32, %v506_v31  ;;  %1224 = vmatprep.subr.bf16.mxu1 %v1223_v29  ;;  %v1191_v38 = vpack.c.bf16 %v529_v35, %v521_v33  ;;  %v1227_v39 = vpack.c.bf16 %v531_v37, %v523_v36  ;;  %v520_v40 = vld [vmem:[%s1765_s20 + $0x80] sm:$0xff]  ;;  %v522_v42 = vld [vmem:[%s1765_s20 + $0x90] sm:$0xff]  ;;  %v537_v45 = vld [vmem:[%s1765_s20 + $0x108] sm:$0xff]  ;;  %s1060_s23 = scalar_lea.vmem (%p1440_p5), %s2006_s4, %s1186_s5 }
  0x6b   : > { %1190 = vmatpush1.bf16.msra.mxu0 %v1189_v30  ;;  %v528_v41 = vld [vmem:[%s1765_s20 + $0xc0] sm:$0xff]  ;;  %v530_v44 = vld [vmem:[%s1765_s20 + $0xd0] sm:$0xff]  ;;  %v545_v46 = vld [vmem:[%s1765_s20 + $0x148] sm:$0xff] }
  0x6c   : > { %1226 = vmatpush1.bf16.msra.mxu1 %v1225_v34  ;;  %v1193_v43 = vpack.c.bf16 %v528_v41, %v520_v40  ;;  %1192 = vmatprep.subr.bf16.mxu0 %v1191_v38  ;;  %v1229_v47 = vpack.c.bf16 %v530_v44, %v522_v42  ;;  %v1195_v48 = vpack.c.bf16 %v545_v46, %v537_v45  ;;  %v539_v49 = vld [vmem:[%s1765_s20 + $0x118] sm:$0xff]  ;;  %v536_v51 = vld [vmem:[%s1765_s20 + $0x100] sm:$0xff]  ;;  %v538_v54 = vld [vmem:[%s1765_s20 + $0x110] sm:$0xff] }
  0x6d   : > { %1228 = vmatprep.subr.bf16.mxu1 %v1227_v39  ;;  %v547_v50 = vld [vmem:[%s1765_s20 + $0x158] sm:$0xff]  ;;  %v544_v53 = vld [vmem:[%s1765_s20 + $0x140] sm:$0xff]  ;;  %v546_v55 = vld [vmem:[%s1765_s20 + $0x150] sm:$0xff] }
  0x6e   : > { %v1231_v52 = vpack.c.bf16 %v547_v50, %v539_v49  ;;  %v1197_v56 = vpack.c.bf16 %v544_v53, %v536_v51  ;;  %v553_v57 = vld [vmem:[%s1765_s20 + $0x188] sm:$0xff]  ;;  %v555_v59 = vld [vmem:[%s1765_s20 + $0x198] sm:$0xff]  ;;  %v1233_v60 = vpack.c.bf16 %v546_v55, %v538_v54  ;;  %v552_v63 = vld [vmem:[%s1765_s20 + $0x180] sm:$0xff] }
  0x6f   : > { %1194 = vmatpush1.bf16.msra.mxu0 %v1193_v43  ;;  %v561_v58 = vld [vmem:[%s1765_s20 + $0x1c8] sm:$0xff]  ;;  %v563_v62 = vld [vmem:[%s1765_s20 + $0x1d8] sm:$0xff]  ;;  %v560_v0 = vld [vmem:[%s1765_s20 + $0x1c0] sm:$0xff] }
  0x70   : > { %1230 = vmatpush1.bf16.msra.mxu1 %v1229_v47  ;;  %1196 = vmatprep.subr.bf16.mxu0 %v1195_v48  ;;  %v1199_v61 = vpack.c.bf16 %v561_v58, %v553_v57  ;;  %v1235_v1 = vpack.c.bf16 %v563_v62, %v555_v59  ;;  %v554_v2 = vld [vmem:[%s1765_s20 + $0x190] sm:$0xff]  ;;  %v569_v4 = vld [vmem:[%s1765_s20 + $0x208] sm:$0xff]  ;;  %v571_v6 = vld [vmem:[%s1765_s20 + $0x218] sm:$0xff]  ;;  %v1201_v8 = vpack.c.bf16 %v560_v0, %v552_v63 }
  0x71   : > { %1232 = vmatprep.subr.bf16.mxu1 %v1231_v52  ;;  %v562_v3 = vld [vmem:[%s1765_s20 + $0x1d0] sm:$0xff]  ;;  %v577_v5 = vld [vmem:[%s1765_s20 + $0x248] sm:$0xff]  ;;  %v579_v7 = vld [vmem:[%s1765_s20 + $0x258] sm:$0xff] }
  0x72   : > { %v1237_v9 = vpack.c.bf16 %v562_v3, %v554_v2  ;;  %v1203_v10 = vpack.c.bf16 %v577_v5, %v569_v4  ;;  %v568_v11 = vld [vmem:[%s1765_s20 + $0x200] sm:$0xff]  ;;  %v570_v13 = vld [vmem:[%s1765_s20 + $0x210] sm:$0xff]  ;;  %v1239_v14 = vpack.c.bf16 %v579_v7, %v571_v6  ;;  %v585_v17 = vld [vmem:[%s1765_s20 + $0x288] sm:$0xff] }
  0x73   : > { %1198 = vmatpush1.bf16.msra.mxu0 %v1197_v56  ;;  %v576_v12 = vld [vmem:[%s1765_s20 + $0x240] sm:$0xff]  ;;  %v578_v15 = vld [vmem:[%s1765_s20 + $0x250] sm:$0xff]  ;;  %v593_v18 = vld [vmem:[%s1765_s20 + $0x2c8] sm:$0xff] }
  0x74   : > { %1234 = vmatpush1.bf16.msra.mxu1 %v1233_v60  ;;  %1200 = vmatprep.subr.bf16.mxu0 %v1199_v61  ;;  %v587_v19 = vld [vmem:[%s1765_s20 + $0x298] sm:$0xff]  ;;  %v1205_v21 = vpack.c.bf16 %v576_v12, %v568_v11  ;;  %v1241_v22 = vpack.c.bf16 %v578_v15, %v570_v13  ;;  %v1207_v23 = vpack.c.bf16 %v593_v18, %v585_v17  ;;  %v584_v24 = vld [vmem:[%s1765_s20 + $0x280] sm:$0xff]  ;;  %v586_v26 = vld [vmem:[%s1765_s20 + $0x290] sm:$0xff] }
  0x75   : > { %1236 = vmatprep.subr.bf16.mxu1 %v1235_v1  ;;  %v595_v20 = vld [vmem:[%s1765_s20 + $0x2d8] sm:$0xff]  ;;  %v592_v25 = vld [vmem:[%s1765_s20 + $0x2c0] sm:$0xff]  ;;  %v594_v28 = vld [vmem:[%s1765_s20 + $0x2d0] sm:$0xff] }
  0x76   : > { %v1243_v27 = vpack.c.bf16 %v595_v20, %v587_v19  ;;  %v601_v29 = vld [vmem:[%s1765_s20 + $0x308] sm:$0xff]  ;;  %v603_v31 = vld [vmem:[%s1765_s20 + $0x318] sm:$0xff]  ;;  %v1209_v33 = vpack.c.bf16 %v592_v25, %v584_v24  ;;  %v1245_v34 = vpack.c.bf16 %v594_v28, %v586_v26  ;;  %v600_v36 = vld [vmem:[%s1765_s20 + $0x300] sm:$0xff] }
  0x77   : > { %1202 = vmatpush1.bf16.msra.mxu0 %v1201_v8  ;;  %v609_v30 = vld [vmem:[%s1765_s20 + $0x348] sm:$0xff]  ;;  %v611_v32 = vld [vmem:[%s1765_s20 + $0x358] sm:$0xff]  ;;  %v608_v37 = vld [vmem:[%s1765_s20 + $0x340] sm:$0xff] }
  0x78   : > { %1238 = vmatpush1.bf16.msra.mxu1 %v1237_v9  ;;  %1204 = vmatprep.subr.bf16.mxu0 %v1203_v10  ;;  %v1211_v35 = vpack.c.bf16 %v609_v30, %v601_v29  ;;  %v602_v38 = vld [vmem:[%s1765_s20 + $0x310] sm:$0xff]  ;;  %v1247_v39 = vpack.c.bf16 %v611_v32, %v603_v31  ;;  %v617_v41 = vld [vmem:[%s1765_s20 + $0x388] sm:$0xff]  ;;  %v619_v43 = vld [vmem:[%s1765_s20 + $0x398] sm:$0xff]  ;;  %v1213_v45 = vpack.c.bf16 %v608_v37, %v600_v36 }
  0x79   : > { %1240 = vmatprep.subr.bf16.mxu1 %v1239_v14  ;;  %v610_v40 = vld [vmem:[%s1765_s20 + $0x350] sm:$0xff]  ;;  %v625_v42 = vld [vmem:[%s1765_s20 + $0x3c8] sm:$0xff]  ;;  %v627_v44 = vld [vmem:[%s1765_s20 + $0x3d8] sm:$0xff] }
  0x7a   : > { %v1249_v46 = vpack.c.bf16 %v610_v40, %v602_v38  ;;  %v1215_v47 = vpack.c.bf16 %v625_v42, %v617_v41  ;;  %v616_v48 = vld [vmem:[%s1765_s20 + $0x380] sm:$0xff]  ;;  %v618_v50 = vld [vmem:[%s1765_s20 + $0x390] sm:$0xff]  ;;  %v1251_v51 = vpack.c.bf16 %v627_v44, %v619_v43  ;;  %v633_v53 = vld [vmem:[%s1765_s20 + $0x408] sm:$0xff] }
  0x7b   : > { %1206 = vmatpush1.bf16.msra.mxu0 %v1205_v21  ;;  %v624_v49 = vld [vmem:[%s1765_s20 + $0x3c0] sm:$0xff]  ;;  %v626_v52 = vld [vmem:[%s1765_s20 + $0x3d0] sm:$0xff]  ;;  %v641_v54 = vld [vmem:[%s1765_s20 + $0x448] sm:$0xff] }
  0x7c   : > { %1242 = vmatpush1.bf16.msra.mxu1 %v1241_v22  ;;  %1208 = vmatprep.subr.bf16.mxu0 %v1207_v23  ;;  %v635_v55 = vld [vmem:[%s1765_s20 + $0x418] sm:$0xff]  ;;  %v1217_v57 = vpack.c.bf16 %v624_v49, %v616_v48  ;;  %v1253_v58 = vpack.c.bf16 %v626_v52, %v618_v50  ;;  %v1219_v59 = vpack.c.bf16 %v641_v54, %v633_v53  ;;  %v632_v60 = vld [vmem:[%s1765_s20 + $0x400] sm:$0xff]  ;;  %v634_v62 = vld [vmem:[%s1765_s20 + $0x410] sm:$0xff] }
  0x7d   : > { %1244 = vmatprep.subr.bf16.mxu1 %v1243_v27  ;;  %v643_v56 = vld [vmem:[%s1765_s20 + $0x458] sm:$0xff]  ;;  %v640_v61 = vld [vmem:[%s1765_s20 + $0x440] sm:$0xff]  ;;  %v642_v0 = vld [vmem:[%s1765_s20 + $0x450] sm:$0xff] }
  0x7e   : > { %v1255_v63 = vpack.c.bf16 %v643_v56, %v635_v55  ;;  %v509_v1 = vld [vmem:[%s1765_s20 + $0x28] sm:$0xff]  ;;  %v511_v3 = vld [vmem:[%s1765_s20 + $0x38] sm:$0xff]  ;;  %v1221_v5 = vpack.c.bf16 %v640_v61, %v632_v60  ;;  %v1257_v6 = vpack.c.bf16 %v642_v0, %v634_v62  ;;  %v508_v8 = vld [vmem:[%s1765_s20 + $0x20] sm:$0xff] }
  0x7f   : > { %1210 = vmatpush1.bf16.msra.mxu0 %v1209_v33  ;;  %v517_v2 = vld [vmem:[%s1765_s20 + $0x68] sm:$0xff]  ;;  %v519_v4 = vld [vmem:[%s1765_s20 + $0x78] sm:$0xff]  ;;  %v516_v9 = vld [vmem:[%s1765_s20 + $0x60] sm:$0xff] }
  0x80   : > { %1246 = vmatpush1.bf16.msra.mxu1 %v1245_v34  ;;  %1212 = vmatprep.subr.bf16.mxu0 %v1211_v35  ;;  %v1259_v7 = vpack.c.bf16 %v517_v2, %v509_v1  ;;  %v510_v10 = vld [vmem:[%s1765_s20 + $0x30] sm:$0xff]  ;;  %v1295_v11 = vpack.c.bf16 %v519_v4, %v511_v3  ;;  %v525_v13 = vld [vmem:[%s1765_s20 + $0xa8] sm:$0xff]  ;;  %v527_v15 = vld [vmem:[%s1765_s20 + $0xb8] sm:$0xff]  ;;  %v1261_v19 = vpack.c.bf16 %v516_v9, %v508_v8 }
  0x81   : > { %1248 = vmatprep.subr.bf16.mxu1 %v1247_v39  ;;  %v518_v12 = vld [vmem:[%s1765_s20 + $0x70] sm:$0xff]  ;;  %v533_v14 = vld [vmem:[%s1765_s20 + $0xe8] sm:$0xff]  ;;  %v535_v17 = vld [vmem:[%s1765_s20 + $0xf8] sm:$0xff] }
  0x82   : > { %v1857_v18 = vld [vmem:[%s2002_s0] sm:$0xff]  ;;  %v1297_v20 = vpack.c.bf16 %v518_v12, %v510_v10  ;;  %v1263_v21 = vpack.c.bf16 %v533_v14, %v525_v13  ;;  %v526_v24 = vld [vmem:[%s1765_s20 + $0xb0] sm:$0xff]  ;;  %v1299_v25 = vpack.c.bf16 %v535_v17, %v527_v15  ;;  %v541_v27 = vld [vmem:[%s1765_s20 + $0x128] sm:$0xff] }
  0x83   : > { %1214 = vmatpush1.bf16.msra.mxu0 %v1213_v45  ;;  %v524_v22 = vld [vmem:[%s1765_s20 + $0xa0] sm:$0xff]  ;;  %v534_v26 = vld [vmem:[%s1765_s20 + $0xf0] sm:$0xff]  ;;  %v549_v28 = vld [vmem:[%s1765_s20 + $0x168] sm:$0xff] }
  0x84   : > { %1250 = vmatpush1.bf16.msra.mxu1 %v1249_v46  ;;  %1216 = vmatprep.subr.bf16.mxu0 %v1215_v47  ;;  %v532_v23 = vld [vmem:[%s1765_s20 + $0xe0] sm:$0xff]  ;;  %v543_v29 = vld [vmem:[%s1765_s20 + $0x138] sm:$0xff]  ;;  %v1877_v33 = vld [vmem:[%s2002_s0 + $0x10] sm:$0xff]  ;;  %v1301_v34 = vpack.c.bf16 %v534_v26, %v526_v24  ;;  %v1267_v35 = vpack.c.bf16 %v549_v28, %v541_v27 }
  0x85   : > { %1252 = vmatprep.subr.bf16.mxu1 %v1251_v51  ;;  %v551_v30 = vld [vmem:[%s1765_s20 + $0x178] sm:$0xff]  ;;  %v1265_v32 = vpack.c.bf16 %v532_v23, %v524_v22  ;;  %v540_v36 = vld [vmem:[%s1765_s20 + $0x120] sm:$0xff]  ;;  %v542_v38 = vld [vmem:[%s1765_s20 + $0x130] sm:$0xff] }
  0x86   : > { %v1871_v31 = vld [vmem:[%s2002_s0 + $0x18] sm:$0xff]  ;;  %v548_v37 = vld [vmem:[%s1765_s20 + $0x160] sm:$0xff]  ;;  %v1303_v39 = vpack.c.bf16 %v551_v30, %v543_v29  ;;  %v550_v40 = vld [vmem:[%s1765_s20 + $0x170] sm:$0xff] }
  0x87   : > { %1218 = vmatpush1.bf16.msra.mxu0 %v1217_v57  ;;  %v557_v41 = vld [vmem:[%s1765_s20 + $0x1a8] sm:$0xff]  ;;  %v559_v43 = vld [vmem:[%s1765_s20 + $0x1b8] sm:$0xff]  ;;  %v1269_v45 = vpack.c.bf16 %v548_v37, %v540_v36  ;;  %v1305_v46 = vpack.c.bf16 %v550_v40, %v542_v38  ;;  %v556_v48 = vld [vmem:[%s1765_s20 + $0x1a0] sm:$0xff] }
  0x88   : > { %1254 = vmatpush1.bf16.msra.mxu1 %v1253_v58  ;;  %1220 = vmatprep.subr.bf16.mxu0 %v1219_v59  ;;  %v565_v42 = vld [vmem:[%s1765_s20 + $0x1e8] sm:$0xff]  ;;  %v567_v44 = vld [vmem:[%s1765_s20 + $0x1f8] sm:$0xff]  ;;  %v564_v49 = vld [vmem:[%s1765_s20 + $0x1e0] sm:$0xff] }
  0x89   : > { %1256 = vmatprep.subr.bf16.mxu1 %v1255_v63  ;;  %v1271_v47 = vpack.c.bf16 %v565_v42, %v557_v41  ;;  %v558_v50 = vld [vmem:[%s1765_s20 + $0x1b0] sm:$0xff]  ;;  %v1307_v51 = vpack.c.bf16 %v567_v44, %v559_v43  ;;  %v573_v53 = vld [vmem:[%s1765_s20 + $0x228] sm:$0xff]  ;;  %v575_v55 = vld [vmem:[%s1765_s20 + $0x238] sm:$0xff]  ;;  %v1273_v57 = vpack.c.bf16 %v564_v49, %v556_v48 }
  0x8a   : > { %v566_v52 = vld [vmem:[%s1765_s20 + $0x1f0] sm:$0xff]  ;;  %v581_v54 = vld [vmem:[%s1765_s20 + $0x268] sm:$0xff]  ;;  %v583_v56 = vld [vmem:[%s1765_s20 + $0x278] sm:$0xff] }
  0x8b   : > { %1222 = vmatpush1.bf16.msra.mxu0 %v1221_v5  ;;  %v1309_v58 = vpack.c.bf16 %v566_v52, %v558_v50  ;;  %v1275_v59 = vpack.c.bf16 %v581_v54, %v573_v53  ;;  %v572_v60 = vld [vmem:[%s1765_s20 + $0x220] sm:$0xff]  ;;  %v574_v62 = vld [vmem:[%s1765_s20 + $0x230] sm:$0xff]  ;;  %v1311_v63 = vpack.c.bf16 %v583_v56, %v575_v55  ;;  %v589_v1 = vld [vmem:[%s1765_s20 + $0x2a8] sm:$0xff] }
  0x8c   : > { %1258 = vmatpush1.bf16.msra.mxu1 %v1257_v6  ;;  %1260 = vmatprep.subr.bf16.mxu0 %v1259_v7  ;;  %v580_v61 = vld [vmem:[%s1765_s20 + $0x260] sm:$0xff]  ;;  %v582_v0 = vld [vmem:[%s1765_s20 + $0x270] sm:$0xff]  ;;  %v591_v2 = vld [vmem:[%s1765_s20 + $0x2b8] sm:$0xff] }
  0x8d   : > { %1296 = vmatprep.subr.bf16.mxu1 %v1295_v11  ;;  %v599_v3 = vld [vmem:[%s1765_s20 + $0x2f8] sm:$0xff]  ;;  %v1277_v4 = vpack.c.bf16 %v580_v61, %v572_v60  ;;  %v1313_v5 = vpack.c.bf16 %v582_v0, %v574_v62  ;;  %v588_v7 = vld [vmem:[%s1765_s20 + $0x2a0] sm:$0xff]  ;;  %v590_v9 = vld [vmem:[%s1765_s20 + $0x2b0] sm:$0xff] }
  0x8e   : > { %720 = vmatmul.mubr.f32.vlgmr.msra.gmra.mrb[0].mxu0 %v1857_v18  ;;  %v596_v8 = vld [vmem:[%s1765_s20 + $0x2e0] sm:$0xff]  ;;  %v1315_v10 = vpack.c.bf16 %v599_v3, %v591_v2  ;;  %v598_v11 = vld [vmem:[%s1765_s20 + $0x2f0] sm:$0xff]  ;;  %v605_v12 = vld [vmem:[%s1765_s20 + $0x328] sm:$0xff] }
  0x8f   : > { %797 = vmatmul.mubr.f32.vlgmr.msra.gmra.mrb[0].mxu1 %v1857_v18  ;;  %1262 = vmatpush1.bf16.msra.mxu0 %v1261_v19  ;;  %v613_v13 = vld [vmem:[%s1765_s20 + $0x368] sm:$0xff]  ;;  %v607_v14 = vld [vmem:[%s1765_s20 + $0x338] sm:$0xff]  ;;  %v1281_v17 = vpack.c.bf16 %v596_v8, %v588_v7  ;;  %v1317_v19 = vpack.c.bf16 %v598_v11, %v590_v9  ;;  %v612_v22 = vld [vmem:[%s1765_s20 + $0x360] sm:$0xff] }
  0x90   : > { %1298 = vmatpush1.bf16.msra.mxu1 %v1297_v20  ;;  %1264 = vmatprep.subr.bf16.mxu0 %v1263_v21  ;;  %v615_v15 = vld [vmem:[%s1765_s20 + $0x378] sm:$0xff]  ;;  %v1283_v20 = vpack.c.bf16 %v613_v13, %v605_v12  ;;  %v604_v21 = vld [vmem:[%s1765_s20 + $0x320] sm:$0xff]  ;;  %v606_v23 = vld [vmem:[%s1765_s20 + $0x330] sm:$0xff] }
  0x91   : > { %1300 = vmatprep.subr.bf16.mxu1 %v1299_v25  ;;  %1173 = vmatprep.mubr.msk.f32.mxu0 %vm648_vm0, %v1871_v31  ;;  %v1319_v24 = vpack.c.bf16 %v615_v15, %v607_v14  ;;  %v614_v25 = vld [vmem:[%s1765_s20 + $0x370] sm:$0xff]  ;;  %v621_v26 = vld [vmem:[%s1765_s20 + $0x3a8] sm:$0xff]  ;;  %v623_v28 = vld [vmem:[%s1765_s20 + $0x3b8] sm:$0xff]  ;;  %v1285_v30 = vpack.c.bf16 %v612_v22, %v604_v21 }
  0x92   : > { %1175 = vmatprep.mubr.msk.f32.mxu1 %vm648_vm0, %v1871_v31  ;;  %726 = vmatmul.mubr.f32.gmra.mrb[2].mxu0 %v1877_v33  ;;  %v629_v27 = vld [vmem:[%s1765_s20 + $0x3e8] sm:$0xff]  ;;  %v631_v29 = vld [vmem:[%s1765_s20 + $0x3f8] sm:$0xff]  ;;  %v628_v36 = vld [vmem:[%s1765_s20 + $0x3e0] sm:$0xff] }
  0x93   : > { %1266 = vmatpush1.bf16.msra.mxu0 %v1265_v32  ;;  %803 = vmatmul.mubr.f32.gmra.mrb[2].mxu1 %v1877_v33  ;;  %v1321_v32 = vpack.c.bf16 %v614_v25, %v606_v23  ;;  %v622_v37 = vld [vmem:[%s1765_s20 + $0x3b0] sm:$0xff]  ;;  %v1323_v38 = vpack.c.bf16 %v631_v29, %v623_v28  ;;  %v637_v40 = vld [vmem:[%s1765_s20 + $0x428] sm:$0xff]  ;;  %v639_v42 = vld [vmem:[%s1765_s20 + $0x438] sm:$0xff] }
  0x94   : > { %1302 = vmatpush1.bf16.msra.mxu1 %v1301_v34  ;;  %1268 = vmatprep.subr.bf16.mxu0 %v1267_v35  ;;  %v1287_v34 = vpack.c.bf16 %v629_v27, %v621_v26  ;;  %v620_v35 = vld [vmem:[%s1765_s20 + $0x3a0] sm:$0xff]  ;;  %v645_v41 = vld [vmem:[%s1765_s20 + $0x468] sm:$0xff]  ;;  %v647_v43 = vld [vmem:[%s1765_s20 + $0x478] sm:$0xff] }
  0x95   : > { %1304 = vmatprep.subr.bf16.mxu1 %v1303_v39  ;;  %1176 = vmatprep.mubr.msk.f32.mxu0 %vm648_vm0, %v1748_v16  ;;  %v630_v39 = vld [vmem:[%s1765_s20 + $0x3f0] sm:$0xff]  ;;  %v1289_v44 = vpack.c.bf16 %v628_v36, %v620_v35  ;;  %v644_v48 = vld [vmem:[%s1765_s20 + $0x460] sm:$0xff]  ;;  %v1327_v49 = vpack.c.bf16 %v647_v43, %v639_v42 }
  0x96   : > { %1178 = vmatprep.mubr.msk.f32.mxu1 %vm648_vm0, %v1748_v16  ;;  %v597_v16 = vld [vmem:[%s1765_s20 + $0x2e8] sm:$0xff]  ;;  %v638_v50 = vld [vmem:[%s1765_s20 + $0x430] sm:$0xff] }
  0x97   : > { %1270 = vmatpush1.bf16.msra.mxu0 %v1269_v45  ;;  %v1279_v6 = vpack.c.bf16 %v597_v16, %v589_v1  ;;  %v1325_v45 = vpack.c.bf16 %v630_v39, %v622_v37 }
  0x98   : > { %1306 = vmatpush1.bf16.msra.mxu1 %v1305_v46  ;;  %1272 = vmatprep.subr.bf16.mxu0 %v1271_v47  ;;  %v1291_v46 = vpack.c.bf16 %v645_v41, %v637_v40  ;;  %v636_v47 = vld [vmem:[%s1765_s20 + $0x420] sm:$0xff] }
  0x99   : > { %1308 = vmatprep.subr.bf16.mxu1 %v1307_v51  ;;  %v646_v51 = vld [vmem:[%s1765_s20 + $0x470] sm:$0xff]  ;;  %v1293_v52 = vpack.c.bf16 %v644_v48, %v636_v47 }
  0x9a   : > { %v1329_v53 = vpack.c.bf16 %v646_v51, %v638_v50 }
  0x9b   : > { %1274 = vmatpush1.bf16.msra.mxu0 %v1273_v57 }
  0x9c   : > { %1310 = vmatpush1.bf16.msra.mxu1 %v1309_v58  ;;  %1276 = vmatprep.subr.bf16.mxu0 %v1275_v59 }
  0x9d   : > { %1312 = vmatprep.subr.bf16.mxu1 %v1311_v63 }
  0x9f   : > { %1278 = vmatpush1.bf16.msra.mxu0 %v1277_v4 }
  0xa0   : > { %1314 = vmatpush1.bf16.msra.mxu1 %v1313_v5  ;;  %1280 = vmatprep.subr.bf16.mxu0 %v1279_v6 }
  0xa1   : > { %1316 = vmatprep.subr.bf16.mxu1 %v1315_v10 }
  0xa3   : > { %1282 = vmatpush1.bf16.msra.mxu0 %v1281_v17 }
  0xa4   : > { %1318 = vmatpush1.bf16.msra.mxu1 %v1317_v19  ;;  %1284 = vmatprep.subr.bf16.mxu0 %v1283_v20 }
  0xa5   : > { %1320 = vmatprep.subr.bf16.mxu1 %v1319_v24 }
  0xa7   : > { %1286 = vmatpush1.bf16.msra.mxu0 %v1285_v30 }
  0xa8   : > { %1322 = vmatpush1.bf16.msra.mxu1 %v1321_v32  ;;  %1288 = vmatprep.subr.bf16.mxu0 %v1287_v34 }
  0xa9   : > { %1324 = vmatprep.subr.bf16.mxu1 %v1323_v38 }
  0xab   : > { %1290 = vmatpush1.bf16.msra.mxu0 %v1289_v44 }
  0xac   : > { %1326 = vmatpush1.bf16.msra.mxu1 %v1325_v45  ;;  %1292 = vmatprep.subr.bf16.mxu0 %v1291_v46 }
  0xad   : > { %1328 = vmatprep.subr.bf16.mxu1 %v1327_v49 }
  0xaf   : > { %1294 = vmatpush1.bf16.msra.mxu0 %v1293_v52 }
  0xb0   : > { %1330 = vmatpush1.bf16.msra.mxu1 %v1329_v53 }
  0xb2   : > { %874 = vmatmul.mubr.f32.vlgmr.msra.gmra.mrb[4].mxu0 %v1857_v18 }
  0xb3   : > { %951 = vmatmul.mubr.f32.vlgmr.msra.gmra.mrb[4].mxu1 %v1857_v18  ;;  %1177 = vmatprep.mubr.msk.f32.mxu0 %vm648_vm0, %v1871_v31 }
  0xb4   : > { %1179 = vmatprep.mubr.msk.f32.mxu1 %vm648_vm0, %v1871_v31 }
  0xb6   : > { %880 = vmatmul.mubr.f32.gmra.mrb[6].mxu0 %v1877_v33 }
  0xb7   : > { %957 = vmatmul.mubr.f32.gmra.mrb[6].mxu1 %v1877_v33 }
  0xe3   : > { %v968_v54 = vpop.permute.xlu0 %967  ;;  %v996_v56 = vpop.permute.xlu1 %995 }
  0xe7   : > { %v973_v62 = vpop.permute.xlu0 %972  ;;  %v1001_v2 = vpop.permute.xlu1 %1000 }
 0x161   : > { %v721_v55 = vpop.f32.mrb[0].mxu0 }
 0x162   : > { %v798_v57 = vpop.f32.mrb[0].mxu1  ;;  %v975_v58 = vmul.f32 %v968_v54, %v721_v55  ;;  %v723_v59 = vpop.f32.mrb[1].mxu0 }
 0x163   : > { %v977_v60 = vmul.f32 %v968_v54, %v798_v57  ;;  %v976_v18 = vmul.f32 %v968_v54, %v723_v59  ;;  %v800_v61 = vpop.f32.mrb[1].mxu1 }
 0x164   : > { %v978_v63 = vmul.f32 %v968_v54, %v800_v61  ;;  %v1003_v0 = vadd.f32 %v996_v56, %v975_v58 }
 0x165   : > { %v1004_v1 = vadd.f32 %v996_v56, %v976_v18  ;;  %v1005_v31 = vadd.f32 %v996_v56, %v977_v60  ;;  %v727_v16 = vpop.f32.mrb[2].mxu0 }
 0x166   : > { %v1006_v3 = vadd.f32 %v996_v56, %v978_v63  ;;  %v1019_v33 = vmax.f32 %v1003_v0, 0.0  ;;  %v804_v4 = vpop.f32.mrb[2].mxu1  ;;  %v983_v5 = vmul.f32 %v973_v62, %v727_v16  ;;  %v729_v6 = vpop.f32.mrb[3].mxu0 }
 0x167   : > { %v1020_v7 = vmax.f32 %v1004_v1, 0.0  ;;  %v1021_v8 = vmax.f32 %v1005_v31, 0.0  ;;  %v985_v9 = vmul.f32 %v973_v62, %v804_v4  ;;  %v984_v10 = vmul.f32 %v973_v62, %v729_v6  ;;  %v806_v11 = vpop.f32.mrb[3].mxu1 }
 0x168   : > { %v1022_v12 = vmax.f32 %v1006_v3, 0.0  ;;  %1035 = vst [vmem:[%s1951_s15] sm:$0xff] %v1019_v33  ;;  %v986_v13 = vmul.f32 %v973_v62, %v806_v11  ;;  %v1011_v14 = vadd.f32 %v1001_v2, %v983_v5 }
 0x169   : > { %1036 = vst [vmem:[%s1951_s15 + $0x8] sm:$0xff] %v1020_v7  ;;  %1037 = vst [vmem:[%s1951_s15 + $0x10] sm:$0xff] %v1021_v8  ;;  %v1012_v15 = vadd.f32 %v1001_v2, %v984_v10  ;;  %v1013_v17 = vadd.f32 %v1001_v2, %v985_v9 }
 0x16a   : > { %1038 = vst [vmem:[%s1951_s15 + $0x18] sm:$0xff] %v1022_v12  ;;  %v1014_v19 = vadd.f32 %v1001_v2, %v986_v13  ;;  %v1027_v20 = vmax.f32 %v1011_v14, 0.0 }
 0x16b   : > { %v1028_v21 = vmax.f32 %v1012_v15, 0.0  ;;  %v1029_v22 = vmax.f32 %v1013_v17, 0.0 }
 0x16c   : > { %v1030_v23 = vmax.f32 %v1014_v19, 0.0  ;;  %1043 = vst [vmem:[%s1951_s15 + $0x40] sm:$0xff] %v1027_v20 }
 0x16d   : > { %1044 = vst [vmem:[%s1951_s15 + $0x48] sm:$0xff] %v1028_v21  ;;  %1045 = vst [vmem:[%s1951_s15 + $0x50] sm:$0xff] %v1029_v22 }
 0x16e   : > { %1046 = vst [vmem:[%s1951_s15 + $0x58] sm:$0xff] %v1030_v23 }
 0x16f   : > { %v1073_v58 = vld [vmem:[%s1951_s15] sm:$0xff] (%p1440_p5) }
 0x170   : > { %v1075_v59 = vld [vmem:[%s1951_s15 + $0x8] sm:$0xff] (%p1440_p5)  ;;  %v1077_v60 = vld [vmem:[%s1951_s15 + $0x10] sm:$0xff] (%p1440_p5)  ;;  %1074 = vst [vmem:[%s1060_s23] sm:$0xff] (%p1440_p5), %v1073_v58 }
 0x171   : > { %v1079_v18 = vld [vmem:[%s1951_s15 + $0x18] sm:$0xff] (%p1440_p5)  ;;  %1076 = vst [vmem:[%s1060_s23 + $0x8] sm:$0xff] (%p1440_p5), %v1075_v59  ;;  %1078 = vst [vmem:[%s1060_s23 + $0x10] sm:$0xff] (%p1440_p5), %v1077_v60 }
 0x172   : > { %1080 = vst [vmem:[%s1060_s23 + $0x18] sm:$0xff] (%p1440_p5), %v1079_v18 }
 0x173   : > { %v1089_v1 = vld [vmem:[%s1951_s15 + $0x40] sm:$0xff] (%p1440_p5) }
 0x174   : > { %1090 = vst [vmem:[%s1060_s23 + $0x80] sm:$0xff] (%p1440_p5), %v1089_v1  ;;  %v1091_v31 = vld [vmem:[%s1951_s15 + $0x48] sm:$0xff] (%p1440_p5)  ;;  %v1093_v16 = vld [vmem:[%s1951_s15 + $0x50] sm:$0xff] (%p1440_p5) }
 0x175   : > { %1092 = vst [vmem:[%s1060_s23 + $0x88] sm:$0xff] (%p1440_p5), %v1091_v31  ;;  %1094 = vst [vmem:[%s1060_s23 + $0x90] sm:$0xff] (%p1440_p5), %v1093_v16 }
 0x185   : > { %v875_v24 = vpop.f32.mrb[4].mxu0 }
 0x186   : > { %v979_v25 = vmul.f32 %v968_v54, %v875_v24  ;;  %v952_v26 = vpop.f32.mrb[4].mxu1  ;;  %v877_v27 = vpop.f32.mrb[5].mxu0 }
 0x187   : > { %v981_v28 = vmul.f32 %v968_v54, %v952_v26  ;;  %v980_v29 = vmul.f32 %v968_v54, %v877_v27  ;;  %v954_v30 = vpop.f32.mrb[5].mxu1 }
 0x188   : > { %v1007_v32 = vadd.f32 %v996_v56, %v979_v25  ;;  %v982_v34 = vmul.f32 %v968_v54, %v954_v30 }
 0x189   : > { %v1009_v35 = vadd.f32 %v996_v56, %v981_v28  ;;  %v1008_v36 = vadd.f32 %v996_v56, %v980_v29  ;;  %v881_v37 = vpop.f32.mrb[6].mxu0 }
 0x18a   : > { %v1023_v38 = vmax.f32 %v1007_v32, 0.0  ;;  %v1010_v39 = vadd.f32 %v996_v56, %v982_v34  ;;  %v987_v40 = vmul.f32 %v973_v62, %v881_v37  ;;  %v958_v41 = vpop.f32.mrb[6].mxu1  ;;  %v883_v42 = vpop.f32.mrb[7].mxu0 }
 0x18b   : > { %v1025_v43 = vmax.f32 %v1009_v35, 0.0  ;;  %v1024_v44 = vmax.f32 %v1008_v36, 0.0  ;;  %v989_v45 = vmul.f32 %v973_v62, %v958_v41  ;;  %v988_v46 = vmul.f32 %v973_v62, %v883_v42  ;;  %v960_v47 = vpop.f32.mrb[7].mxu1 }
 0x18c   : > { %1039 = vst [vmem:[%s1951_s15 + $0x20] sm:$0xff] %v1023_v38  ;;  %v1026_v48 = vmax.f32 %v1010_v39, 0.0  ;;  %v1015_v49 = vadd.f32 %v1001_v2, %v987_v40  ;;  %v990_v50 = vmul.f32 %v973_v62, %v960_v47  ;;  %1057 = sbr.rel (!%p1440_p5) target bundleno = 411 (0x19b), region = 63 }
 0x18d   : > { %1041 = vst [vmem:[%s1951_s15 + $0x30] sm:$0xff] %v1025_v43  ;;  %1040 = vst [vmem:[%s1951_s15 + $0x28] sm:$0xff] %v1024_v44  ;;  %v1017_v51 = vadd.f32 %v1001_v2, %v989_v45  ;;  %v1016_v52 = vadd.f32 %v1001_v2, %v988_v46 }
 0x18e   : > { %1042 = vst [vmem:[%s1951_s15 + $0x38] sm:$0xff] %v1026_v48  ;;  %v1031_v53 = vmax.f32 %v1015_v49, 0.0  ;;  %v1018_v54 = vadd.f32 %v1001_v2, %v990_v50  ;;  %v1095_v2 = vld [vmem:[%s1951_s15 + $0x58] sm:$0xff] (%p1440_p5) }
 0x18f   : > { %v1033_v55 = vmax.f32 %v1017_v51, 0.0  ;;  %v1032_v56 = vmax.f32 %v1016_v52, 0.0  ;;  %1096 = vst [vmem:[%s1060_s23 + $0x98] sm:$0xff] (%p1440_p5), %v1095_v2 }
 0x190   : > { %1047 = vst [vmem:[%s1951_s15 + $0x60] sm:$0xff] %v1031_v53  ;;  %v1034_v57 = vmax.f32 %v1018_v54, 0.0 }
 0x191   : > { %1049 = vst [vmem:[%s1951_s15 + $0x70] sm:$0xff] %v1033_v55  ;;  %1048 = vst [vmem:[%s1951_s15 + $0x68] sm:$0xff] %v1032_v56 }
 0x192   : > { %1050 = vst [vmem:[%s1951_s15 + $0x78] sm:$0xff] %v1034_v57 }
 0x193   : > { %v1081_v61 = vld [vmem:[%s1951_s15 + $0x20] sm:$0xff] }
 0x194   : > { %v1083_v62 = vld [vmem:[%s1951_s15 + $0x28] sm:$0xff]  ;;  %1082 = vst [vmem:[%s1060_s23 + $0x20] sm:$0xff] %v1081_v61  ;;  %v1085_v63 = vld [vmem:[%s1951_s15 + $0x30] sm:$0xff] }
 0x195   : > { %1084 = vst [vmem:[%s1060_s23 + $0x28] sm:$0xff] %v1083_v62  ;;  %v1087_v0 = vld [vmem:[%s1951_s15 + $0x38] sm:$0xff]  ;;  %1086 = vst [vmem:[%s1060_s23 + $0x30] sm:$0xff] %v1085_v63 }
 0x196   : > { %1088 = vst [vmem:[%s1060_s23 + $0x38] sm:$0xff] %v1087_v0 }
 0x197   : > { %v1097_v3 = vld [vmem:[%s1951_s15 + $0x60] sm:$0xff] }
 0x198   : > { %v1099_v33 = vld [vmem:[%s1951_s15 + $0x68] sm:$0xff]  ;;  %v1101_v4 = vld [vmem:[%s1951_s15 + $0x70] sm:$0xff]  ;;  %1098 = vst [vmem:[%s1060_s23 + $0xa0] sm:$0xff] %v1097_v3 }
 0x199   : > { %1100 = vst [vmem:[%s1060_s23 + $0xa8] sm:$0xff] %v1099_v33  ;;  %1102 = vst [vmem:[%s1060_s23 + $0xb0] sm:$0xff] %v1101_v4  ;;  %v1103_v5 = vld [vmem:[%s1951_s15 + $0x78] sm:$0xff] }
 0x19a   : > { %1104 = vst [vmem:[%s1060_s23 + $0xb8] sm:$0xff] %v1103_v5 }
 0x19b PF: > { %p11_p10 = scmp.ge.s32.totalorder %s1427_s19, 4   ;;  %s2008_s15 = smov %s1378_s16 }
 0x19c   : > { %s2009_s16 = smov %s1438_s22  ;;  %s2010_s17 = smov %s1427_s19 }
 0x19d   :  { %13 = sbr.rel (!%p11_p10) target bundleno = 2 (0x2), region = 117 }

// kernel: forward.18
= control target key start
LH: loop header
LB: loop body
LE: loop exit
PB: predicated region body
PF: predicated region fallthrough
CT: control target
= control target key end

     0   :  { %s1568_s18 = smov 0   ;;  %s1570_s19 = smov 0   ;;  %s2253_s0 = inlined_call_operand.vmem [shape: f32[16,144], index: 0, kind: input, shape index: {}]   ;;  %s2254_s1 = inlined_call_operand.vmem [shape: f32[144,2048], index: 1, kind: input, shape index: {}]   ;;  %s2255_s2 = inlined_call_operand.vmem [shape: f32[16,1], index: 2, kind: input, shape index: {}]   ;;  %s2256_s3 = inlined_call_operand.vmem [shape: f32[16,1], index: 3, kind: input, shape index: {}]   ;;  %s2257_s4 = inlined_call_operand.vmem [shape: f32[16,2048], index: 4, kind: input, shape index: {}]   ;;  %s2258_s5 = inlined_call_operand.vmem [shape: f32[16,2048], index: 5, kind: output, shape index: {}]  }
   0x1   :  { %s1572_s20 = smov 0  }
   0x2 LB: > { %s1312_s21 = sadd.s32 4294967295, %s1535_s20   ;;  %s1585_s22 = sadd.s32 1, %s1535_s20   ;;  %s1535_s20 = sphi %s1572_s20, %s2263_s20   ;;  %s1531_s19 = sphi %s1570_s19, %s2262_s19   ;;  %s1527_s18 = sphi %s1568_s18, %s2261_s18  }
   0x3   : > { %s40_s23 = ssub.s32 %s1535_s20, %s1585_s22  ;;  %s43_s24 = sadd.s32 1, %s1531_s19 }
   0x4   : > { %p41_p0 = scmp.eq.s32.totalorder %s40_s23, 0  ;;  %p50_p1 = scmp.ne.s32.totalorder %s1531_s19, %s1527_s18 }
   0x5   : > { %p51_p2 = scmp.eq.s32.totalorder %s1535_s20, 0  ;;  %p148_p3 = scmp.eq.s32.totalorder %s1312_s21, 1 }
   0x6   : > { %s1596_s25 = scalar_select %p41_p0, %s1531_s19, %s43_s24  }
   0x7   : > { %p1598_p4 = por %p51_p2, %p50_p1  ;;  %p1602_p5 = por %p148_p3, %p50_p1 }
   0x8   : > { %p1315_p6 = scmp.ge.s32.totalorder %s1535_s20, 2 }
   0xa   : > { %179 = sbr.rel (%p1315_p6) target bundleno = 106 (0x6a), region = 28 }
  0x11   : > { %182 = sbr.rel (!%p1598_p4) target bundleno = 94 (0x5e), region = 32  ;;  %s184_s28 = sand.u32 (%p1598_p4), 1, %s1531_s19  }
  0x12   : > { %s1337_s29 = sshll.u32 (%p1598_p4), %s1535_s20, 6  ;;  %s1484_s30 = smul.u32 (%p1598_p4), 1152, %s184_s28 }
  0x13   : > { %s1614_s8 = scalar_lea.vmem (%p1598_p4), %s2254_s1, %s1337_s29 }
  0x14   : > { %v202_v0 = vld [vmem:[%s1614_s8] sm:$0xff] (%p1598_p4)  ;;  %v204_v1 = vld [vmem:[%s1614_s8 + $0x8] sm:$0xff] (%p1598_p4)  ;;  %v206_v2 = vld [vmem:[%s1614_s8 + $0x10] sm:$0xff] (%p1598_p4)  ;;  %s1622_s9 = scalar_lea.vmem (%p1598_p4), [#allocation2], %s1484_s30 }
  0x15   : > { %v208_v3 = vld [vmem:[%s1614_s8 + $0x18] sm:$0xff] (%p1598_p4)  ;;  %v210_v4 = vld [vmem:[%s1614_s8 + $0x20] sm:$0xff] (%p1598_p4)  ;;  %v212_v5 = vld [vmem:[%s1614_s8 + $0x28] sm:$0xff] (%p1598_p4)  ;;  %203 = vst [vmem:[%s1622_s9] sm:$0xff] (%p1598_p4), %v202_v0 }
  0x16   : > { %205 = vst [vmem:[%s1622_s9 + $0x8] sm:$0xff] (%p1598_p4), %v204_v1  ;;  %207 = vst [vmem:[%s1622_s9 + $0x10] sm:$0xff] (%p1598_p4), %v206_v2  ;;  %v214_v6 = vld [vmem:[%s1614_s8 + $0x30] sm:$0xff] (%p1598_p4)  ;;  %v216_v7 = vld [vmem:[%s1614_s8 + $0x38] sm:$0xff] (%p1598_p4) }
  0x17   : > { %209 = vst [vmem:[%s1622_s9 + $0x18] sm:$0xff] (%p1598_p4), %v208_v3  ;;  %211 = vst [vmem:[%s1622_s9 + $0x20] sm:$0xff] (%p1598_p4), %v210_v4  ;;  %v218_v8 = vld [vmem:[%s1614_s8 + $0x80] sm:$0xff] (%p1598_p4)  ;;  %v220_v9 = vld [vmem:[%s1614_s8 + $0x88] sm:$0xff] (%p1598_p4) }
  0x18   : > { %213 = vst [vmem:[%s1622_s9 + $0x28] sm:$0xff] %v212_v5  ;;  %215 = vst [vmem:[%s1622_s9 + $0x30] sm:$0xff] %v214_v6  ;;  %v222_v10 = vld [vmem:[%s1614_s8 + $0x90] sm:$0xff]  ;;  %v224_v11 = vld [vmem:[%s1614_s8 + $0x98] sm:$0xff] }
  0x19   : > { %217 = vst [vmem:[%s1622_s9 + $0x38] sm:$0xff] %v216_v7  ;;  %219 = vst [vmem:[%s1622_s9 + $0x40] sm:$0xff] %v218_v8  ;;  %v226_v12 = vld [vmem:[%s1614_s8 + $0xa0] sm:$0xff]  ;;  %v228_v13 = vld [vmem:[%s1614_s8 + $0xa8] sm:$0xff] }
  0x1a   : > { %221 = vst [vmem:[%s1622_s9 + $0x48] sm:$0xff] %v220_v9  ;;  %223 = vst [vmem:[%s1622_s9 + $0x50] sm:$0xff] %v222_v10  ;;  %v230_v14 = vld [vmem:[%s1614_s8 + $0xb0] sm:$0xff]  ;;  %v232_v15 = vld [vmem:[%s1614_s8 + $0xb8] sm:$0xff] }
  0x1b   : > { %225 = vst [vmem:[%s1622_s9 + $0x58] sm:$0xff] %v224_v11  ;;  %227 = vst [vmem:[%s1622_s9 + $0x60] sm:$0xff] %v226_v12  ;;  %v234_v16 = vld [vmem:[%s1614_s8 + $0x100] sm:$0xff]  ;;  %v236_v17 = vld [vmem:[%s1614_s8 + $0x108] sm:$0xff] }
  0x1c   : > { %229 = vst [vmem:[%s1622_s9 + $0x68] sm:$0xff] %v228_v13  ;;  %231 = vst [vmem:[%s1622_s9 + $0x70] sm:$0xff] %v230_v14  ;;  %v238_v18 = vld [vmem:[%s1614_s8 + $0x110] sm:$0xff]  ;;  %v240_v19 = vld [vmem:[%s1614_s8 + $0x118] sm:$0xff] }
  0x1d   : > { %233 = vst [vmem:[%s1622_s9 + $0x78] sm:$0xff] %v232_v15  ;;  %235 = vst [vmem:[%s1622_s9 + $0x80] sm:$0xff] %v234_v16  ;;  %v242_v20 = vld [vmem:[%s1614_s8 + $0x120] sm:$0xff]  ;;  %v244_v21 = vld [vmem:[%s1614_s8 + $0x128] sm:$0xff] }
  0x1e   : > { %237 = vst [vmem:[%s1622_s9 + $0x88] sm:$0xff] %v236_v17  ;;  %239 = vst [vmem:[%s1622_s9 + $0x90] sm:$0xff] %v238_v18  ;;  %v246_v22 = vld [vmem:[%s1614_s8 + $0x130] sm:$0xff]  ;;  %v248_v23 = vld [vmem:[%s1614_s8 + $0x138] sm:$0xff] }
  0x1f   : > { %241 = vst [vmem:[%s1622_s9 + $0x98] sm:$0xff] %v240_v19  ;;  %243 = vst [vmem:[%s1622_s9 + $0xa0] sm:$0xff] %v242_v20  ;;  %v250_v24 = vld [vmem:[%s1614_s8 + $0x180] sm:$0xff]  ;;  %v252_v25 = vld [vmem:[%s1614_s8 + $0x188] sm:$0xff] }
  0x20   : > { %245 = vst [vmem:[%s1622_s9 + $0xa8] sm:$0xff] %v244_v21  ;;  %247 = vst [vmem:[%s1622_s9 + $0xb0] sm:$0xff] %v246_v22  ;;  %v254_v26 = vld [vmem:[%s1614_s8 + $0x190] sm:$0xff]  ;;  %v256_v27 = vld [vmem:[%s1614_s8 + $0x198] sm:$0xff] }
  0x21   : > { %249 = vst [vmem:[%s1622_s9 + $0xb8] sm:$0xff] %v248_v23  ;;  %251 = vst [vmem:[%s1622_s9 + $0xc0] sm:$0xff] %v250_v24  ;;  %v258_v28 = vld [vmem:[%s1614_s8 + $0x1a0] sm:$0xff]  ;;  %v260_v29 = vld [vmem:[%s1614_s8 + $0x1a8] sm:$0xff] }
  0x22   : > { %253 = vst [vmem:[%s1622_s9 + $0xc8] sm:$0xff] %v252_v25  ;;  %255 = vst [vmem:[%s1622_s9 + $0xd0] sm:$0xff] %v254_v26  ;;  %v262_v30 = vld [vmem:[%s1614_s8 + $0x1b0] sm:$0xff]  ;;  %v264_v31 = vld [vmem:[%s1614_s8 + $0x1b8] sm:$0xff] }
  0x23   : > { %257 = vst [vmem:[%s1622_s9 + $0xd8] sm:$0xff] %v256_v27  ;;  %259 = vst [vmem:[%s1622_s9 + $0xe0] sm:$0xff] %v258_v28  ;;  %v266_v32 = vld [vmem:[%s1614_s8 + $0x200] sm:$0xff]  ;;  %v268_v33 = vld [vmem:[%s1614_s8 + $0x208] sm:$0xff] }
  0x24   : > { %261 = vst [vmem:[%s1622_s9 + $0xe8] sm:$0xff] %v260_v29  ;;  %263 = vst [vmem:[%s1622_s9 + $0xf0] sm:$0xff] %v262_v30  ;;  %v270_v34 = vld [vmem:[%s1614_s8 + $0x210] sm:$0xff]  ;;  %v272_v35 = vld [vmem:[%s1614_s8 + $0x218] sm:$0xff] }
  0x25   : > { %265 = vst [vmem:[%s1622_s9 + $0xf8] sm:$0xff] %v264_v31  ;;  %267 = vst [vmem:[%s1622_s9 + $0x100] sm:$0xff] %v266_v32  ;;  %v274_v36 = vld [vmem:[%s1614_s8 + $0x220] sm:$0xff]  ;;  %v276_v37 = vld [vmem:[%s1614_s8 + $0x228] sm:$0xff] }
  0x26   : > { %269 = vst [vmem:[%s1622_s9 + $0x108] sm:$0xff] %v268_v33  ;;  %271 = vst [vmem:[%s1622_s9 + $0x110] sm:$0xff] %v270_v34  ;;  %v278_v38 = vld [vmem:[%s1614_s8 + $0x230] sm:$0xff]  ;;  %v280_v39 = vld [vmem:[%s1614_s8 + $0x238] sm:$0xff] }
  0x27   : > { %273 = vst [vmem:[%s1622_s9 + $0x118] sm:$0xff] %v272_v35  ;;  %275 = vst [vmem:[%s1622_s9 + $0x120] sm:$0xff] %v274_v36  ;;  %v282_v40 = vld [vmem:[%s1614_s8 + $0x280] sm:$0xff]  ;;  %v284_v41 = vld [vmem:[%s1614_s8 + $0x288] sm:$0xff] }
  0x28   : > { %277 = vst [vmem:[%s1622_s9 + $0x128] sm:$0xff] %v276_v37  ;;  %279 = vst [vmem:[%s1622_s9 + $0x130] sm:$0xff] %v278_v38  ;;  %v286_v42 = vld [vmem:[%s1614_s8 + $0x290] sm:$0xff]  ;;  %v288_v43 = vld [vmem:[%s1614_s8 + $0x298] sm:$0xff] }
  0x29   : > { %281 = vst [vmem:[%s1622_s9 + $0x138] sm:$0xff] %v280_v39  ;;  %283 = vst [vmem:[%s1622_s9 + $0x140] sm:$0xff] %v282_v40  ;;  %v290_v44 = vld [vmem:[%s1614_s8 + $0x2a0] sm:$0xff]  ;;  %v292_v45 = vld [vmem:[%s1614_s8 + $0x2a8] sm:$0xff] }
  0x2a   : > { %285 = vst [vmem:[%s1622_s9 + $0x148] sm:$0xff] %v284_v41  ;;  %287 = vst [vmem:[%s1622_s9 + $0x150] sm:$0xff] %v286_v42  ;;  %v294_v46 = vld [vmem:[%s1614_s8 + $0x2b0] sm:$0xff]  ;;  %v296_v47 = vld [vmem:[%s1614_s8 + $0x2b8] sm:$0xff] }
  0x2b   : > { %289 = vst [vmem:[%s1622_s9 + $0x158] sm:$0xff] %v288_v43  ;;  %291 = vst [vmem:[%s1622_s9 + $0x160] sm:$0xff] %v290_v44  ;;  %v298_v48 = vld [vmem:[%s1614_s8 + $0x300] sm:$0xff]  ;;  %v300_v49 = vld [vmem:[%s1614_s8 + $0x308] sm:$0xff] }
  0x2c   : > { %293 = vst [vmem:[%s1622_s9 + $0x168] sm:$0xff] %v292_v45  ;;  %295 = vst [vmem:[%s1622_s9 + $0x170] sm:$0xff] %v294_v46  ;;  %v302_v50 = vld [vmem:[%s1614_s8 + $0x310] sm:$0xff]  ;;  %v304_v51 = vld [vmem:[%s1614_s8 + $0x318] sm:$0xff] }
  0x2d   : > { %297 = vst [vmem:[%s1622_s9 + $0x178] sm:$0xff] %v296_v47  ;;  %299 = vst [vmem:[%s1622_s9 + $0x180] sm:$0xff] %v298_v48  ;;  %v306_v52 = vld [vmem:[%s1614_s8 + $0x320] sm:$0xff]  ;;  %v308_v53 = vld [vmem:[%s1614_s8 + $0x328] sm:$0xff] }
  0x2e   : > { %301 = vst [vmem:[%s1622_s9 + $0x188] sm:$0xff] %v300_v49  ;;  %303 = vst [vmem:[%s1622_s9 + $0x190] sm:$0xff] %v302_v50  ;;  %v310_v54 = vld [vmem:[%s1614_s8 + $0x330] sm:$0xff]  ;;  %v312_v55 = vld [vmem:[%s1614_s8 + $0x338] sm:$0xff] }
  0x2f   : > { %305 = vst [vmem:[%s1622_s9 + $0x198] sm:$0xff] %v304_v51  ;;  %307 = vst [vmem:[%s1622_s9 + $0x1a0] sm:$0xff] %v306_v52  ;;  %v314_v56 = vld [vmem:[%s1614_s8 + $0x380] sm:$0xff]  ;;  %v316_v57 = vld [vmem:[%s1614_s8 + $0x388] sm:$0xff] }
  0x30   : > { %309 = vst [vmem:[%s1622_s9 + $0x1a8] sm:$0xff] %v308_v53  ;;  %311 = vst [vmem:[%s1622_s9 + $0x1b0] sm:$0xff] %v310_v54  ;;  %v318_v58 = vld [vmem:[%s1614_s8 + $0x390] sm:$0xff]  ;;  %v320_v59 = vld [vmem:[%s1614_s8 + $0x398] sm:$0xff] }
  0x31   : > { %313 = vst [vmem:[%s1622_s9 + $0x1b8] sm:$0xff] %v312_v55  ;;  %315 = vst [vmem:[%s1622_s9 + $0x1c0] sm:$0xff] %v314_v56  ;;  %v322_v60 = vld [vmem:[%s1614_s8 + $0x3a0] sm:$0xff]  ;;  %v324_v61 = vld [vmem:[%s1614_s8 + $0x3a8] sm:$0xff] }
  0x32   : > { %317 = vst [vmem:[%s1622_s9 + $0x1c8] sm:$0xff] %v316_v57  ;;  %319 = vst [vmem:[%s1622_s9 + $0x1d0] sm:$0xff] %v318_v58  ;;  %v326_v62 = vld [vmem:[%s1614_s8 + $0x3b0] sm:$0xff]  ;;  %v328_v63 = vld [vmem:[%s1614_s8 + $0x3b8] sm:$0xff] }
  0x33   : > { %321 = vst [vmem:[%s1622_s9 + $0x1d8] sm:$0xff] %v320_v59  ;;  %323 = vst [vmem:[%s1622_s9 + $0x1e0] sm:$0xff] %v322_v60  ;;  %v330_v0 = vld [vmem:[%s1614_s8 + $0x400] sm:$0xff]  ;;  %v332_v1 = vld [vmem:[%s1614_s8 + $0x408] sm:$0xff] }
  0x34   : > { %325 = vst [vmem:[%s1622_s9 + $0x1e8] sm:$0xff] %v324_v61  ;;  %327 = vst [vmem:[%s1622_s9 + $0x1f0] sm:$0xff] %v326_v62  ;;  %v334_v2 = vld [vmem:[%s1614_s8 + $0x410] sm:$0xff]  ;;  %v336_v3 = vld [vmem:[%s1614_s8 + $0x418] sm:$0xff] }
  0x35   : > { %329 = vst [vmem:[%s1622_s9 + $0x1f8] sm:$0xff] %v328_v63  ;;  %331 = vst [vmem:[%s1622_s9 + $0x200] sm:$0xff] %v330_v0  ;;  %v338_v4 = vld [vmem:[%s1614_s8 + $0x420] sm:$0xff]  ;;  %v340_v5 = vld [vmem:[%s1614_s8 + $0x428] sm:$0xff] }
  0x36   : > { %333 = vst [vmem:[%s1622_s9 + $0x208] sm:$0xff] %v332_v1  ;;  %335 = vst [vmem:[%s1622_s9 + $0x210] sm:$0xff] %v334_v2  ;;  %v342_v6 = vld [vmem:[%s1614_s8 + $0x430] sm:$0xff]  ;;  %v344_v7 = vld [vmem:[%s1614_s8 + $0x438] sm:$0xff] }
  0x37   : > { %337 = vst [vmem:[%s1622_s9 + $0x218] sm:$0xff] %v336_v3  ;;  %339 = vst [vmem:[%s1622_s9 + $0x220] sm:$0xff] %v338_v4  ;;  %v346_v8 = vld [vmem:[%s1614_s8 + $0x480] sm:$0xff]  ;;  %v348_v9 = vld [vmem:[%s1614_s8 + $0x488] sm:$0xff] }
  0x38   : > { %341 = vst [vmem:[%s1622_s9 + $0x228] sm:$0xff] %v340_v5  ;;  %343 = vst [vmem:[%s1622_s9 + $0x230] sm:$0xff] %v342_v6  ;;  %v350_v10 = vld [vmem:[%s1614_s8 + $0x490] sm:$0xff]  ;;  %v352_v11 = vld [vmem:[%s1614_s8 + $0x498] sm:$0xff] }
  0x39   : > { %345 = vst [vmem:[%s1622_s9 + $0x238] sm:$0xff] %v344_v7  ;;  %347 = vst [vmem:[%s1622_s9 + $0x240] sm:$0xff] %v346_v8  ;;  %v354_v12 = vld [vmem:[%s1614_s8 + $0x4a0] sm:$0xff]  ;;  %v356_v13 = vld [vmem:[%s1614_s8 + $0x4a8] sm:$0xff] }
  0x3a   : > { %349 = vst [vmem:[%s1622_s9 + $0x248] sm:$0xff] %v348_v9  ;;  %351 = vst [vmem:[%s1622_s9 + $0x250] sm:$0xff] %v350_v10  ;;  %v358_v14 = vld [vmem:[%s1614_s8 + $0x4b0] sm:$0xff]  ;;  %v360_v15 = vld [vmem:[%s1614_s8 + $0x4b8] sm:$0xff] }
  0x3b   : > { %353 = vst [vmem:[%s1622_s9 + $0x258] sm:$0xff] %v352_v11  ;;  %355 = vst [vmem:[%s1622_s9 + $0x260] sm:$0xff] %v354_v12  ;;  %v362_v16 = vld [vmem:[%s1614_s8 + $0x500] sm:$0xff]  ;;  %v364_v17 = vld [vmem:[%s1614_s8 + $0x508] sm:$0xff] }
  0x3c   : > { %357 = vst [vmem:[%s1622_s9 + $0x268] sm:$0xff] %v356_v13  ;;  %359 = vst [vmem:[%s1622_s9 + $0x270] sm:$0xff] %v358_v14  ;;  %v366_v18 = vld [vmem:[%s1614_s8 + $0x510] sm:$0xff]  ;;  %v368_v19 = vld [vmem:[%s1614_s8 + $0x518] sm:$0xff] }
  0x3d   : > { %361 = vst [vmem:[%s1622_s9 + $0x278] sm:$0xff] %v360_v15  ;;  %363 = vst [vmem:[%s1622_s9 + $0x280] sm:$0xff] %v362_v16  ;;  %v370_v20 = vld [vmem:[%s1614_s8 + $0x520] sm:$0xff]  ;;  %v372_v21 = vld [vmem:[%s1614_s8 + $0x528] sm:$0xff] }
  0x3e   : > { %365 = vst [vmem:[%s1622_s9 + $0x288] sm:$0xff] %v364_v17  ;;  %367 = vst [vmem:[%s1622_s9 + $0x290] sm:$0xff] %v366_v18  ;;  %v374_v22 = vld [vmem:[%s1614_s8 + $0x530] sm:$0xff]  ;;  %v376_v23 = vld [vmem:[%s1614_s8 + $0x538] sm:$0xff] }
  0x3f   : > { %369 = vst [vmem:[%s1622_s9 + $0x298] sm:$0xff] %v368_v19  ;;  %371 = vst [vmem:[%s1622_s9 + $0x2a0] sm:$0xff] %v370_v20  ;;  %v378_v24 = vld [vmem:[%s1614_s8 + $0x580] sm:$0xff]  ;;  %v380_v25 = vld [vmem:[%s1614_s8 + $0x588] sm:$0xff] }
  0x40   : > { %373 = vst [vmem:[%s1622_s9 + $0x2a8] sm:$0xff] %v372_v21  ;;  %375 = vst [vmem:[%s1622_s9 + $0x2b0] sm:$0xff] %v374_v22  ;;  %v382_v26 = vld [vmem:[%s1614_s8 + $0x590] sm:$0xff]  ;;  %v384_v27 = vld [vmem:[%s1614_s8 + $0x598] sm:$0xff] }
  0x41   : > { %377 = vst [vmem:[%s1622_s9 + $0x2b8] sm:$0xff] %v376_v23  ;;  %379 = vst [vmem:[%s1622_s9 + $0x2c0] sm:$0xff] %v378_v24  ;;  %v386_v28 = vld [vmem:[%s1614_s8 + $0x5a0] sm:$0xff]  ;;  %v388_v29 = vld [vmem:[%s1614_s8 + $0x5a8] sm:$0xff] }
  0x42   : > { %381 = vst [vmem:[%s1622_s9 + $0x2c8] sm:$0xff] %v380_v25  ;;  %383 = vst [vmem:[%s1622_s9 + $0x2d0] sm:$0xff] %v382_v26  ;;  %v390_v30 = vld [vmem:[%s1614_s8 + $0x5b0] sm:$0xff]  ;;  %v392_v31 = vld [vmem:[%s1614_s8 + $0x5b8] sm:$0xff] }
  0x43   : > { %385 = vst [vmem:[%s1622_s9 + $0x2d8] sm:$0xff] %v384_v27  ;;  %387 = vst [vmem:[%s1622_s9 + $0x2e0] sm:$0xff] %v386_v28  ;;  %v394_v32 = vld [vmem:[%s1614_s8 + $0x600] sm:$0xff]  ;;  %v396_v33 = vld [vmem:[%s1614_s8 + $0x608] sm:$0xff] }
  0x44   : > { %389 = vst [vmem:[%s1622_s9 + $0x2e8] sm:$0xff] %v388_v29  ;;  %391 = vst [vmem:[%s1622_s9 + $0x2f0] sm:$0xff] %v390_v30  ;;  %v398_v34 = vld [vmem:[%s1614_s8 + $0x610] sm:$0xff]  ;;  %v400_v35 = vld [vmem:[%s1614_s8 + $0x618] sm:$0xff] }
  0x45   : > { %393 = vst [vmem:[%s1622_s9 + $0x2f8] sm:$0xff] %v392_v31  ;;  %395 = vst [vmem:[%s1622_s9 + $0x300] sm:$0xff] %v394_v32  ;;  %v402_v36 = vld [vmem:[%s1614_s8 + $0x620] sm:$0xff]  ;;  %v404_v37 = vld [vmem:[%s1614_s8 + $0x628] sm:$0xff] }
  0x46   : > { %397 = vst [vmem:[%s1622_s9 + $0x308] sm:$0xff] %v396_v33  ;;  %399 = vst [vmem:[%s1622_s9 + $0x310] sm:$0xff] %v398_v34  ;;  %v406_v38 = vld [vmem:[%s1614_s8 + $0x630] sm:$0xff]  ;;  %v408_v39 = vld [vmem:[%s1614_s8 + $0x638] sm:$0xff] }
  0x47   : > { %401 = vst [vmem:[%s1622_s9 + $0x318] sm:$0xff] %v400_v35  ;;  %403 = vst [vmem:[%s1622_s9 + $0x320] sm:$0xff] %v402_v36  ;;  %v410_v40 = vld [vmem:[%s1614_s8 + $0x680] sm:$0xff]  ;;  %v412_v41 = vld [vmem:[%s1614_s8 + $0x688] sm:$0xff] }
  0x48   : > { %405 = vst [vmem:[%s1622_s9 + $0x328] sm:$0xff] %v404_v37  ;;  %407 = vst [vmem:[%s1622_s9 + $0x330] sm:$0xff] %v406_v38  ;;  %v414_v42 = vld [vmem:[%s1614_s8 + $0x690] sm:$0xff]  ;;  %v416_v43 = vld [vmem:[%s1614_s8 + $0x698] sm:$0xff] }
  0x49   : > { %409 = vst [vmem:[%s1622_s9 + $0x338] sm:$0xff] %v408_v39  ;;  %411 = vst [vmem:[%s1622_s9 + $0x340] sm:$0xff] %v410_v40  ;;  %v418_v44 = vld [vmem:[%s1614_s8 + $0x6a0] sm:$0xff]  ;;  %v420_v45 = vld [vmem:[%s1614_s8 + $0x6a8] sm:$0xff] }
  0x4a   : > { %413 = vst [vmem:[%s1622_s9 + $0x348] sm:$0xff] %v412_v41  ;;  %415 = vst [vmem:[%s1622_s9 + $0x350] sm:$0xff] %v414_v42  ;;  %v422_v46 = vld [vmem:[%s1614_s8 + $0x6b0] sm:$0xff]  ;;  %v424_v47 = vld [vmem:[%s1614_s8 + $0x6b8] sm:$0xff] }
  0x4b   : > { %417 = vst [vmem:[%s1622_s9 + $0x358] sm:$0xff] %v416_v43  ;;  %419 = vst [vmem:[%s1622_s9 + $0x360] sm:$0xff] %v418_v44  ;;  %v426_v48 = vld [vmem:[%s1614_s8 + $0x700] sm:$0xff]  ;;  %v428_v49 = vld [vmem:[%s1614_s8 + $0x708] sm:$0xff] }
  0x4c   : > { %421 = vst [vmem:[%s1622_s9 + $0x368] sm:$0xff] %v420_v45  ;;  %423 = vst [vmem:[%s1622_s9 + $0x370] sm:$0xff] %v422_v46  ;;  %v430_v50 = vld [vmem:[%s1614_s8 + $0x710] sm:$0xff]  ;;  %v432_v51 = vld [vmem:[%s1614_s8 + $0x718] sm:$0xff] }
  0x4d   : > { %425 = vst [vmem:[%s1622_s9 + $0x378] sm:$0xff] %v424_v47  ;;  %427 = vst [vmem:[%s1622_s9 + $0x380] sm:$0xff] %v426_v48  ;;  %v434_v52 = vld [vmem:[%s1614_s8 + $0x720] sm:$0xff]  ;;  %v436_v53 = vld [vmem:[%s1614_s8 + $0x728] sm:$0xff] }
  0x4e   : > { %429 = vst [vmem:[%s1622_s9 + $0x388] sm:$0xff] %v428_v49  ;;  %431 = vst [vmem:[%s1622_s9 + $0x390] sm:$0xff] %v430_v50  ;;  %v438_v54 = vld [vmem:[%s1614_s8 + $0x730] sm:$0xff]  ;;  %v440_v55 = vld [vmem:[%s1614_s8 + $0x738] sm:$0xff] }
  0x4f   : > { %433 = vst [vmem:[%s1622_s9 + $0x398] sm:$0xff] %v432_v51  ;;  %435 = vst [vmem:[%s1622_s9 + $0x3a0] sm:$0xff] %v434_v52  ;;  %v442_v56 = vld [vmem:[%s1614_s8 + $0x780] sm:$0xff]  ;;  %v444_v57 = vld [vmem:[%s1614_s8 + $0x788] sm:$0xff] }
  0x50   : > { %437 = vst [vmem:[%s1622_s9 + $0x3a8] sm:$0xff] %v436_v53  ;;  %439 = vst [vmem:[%s1622_s9 + $0x3b0] sm:$0xff] %v438_v54  ;;  %v446_v58 = vld [vmem:[%s1614_s8 + $0x790] sm:$0xff]  ;;  %v448_v59 = vld [vmem:[%s1614_s8 + $0x798] sm:$0xff] }
  0x51   : > { %441 = vst [vmem:[%s1622_s9 + $0x3b8] sm:$0xff] %v440_v55  ;;  %443 = vst [vmem:[%s1622_s9 + $0x3c0] sm:$0xff] %v442_v56  ;;  %v450_v60 = vld [vmem:[%s1614_s8 + $0x7a0] sm:$0xff]  ;;  %v452_v61 = vld [vmem:[%s1614_s8 + $0x7a8] sm:$0xff] }
  0x52   : > { %445 = vst [vmem:[%s1622_s9 + $0x3c8] sm:$0xff] %v444_v57  ;;  %447 = vst [vmem:[%s1622_s9 + $0x3d0] sm:$0xff] %v446_v58  ;;  %v454_v62 = vld [vmem:[%s1614_s8 + $0x7b0] sm:$0xff]  ;;  %v456_v63 = vld [vmem:[%s1614_s8 + $0x7b8] sm:$0xff] }
  0x53   : > { %449 = vst [vmem:[%s1622_s9 + $0x3d8] sm:$0xff] %v448_v59  ;;  %451 = vst [vmem:[%s1622_s9 + $0x3e0] sm:$0xff] %v450_v60  ;;  %v458_v0 = vld [vmem:[%s1614_s8 + $0x800] sm:$0xff]  ;;  %v460_v1 = vld [vmem:[%s1614_s8 + $0x808] sm:$0xff] }
  0x54   : > { %453 = vst [vmem:[%s1622_s9 + $0x3e8] sm:$0xff] %v452_v61  ;;  %455 = vst [vmem:[%s1622_s9 + $0x3f0] sm:$0xff] %v454_v62  ;;  %v462_v2 = vld [vmem:[%s1614_s8 + $0x810] sm:$0xff]  ;;  %v464_v3 = vld [vmem:[%s1614_s8 + $0x818] sm:$0xff] }
  0x55   : > { %457 = vst [vmem:[%s1622_s9 + $0x3f8] sm:$0xff] %v456_v63  ;;  %459 = vst [vmem:[%s1622_s9 + $0x400] sm:$0xff] %v458_v0  ;;  %v466_v4 = vld [vmem:[%s1614_s8 + $0x820] sm:$0xff]  ;;  %v468_v5 = vld [vmem:[%s1614_s8 + $0x828] sm:$0xff] }
  0x56   : > { %461 = vst [vmem:[%s1622_s9 + $0x408] sm:$0xff] %v460_v1  ;;  %463 = vst [vmem:[%s1622_s9 + $0x410] sm:$0xff] %v462_v2  ;;  %v470_v6 = vld [vmem:[%s1614_s8 + $0x830] sm:$0xff]  ;;  %v472_v7 = vld [vmem:[%s1614_s8 + $0x838] sm:$0xff] }
  0x57   : > { %465 = vst [vmem:[%s1622_s9 + $0x418] sm:$0xff] %v464_v3  ;;  %467 = vst [vmem:[%s1622_s9 + $0x420] sm:$0xff] %v466_v4  ;;  %v474_v8 = vld [vmem:[%s1614_s8 + $0x880] sm:$0xff]  ;;  %v476_v9 = vld [vmem:[%s1614_s8 + $0x888] sm:$0xff] }
  0x58   : > { %469 = vst [vmem:[%s1622_s9 + $0x428] sm:$0xff] %v468_v5  ;;  %471 = vst [vmem:[%s1622_s9 + $0x430] sm:$0xff] %v470_v6  ;;  %v478_v10 = vld [vmem:[%s1614_s8 + $0x890] sm:$0xff]  ;;  %v480_v11 = vld [vmem:[%s1614_s8 + $0x898] sm:$0xff] }
  0x59   : > { %473 = vst [vmem:[%s1622_s9 + $0x438] sm:$0xff] %v472_v7  ;;  %475 = vst [vmem:[%s1622_s9 + $0x440] sm:$0xff] %v474_v8  ;;  %v482_v12 = vld [vmem:[%s1614_s8 + $0x8a0] sm:$0xff]  ;;  %v484_v13 = vld [vmem:[%s1614_s8 + $0x8a8] sm:$0xff] }
  0x5a   : > { %477 = vst [vmem:[%s1622_s9 + $0x448] sm:$0xff] %v476_v9  ;;  %479 = vst [vmem:[%s1622_s9 + $0x450] sm:$0xff] %v478_v10  ;;  %v486_v14 = vld [vmem:[%s1614_s8 + $0x8b0] sm:$0xff]  ;;  %v488_v15 = vld [vmem:[%s1614_s8 + $0x8b8] sm:$0xff] }
  0x5b   : > { %481 = vst [vmem:[%s1622_s9 + $0x458] sm:$0xff] %v480_v11  ;;  %483 = vst [vmem:[%s1622_s9 + $0x460] sm:$0xff] %v482_v12 }
  0x5c   : > { %485 = vst [vmem:[%s1622_s9 + $0x468] sm:$0xff] %v484_v13  ;;  %487 = vst [vmem:[%s1622_s9 + $0x470] sm:$0xff] %v486_v14 }
  0x5d   : > { %489 = vst [vmem:[%s1622_s9 + $0x478] sm:$0xff] %v488_v15 }
  0x5e PF: > { %495 = sbr.rel (!%p1598_p4) target bundleno = 106 (0x6a), region = 55  ;;  %s497_s10 = sand.u32 (%p1598_p4), 1, %s1531_s19  }
  0x5f   : > { %s1338_s11 = sshll.u32 (%p1598_p4), %s1535_s20, 6  ;;  %s1318_s12 = sshll.u32 (%p1598_p4), %s497_s10, 7 }
  0x60   : > { %s1913_s15 = scalar_lea.vmem (%p1598_p4), %s2257_s4, %s1338_s11  ;;  %s499_s16 = scalar_lea.vmem (%p1598_p4), [#allocation3], %s1318_s12 }
  0x61   : > { %v515_v16 = vld [vmem:[%s1913_s15] sm:$0xff] (%p1598_p4)  ;;  %v517_v17 = vld [vmem:[%s1913_s15 + $0x8] sm:$0xff] (%p1598_p4)  ;;  %v519_v18 = vld [vmem:[%s1913_s15 + $0x10] sm:$0xff] (%p1598_p4) }
  0x62   : > { %516 = vst [vmem:[%s499_s16] sm:$0xff] (%p1598_p4), %v515_v16  ;;  %518 = vst [vmem:[%s499_s16 + $0x8] sm:$0xff] (%p1598_p4), %v517_v17  ;;  %v521_v19 = vld [vmem:[%s1913_s15 + $0x18] sm:$0xff] (%p1598_p4)  ;;  %v523_v20 = vld [vmem:[%s1913_s15 + $0x20] sm:$0xff] (%p1598_p4) }
  0x63   : > { %520 = vst [vmem:[%s499_s16 + $0x10] sm:$0xff] (%p1598_p4), %v519_v18  ;;  %v525_v21 = vld [vmem:[%s1913_s15 + $0x28] sm:$0xff] (%p1598_p4)  ;;  %522 = vst [vmem:[%s499_s16 + $0x18] sm:$0xff] (%p1598_p4), %v521_v19  ;;  %v527_v22 = vld [vmem:[%s1913_s15 + $0x30] sm:$0xff] (%p1598_p4) }
  0x64   : > { %524 = vst [vmem:[%s499_s16 + $0x20] sm:$0xff] (%p1598_p4), %v523_v20  ;;  %526 = vst [vmem:[%s499_s16 + $0x28] sm:$0xff] (%p1598_p4), %v525_v21  ;;  %v529_v23 = vld [vmem:[%s1913_s15 + $0x38] sm:$0xff] (%p1598_p4)  ;;  %v531_v24 = vld [vmem:[%s1913_s15 + $0x80] sm:$0xff] (%p1598_p4) }
  0x65   : > { %528 = vst [vmem:[%s499_s16 + $0x30] sm:$0xff] %v527_v22  ;;  %530 = vst [vmem:[%s499_s16 + $0x38] sm:$0xff] %v529_v23  ;;  %v533_v25 = vld [vmem:[%s1913_s15 + $0x88] sm:$0xff]  ;;  %v535_v26 = vld [vmem:[%s1913_s15 + $0x90] sm:$0xff] }
  0x66   : > { %532 = vst [vmem:[%s499_s16 + $0x40] sm:$0xff] %v531_v24  ;;  %v537_v27 = vld [vmem:[%s1913_s15 + $0x98] sm:$0xff]  ;;  %534 = vst [vmem:[%s499_s16 + $0x48] sm:$0xff] %v533_v25  ;;  %v539_v28 = vld [vmem:[%s1913_s15 + $0xa0] sm:$0xff] }
  0x67   : > { %536 = vst [vmem:[%s499_s16 + $0x50] sm:$0xff] %v535_v26  ;;  %538 = vst [vmem:[%s499_s16 + $0x58] sm:$0xff] %v537_v27  ;;  %v541_v29 = vld [vmem:[%s1913_s15 + $0xa8] sm:$0xff]  ;;  %v543_v30 = vld [vmem:[%s1913_s15 + $0xb0] sm:$0xff] }
  0x68   : > { %540 = vst [vmem:[%s499_s16 + $0x60] sm:$0xff] %v539_v28  ;;  %542 = vst [vmem:[%s499_s16 + $0x68] sm:$0xff] %v541_v29  ;;  %v545_v31 = vld [vmem:[%s1913_s15 + $0xb8] sm:$0xff] }
  0x69   : > { %544 = vst [vmem:[%s499_s16 + $0x70] sm:$0xff] %v543_v30  ;;  %546 = vst [vmem:[%s499_s16 + $0x78] sm:$0xff] %v545_v31 }
  0x6a PF: > { %p1321_p7 = scmp.ge.s32.totalorder %s1535_s20, 1  ;;  %p551_p8 = scmp.lt.s32.totalorder %s1535_s20, 3 }
  0x6c   : > { %p552_p9 = pnand %p1321_p7, %p551_p8 }
  0x6d   : > { %s558_s17 = sand.u32 (!%p552_p9), 1, %s1527_s18   ;;  %v1937_v32 = vld [vmem:[%s2253_s0 + $0x8] sm:$0xff] (!%p552_p9)  ;;  %vm746_vm0 = vcmask (!%p552_p9), 130048   ;;  %v1061_v33 = vld [vmem:[%s2255_s2] sm:$0xff] (!%p552_p9)  ;;  %v1537_v35 = vmov (!%p552_p9), 0  }
  0x6e   : > { %555 = sbr.rel (%p552_p9) target bundleno = 425 (0x1a9), region = 78  ;;  %1324 = vmatprep.mubr.msk.f32.mxu0 (!%p552_p9), %vm746_vm0, %v1937_v32  ;;  %1326 = vmatprep.mubr.msk.f32.mxu1 (!%p552_p9), %vm746_vm0, %v1937_v32  ;;  %v1089_v34 = vld [vmem:[%s2256_s3] sm:$0xff] (!%p552_p9)  ;;  %v1062_v36 = vld [vmem:[%s2255_s2 + $0x8] sm:$0xff] (!%p552_p9)  ;;  %s2140_s24 = sshll.u32 (!%p552_p9), %s558_s17, 7 }
  0x6f   : > { %s1485_s26 = smul.u32 (!%p552_p9), 1152, %s558_s17  ;;  %1511 = vset.pattern.permute.xlu0 (!%p552_p9), %v1537_v35  ;;  %1512 = vset.pattern.permute.xlu1 (!%p552_p9), %v1537_v35  ;;  %v1090_v40 = vld [vmem:[%s2256_s3 + $0x8] sm:$0xff] (!%p552_p9)  ;;  %s2177_s18 = scalar_lea.vmem (!%p552_p9), [#allocation4], %s2140_s24 }
  0x70   : > { %1065 = vperm.xlu0 (!%p552_p9), %1511, %v1061_v33   ;;  %1093 = vperm.xlu1 (!%p552_p9), %1512, %v1089_v34  }
  0x71   : > { %s1954_s9 = scalar_lea.vmem (!%p552_p9), [#allocation2], %s1485_s26  ;;  %s2150_s26 = scalar_lea.vmem (!%p552_p9), [#allocation3], %s2140_s24 }
  0x72   : > { %v603_v37 = vld [vmem:[%s1954_s9 + $0x8] sm:$0xff] (!%p552_p9)  ;;  %v605_v39 = vld [vmem:[%s1954_s9 + $0x18] sm:$0xff] (!%p552_p9)  ;;  %v602_v43 = vld [vmem:[%s1954_s9] sm:$0xff] (!%p552_p9) }
  0x73   : > { %v611_v38 = vld [vmem:[%s1954_s9 + $0x48] sm:$0xff] (!%p552_p9)  ;;  %v613_v42 = vld [vmem:[%s1954_s9 + $0x58] sm:$0xff] (!%p552_p9)  ;;  %v610_v44 = vld [vmem:[%s1954_s9 + $0x40] sm:$0xff] (!%p552_p9) }
  0x74   : > { %v1340_v41 = vpack.c.bf16 (!%p552_p9), %v611_v38, %v603_v37  ;;  %v1376_v45 = vpack.c.bf16 (!%p552_p9), %v613_v42, %v605_v39  ;;  %v1342_v46 = vpack.c.bf16 (!%p552_p9), %v610_v44, %v602_v43  ;;  %v604_v47 = vld [vmem:[%s1954_s9 + $0x10] sm:$0xff] (!%p552_p9)  ;;  %v619_v49 = vld [vmem:[%s1954_s9 + $0x88] sm:$0xff] (!%p552_p9)  ;;  %v621_v52 = vld [vmem:[%s1954_s9 + $0x98] sm:$0xff] (!%p552_p9)  ;;  %1070 = vperm.xlu0 (!%p552_p9), %1511, %v1062_v36   ;;  %1098 = vperm.xlu1 (!%p552_p9), %1512, %v1090_v40  }
  0x75   : > { %v612_v48 = vld [vmem:[%s1954_s9 + $0x50] sm:$0xff]  ;;  %v627_v51 = vld [vmem:[%s1954_s9 + $0xc8] sm:$0xff]  ;;  %v629_v53 = vld [vmem:[%s1954_s9 + $0xd8] sm:$0xff]  ;;  %s1339_s17 = sshll.u32 (%p1602_p5), %s1312_s21, 6 }
  0x76   : > { %1341 = vmatprep.subr.bf16.mxu0 %v1340_v41  ;;  %v1378_v50 = vpack.c.bf16 %v612_v48, %v604_v47  ;;  %1377 = vmatprep.subr.bf16.mxu1 %v1376_v45  ;;  %v1344_v54 = vpack.c.bf16 %v627_v51, %v619_v49  ;;  %v1380_v55 = vpack.c.bf16 %v629_v53, %v621_v52  ;;  %v618_v56 = vld [vmem:[%s1954_s9 + $0x80] sm:$0xff]  ;;  %v620_v58 = vld [vmem:[%s1954_s9 + $0x90] sm:$0xff]  ;;  %v635_v61 = vld [vmem:[%s1954_s9 + $0x108] sm:$0xff]  ;;  %s1190_s27 = scalar_lea.vmem (%p1602_p5), %s2258_s5, %s1339_s17 }
  0x77   : > { %1343 = vmatpush1.bf16.msra.mxu0 %v1342_v46  ;;  %v626_v57 = vld [vmem:[%s1954_s9 + $0xc0] sm:$0xff]  ;;  %v628_v60 = vld [vmem:[%s1954_s9 + $0xd0] sm:$0xff]  ;;  %v643_v62 = vld [vmem:[%s1954_s9 + $0x148] sm:$0xff] }
  0x78   : > { %1379 = vmatpush1.bf16.msra.mxu1 %v1378_v50  ;;  %v1346_v59 = vpack.c.bf16 %v626_v57, %v618_v56  ;;  %1345 = vmatprep.subr.bf16.mxu0 %v1344_v54  ;;  %v1382_v63 = vpack.c.bf16 %v628_v60, %v620_v58  ;;  %v1348_v0 = vpack.c.bf16 %v643_v62, %v635_v61  ;;  %v637_v1 = vld [vmem:[%s1954_s9 + $0x118] sm:$0xff]  ;;  %v634_v3 = vld [vmem:[%s1954_s9 + $0x100] sm:$0xff]  ;;  %v636_v6 = vld [vmem:[%s1954_s9 + $0x110] sm:$0xff] }
  0x79   : > { %1381 = vmatprep.subr.bf16.mxu1 %v1380_v55  ;;  %v645_v2 = vld [vmem:[%s1954_s9 + $0x158] sm:$0xff]  ;;  %v642_v5 = vld [vmem:[%s1954_s9 + $0x140] sm:$0xff]  ;;  %v644_v7 = vld [vmem:[%s1954_s9 + $0x150] sm:$0xff] }
  0x7a   : > { %v1384_v4 = vpack.c.bf16 %v645_v2, %v637_v1  ;;  %v1350_v8 = vpack.c.bf16 %v642_v5, %v634_v3  ;;  %v651_v9 = vld [vmem:[%s1954_s9 + $0x188] sm:$0xff]  ;;  %v653_v11 = vld [vmem:[%s1954_s9 + $0x198] sm:$0xff]  ;;  %v1386_v12 = vpack.c.bf16 %v644_v7, %v636_v6  ;;  %v650_v15 = vld [vmem:[%s1954_s9 + $0x180] sm:$0xff] }
  0x7b   : > { %1347 = vmatpush1.bf16.msra.mxu0 %v1346_v59  ;;  %v659_v10 = vld [vmem:[%s1954_s9 + $0x1c8] sm:$0xff]  ;;  %v661_v14 = vld [vmem:[%s1954_s9 + $0x1d8] sm:$0xff]  ;;  %v658_v16 = vld [vmem:[%s1954_s9 + $0x1c0] sm:$0xff] }
  0x7c   : > { %1383 = vmatpush1.bf16.msra.mxu1 %v1382_v63  ;;  %1349 = vmatprep.subr.bf16.mxu0 %v1348_v0  ;;  %v1352_v13 = vpack.c.bf16 %v659_v10, %v651_v9  ;;  %v1388_v17 = vpack.c.bf16 %v661_v14, %v653_v11  ;;  %v652_v18 = vld [vmem:[%s1954_s9 + $0x190] sm:$0xff]  ;;  %v667_v20 = vld [vmem:[%s1954_s9 + $0x208] sm:$0xff]  ;;  %v669_v22 = vld [vmem:[%s1954_s9 + $0x218] sm:$0xff]  ;;  %v1354_v24 = vpack.c.bf16 %v658_v16, %v650_v15 }
  0x7d   : > { %1385 = vmatprep.subr.bf16.mxu1 %v1384_v4  ;;  %v660_v19 = vld [vmem:[%s1954_s9 + $0x1d0] sm:$0xff]  ;;  %v675_v21 = vld [vmem:[%s1954_s9 + $0x248] sm:$0xff]  ;;  %v677_v23 = vld [vmem:[%s1954_s9 + $0x258] sm:$0xff] }
  0x7e   : > { %v1390_v25 = vpack.c.bf16 %v660_v19, %v652_v18  ;;  %v1356_v26 = vpack.c.bf16 %v675_v21, %v667_v20  ;;  %v666_v27 = vld [vmem:[%s1954_s9 + $0x200] sm:$0xff]  ;;  %v668_v29 = vld [vmem:[%s1954_s9 + $0x210] sm:$0xff]  ;;  %v1392_v30 = vpack.c.bf16 %v677_v23, %v669_v22  ;;  %v683_v33 = vld [vmem:[%s1954_s9 + $0x288] sm:$0xff] }
  0x7f   : > { %1351 = vmatpush1.bf16.msra.mxu0 %v1350_v8  ;;  %v674_v28 = vld [vmem:[%s1954_s9 + $0x240] sm:$0xff]  ;;  %v676_v31 = vld [vmem:[%s1954_s9 + $0x250] sm:$0xff]  ;;  %v691_v34 = vld [vmem:[%s1954_s9 + $0x2c8] sm:$0xff] }
  0x80   : > { %1387 = vmatpush1.bf16.msra.mxu1 %v1386_v12  ;;  %1353 = vmatprep.subr.bf16.mxu0 %v1352_v13  ;;  %v685_v35 = vld [vmem:[%s1954_s9 + $0x298] sm:$0xff]  ;;  %v1358_v37 = vpack.c.bf16 %v674_v28, %v666_v27  ;;  %v1394_v38 = vpack.c.bf16 %v676_v31, %v668_v29  ;;  %v1360_v39 = vpack.c.bf16 %v691_v34, %v683_v33  ;;  %v682_v40 = vld [vmem:[%s1954_s9 + $0x280] sm:$0xff]  ;;  %v684_v42 = vld [vmem:[%s1954_s9 + $0x290] sm:$0xff] }
  0x81   : > { %1389 = vmatprep.subr.bf16.mxu1 %v1388_v17  ;;  %v693_v36 = vld [vmem:[%s1954_s9 + $0x2d8] sm:$0xff]  ;;  %v690_v41 = vld [vmem:[%s1954_s9 + $0x2c0] sm:$0xff]  ;;  %v692_v44 = vld [vmem:[%s1954_s9 + $0x2d0] sm:$0xff] }
  0x82   : > { %v1396_v43 = vpack.c.bf16 %v693_v36, %v685_v35  ;;  %v699_v45 = vld [vmem:[%s1954_s9 + $0x308] sm:$0xff]  ;;  %v701_v47 = vld [vmem:[%s1954_s9 + $0x318] sm:$0xff]  ;;  %v1362_v49 = vpack.c.bf16 %v690_v41, %v682_v40  ;;  %v1398_v50 = vpack.c.bf16 %v692_v44, %v684_v42  ;;  %v698_v52 = vld [vmem:[%s1954_s9 + $0x300] sm:$0xff] }
  0x83   : > { %1355 = vmatpush1.bf16.msra.mxu0 %v1354_v24  ;;  %v707_v46 = vld [vmem:[%s1954_s9 + $0x348] sm:$0xff]  ;;  %v709_v48 = vld [vmem:[%s1954_s9 + $0x358] sm:$0xff]  ;;  %v706_v53 = vld [vmem:[%s1954_s9 + $0x340] sm:$0xff] }
  0x84   : > { %1391 = vmatpush1.bf16.msra.mxu1 %v1390_v25  ;;  %1357 = vmatprep.subr.bf16.mxu0 %v1356_v26  ;;  %v1364_v51 = vpack.c.bf16 %v707_v46, %v699_v45  ;;  %v700_v54 = vld [vmem:[%s1954_s9 + $0x310] sm:$0xff]  ;;  %v1400_v55 = vpack.c.bf16 %v709_v48, %v701_v47  ;;  %v715_v57 = vld [vmem:[%s1954_s9 + $0x388] sm:$0xff]  ;;  %v717_v59 = vld [vmem:[%s1954_s9 + $0x398] sm:$0xff]  ;;  %v1366_v61 = vpack.c.bf16 %v706_v53, %v698_v52 }
  0x85   : > { %1393 = vmatprep.subr.bf16.mxu1 %v1392_v30  ;;  %v708_v56 = vld [vmem:[%s1954_s9 + $0x350] sm:$0xff]  ;;  %v723_v58 = vld [vmem:[%s1954_s9 + $0x3c8] sm:$0xff]  ;;  %v725_v60 = vld [vmem:[%s1954_s9 + $0x3d8] sm:$0xff] }
  0x86   : > { %v1402_v62 = vpack.c.bf16 %v708_v56, %v700_v54  ;;  %v1368_v63 = vpack.c.bf16 %v723_v58, %v715_v57  ;;  %v714_v0 = vld [vmem:[%s1954_s9 + $0x380] sm:$0xff]  ;;  %v716_v2 = vld [vmem:[%s1954_s9 + $0x390] sm:$0xff]  ;;  %v1404_v3 = vpack.c.bf16 %v725_v60, %v717_v59  ;;  %v731_v5 = vld [vmem:[%s1954_s9 + $0x408] sm:$0xff] }
  0x87   : > { %1359 = vmatpush1.bf16.msra.mxu0 %v1358_v37  ;;  %v722_v1 = vld [vmem:[%s1954_s9 + $0x3c0] sm:$0xff]  ;;  %v724_v4 = vld [vmem:[%s1954_s9 + $0x3d0] sm:$0xff]  ;;  %v739_v6 = vld [vmem:[%s1954_s9 + $0x448] sm:$0xff] }
  0x88   : > { %1395 = vmatpush1.bf16.msra.mxu1 %v1394_v38  ;;  %1361 = vmatprep.subr.bf16.mxu0 %v1360_v39  ;;  %v733_v7 = vld [vmem:[%s1954_s9 + $0x418] sm:$0xff]  ;;  %v1370_v9 = vpack.c.bf16 %v722_v1, %v714_v0  ;;  %v1406_v10 = vpack.c.bf16 %v724_v4, %v716_v2  ;;  %v1372_v11 = vpack.c.bf16 %v739_v6, %v731_v5  ;;  %v730_v12 = vld [vmem:[%s1954_s9 + $0x400] sm:$0xff]  ;;  %v732_v14 = vld [vmem:[%s1954_s9 + $0x410] sm:$0xff] }
  0x89   : > { %1397 = vmatprep.subr.bf16.mxu1 %v1396_v43  ;;  %v741_v8 = vld [vmem:[%s1954_s9 + $0x458] sm:$0xff]  ;;  %v738_v13 = vld [vmem:[%s1954_s9 + $0x440] sm:$0xff]  ;;  %v740_v16 = vld [vmem:[%s1954_s9 + $0x450] sm:$0xff] }
  0x8a   : > { %v1408_v15 = vpack.c.bf16 %v741_v8, %v733_v7  ;;  %v607_v17 = vld [vmem:[%s1954_s9 + $0x28] sm:$0xff]  ;;  %v609_v19 = vld [vmem:[%s1954_s9 + $0x38] sm:$0xff]  ;;  %v1374_v21 = vpack.c.bf16 %v738_v13, %v730_v12  ;;  %v1410_v22 = vpack.c.bf16 %v740_v16, %v732_v14  ;;  %v606_v24 = vld [vmem:[%s1954_s9 + $0x20] sm:$0xff] }
  0x8b   : > { %1363 = vmatpush1.bf16.msra.mxu0 %v1362_v49  ;;  %v615_v18 = vld [vmem:[%s1954_s9 + $0x68] sm:$0xff]  ;;  %v617_v20 = vld [vmem:[%s1954_s9 + $0x78] sm:$0xff]  ;;  %v614_v25 = vld [vmem:[%s1954_s9 + $0x60] sm:$0xff] }
  0x8c   : > { %1399 = vmatpush1.bf16.msra.mxu1 %v1398_v50  ;;  %1365 = vmatprep.subr.bf16.mxu0 %v1364_v51  ;;  %v1412_v23 = vpack.c.bf16 %v615_v18, %v607_v17  ;;  %v608_v26 = vld [vmem:[%s1954_s9 + $0x30] sm:$0xff]  ;;  %v1448_v27 = vpack.c.bf16 %v617_v20, %v609_v19  ;;  %v623_v29 = vld [vmem:[%s1954_s9 + $0xa8] sm:$0xff]  ;;  %v625_v31 = vld [vmem:[%s1954_s9 + $0xb8] sm:$0xff]  ;;  %v1414_v35 = vpack.c.bf16 %v614_v25, %v606_v24 }
  0x8d   : > { %1401 = vmatprep.subr.bf16.mxu1 %v1400_v55  ;;  %v616_v28 = vld [vmem:[%s1954_s9 + $0x70] sm:$0xff]  ;;  %v631_v30 = vld [vmem:[%s1954_s9 + $0xe8] sm:$0xff]  ;;  %v633_v33 = vld [vmem:[%s1954_s9 + $0xf8] sm:$0xff] }
  0x8e   : > { %v2046_v34 = vld [vmem:[%s2253_s0] sm:$0xff]  ;;  %v1450_v36 = vpack.c.bf16 %v616_v28, %v608_v26  ;;  %v1416_v37 = vpack.c.bf16 %v631_v30, %v623_v29  ;;  %v624_v40 = vld [vmem:[%s1954_s9 + $0xb0] sm:$0xff]  ;;  %v1452_v41 = vpack.c.bf16 %v633_v33, %v625_v31  ;;  %v639_v43 = vld [vmem:[%s1954_s9 + $0x128] sm:$0xff] }
  0x8f   : > { %1367 = vmatpush1.bf16.msra.mxu0 %v1366_v61  ;;  %v622_v38 = vld [vmem:[%s1954_s9 + $0xa0] sm:$0xff]  ;;  %v632_v42 = vld [vmem:[%s1954_s9 + $0xf0] sm:$0xff]  ;;  %v647_v44 = vld [vmem:[%s1954_s9 + $0x168] sm:$0xff] }
  0x90   : > { %1403 = vmatpush1.bf16.msra.mxu1 %v1402_v62  ;;  %1369 = vmatprep.subr.bf16.mxu0 %v1368_v63  ;;  %v630_v39 = vld [vmem:[%s1954_s9 + $0xe0] sm:$0xff]  ;;  %v641_v45 = vld [vmem:[%s1954_s9 + $0x138] sm:$0xff]  ;;  %v2066_v49 = vld [vmem:[%s2253_s0 + $0x10] sm:$0xff]  ;;  %v1454_v50 = vpack.c.bf16 %v632_v42, %v624_v40  ;;  %v1420_v51 = vpack.c.bf16 %v647_v44, %v639_v43 }
  0x91   : > { %1405 = vmatprep.subr.bf16.mxu1 %v1404_v3  ;;  %v649_v46 = vld [vmem:[%s1954_s9 + $0x178] sm:$0xff]  ;;  %v1418_v48 = vpack.c.bf16 %v630_v39, %v622_v38  ;;  %v638_v52 = vld [vmem:[%s1954_s9 + $0x120] sm:$0xff]  ;;  %v640_v54 = vld [vmem:[%s1954_s9 + $0x130] sm:$0xff] }
  0x92   : > { %v2060_v47 = vld [vmem:[%s2253_s0 + $0x18] sm:$0xff]  ;;  %v646_v53 = vld [vmem:[%s1954_s9 + $0x160] sm:$0xff]  ;;  %v1456_v55 = vpack.c.bf16 %v649_v46, %v641_v45  ;;  %v648_v56 = vld [vmem:[%s1954_s9 + $0x170] sm:$0xff] }
  0x93   : > { %1371 = vmatpush1.bf16.msra.mxu0 %v1370_v9  ;;  %v655_v57 = vld [vmem:[%s1954_s9 + $0x1a8] sm:$0xff]  ;;  %v657_v59 = vld [vmem:[%s1954_s9 + $0x1b8] sm:$0xff]  ;;  %v1422_v61 = vpack.c.bf16 %v646_v53, %v638_v52  ;;  %v1458_v62 = vpack.c.bf16 %v648_v56, %v640_v54  ;;  %v654_v0 = vld [vmem:[%s1954_s9 + $0x1a0] sm:$0xff] }
  0x94   : > { %1407 = vmatpush1.bf16.msra.mxu1 %v1406_v10  ;;  %1373 = vmatprep.subr.bf16.mxu0 %v1372_v11  ;;  %v663_v58 = vld [vmem:[%s1954_s9 + $0x1e8] sm:$0xff]  ;;  %v665_v60 = vld [vmem:[%s1954_s9 + $0x1f8] sm:$0xff]  ;;  %v662_v1 = vld [vmem:[%s1954_s9 + $0x1e0] sm:$0xff] }
  0x95   : > { %1409 = vmatprep.subr.bf16.mxu1 %v1408_v15  ;;  %v1424_v63 = vpack.c.bf16 %v663_v58, %v655_v57  ;;  %v656_v2 = vld [vmem:[%s1954_s9 + $0x1b0] sm:$0xff]  ;;  %v1460_v3 = vpack.c.bf16 %v665_v60, %v657_v59  ;;  %v671_v5 = vld [vmem:[%s1954_s9 + $0x228] sm:$0xff]  ;;  %v673_v7 = vld [vmem:[%s1954_s9 + $0x238] sm:$0xff]  ;;  %v1426_v9 = vpack.c.bf16 %v662_v1, %v654_v0 }
  0x96   : > { %v664_v4 = vld [vmem:[%s1954_s9 + $0x1f0] sm:$0xff]  ;;  %v679_v6 = vld [vmem:[%s1954_s9 + $0x268] sm:$0xff]  ;;  %v681_v8 = vld [vmem:[%s1954_s9 + $0x278] sm:$0xff] }
  0x97   : > { %1375 = vmatpush1.bf16.msra.mxu0 %v1374_v21  ;;  %v1462_v10 = vpack.c.bf16 %v664_v4, %v656_v2  ;;  %v1428_v11 = vpack.c.bf16 %v679_v6, %v671_v5  ;;  %v670_v12 = vld [vmem:[%s1954_s9 + $0x220] sm:$0xff]  ;;  %v672_v14 = vld [vmem:[%s1954_s9 + $0x230] sm:$0xff]  ;;  %v1464_v15 = vpack.c.bf16 %v681_v8, %v673_v7  ;;  %v687_v17 = vld [vmem:[%s1954_s9 + $0x2a8] sm:$0xff] }
  0x98   : > { %1411 = vmatpush1.bf16.msra.mxu1 %v1410_v22  ;;  %1413 = vmatprep.subr.bf16.mxu0 %v1412_v23  ;;  %v678_v13 = vld [vmem:[%s1954_s9 + $0x260] sm:$0xff]  ;;  %v680_v16 = vld [vmem:[%s1954_s9 + $0x270] sm:$0xff]  ;;  %v689_v18 = vld [vmem:[%s1954_s9 + $0x2b8] sm:$0xff] }
  0x99   : > { %1449 = vmatprep.subr.bf16.mxu1 %v1448_v27  ;;  %v697_v19 = vld [vmem:[%s1954_s9 + $0x2f8] sm:$0xff]  ;;  %v1430_v20 = vpack.c.bf16 %v678_v13, %v670_v12  ;;  %v1466_v21 = vpack.c.bf16 %v680_v16, %v672_v14  ;;  %v686_v23 = vld [vmem:[%s1954_s9 + $0x2a0] sm:$0xff]  ;;  %v688_v25 = vld [vmem:[%s1954_s9 + $0x2b0] sm:$0xff] }
  0x9a   : > { %818 = vmatmul.mubr.f32.vlgmr.msra.gmra.mrb[0].mxu0 %v2046_v34  ;;  %v694_v24 = vld [vmem:[%s1954_s9 + $0x2e0] sm:$0xff]  ;;  %v1468_v26 = vpack.c.bf16 %v697_v19, %v689_v18  ;;  %v696_v27 = vld [vmem:[%s1954_s9 + $0x2f0] sm:$0xff]  ;;  %v703_v28 = vld [vmem:[%s1954_s9 + $0x328] sm:$0xff] }
  0x9b   : > { %895 = vmatmul.mubr.f32.vlgmr.msra.gmra.mrb[0].mxu1 %v2046_v34  ;;  %1415 = vmatpush1.bf16.msra.mxu0 %v1414_v35  ;;  %v711_v29 = vld [vmem:[%s1954_s9 + $0x368] sm:$0xff]  ;;  %v705_v30 = vld [vmem:[%s1954_s9 + $0x338] sm:$0xff]  ;;  %v1434_v33 = vpack.c.bf16 %v694_v24, %v686_v23  ;;  %v1470_v35 = vpack.c.bf16 %v696_v27, %v688_v25  ;;  %v710_v38 = vld [vmem:[%s1954_s9 + $0x360] sm:$0xff] }
  0x9c   : > { %1451 = vmatpush1.bf16.msra.mxu1 %v1450_v36  ;;  %1417 = vmatprep.subr.bf16.mxu0 %v1416_v37  ;;  %v713_v31 = vld [vmem:[%s1954_s9 + $0x378] sm:$0xff]  ;;  %v1436_v36 = vpack.c.bf16 %v711_v29, %v703_v28  ;;  %v702_v37 = vld [vmem:[%s1954_s9 + $0x320] sm:$0xff]  ;;  %v704_v39 = vld [vmem:[%s1954_s9 + $0x330] sm:$0xff] }
  0x9d   : > { %1453 = vmatprep.subr.bf16.mxu1 %v1452_v41  ;;  %1325 = vmatprep.mubr.msk.f32.mxu0 %vm746_vm0, %v2060_v47  ;;  %v1472_v40 = vpack.c.bf16 %v713_v31, %v705_v30  ;;  %v712_v41 = vld [vmem:[%s1954_s9 + $0x370] sm:$0xff]  ;;  %v719_v42 = vld [vmem:[%s1954_s9 + $0x3a8] sm:$0xff]  ;;  %v721_v44 = vld [vmem:[%s1954_s9 + $0x3b8] sm:$0xff]  ;;  %v1438_v46 = vpack.c.bf16 %v710_v38, %v702_v37 }
  0x9e   : > { %1327 = vmatprep.mubr.msk.f32.mxu1 %vm746_vm0, %v2060_v47  ;;  %824 = vmatmul.mubr.f32.gmra.mrb[2].mxu0 %v2066_v49  ;;  %v727_v43 = vld [vmem:[%s1954_s9 + $0x3e8] sm:$0xff]  ;;  %v729_v45 = vld [vmem:[%s1954_s9 + $0x3f8] sm:$0xff]  ;;  %v726_v52 = vld [vmem:[%s1954_s9 + $0x3e0] sm:$0xff] }
  0x9f   : > { %1419 = vmatpush1.bf16.msra.mxu0 %v1418_v48  ;;  %901 = vmatmul.mubr.f32.gmra.mrb[2].mxu1 %v2066_v49  ;;  %v1474_v48 = vpack.c.bf16 %v712_v41, %v704_v39  ;;  %v720_v53 = vld [vmem:[%s1954_s9 + $0x3b0] sm:$0xff]  ;;  %v1476_v54 = vpack.c.bf16 %v729_v45, %v721_v44  ;;  %v735_v56 = vld [vmem:[%s1954_s9 + $0x428] sm:$0xff]  ;;  %v737_v58 = vld [vmem:[%s1954_s9 + $0x438] sm:$0xff] }
  0xa0   : > { %1455 = vmatpush1.bf16.msra.mxu1 %v1454_v50  ;;  %1421 = vmatprep.subr.bf16.mxu0 %v1420_v51  ;;  %v1440_v50 = vpack.c.bf16 %v727_v43, %v719_v42  ;;  %v718_v51 = vld [vmem:[%s1954_s9 + $0x3a0] sm:$0xff]  ;;  %v743_v57 = vld [vmem:[%s1954_s9 + $0x468] sm:$0xff]  ;;  %v745_v59 = vld [vmem:[%s1954_s9 + $0x478] sm:$0xff] }
  0xa1   : > { %1457 = vmatprep.subr.bf16.mxu1 %v1456_v55  ;;  %1328 = vmatprep.mubr.msk.f32.mxu0 %vm746_vm0, %v1937_v32  ;;  %v728_v55 = vld [vmem:[%s1954_s9 + $0x3f0] sm:$0xff]  ;;  %v1442_v60 = vpack.c.bf16 %v726_v52, %v718_v51  ;;  %v742_v0 = vld [vmem:[%s1954_s9 + $0x460] sm:$0xff]  ;;  %v1480_v1 = vpack.c.bf16 %v745_v59, %v737_v58  ;;  %v1118_v16 = vld [vmem:[%s2150_s26 + $0x8] sm:$0xff] }
  0xa2   : > { %1330 = vmatprep.mubr.msk.f32.mxu1 %vm746_vm0, %v1937_v32  ;;  %v695_v32 = vld [vmem:[%s1954_s9 + $0x2e8] sm:$0xff]  ;;  %v736_v2 = vld [vmem:[%s1954_s9 + $0x430] sm:$0xff]  ;;  %v1120_v19 = vld [vmem:[%s2150_s26 + $0x18] sm:$0xff] }
  0xa3   : > { %1423 = vmatpush1.bf16.msra.mxu0 %v1422_v61  ;;  %v1432_v22 = vpack.c.bf16 %v695_v32, %v687_v17  ;;  %v1478_v61 = vpack.c.bf16 %v728_v55, %v720_v53  ;;  %v1119_v17 = vld [vmem:[%s2150_s26 + $0x10] sm:$0xff]  ;;  %v1126_v39 = vld [vmem:[%s2150_s26 + $0x48] sm:$0xff]  ;;  %v1128_v45 = vld [vmem:[%s2150_s26 + $0x58] sm:$0xff] }
  0xa4   : > { %1459 = vmatpush1.bf16.msra.mxu1 %v1458_v62  ;;  %1425 = vmatprep.subr.bf16.mxu0 %v1424_v63  ;;  %v1444_v62 = vpack.c.bf16 %v743_v57, %v735_v56  ;;  %v734_v63 = vld [vmem:[%s1954_s9 + $0x420] sm:$0xff] }
  0xa5   : > { %1461 = vmatprep.subr.bf16.mxu1 %v1460_v3  ;;  %v744_v3 = vld [vmem:[%s1954_s9 + $0x470] sm:$0xff]  ;;  %v1446_v4 = vpack.c.bf16 %v742_v0, %v734_v63 }
  0xa6   : > { %v1482_v5 = vpack.c.bf16 %v744_v3, %v736_v2  ;;  %v1123_v3 = vld [vmem:[%s2150_s26 + $0x30] sm:$0xff] }
  0xa7   : > { %1427 = vmatpush1.bf16.msra.mxu0 %v1426_v9 }
  0xa8   : > { %1463 = vmatpush1.bf16.msra.mxu1 %v1462_v10  ;;  %1429 = vmatprep.subr.bf16.mxu0 %v1428_v11 }
  0xa9   : > { %1465 = vmatprep.subr.bf16.mxu1 %v1464_v15 }
  0xab   : > { %1431 = vmatpush1.bf16.msra.mxu0 %v1430_v20 }
  0xac   : > { %1467 = vmatpush1.bf16.msra.mxu1 %v1466_v21  ;;  %1433 = vmatprep.subr.bf16.mxu0 %v1432_v22 }
  0xad   : > { %1469 = vmatprep.subr.bf16.mxu1 %v1468_v26 }
  0xaf   : > { %1435 = vmatpush1.bf16.msra.mxu0 %v1434_v33  ;;  %v1125_v33 = vld [vmem:[%s2150_s26 + $0x40] sm:$0xff] }
  0xb0   : > { %1471 = vmatpush1.bf16.msra.mxu1 %v1470_v35  ;;  %1437 = vmatprep.subr.bf16.mxu0 %v1436_v36 }
  0xb1   : > { %1473 = vmatprep.subr.bf16.mxu1 %v1472_v40  ;;  %v1127_v40 = vld [vmem:[%s2150_s26 + $0x50] sm:$0xff] }
  0xb3   : > { %1439 = vmatpush1.bf16.msra.mxu0 %v1438_v46 }
  0xb4   : > { %1475 = vmatpush1.bf16.msra.mxu1 %v1474_v48  ;;  %1441 = vmatprep.subr.bf16.mxu0 %v1440_v50 }
  0xb5   : > { %1477 = vmatprep.subr.bf16.mxu1 %v1476_v54 }
  0xb7   : > { %1443 = vmatpush1.bf16.msra.mxu0 %v1442_v60 }
  0xb8   : > { %1479 = vmatpush1.bf16.msra.mxu1 %v1478_v61  ;;  %1445 = vmatprep.subr.bf16.mxu0 %v1444_v62  ;;  %v1121_v62 = vld [vmem:[%s2150_s26 + $0x20] sm:$0xff] }
  0xb9   : > { %1481 = vmatprep.subr.bf16.mxu1 %v1480_v1 }
  0xbb   : > { %1447 = vmatpush1.bf16.msra.mxu0 %v1446_v4  ;;  %v1122_v4 = vld [vmem:[%s2150_s26 + $0x28] sm:$0xff] }
  0xbc   : > { %1483 = vmatpush1.bf16.msra.mxu1 %v1482_v5 }
  0xbe   : > { %972 = vmatmul.mubr.f32.vlgmr.msra.gmra.mrb[4].mxu0 %v2046_v34 }
  0xbf   : > { %1049 = vmatmul.mubr.f32.vlgmr.msra.gmra.mrb[4].mxu1 %v2046_v34  ;;  %1329 = vmatprep.mubr.msk.f32.mxu0 %vm746_vm0, %v2060_v47 }
  0xc0   : > { %1331 = vmatprep.mubr.msk.f32.mxu1 %vm746_vm0, %v2060_v47 }
  0xc2   : > { %978 = vmatmul.mubr.f32.gmra.mrb[6].mxu0 %v2066_v49 }
  0xc3   : > { %1055 = vmatmul.mubr.f32.gmra.mrb[6].mxu1 %v2066_v49  ;;  %v1117_v49 = vld [vmem:[%s2150_s26] sm:$0xff] }
  0xef   : > { %v2142_v6 = vpop.permute.xlu0 %1065  ;;  %v2144_v8 = vpop.permute.xlu1 %1093 }
  0xf3   : > { %v2153_v13 = vpop.permute.xlu0 %1070  ;;  %v2162_v21 = vpop.permute.xlu1 %1098 }
 0x16d   : > { %v819_v7 = vpop.f32.mrb[0].mxu0 }
 0x16e   : > { %v896_v34 = vpop.f32.mrb[0].mxu1  ;;  %v1073_v9 = vmul.f32 %v2142_v6, %v819_v7  ;;  %v821_v10 = vpop.f32.mrb[1].mxu0 }
 0x16f   : > { %v1075_v11 = vmul.f32 %v2142_v6, %v896_v34  ;;  %v1074_v47 = vmul.f32 %v2142_v6, %v821_v10  ;;  %v898_v12 = vpop.f32.mrb[1].mxu1 }
 0x170   : > { %v1076_v14 = vmul.f32 %v2142_v6, %v898_v12  ;;  %v1101_v15 = vadd.f32 %v2144_v8, %v1073_v9  ;;  %v1124_v9 = vld [vmem:[%s2150_s26 + $0x38] sm:$0xff] }
 0x171   : > { %v1102_v32 = vadd.f32 %v2144_v8, %v1074_v47  ;;  %v1103_v18 = vadd.f32 %v2144_v8, %v1075_v11  ;;  %v825_v20 = vpop.f32.mrb[2].mxu0 }
 0x172   : > { %v1104_v22 = vadd.f32 %v2144_v8, %v1076_v14  ;;  %v1133_v23 = vadd.f32 %v1117_v49, %v1101_v15  ;;  %v902_v24 = vpop.f32.mrb[2].mxu1  ;;  %v1081_v25 = vmul.f32 %v2153_v13, %v825_v20  ;;  %v827_v26 = vpop.f32.mrb[3].mxu0 }
 0x173   : > { %v1134_v27 = vadd.f32 %v1118_v16, %v1102_v32  ;;  %v1135_v28 = vadd.f32 %v1119_v17, %v1103_v18  ;;  %v1083_v29 = vmul.f32 %v2153_v13, %v902_v24  ;;  %v1082_v30 = vmul.f32 %v2153_v13, %v827_v26  ;;  %v904_v31 = vpop.f32.mrb[3].mxu1 }
 0x174   : > { %v1136_v35 = vadd.f32 %v1120_v19, %v1104_v22  ;;  %v1149_v36 = vmax.f32 %v1133_v23, 0.0  ;;  %v1084_v37 = vmul.f32 %v2153_v13, %v904_v31  ;;  %v1109_v38 = vadd.f32 %v2162_v21, %v1081_v25  ;;  %v1131_v22 = vld [vmem:[%s2150_s26 + $0x70] sm:$0xff]  ;;  %v1130_v23 = vld [vmem:[%s2150_s26 + $0x68] sm:$0xff] }
 0x175   : > { %v1150_v41 = vmax.f32 %v1134_v27, 0.0  ;;  %v1151_v42 = vmax.f32 %v1135_v28, 0.0  ;;  %v1110_v43 = vadd.f32 %v2162_v21, %v1082_v30  ;;  %v1111_v44 = vadd.f32 %v2162_v21, %v1083_v29  ;;  %v1132_v29 = vld [vmem:[%s2150_s26 + $0x78] sm:$0xff] }
 0x176   : > { %v1152_v46 = vmax.f32 %v1136_v35, 0.0  ;;  %1165 = vst [vmem:[%s2177_s18] sm:$0xff] %v1149_v36  ;;  %v1112_v48 = vadd.f32 %v2162_v21, %v1084_v37  ;;  %v1141_v50 = vadd.f32 %v1125_v33, %v1109_v38 }
 0x177   : > { %1166 = vst [vmem:[%s2177_s18 + $0x8] sm:$0xff] %v1150_v41  ;;  %1167 = vst [vmem:[%s2177_s18 + $0x10] sm:$0xff] %v1151_v42  ;;  %v1142_v51 = vadd.f32 %v1126_v39, %v1110_v43  ;;  %v1143_v52 = vadd.f32 %v1127_v40, %v1111_v44 }
 0x178   : > { %1168 = vst [vmem:[%s2177_s18 + $0x18] sm:$0xff] %v1152_v46  ;;  %v1144_v53 = vadd.f32 %v1128_v45, %v1112_v48  ;;  %v1157_v54 = vmax.f32 %v1141_v50, 0.0 }
 0x179   : > { %v1158_v55 = vmax.f32 %v1142_v51, 0.0  ;;  %v1159_v56 = vmax.f32 %v1143_v52, 0.0 }
 0x17a   : > { %v1160_v57 = vmax.f32 %v1144_v53, 0.0  ;;  %1173 = vst [vmem:[%s2177_s18 + $0x40] sm:$0xff] %v1157_v54 }
 0x17b   : > { %1174 = vst [vmem:[%s2177_s18 + $0x48] sm:$0xff] %v1158_v55  ;;  %1175 = vst [vmem:[%s2177_s18 + $0x50] sm:$0xff] %v1159_v56 }
 0x17c   : > { %1176 = vst [vmem:[%s2177_s18 + $0x58] sm:$0xff] %v1160_v57 }
 0x17e   : > { %v1205_v41 = vld [vmem:[%s2177_s18 + $0x8] sm:$0xff] (%p1602_p5)  ;;  %v1207_v42 = vld [vmem:[%s2177_s18 + $0x10] sm:$0xff] (%p1602_p5) }
 0x17f   : > { %v1209_v43 = vld [vmem:[%s2177_s18 + $0x18] sm:$0xff] (%p1602_p5)  ;;  %1206 = vst [vmem:[%s1190_s27 + $0x8] sm:$0xff] (%p1602_p5), %v1205_v41  ;;  %1208 = vst [vmem:[%s1190_s27 + $0x10] sm:$0xff] (%p1602_p5), %v1207_v42 }
 0x180   : > { %1210 = vst [vmem:[%s1190_s27 + $0x18] sm:$0xff] (%p1602_p5), %v1209_v43 }
 0x181   : > { %v1219_v50 = vld [vmem:[%s2177_s18 + $0x40] sm:$0xff] (%p1602_p5) }
 0x182   : > { %1220 = vst [vmem:[%s1190_s27 + $0x80] sm:$0xff] (%p1602_p5), %v1219_v50  ;;  %v1221_v51 = vld [vmem:[%s2177_s18 + $0x48] sm:$0xff] (%p1602_p5)  ;;  %v1223_v52 = vld [vmem:[%s2177_s18 + $0x50] sm:$0xff] (%p1602_p5) }
 0x183   : > { %v1225_v53 = vld [vmem:[%s2177_s18 + $0x58] sm:$0xff] (%p1602_p5)  ;;  %1222 = vst [vmem:[%s1190_s27 + $0x88] sm:$0xff] (%p1602_p5), %v1221_v51  ;;  %1224 = vst [vmem:[%s1190_s27 + $0x90] sm:$0xff] (%p1602_p5), %v1223_v52 }
 0x184   : > { %1226 = vst [vmem:[%s1190_s27 + $0x98] sm:$0xff] (%p1602_p5), %v1225_v53 }
 0x191   : > { %v973_v58 = vpop.f32.mrb[4].mxu0 }
 0x192   : > { %v1077_v59 = vmul.f32 %v2142_v6, %v973_v58  ;;  %v1050_v60 = vpop.f32.mrb[4].mxu1  ;;  %v975_v61 = vpop.f32.mrb[5].mxu0 }
 0x193   : > { %v1079_v63 = vmul.f32 %v2142_v6, %v1050_v60  ;;  %v1078_v0 = vmul.f32 %v2142_v6, %v975_v61  ;;  %v1052_v1 = vpop.f32.mrb[5].mxu1 }
 0x194   : > { %v1105_v2 = vadd.f32 %v2144_v8, %v1077_v59  ;;  %v1080_v5 = vmul.f32 %v2142_v6, %v1052_v1  ;;  %v1129_v6 = vld [vmem:[%s2150_s26 + $0x60] sm:$0xff] }
 0x195   : > { %v1107_v7 = vadd.f32 %v2144_v8, %v1079_v63  ;;  %v1106_v34 = vadd.f32 %v2144_v8, %v1078_v0  ;;  %v979_v10 = vpop.f32.mrb[6].mxu0 }
 0x196   : > { %v1137_v11 = vadd.f32 %v1121_v62, %v1105_v2  ;;  %v1108_v47 = vadd.f32 %v2144_v8, %v1080_v5  ;;  %v1085_v12 = vmul.f32 %v2153_v13, %v979_v10  ;;  %v1056_v49 = vpop.f32.mrb[6].mxu1  ;;  %v981_v14 = vpop.f32.mrb[7].mxu0 }
 0x197   : > { %v1139_v15 = vadd.f32 %v1123_v3, %v1107_v7  ;;  %v1138_v16 = vadd.f32 %v1122_v4, %v1106_v34  ;;  %v1087_v17 = vmul.f32 %v2153_v13, %v1056_v49  ;;  %v1086_v32 = vmul.f32 %v2153_v13, %v981_v14  ;;  %v1058_v18 = vpop.f32.mrb[7].mxu1 }
 0x198   : > { %v1153_v19 = vmax.f32 %v1137_v11, 0.0  ;;  %v1140_v20 = vadd.f32 %v1124_v9, %v1108_v47  ;;  %v1113_v8 = vadd.f32 %v2162_v21, %v1085_v12  ;;  %v1088_v24 = vmul.f32 %v2153_v13, %v1058_v18 }
 0x199   : > { %v1155_v25 = vmax.f32 %v1139_v15, 0.0  ;;  %v1154_v26 = vmax.f32 %v1138_v16, 0.0  ;;  %v1115_v27 = vadd.f32 %v2162_v21, %v1087_v17  ;;  %v1114_v28 = vadd.f32 %v2162_v21, %v1086_v32 }
 0x19a   : > { %1169 = vst [vmem:[%s2177_s18 + $0x20] sm:$0xff] %v1153_v19  ;;  %v1156_v30 = vmax.f32 %v1140_v20, 0.0  ;;  %v1145_v31 = vadd.f32 %v1129_v6, %v1113_v8  ;;  %v1116_v33 = vadd.f32 %v2162_v21, %v1088_v24  ;;  %1187 = sbr.rel (!%p1602_p5) target bundleno = 425 (0x1a9), region = 90  ;;  %v1203_v21 = vld [vmem:[%s2177_s18] sm:$0xff] (%p1602_p5) }
 0x19b   : > { %1171 = vst [vmem:[%s2177_s18 + $0x30] sm:$0xff] %v1155_v25  ;;  %1170 = vst [vmem:[%s2177_s18 + $0x28] sm:$0xff] %v1154_v26  ;;  %v1147_v35 = vadd.f32 %v1131_v22, %v1115_v27  ;;  %v1146_v13 = vadd.f32 %v1130_v23, %v1114_v28 }
 0x19c   : > { %1172 = vst [vmem:[%s2177_s18 + $0x38] sm:$0xff] %v1156_v30  ;;  %v1161_v36 = vmax.f32 %v1145_v31, 0.0  ;;  %v1148_v37 = vadd.f32 %v1132_v29, %v1116_v33  ;;  %1204 = vst [vmem:[%s1190_s27] sm:$0xff] (%p1602_p5), %v1203_v21 }
 0x19d   : > { %v1163_v38 = vmax.f32 %v1147_v35, 0.0  ;;  %v1162_v39 = vmax.f32 %v1146_v13, 0.0 }
 0x19e   : > { %1177 = vst [vmem:[%s2177_s18 + $0x60] sm:$0xff] %v1161_v36  ;;  %v1164_v40 = vmax.f32 %v1148_v37, 0.0 }
 0x19f   : > { %1179 = vst [vmem:[%s2177_s18 + $0x70] sm:$0xff] %v1163_v38  ;;  %1178 = vst [vmem:[%s2177_s18 + $0x68] sm:$0xff] %v1162_v39 }
 0x1a0   : > { %1180 = vst [vmem:[%s2177_s18 + $0x78] sm:$0xff] %v1164_v40 }
 0x1a1   : > { %v1211_v44 = vld [vmem:[%s2177_s18 + $0x20] sm:$0xff] }
 0x1a2   : > { %v1213_v45 = vld [vmem:[%s2177_s18 + $0x28] sm:$0xff]  ;;  %1212 = vst [vmem:[%s1190_s27 + $0x20] sm:$0xff] %v1211_v44  ;;  %v1215_v46 = vld [vmem:[%s2177_s18 + $0x30] sm:$0xff] }
 0x1a3   : > { %1214 = vst [vmem:[%s1190_s27 + $0x28] sm:$0xff] %v1213_v45  ;;  %v1217_v48 = vld [vmem:[%s2177_s18 + $0x38] sm:$0xff]  ;;  %1216 = vst [vmem:[%s1190_s27 + $0x30] sm:$0xff] %v1215_v46 }
 0x1a4   : > { %1218 = vst [vmem:[%s1190_s27 + $0x38] sm:$0xff] %v1217_v48 }
 0x1a5   : > { %v1227_v54 = vld [vmem:[%s2177_s18 + $0x60] sm:$0xff] }
 0x1a6   : > { %v1229_v55 = vld [vmem:[%s2177_s18 + $0x68] sm:$0xff]  ;;  %v1231_v56 = vld [vmem:[%s2177_s18 + $0x70] sm:$0xff]  ;;  %1228 = vst [vmem:[%s1190_s27 + $0xa0] sm:$0xff] %v1227_v54 }
 0x1a7   : > { %1230 = vst [vmem:[%s1190_s27 + $0xa8] sm:$0xff] %v1229_v55  ;;  %1232 = vst [vmem:[%s1190_s27 + $0xb0] sm:$0xff] %v1231_v56  ;;  %v1233_v57 = vld [vmem:[%s2177_s18 + $0x78] sm:$0xff] }
 0x1a8   : > { %1234 = vst [vmem:[%s1190_s27 + $0xb8] sm:$0xff] %v1233_v57 }
 0x1a9 PF: > { %p12_p10 = scmp.ge.s32.totalorder %s1585_s22, 4   ;;  %s2261_s18 = smov %s1531_s19 }
 0x1aa   : > { %s2262_s19 = smov %s1596_s25  ;;  %s2263_s20 = smov %s1585_s22 }
 0x1ab   :  { %14 = sbr.rel (!%p12_p10) target bundleno = 2 (0x2), region = 152 }

// kernel: forward.21
= control target key start
LH: loop header
LB: loop body
LE: loop exit
PB: predicated region body
PF: predicated region fallthrough
CT: control target
= control target key end

     0   :  { %v487_v3 = vmov 0   ;;  %vm97_vm0 = vcmask 130048   ;;  %s839_s1 = inlined_call_operand.vmem [shape: f32[144,512], index: 1, kind: input, shape index: {}]   ;;  %s840_s0 = inlined_call_operand.vmem [shape: f32[32,144], index: 0, kind: input, shape index: {}]   ;;  %s841_s2 = inlined_call_operand.vmem [shape: f32[32,1], index: 2, kind: input, shape index: {}]   ;;  %s842_s3 = inlined_call_operand.vmem [shape: f32[32,1], index: 3, kind: input, shape index: {}]   ;;  %s843_s4 = inlined_call_operand.vmem [shape: f32[32,512], index: 4, kind: output, shape index: {}]  }
   0x1   :  { %v26_v0 = vld [vmem:[%s839_s1 + $0x8] sm:$0xff]  ;;  %v28_v2 = vld [vmem:[%s839_s1 + $0x18] sm:$0xff]  ;;  %486 = vset.pattern.permute.xlu1 %v487_v3  ;;  %485 = vset.pattern.permute.xlu0 %v487_v3  ;;  %v25_v6 = vld [vmem:[%s839_s1] sm:$0xff] }
   0x2   :  { %v30_v1 = vld [vmem:[%s839_s1 + $0x28] sm:$0xff]  ;;  %v32_v5 = vld [vmem:[%s839_s1 + $0x38] sm:$0xff]  ;;  %v29_v7 = vld [vmem:[%s839_s1 + $0x20] sm:$0xff] }
   0x3   :  { %v412_v4 = vpack.c.bf16 %v30_v1, %v26_v0  ;;  %v448_v8 = vpack.c.bf16 %v32_v5, %v28_v2  ;;  %v414_v9 = vpack.c.bf16 %v29_v7, %v25_v6  ;;  %v27_v10 = vld [vmem:[%s839_s1 + $0x10] sm:$0xff]  ;;  %v34_v12 = vld [vmem:[%s839_s1 + $0x48] sm:$0xff]  ;;  %v36_v15 = vld [vmem:[%s839_s1 + $0x58] sm:$0xff] }
   0x4   :  { %v31_v11 = vld [vmem:[%s839_s1 + $0x30] sm:$0xff]  ;;  %v38_v14 = vld [vmem:[%s839_s1 + $0x68] sm:$0xff]  ;;  %v40_v16 = vld [vmem:[%s839_s1 + $0x78] sm:$0xff] }
   0x5   :  { %413 = vmatprep.subr.bf16.mxu0 %v412_v4  ;;  %v450_v13 = vpack.c.bf16 %v31_v11, %v27_v10  ;;  %449 = vmatprep.subr.bf16.mxu1 %v448_v8  ;;  %v416_v17 = vpack.c.bf16 %v38_v14, %v34_v12  ;;  %v452_v18 = vpack.c.bf16 %v40_v16, %v36_v15  ;;  %v33_v19 = vld [vmem:[%s839_s1 + $0x40] sm:$0xff]  ;;  %v35_v21 = vld [vmem:[%s839_s1 + $0x50] sm:$0xff]  ;;  %v42_v24 = vld [vmem:[%s839_s1 + $0x88] sm:$0xff] }
   0x6   :  { %415 = vmatpush1.bf16.msra.mxu0 %v414_v9  ;;  %v37_v20 = vld [vmem:[%s839_s1 + $0x60] sm:$0xff]  ;;  %v39_v23 = vld [vmem:[%s839_s1 + $0x70] sm:$0xff]  ;;  %v46_v25 = vld [vmem:[%s839_s1 + $0xa8] sm:$0xff] }
   0x7   :  { %451 = vmatpush1.bf16.msra.mxu1 %v450_v13  ;;  %v418_v22 = vpack.c.bf16 %v37_v20, %v33_v19  ;;  %417 = vmatprep.subr.bf16.mxu0 %v416_v17  ;;  %v454_v26 = vpack.c.bf16 %v39_v23, %v35_v21  ;;  %v420_v27 = vpack.c.bf16 %v46_v25, %v42_v24  ;;  %v44_v28 = vld [vmem:[%s839_s1 + $0x98] sm:$0xff]  ;;  %v41_v30 = vld [vmem:[%s839_s1 + $0x80] sm:$0xff]  ;;  %v43_v33 = vld [vmem:[%s839_s1 + $0x90] sm:$0xff] }
   0x8   :  { %453 = vmatprep.subr.bf16.mxu1 %v452_v18  ;;  %v48_v29 = vld [vmem:[%s839_s1 + $0xb8] sm:$0xff]  ;;  %v45_v32 = vld [vmem:[%s839_s1 + $0xa0] sm:$0xff]  ;;  %v47_v34 = vld [vmem:[%s839_s1 + $0xb0] sm:$0xff] }
   0x9   :  { %v456_v31 = vpack.c.bf16 %v48_v29, %v44_v28  ;;  %v422_v35 = vpack.c.bf16 %v45_v32, %v41_v30  ;;  %v50_v36 = vld [vmem:[%s839_s1 + $0xc8] sm:$0xff]  ;;  %v52_v38 = vld [vmem:[%s839_s1 + $0xd8] sm:$0xff]  ;;  %v458_v39 = vpack.c.bf16 %v47_v34, %v43_v33  ;;  %v49_v42 = vld [vmem:[%s839_s1 + $0xc0] sm:$0xff] }
   0xa   :  { %419 = vmatpush1.bf16.msra.mxu0 %v418_v22  ;;  %v54_v37 = vld [vmem:[%s839_s1 + $0xe8] sm:$0xff]  ;;  %v56_v41 = vld [vmem:[%s839_s1 + $0xf8] sm:$0xff]  ;;  %v53_v43 = vld [vmem:[%s839_s1 + $0xe0] sm:$0xff] }
   0xb   :  { %455 = vmatpush1.bf16.msra.mxu1 %v454_v26  ;;  %421 = vmatprep.subr.bf16.mxu0 %v420_v27  ;;  %v424_v40 = vpack.c.bf16 %v54_v37, %v50_v36  ;;  %v460_v44 = vpack.c.bf16 %v56_v41, %v52_v38  ;;  %v51_v45 = vld [vmem:[%s839_s1 + $0xd0] sm:$0xff]  ;;  %v58_v47 = vld [vmem:[%s839_s1 + $0x108] sm:$0xff]  ;;  %v60_v49 = vld [vmem:[%s839_s1 + $0x118] sm:$0xff]  ;;  %v426_v51 = vpack.c.bf16 %v53_v43, %v49_v42 }
   0xc   :  { %457 = vmatprep.subr.bf16.mxu1 %v456_v31  ;;  %v55_v46 = vld [vmem:[%s839_s1 + $0xf0] sm:$0xff]  ;;  %v62_v48 = vld [vmem:[%s839_s1 + $0x128] sm:$0xff]  ;;  %v64_v50 = vld [vmem:[%s839_s1 + $0x138] sm:$0xff] }
   0xd   :  { %v462_v52 = vpack.c.bf16 %v55_v46, %v51_v45  ;;  %v428_v53 = vpack.c.bf16 %v62_v48, %v58_v47  ;;  %v57_v54 = vld [vmem:[%s839_s1 + $0x100] sm:$0xff]  ;;  %v59_v56 = vld [vmem:[%s839_s1 + $0x110] sm:$0xff]  ;;  %v464_v57 = vpack.c.bf16 %v64_v50, %v60_v49  ;;  %v66_v59 = vld [vmem:[%s839_s1 + $0x148] sm:$0xff] }
   0xe   :  { %423 = vmatpush1.bf16.msra.mxu0 %v422_v35  ;;  %v61_v55 = vld [vmem:[%s839_s1 + $0x120] sm:$0xff]  ;;  %v63_v58 = vld [vmem:[%s839_s1 + $0x130] sm:$0xff]  ;;  %v70_v60 = vld [vmem:[%s839_s1 + $0x168] sm:$0xff] }
   0xf   :  { %459 = vmatpush1.bf16.msra.mxu1 %v458_v39  ;;  %425 = vmatprep.subr.bf16.mxu0 %v424_v40  ;;  %v68_v61 = vld [vmem:[%s839_s1 + $0x158] sm:$0xff]  ;;  %v430_v63 = vpack.c.bf16 %v61_v55, %v57_v54  ;;  %v466_v0 = vpack.c.bf16 %v63_v58, %v59_v56  ;;  %v432_v1 = vpack.c.bf16 %v70_v60, %v66_v59  ;;  %v65_v2 = vld [vmem:[%s839_s1 + $0x140] sm:$0xff]  ;;  %v67_v4 = vld [vmem:[%s839_s1 + $0x150] sm:$0xff] }
  0x10   :  { %461 = vmatprep.subr.bf16.mxu1 %v460_v44  ;;  %v72_v62 = vld [vmem:[%s839_s1 + $0x178] sm:$0xff]  ;;  %v69_v3 = vld [vmem:[%s839_s1 + $0x160] sm:$0xff]  ;;  %v71_v6 = vld [vmem:[%s839_s1 + $0x170] sm:$0xff] }
  0x11   :  { %v468_v5 = vpack.c.bf16 %v72_v62, %v68_v61  ;;  %v74_v7 = vld [vmem:[%s839_s1 + $0x188] sm:$0xff]  ;;  %v76_v9 = vld [vmem:[%s839_s1 + $0x198] sm:$0xff]  ;;  %v434_v11 = vpack.c.bf16 %v69_v3, %v65_v2  ;;  %v470_v12 = vpack.c.bf16 %v71_v6, %v67_v4  ;;  %v73_v14 = vld [vmem:[%s839_s1 + $0x180] sm:$0xff] }
  0x12   :  { %427 = vmatpush1.bf16.msra.mxu0 %v426_v51  ;;  %v78_v8 = vld [vmem:[%s839_s1 + $0x1a8] sm:$0xff]  ;;  %v80_v10 = vld [vmem:[%s839_s1 + $0x1b8] sm:$0xff]  ;;  %v77_v15 = vld [vmem:[%s839_s1 + $0x1a0] sm:$0xff] }
  0x13   :  { %463 = vmatpush1.bf16.msra.mxu1 %v462_v52  ;;  %429 = vmatprep.subr.bf16.mxu0 %v428_v53  ;;  %v436_v13 = vpack.c.bf16 %v78_v8, %v74_v7  ;;  %v75_v16 = vld [vmem:[%s839_s1 + $0x190] sm:$0xff]  ;;  %v472_v17 = vpack.c.bf16 %v80_v10, %v76_v9  ;;  %v82_v19 = vld [vmem:[%s839_s1 + $0x1c8] sm:$0xff]  ;;  %v84_v21 = vld [vmem:[%s839_s1 + $0x1d8] sm:$0xff]  ;;  %v438_v23 = vpack.c.bf16 %v77_v15, %v73_v14 }
  0x14   :  { %465 = vmatprep.subr.bf16.mxu1 %v464_v57  ;;  %v79_v18 = vld [vmem:[%s839_s1 + $0x1b0] sm:$0xff]  ;;  %v86_v20 = vld [vmem:[%s839_s1 + $0x1e8] sm:$0xff]  ;;  %v88_v22 = vld [vmem:[%s839_s1 + $0x1f8] sm:$0xff] }
  0x15   :  { %v81_v24 = vld [vmem:[%s839_s1 + $0x1c0] sm:$0xff]  ;;  %v18_v25 = vld [vmem:[%s840_s0 + $0x8] sm:$0xff]  ;;  %v474_v26 = vpack.c.bf16 %v79_v18, %v75_v16  ;;  %v440_v27 = vpack.c.bf16 %v86_v20, %v82_v19  ;;  %v83_v29 = vld [vmem:[%s839_s1 + $0x1d0] sm:$0xff]  ;;  %v476_v31 = vpack.c.bf16 %v88_v22, %v84_v21 }
  0x16   :  { %431 = vmatpush1.bf16.msra.mxu0 %v430_v63  ;;  %v85_v28 = vld [vmem:[%s839_s1 + $0x1e0] sm:$0xff]  ;;  %v87_v30 = vld [vmem:[%s839_s1 + $0x1f0] sm:$0xff]  ;;  %v90_v32 = vld [vmem:[%s839_s1 + $0x208] sm:$0xff]  ;;  %404 = vmatprep.mubr.msk.f32.mxu0 %vm97_vm0, %v18_v25 }
  0x17   :  { %467 = vmatpush1.bf16.msra.mxu1 %v466_v0  ;;  %433 = vmatprep.subr.bf16.mxu0 %v432_v1  ;;  %v94_v33 = vld [vmem:[%s839_s1 + $0x228] sm:$0xff]  ;;  %v290_v34 = vld [vmem:[%s841_s2 + $0x10] sm:$0xff]  ;;  %v92_v35 = vld [vmem:[%s839_s1 + $0x218] sm:$0xff]  ;;  %v442_v38 = vpack.c.bf16 %v85_v28, %v81_v24  ;;  %v478_v40 = vpack.c.bf16 %v87_v30, %v83_v29 }
  0x18   :  { %469 = vmatprep.subr.bf16.mxu1 %v468_v5  ;;  %v96_v36 = vld [vmem:[%s839_s1 + $0x238] sm:$0xff]  ;;  %408 = vmatprep.mubr.msk.f32.mxu1 %vm97_vm0, %v18_v25  ;;  %v288_v37 = vld [vmem:[%s841_s2] sm:$0xff]  ;;  %v444_v41 = vpack.c.bf16 %v94_v33, %v90_v32  ;;  %v289_v44 = vld [vmem:[%s841_s2 + $0x8] sm:$0xff] }
  0x19   :  { %304 = vperm.xlu1 %486, %v290_v34   ;;  %294 = vperm.xlu0 %485, %v288_v37   ;;  %v291_v39 = vld [vmem:[%s841_s2 + $0x18] sm:$0xff]  ;;  %v89_v42 = vld [vmem:[%s839_s1 + $0x200] sm:$0xff]  ;;  %v480_v45 = vpack.c.bf16 %v96_v36, %v92_v35  ;;  %v91_v46 = vld [vmem:[%s839_s1 + $0x210] sm:$0xff] }
  0x1a   :  { %435 = vmatpush1.bf16.msra.mxu0 %v434_v11  ;;  %v93_v43 = vld [vmem:[%s839_s1 + $0x220] sm:$0xff]  ;;  %v95_v47 = vld [vmem:[%s839_s1 + $0x230] sm:$0xff]  ;;  %v329_v49 = vld [vmem:[%s842_s3 + $0x8] sm:$0xff] }
  0x1b   :  { %471 = vmatpush1.bf16.msra.mxu1 %v470_v12  ;;  %437 = vmatprep.subr.bf16.mxu0 %v436_v13  ;;  %v446_v48 = vpack.c.bf16 %v93_v43, %v89_v42  ;;  %v482_v50 = vpack.c.bf16 %v95_v47, %v91_v46  ;;  %v328_v51 = vld [vmem:[%s842_s3] sm:$0xff]  ;;  %v331_v53 = vld [vmem:[%s842_s3 + $0x18] sm:$0xff]  ;;  %v330_v55 = vld [vmem:[%s842_s3 + $0x10] sm:$0xff] }
  0x1c   :  { %473 = vmatprep.subr.bf16.mxu1 %v472_v17  ;;  %v17_v52 = vld [vmem:[%s840_s0] sm:$0xff]  ;;  %v20_v54 = vld [vmem:[%s840_s0 + $0x18] sm:$0xff]  ;;  %v19_v56 = vld [vmem:[%s840_s0 + $0x10] sm:$0xff] }
  0x1d   :  { %309 = vperm.xlu1 %486, %v291_v39   ;;  %299 = vperm.xlu0 %485, %v289_v44   ;;  %v22_v57 = vld [vmem:[%s840_s0 + $0x28] sm:$0xff]  ;;  %v21_v58 = vld [vmem:[%s840_s0 + $0x20] sm:$0xff]  ;;  %v24_v59 = vld [vmem:[%s840_s0 + $0x38] sm:$0xff] }
  0x1e   :  { %439 = vmatpush1.bf16.msra.mxu0 %v438_v23  ;;  %v23_v60 = vld [vmem:[%s840_s0 + $0x30] sm:$0xff] }
  0x1f   :  { %475 = vmatpush1.bf16.msra.mxu1 %v474_v26  ;;  %441 = vmatprep.subr.bf16.mxu0 %v440_v27 }
  0x20   :  { %477 = vmatprep.subr.bf16.mxu1 %v476_v31 }
  0x21   :  { %339 = vperm.xlu1 %486, %v329_v49   ;;  %334 = vperm.xlu0 %485, %v328_v51  }
  0x22   :  { %443 = vmatpush1.bf16.msra.mxu0 %v442_v38 }
  0x23   :  { %479 = vmatpush1.bf16.msra.mxu1 %v478_v40  ;;  %445 = vmatprep.subr.bf16.mxu0 %v444_v41 }
  0x24   :  { %481 = vmatprep.subr.bf16.mxu1 %v480_v45 }
  0x25   :  { %349 = vperm.xlu1 %486, %v331_v53   ;;  %344 = vperm.xlu0 %485, %v330_v55  }
  0x26   :  { %447 = vmatpush1.bf16.msra.mxu0 %v446_v48 }
  0x27   :  { %483 = vmatpush1.bf16.msra.mxu1 %v482_v50 }
  0x29   :  { %175 = vmatmul.mubr.f32.vlgmr.msra.gmra.mrb[0].mxu0 %v17_v52 }
  0x2a   :  { %264 = vmatmul.mubr.f32.vlgmr.msra.gmra.mrb[0].mxu1 %v17_v52  ;;  %405 = vmatprep.mubr.msk.f32.mxu0 %vm97_vm0, %v20_v54 }
  0x2b   :  { %409 = vmatprep.mubr.msk.f32.mxu1 %vm97_vm0, %v20_v54 }
  0x2d   :  { %181 = vmatmul.mubr.f32.gmra.mrb[2].mxu0 %v19_v56 }
  0x2e   :  { %270 = vmatmul.mubr.f32.gmra.mrb[2].mxu1 %v19_v56  ;;  %406 = vmatprep.mubr.msk.f32.mxu0 %vm97_vm0, %v22_v57 }
  0x2f   :  { %410 = vmatprep.mubr.msk.f32.mxu1 %vm97_vm0, %v22_v57 }
  0x31   :  { %187 = vmatmul.mubr.f32.gmra.mrb[4].mxu0 %v21_v58 }
  0x32   :  { %276 = vmatmul.mubr.f32.gmra.mrb[4].mxu1 %v21_v58  ;;  %407 = vmatprep.mubr.msk.f32.mxu0 %vm97_vm0, %v24_v59 }
  0x33   :  { %411 = vmatprep.mubr.msk.f32.mxu1 %vm97_vm0, %v24_v59 }
  0x35   :  { %193 = vmatmul.mubr.f32.gmra.mrb[6].mxu0 %v23_v60 }
  0x36   :  { %282 = vmatmul.mubr.f32.gmra.mrb[6].mxu1 %v23_v60 }
  0x98   :  { %v295_v61 = vpop.permute.xlu0 %294  ;;  %v305_v62 = vpop.permute.xlu1 %304 }
  0x9c   :  { %v300_v63 = vpop.permute.xlu0 %299  ;;  %v785_v0 = vpop.permute.xlu1 %309 }
  0xa0   :  { %v335_v5 = vpop.permute.xlu0 %334  ;;  %v340_v19 = vpop.permute.xlu1 %339 }
  0xa4   :  { %v345_v36 = vpop.permute.xlu0 %344  ;;  %v350_v53 = vpop.permute.xlu1 %349 }
  0xfc   :  { %v176_v1 = vpop.f32.mrb[0].mxu0 }
  0xfd   :  { %v312_v2 = vmul.f32 %v295_v61, %v176_v1  ;;  %v265_v3 = vpop.f32.mrb[0].mxu1  ;;  %v178_v4 = vpop.f32.mrb[1].mxu0 }
  0xfe   :  { %v314_v6 = vmul.f32 %v295_v61, %v265_v3  ;;  %v313_v7 = vmul.f32 %v295_v61, %v178_v4  ;;  %v267_v8 = vpop.f32.mrb[1].mxu1 }
  0xff   :  { %v352_v9 = vadd.f32 %v335_v5, %v312_v2  ;;  %v315_v10 = vmul.f32 %v295_v61, %v267_v8 }
 0x100   :  { %v354_v11 = vadd.f32 %v335_v5, %v314_v6  ;;  %v353_v12 = vadd.f32 %v335_v5, %v313_v7  ;;  %v182_v13 = vpop.f32.mrb[2].mxu0 }
 0x101   :  { %v368_v14 = vmax.f32 %v352_v9, 0.0  ;;  %v355_v15 = vadd.f32 %v335_v5, %v315_v10  ;;  %v316_v16 = vmul.f32 %v300_v63, %v182_v13  ;;  %v271_v17 = vpop.f32.mrb[2].mxu1  ;;  %v184_v18 = vpop.f32.mrb[3].mxu0 }
 0x102   :  { %v370_v20 = vmax.f32 %v354_v11, 0.0  ;;  %v369_v21 = vmax.f32 %v353_v12, 0.0  ;;  %v318_v22 = vmul.f32 %v300_v63, %v271_v17  ;;  %v317_v23 = vmul.f32 %v300_v63, %v184_v18  ;;  %v273_v24 = vpop.f32.mrb[3].mxu1 }
 0x103   :  { %384 = vst [vmem:[%s843_s4] sm:$0xff] %v368_v14  ;;  %v371_v25 = vmax.f32 %v355_v15, 0.0  ;;  %v356_v26 = vadd.f32 %v340_v19, %v316_v16  ;;  %v319_v27 = vmul.f32 %v300_v63, %v273_v24 }
 0x104   :  { %386 = vst [vmem:[%s843_s4 + $0x10] sm:$0xff] %v370_v20  ;;  %385 = vst [vmem:[%s843_s4 + $0x8] sm:$0xff] %v369_v21  ;;  %v358_v28 = vadd.f32 %v340_v19, %v318_v22  ;;  %v357_v29 = vadd.f32 %v340_v19, %v317_v23  ;;  %v188_v30 = vpop.f32.mrb[4].mxu0 }
 0x105   :  { %387 = vst [vmem:[%s843_s4 + $0x18] sm:$0xff] %v371_v25  ;;  %v372_v31 = vmax.f32 %v356_v26, 0.0  ;;  %v359_v32 = vadd.f32 %v340_v19, %v319_v27  ;;  %v320_v33 = vmul.f32 %v305_v62, %v188_v30  ;;  %v277_v34 = vpop.f32.mrb[4].mxu1  ;;  %v190_v35 = vpop.f32.mrb[5].mxu0 }
 0x106   :  { %v374_v37 = vmax.f32 %v358_v28, 0.0  ;;  %v373_v38 = vmax.f32 %v357_v29, 0.0  ;;  %v322_v39 = vmul.f32 %v305_v62, %v277_v34  ;;  %v321_v40 = vmul.f32 %v305_v62, %v190_v35  ;;  %v279_v41 = vpop.f32.mrb[5].mxu1 }
 0x107   :  { %388 = vst [vmem:[%s843_s4 + $0x20] sm:$0xff] %v372_v31  ;;  %v375_v42 = vmax.f32 %v359_v32, 0.0  ;;  %v360_v43 = vadd.f32 %v345_v36, %v320_v33  ;;  %v323_v44 = vmul.f32 %v305_v62, %v279_v41 }
 0x108   :  { %390 = vst [vmem:[%s843_s4 + $0x30] sm:$0xff] %v374_v37  ;;  %389 = vst [vmem:[%s843_s4 + $0x28] sm:$0xff] %v373_v38  ;;  %v362_v45 = vadd.f32 %v345_v36, %v322_v39  ;;  %v361_v46 = vadd.f32 %v345_v36, %v321_v40  ;;  %v194_v47 = vpop.f32.mrb[6].mxu0 }
 0x109   :  { %391 = vst [vmem:[%s843_s4 + $0x38] sm:$0xff] %v375_v42  ;;  %v376_v48 = vmax.f32 %v360_v43, 0.0  ;;  %v363_v49 = vadd.f32 %v345_v36, %v323_v44  ;;  %v324_v50 = vmul.f32 %v785_v0, %v194_v47  ;;  %v283_v51 = vpop.f32.mrb[6].mxu1  ;;  %v196_v52 = vpop.f32.mrb[7].mxu0 }
 0x10a   :  { %v378_v54 = vmax.f32 %v362_v45, 0.0  ;;  %v377_v55 = vmax.f32 %v361_v46, 0.0  ;;  %v326_v56 = vmul.f32 %v785_v0, %v283_v51  ;;  %v325_v57 = vmul.f32 %v785_v0, %v196_v52  ;;  %v285_v58 = vpop.f32.mrb[7].mxu1 }
 0x10b   :  { %392 = vst [vmem:[%s843_s4 + $0x40] sm:$0xff] %v376_v48  ;;  %v379_v59 = vmax.f32 %v363_v49, 0.0  ;;  %v364_v60 = vadd.f32 %v350_v53, %v324_v50  ;;  %v327_v61 = vmul.f32 %v785_v0, %v285_v58 }
 0x10c   :  { %394 = vst [vmem:[%s843_s4 + $0x50] sm:$0xff] %v378_v54  ;;  %393 = vst [vmem:[%s843_s4 + $0x48] sm:$0xff] %v377_v55  ;;  %v366_v62 = vadd.f32 %v350_v53, %v326_v56  ;;  %v365_v63 = vadd.f32 %v350_v53, %v325_v57 }
 0x10d   :  { %395 = vst [vmem:[%s843_s4 + $0x58] sm:$0xff] %v379_v59  ;;  %v380_v1 = vmax.f32 %v364_v60, 0.0  ;;  %v367_v2 = vadd.f32 %v350_v53, %v327_v61 }
 0x10e   :  { %v382_v3 = vmax.f32 %v366_v62, 0.0  ;;  %v381_v4 = vmax.f32 %v365_v63, 0.0 }
 0x10f   :  { %396 = vst [vmem:[%s843_s4 + $0x60] sm:$0xff] %v380_v1  ;;  %v383_v0 = vmax.f32 %v367_v2, 0.0 }
 0x110   :  { %398 = vst [vmem:[%s843_s4 + $0x70] sm:$0xff] %v382_v3  ;;  %397 = vst [vmem:[%s843_s4 + $0x68] sm:$0xff] %v381_v4 }
 0x111   :  { %399 = vst [vmem:[%s843_s4 + $0x78] sm:$0xff] %v383_v0 }

// kernel: forward.22
= control target key start
LH: loop header
LB: loop body
LE: loop exit
PB: predicated region body
PF: predicated region fallthrough
CT: control target
= control target key end

     0   :  { %v340_v3 = vmov 0.0   ;;  %v341_v8 = vmov 0   ;;  %vm29_vm0 = vcmask 130048   ;;  %s483_s1 = inlined_call_operand.vmem [shape: f32[16,512], index: 1, kind: input, shape index: {}]   ;;  %s484_s0 = inlined_call_operand.vmem [shape: f32[32,16], index: 0, kind: input, shape index: {}]   ;;  %s485_s2 = inlined_call_operand.vmem [shape: f32[32,1], index: 2, kind: input, shape index: {}]   ;;  %s486_s3 = inlined_call_operand.vmem [shape: f32[32,1], index: 3, kind: input, shape index: {}]   ;;  %s487_s4 = inlined_call_operand.vmem [shape: f32[32,512], index: 4, kind: output, shape index: {}]  }
   0x1   :  { %v22_v0 = vld [vmem:[%s483_s1 + $0x8] sm:$0xff]  ;;  %v24_v2 = vld [vmem:[%s483_s1 + $0x18] sm:$0xff]  ;;  %106 = vmatprep.mubr.f32.mxu0 %v340_v3  ;;  %195 = vmatprep.mubr.f32.mxu1 %v340_v3  ;;  %v21_v6 = vld [vmem:[%s483_s1] sm:$0xff] }
   0x2   :  { %v26_v1 = vld [vmem:[%s483_s1 + $0x28] sm:$0xff]  ;;  %v28_v5 = vld [vmem:[%s483_s1 + $0x38] sm:$0xff]  ;;  %v25_v7 = vld [vmem:[%s483_s1 + $0x20] sm:$0xff]  ;;  %339 = vset.pattern.permute.xlu1 %v341_v8  ;;  %338 = vset.pattern.permute.xlu0 %v341_v8 }
   0x3   :  { %v328_v4 = vpack.c.bf16 %v26_v1, %v22_v0  ;;  %v332_v9 = vpack.c.bf16 %v28_v5, %v24_v2  ;;  %v330_v10 = vpack.c.bf16 %v25_v7, %v21_v6  ;;  %v23_v11 = vld [vmem:[%s483_s1 + $0x10] sm:$0xff]  ;;  %v17_v14 = vld [vmem:[%s484_s0] sm:$0xff]  ;;  %v223_v17 = vld [vmem:[%s485_s2 + $0x18] sm:$0xff] }
   0x4   :  { %v27_v12 = vld [vmem:[%s483_s1 + $0x30] sm:$0xff]  ;;  %v220_v16 = vld [vmem:[%s485_s2] sm:$0xff]  ;;  %v221_v18 = vld [vmem:[%s485_s2 + $0x8] sm:$0xff] }
   0x5   :  { %329 = vmatprep.subr.bf16.mxu0 %v328_v4  ;;  %v334_v13 = vpack.c.bf16 %v27_v12, %v23_v11  ;;  %333 = vmatprep.subr.bf16.mxu1 %v332_v9  ;;  %v222_v15 = vld [vmem:[%s485_s2 + $0x10] sm:$0xff]  ;;  %v18_v19 = vld [vmem:[%s484_s0 + $0x8] sm:$0xff]  ;;  %v260_v21 = vld [vmem:[%s486_s3] sm:$0xff] }
   0x6   :  { %331 = vmatpush1.bf16.msra.mxu0 %v330_v10  ;;  %236 = vperm.xlu1 %339, %v222_v15   ;;  %v261_v20 = vld [vmem:[%s486_s3 + $0x8] sm:$0xff]  ;;  %v19_v22 = vld [vmem:[%s484_s0 + $0x10] sm:$0xff]  ;;  %v263_v23 = vld [vmem:[%s486_s3 + $0x18] sm:$0xff] }
   0x7   :  { %335 = vmatpush1.bf16.msra.mxu1 %v334_v13  ;;  %226 = vperm.xlu0 %338, %v220_v16   ;;  %v262_v24 = vld [vmem:[%s486_s3 + $0x10] sm:$0xff]  ;;  %v20_v25 = vld [vmem:[%s484_s0 + $0x18] sm:$0xff] }
   0x9   :  { %320 = vmatmul.mubr.msk.f32.vlgmr.msra.gmra.mrb[0].mxu0 %vm29_vm0, %v17_v14 }
   0xa   :  { %324 = vmatmul.mubr.msk.f32.vlgmr.msra.gmra.mrb[0].mxu1 %vm29_vm0, %v17_v14  ;;  %112 = vmatprep.mubr.f32.mxu0 %v340_v3 }
   0xb   :  { %201 = vmatprep.mubr.f32.mxu1 %v340_v3  ;;  %241 = vperm.xlu1 %339, %v223_v17  }
   0xc   :  { %231 = vperm.xlu0 %338, %v221_v18  }
   0xd   :  { %321 = vmatmul.mubr.msk.f32.gmra.mrb[2].mxu0 %vm29_vm0, %v18_v19 }
   0xe   :  { %325 = vmatmul.mubr.msk.f32.gmra.mrb[2].mxu1 %vm29_vm0, %v18_v19  ;;  %118 = vmatprep.mubr.f32.mxu0 %v340_v3 }
   0xf   :  { %207 = vmatprep.mubr.f32.mxu1 %v340_v3  ;;  %271 = vperm.xlu1 %339, %v261_v20  }
  0x10   :  { %266 = vperm.xlu0 %338, %v260_v21  }
  0x11   :  { %322 = vmatmul.mubr.msk.f32.gmra.mrb[4].mxu0 %vm29_vm0, %v19_v22 }
  0x12   :  { %326 = vmatmul.mubr.msk.f32.gmra.mrb[4].mxu1 %vm29_vm0, %v19_v22  ;;  %124 = vmatprep.mubr.f32.mxu0 %v340_v3 }
  0x13   :  { %213 = vmatprep.mubr.f32.mxu1 %v340_v3  ;;  %281 = vperm.xlu1 %339, %v263_v23  }
  0x14   :  { %276 = vperm.xlu0 %338, %v262_v24  }
  0x15   :  { %323 = vmatmul.mubr.msk.f32.gmra.mrb[6].mxu0 %vm29_vm0, %v20_v25 }
  0x16   :  { %327 = vmatmul.mubr.msk.f32.gmra.mrb[6].mxu1 %vm29_vm0, %v20_v25 }
  0x85   :  { %v237_v27 = vpop.permute.xlu1 %236 }
  0x86   :  { %v227_v26 = vpop.permute.xlu0 %226 }
  0x8a   :  { %v242_v29 = vpop.permute.xlu1 %241 }
  0x8b   :  { %v232_v28 = vpop.permute.xlu0 %231 }
  0x8e   :  { %v272_v47 = vpop.permute.xlu1 %271 }
  0x8f   :  { %v267_v34 = vpop.permute.xlu0 %266 }
  0x92   :  { %v282_v9 = vpop.permute.xlu1 %281 }
  0x93   :  { %v277_v60 = vpop.permute.xlu0 %276 }
  0xdc   :  { %v108_v30 = vpop.f32.mrb[0].mxu0 }
  0xdd   :  { %v244_v31 = vmul.f32 %v227_v26, %v108_v30  ;;  %v197_v32 = vpop.f32.mrb[0].mxu1  ;;  %v110_v33 = vpop.f32.mrb[1].mxu0 }
  0xde   :  { %v246_v35 = vmul.f32 %v227_v26, %v197_v32  ;;  %v245_v36 = vmul.f32 %v227_v26, %v110_v33  ;;  %v199_v37 = vpop.f32.mrb[1].mxu1 }
  0xdf   :  { %v284_v38 = vadd.f32 %v267_v34, %v244_v31  ;;  %v247_v39 = vmul.f32 %v227_v26, %v199_v37 }
  0xe0   :  { %v286_v40 = vadd.f32 %v267_v34, %v246_v35  ;;  %v285_v41 = vadd.f32 %v267_v34, %v245_v36  ;;  %v114_v42 = vpop.f32.mrb[2].mxu0 }
  0xe1   :  { %300 = vst [vmem:[%s487_s4] sm:$0xff] %v284_v38  ;;  %v287_v43 = vadd.f32 %v267_v34, %v247_v39  ;;  %v248_v44 = vmul.f32 %v232_v28, %v114_v42  ;;  %v203_v45 = vpop.f32.mrb[2].mxu1  ;;  %v116_v46 = vpop.f32.mrb[3].mxu0 }
  0xe2   :  { %302 = vst [vmem:[%s487_s4 + $0x10] sm:$0xff] %v286_v40  ;;  %301 = vst [vmem:[%s487_s4 + $0x8] sm:$0xff] %v285_v41  ;;  %v250_v48 = vmul.f32 %v232_v28, %v203_v45  ;;  %v249_v49 = vmul.f32 %v232_v28, %v116_v46  ;;  %v205_v50 = vpop.f32.mrb[3].mxu1 }
  0xe3   :  { %303 = vst [vmem:[%s487_s4 + $0x18] sm:$0xff] %v287_v43  ;;  %v288_v51 = vadd.f32 %v272_v47, %v248_v44  ;;  %v251_v52 = vmul.f32 %v232_v28, %v205_v50 }
  0xe4   :  { %v290_v53 = vadd.f32 %v272_v47, %v250_v48  ;;  %v289_v54 = vadd.f32 %v272_v47, %v249_v49  ;;  %v120_v55 = vpop.f32.mrb[4].mxu0 }
  0xe5   :  { %304 = vst [vmem:[%s487_s4 + $0x20] sm:$0xff] %v288_v51  ;;  %v291_v56 = vadd.f32 %v272_v47, %v251_v52  ;;  %v252_v57 = vmul.f32 %v237_v27, %v120_v55  ;;  %v209_v58 = vpop.f32.mrb[4].mxu1  ;;  %v122_v59 = vpop.f32.mrb[5].mxu0 }
  0xe6   :  { %306 = vst [vmem:[%s487_s4 + $0x30] sm:$0xff] %v290_v53  ;;  %305 = vst [vmem:[%s487_s4 + $0x28] sm:$0xff] %v289_v54  ;;  %v254_v61 = vmul.f32 %v237_v27, %v209_v58  ;;  %v253_v62 = vmul.f32 %v237_v27, %v122_v59  ;;  %v211_v63 = vpop.f32.mrb[5].mxu1 }
  0xe7   :  { %307 = vst [vmem:[%s487_s4 + $0x38] sm:$0xff] %v291_v56  ;;  %v292_v0 = vadd.f32 %v277_v60, %v252_v57  ;;  %v255_v1 = vmul.f32 %v237_v27, %v211_v63 }
  0xe8   :  { %v294_v2 = vadd.f32 %v277_v60, %v254_v61  ;;  %v293_v3 = vadd.f32 %v277_v60, %v253_v62  ;;  %v126_v4 = vpop.f32.mrb[6].mxu0 }
  0xe9   :  { %308 = vst [vmem:[%s487_s4 + $0x40] sm:$0xff] %v292_v0  ;;  %v295_v5 = vadd.f32 %v277_v60, %v255_v1  ;;  %v256_v6 = vmul.f32 %v242_v29, %v126_v4  ;;  %v215_v7 = vpop.f32.mrb[6].mxu1  ;;  %v128_v8 = vpop.f32.mrb[7].mxu0 }
  0xea   :  { %310 = vst [vmem:[%s487_s4 + $0x50] sm:$0xff] %v294_v2  ;;  %309 = vst [vmem:[%s487_s4 + $0x48] sm:$0xff] %v293_v3  ;;  %v258_v10 = vmul.f32 %v242_v29, %v215_v7  ;;  %v257_v11 = vmul.f32 %v242_v29, %v128_v8  ;;  %v217_v12 = vpop.f32.mrb[7].mxu1 }
  0xeb   :  { %311 = vst [vmem:[%s487_s4 + $0x58] sm:$0xff] %v295_v5  ;;  %v296_v13 = vadd.f32 %v282_v9, %v256_v6  ;;  %v259_v14 = vmul.f32 %v242_v29, %v217_v12 }
  0xec   :  { %v298_v15 = vadd.f32 %v282_v9, %v258_v10  ;;  %v297_v16 = vadd.f32 %v282_v9, %v257_v11 }
  0xed   :  { %312 = vst [vmem:[%s487_s4 + $0x60] sm:$0xff] %v296_v13  ;;  %v299_v17 = vadd.f32 %v282_v9, %v259_v14 }
  0xee   :  { %314 = vst [vmem:[%s487_s4 + $0x70] sm:$0xff] %v298_v15  ;;  %313 = vst [vmem:[%s487_s4 + $0x68] sm:$0xff] %v297_v16 }
  0xef   :  { %315 = vst [vmem:[%s487_s4 + $0x78] sm:$0xff] %v299_v17 }

// kernel: forward.23
= control target key start
LH: loop header
LB: loop body
LE: loop exit
PB: predicated region body
PF: predicated region fallthrough
CT: control target
= control target key end

     0   :  { %v865_v3 = vmov 0   ;;  %vm176_vm0 = vcmask 261120   ;;  %s1505_s1 = inlined_call_operand.vmem [shape: f32[288,512], index: 1, kind: input, shape index: {}]   ;;  %s1506_s0 = inlined_call_operand.vmem [shape: f32[32,288], index: 0, kind: input, shape index: {}]   ;;  %s1507_s2 = inlined_call_operand.vmem [shape: f32[32,1], index: 2, kind: input, shape index: {}]   ;;  %s1508_s3 = inlined_call_operand.vmem [shape: f32[32,1], index: 3, kind: input, shape index: {}]   ;;  %s1509_s4 = inlined_call_operand.vmem [shape: f32[32,512], index: 4, kind: input, shape index: {}]   ;;  %s1510_s5 = inlined_call_operand.vmem [shape: f32[32,512], index: 5, kind: output, shape index: {}]  }
   0x1   :  { %v33_v0 = vld [vmem:[%s1505_s1 + $0x8] sm:$0xff]  ;;  %v35_v2 = vld [vmem:[%s1505_s1 + $0x18] sm:$0xff]  ;;  %864 = vset.pattern.permute.xlu1 %v865_v3  ;;  %863 = vset.pattern.permute.xlu0 %v865_v3  ;;  %v32_v6 = vld [vmem:[%s1505_s1] sm:$0xff] }
   0x2   :  { %v37_v1 = vld [vmem:[%s1505_s1 + $0x28] sm:$0xff]  ;;  %v39_v5 = vld [vmem:[%s1505_s1 + $0x38] sm:$0xff]  ;;  %v36_v7 = vld [vmem:[%s1505_s1 + $0x20] sm:$0xff] }
   0x3   :  { %v701_v4 = vpack.c.bf16 %v37_v1, %v33_v0  ;;  %v773_v8 = vpack.c.bf16 %v39_v5, %v35_v2  ;;  %v703_v9 = vpack.c.bf16 %v36_v7, %v32_v6  ;;  %v34_v10 = vld [vmem:[%s1505_s1 + $0x10] sm:$0xff]  ;;  %v41_v12 = vld [vmem:[%s1505_s1 + $0x48] sm:$0xff]  ;;  %v43_v15 = vld [vmem:[%s1505_s1 + $0x58] sm:$0xff] }
   0x4   :  { %v38_v11 = vld [vmem:[%s1505_s1 + $0x30] sm:$0xff]  ;;  %v45_v14 = vld [vmem:[%s1505_s1 + $0x68] sm:$0xff]  ;;  %v47_v16 = vld [vmem:[%s1505_s1 + $0x78] sm:$0xff] }
   0x5   :  { %702 = vmatprep.subr.bf16.mxu0 %v701_v4  ;;  %v775_v13 = vpack.c.bf16 %v38_v11, %v34_v10  ;;  %774 = vmatprep.subr.bf16.mxu1 %v773_v8  ;;  %v705_v17 = vpack.c.bf16 %v45_v14, %v41_v12  ;;  %v777_v18 = vpack.c.bf16 %v47_v16, %v43_v15  ;;  %v40_v19 = vld [vmem:[%s1505_s1 + $0x40] sm:$0xff]  ;;  %v42_v21 = vld [vmem:[%s1505_s1 + $0x50] sm:$0xff]  ;;  %v49_v24 = vld [vmem:[%s1505_s1 + $0x88] sm:$0xff] }
   0x6   :  { %704 = vmatpush1.bf16.msra.mxu0 %v703_v9  ;;  %v44_v20 = vld [vmem:[%s1505_s1 + $0x60] sm:$0xff]  ;;  %v46_v23 = vld [vmem:[%s1505_s1 + $0x70] sm:$0xff]  ;;  %v53_v25 = vld [vmem:[%s1505_s1 + $0xa8] sm:$0xff] }
   0x7   :  { %776 = vmatpush1.bf16.msra.mxu1 %v775_v13  ;;  %v707_v22 = vpack.c.bf16 %v44_v20, %v40_v19  ;;  %706 = vmatprep.subr.bf16.mxu0 %v705_v17  ;;  %v779_v26 = vpack.c.bf16 %v46_v23, %v42_v21  ;;  %v709_v27 = vpack.c.bf16 %v53_v25, %v49_v24  ;;  %v51_v28 = vld [vmem:[%s1505_s1 + $0x98] sm:$0xff]  ;;  %v48_v30 = vld [vmem:[%s1505_s1 + $0x80] sm:$0xff]  ;;  %v50_v33 = vld [vmem:[%s1505_s1 + $0x90] sm:$0xff] }
   0x8   :  { %778 = vmatprep.subr.bf16.mxu1 %v777_v18  ;;  %v55_v29 = vld [vmem:[%s1505_s1 + $0xb8] sm:$0xff]  ;;  %v52_v32 = vld [vmem:[%s1505_s1 + $0xa0] sm:$0xff]  ;;  %v54_v34 = vld [vmem:[%s1505_s1 + $0xb0] sm:$0xff] }
   0x9   :  { %v781_v31 = vpack.c.bf16 %v55_v29, %v51_v28  ;;  %v711_v35 = vpack.c.bf16 %v52_v32, %v48_v30  ;;  %v57_v36 = vld [vmem:[%s1505_s1 + $0xc8] sm:$0xff]  ;;  %v59_v38 = vld [vmem:[%s1505_s1 + $0xd8] sm:$0xff]  ;;  %v783_v39 = vpack.c.bf16 %v54_v34, %v50_v33  ;;  %v56_v42 = vld [vmem:[%s1505_s1 + $0xc0] sm:$0xff] }
   0xa   :  { %708 = vmatpush1.bf16.msra.mxu0 %v707_v22  ;;  %v61_v37 = vld [vmem:[%s1505_s1 + $0xe8] sm:$0xff]  ;;  %v63_v41 = vld [vmem:[%s1505_s1 + $0xf8] sm:$0xff]  ;;  %v60_v43 = vld [vmem:[%s1505_s1 + $0xe0] sm:$0xff] }
   0xb   :  { %780 = vmatpush1.bf16.msra.mxu1 %v779_v26  ;;  %710 = vmatprep.subr.bf16.mxu0 %v709_v27  ;;  %v713_v40 = vpack.c.bf16 %v61_v37, %v57_v36  ;;  %v785_v44 = vpack.c.bf16 %v63_v41, %v59_v38  ;;  %v58_v45 = vld [vmem:[%s1505_s1 + $0xd0] sm:$0xff]  ;;  %v65_v47 = vld [vmem:[%s1505_s1 + $0x108] sm:$0xff]  ;;  %v67_v49 = vld [vmem:[%s1505_s1 + $0x118] sm:$0xff]  ;;  %v715_v51 = vpack.c.bf16 %v60_v43, %v56_v42 }
   0xc   :  { %782 = vmatprep.subr.bf16.mxu1 %v781_v31  ;;  %v62_v46 = vld [vmem:[%s1505_s1 + $0xf0] sm:$0xff]  ;;  %v69_v48 = vld [vmem:[%s1505_s1 + $0x128] sm:$0xff]  ;;  %v71_v50 = vld [vmem:[%s1505_s1 + $0x138] sm:$0xff] }
   0xd   :  { %v787_v52 = vpack.c.bf16 %v62_v46, %v58_v45  ;;  %v717_v53 = vpack.c.bf16 %v69_v48, %v65_v47  ;;  %v64_v54 = vld [vmem:[%s1505_s1 + $0x100] sm:$0xff]  ;;  %v66_v56 = vld [vmem:[%s1505_s1 + $0x110] sm:$0xff]  ;;  %v789_v57 = vpack.c.bf16 %v71_v50, %v67_v49  ;;  %v73_v59 = vld [vmem:[%s1505_s1 + $0x148] sm:$0xff] }
   0xe   :  { %712 = vmatpush1.bf16.msra.mxu0 %v711_v35  ;;  %v68_v55 = vld [vmem:[%s1505_s1 + $0x120] sm:$0xff]  ;;  %v70_v58 = vld [vmem:[%s1505_s1 + $0x130] sm:$0xff]  ;;  %v77_v60 = vld [vmem:[%s1505_s1 + $0x168] sm:$0xff] }
   0xf   :  { %784 = vmatpush1.bf16.msra.mxu1 %v783_v39  ;;  %714 = vmatprep.subr.bf16.mxu0 %v713_v40  ;;  %v75_v61 = vld [vmem:[%s1505_s1 + $0x158] sm:$0xff]  ;;  %v719_v63 = vpack.c.bf16 %v68_v55, %v64_v54  ;;  %v791_v0 = vpack.c.bf16 %v70_v58, %v66_v56  ;;  %v721_v1 = vpack.c.bf16 %v77_v60, %v73_v59  ;;  %v72_v2 = vld [vmem:[%s1505_s1 + $0x140] sm:$0xff]  ;;  %v74_v4 = vld [vmem:[%s1505_s1 + $0x150] sm:$0xff] }
  0x10   :  { %786 = vmatprep.subr.bf16.mxu1 %v785_v44  ;;  %v79_v62 = vld [vmem:[%s1505_s1 + $0x178] sm:$0xff]  ;;  %v76_v3 = vld [vmem:[%s1505_s1 + $0x160] sm:$0xff]  ;;  %v78_v6 = vld [vmem:[%s1505_s1 + $0x170] sm:$0xff] }
  0x11   :  { %v793_v5 = vpack.c.bf16 %v79_v62, %v75_v61  ;;  %v81_v7 = vld [vmem:[%s1505_s1 + $0x188] sm:$0xff]  ;;  %v83_v9 = vld [vmem:[%s1505_s1 + $0x198] sm:$0xff]  ;;  %v723_v11 = vpack.c.bf16 %v76_v3, %v72_v2  ;;  %v795_v12 = vpack.c.bf16 %v78_v6, %v74_v4  ;;  %v80_v14 = vld [vmem:[%s1505_s1 + $0x180] sm:$0xff] }
  0x12   :  { %716 = vmatpush1.bf16.msra.mxu0 %v715_v51  ;;  %v85_v8 = vld [vmem:[%s1505_s1 + $0x1a8] sm:$0xff]  ;;  %v87_v10 = vld [vmem:[%s1505_s1 + $0x1b8] sm:$0xff]  ;;  %v84_v15 = vld [vmem:[%s1505_s1 + $0x1a0] sm:$0xff] }
  0x13   :  { %788 = vmatpush1.bf16.msra.mxu1 %v787_v52  ;;  %718 = vmatprep.subr.bf16.mxu0 %v717_v53  ;;  %v725_v13 = vpack.c.bf16 %v85_v8, %v81_v7  ;;  %v82_v16 = vld [vmem:[%s1505_s1 + $0x190] sm:$0xff]  ;;  %v797_v17 = vpack.c.bf16 %v87_v10, %v83_v9  ;;  %v89_v19 = vld [vmem:[%s1505_s1 + $0x1c8] sm:$0xff]  ;;  %v91_v21 = vld [vmem:[%s1505_s1 + $0x1d8] sm:$0xff]  ;;  %v727_v23 = vpack.c.bf16 %v84_v15, %v80_v14 }
  0x14   :  { %790 = vmatprep.subr.bf16.mxu1 %v789_v57  ;;  %v86_v18 = vld [vmem:[%s1505_s1 + $0x1b0] sm:$0xff]  ;;  %v93_v20 = vld [vmem:[%s1505_s1 + $0x1e8] sm:$0xff]  ;;  %v95_v22 = vld [vmem:[%s1505_s1 + $0x1f8] sm:$0xff] }
  0x15   :  { %v799_v24 = vpack.c.bf16 %v86_v18, %v82_v16  ;;  %v729_v25 = vpack.c.bf16 %v93_v20, %v89_v19  ;;  %v88_v26 = vld [vmem:[%s1505_s1 + $0x1c0] sm:$0xff]  ;;  %v90_v28 = vld [vmem:[%s1505_s1 + $0x1d0] sm:$0xff]  ;;  %v801_v29 = vpack.c.bf16 %v95_v22, %v91_v21  ;;  %v97_v31 = vld [vmem:[%s1505_s1 + $0x208] sm:$0xff] }
  0x16   :  { %720 = vmatpush1.bf16.msra.mxu0 %v719_v63  ;;  %v92_v27 = vld [vmem:[%s1505_s1 + $0x1e0] sm:$0xff]  ;;  %v94_v30 = vld [vmem:[%s1505_s1 + $0x1f0] sm:$0xff]  ;;  %v101_v32 = vld [vmem:[%s1505_s1 + $0x228] sm:$0xff] }
  0x17   :  { %792 = vmatpush1.bf16.msra.mxu1 %v791_v0  ;;  %722 = vmatprep.subr.bf16.mxu0 %v721_v1  ;;  %v99_v33 = vld [vmem:[%s1505_s1 + $0x218] sm:$0xff]  ;;  %v731_v35 = vpack.c.bf16 %v92_v27, %v88_v26  ;;  %v803_v36 = vpack.c.bf16 %v94_v30, %v90_v28  ;;  %v733_v37 = vpack.c.bf16 %v101_v32, %v97_v31  ;;  %v96_v38 = vld [vmem:[%s1505_s1 + $0x200] sm:$0xff]  ;;  %v98_v40 = vld [vmem:[%s1505_s1 + $0x210] sm:$0xff] }
  0x18   :  { %794 = vmatprep.subr.bf16.mxu1 %v793_v5  ;;  %v103_v34 = vld [vmem:[%s1505_s1 + $0x238] sm:$0xff]  ;;  %v100_v39 = vld [vmem:[%s1505_s1 + $0x220] sm:$0xff]  ;;  %v102_v42 = vld [vmem:[%s1505_s1 + $0x230] sm:$0xff] }
  0x19   :  { %v805_v41 = vpack.c.bf16 %v103_v34, %v99_v33  ;;  %v105_v43 = vld [vmem:[%s1505_s1 + $0x248] sm:$0xff]  ;;  %v107_v45 = vld [vmem:[%s1505_s1 + $0x258] sm:$0xff]  ;;  %v735_v47 = vpack.c.bf16 %v100_v39, %v96_v38  ;;  %v807_v48 = vpack.c.bf16 %v102_v42, %v98_v40  ;;  %v104_v50 = vld [vmem:[%s1505_s1 + $0x240] sm:$0xff] }
  0x1a   :  { %724 = vmatpush1.bf16.msra.mxu0 %v723_v11  ;;  %v109_v44 = vld [vmem:[%s1505_s1 + $0x268] sm:$0xff]  ;;  %v111_v46 = vld [vmem:[%s1505_s1 + $0x278] sm:$0xff]  ;;  %v108_v51 = vld [vmem:[%s1505_s1 + $0x260] sm:$0xff] }
  0x1b   :  { %796 = vmatpush1.bf16.msra.mxu1 %v795_v12  ;;  %726 = vmatprep.subr.bf16.mxu0 %v725_v13  ;;  %v737_v49 = vpack.c.bf16 %v109_v44, %v105_v43  ;;  %v106_v52 = vld [vmem:[%s1505_s1 + $0x250] sm:$0xff]  ;;  %v809_v53 = vpack.c.bf16 %v111_v46, %v107_v45  ;;  %v113_v55 = vld [vmem:[%s1505_s1 + $0x288] sm:$0xff]  ;;  %v115_v57 = vld [vmem:[%s1505_s1 + $0x298] sm:$0xff]  ;;  %v739_v59 = vpack.c.bf16 %v108_v51, %v104_v50 }
  0x1c   :  { %798 = vmatprep.subr.bf16.mxu1 %v797_v17  ;;  %v110_v54 = vld [vmem:[%s1505_s1 + $0x270] sm:$0xff]  ;;  %v117_v56 = vld [vmem:[%s1505_s1 + $0x2a8] sm:$0xff]  ;;  %v119_v58 = vld [vmem:[%s1505_s1 + $0x2b8] sm:$0xff] }
  0x1d   :  { %v811_v60 = vpack.c.bf16 %v110_v54, %v106_v52  ;;  %v741_v61 = vpack.c.bf16 %v117_v56, %v113_v55  ;;  %v112_v62 = vld [vmem:[%s1505_s1 + $0x280] sm:$0xff]  ;;  %v114_v0 = vld [vmem:[%s1505_s1 + $0x290] sm:$0xff]  ;;  %v813_v1 = vpack.c.bf16 %v119_v58, %v115_v57  ;;  %v121_v3 = vld [vmem:[%s1505_s1 + $0x2c8] sm:$0xff] }
  0x1e   :  { %728 = vmatpush1.bf16.msra.mxu0 %v727_v23  ;;  %v116_v63 = vld [vmem:[%s1505_s1 + $0x2a0] sm:$0xff]  ;;  %v118_v2 = vld [vmem:[%s1505_s1 + $0x2b0] sm:$0xff]  ;;  %v125_v4 = vld [vmem:[%s1505_s1 + $0x2e8] sm:$0xff] }
  0x1f   :  { %800 = vmatpush1.bf16.msra.mxu1 %v799_v24  ;;  %730 = vmatprep.subr.bf16.mxu0 %v729_v25  ;;  %v123_v5 = vld [vmem:[%s1505_s1 + $0x2d8] sm:$0xff]  ;;  %v743_v7 = vpack.c.bf16 %v116_v63, %v112_v62  ;;  %v120_v8 = vld [vmem:[%s1505_s1 + $0x2c0] sm:$0xff]  ;;  %v815_v9 = vpack.c.bf16 %v118_v2, %v114_v0  ;;  %v745_v10 = vpack.c.bf16 %v125_v4, %v121_v3  ;;  %v122_v12 = vld [vmem:[%s1505_s1 + $0x2d0] sm:$0xff] }
  0x20   :  { %802 = vmatprep.subr.bf16.mxu1 %v801_v29  ;;  %v127_v6 = vld [vmem:[%s1505_s1 + $0x2f8] sm:$0xff]  ;;  %v124_v11 = vld [vmem:[%s1505_s1 + $0x2e0] sm:$0xff]  ;;  %v126_v13 = vld [vmem:[%s1505_s1 + $0x2f0] sm:$0xff] }
  0x21   :  { %v817_v14 = vpack.c.bf16 %v127_v6, %v123_v5  ;;  %v129_v15 = vld [vmem:[%s1505_s1 + $0x308] sm:$0xff]  ;;  %v131_v18 = vld [vmem:[%s1505_s1 + $0x318] sm:$0xff]  ;;  %v747_v20 = vpack.c.bf16 %v124_v11, %v120_v8  ;;  %v819_v21 = vpack.c.bf16 %v126_v13, %v122_v12  ;;  %v128_v23 = vld [vmem:[%s1505_s1 + $0x300] sm:$0xff] }
  0x22   :  { %732 = vmatpush1.bf16.msra.mxu0 %v731_v35  ;;  %v133_v16 = vld [vmem:[%s1505_s1 + $0x328] sm:$0xff]  ;;  %v135_v19 = vld [vmem:[%s1505_s1 + $0x338] sm:$0xff]  ;;  %v132_v24 = vld [vmem:[%s1505_s1 + $0x320] sm:$0xff] }
  0x23   :  { %804 = vmatpush1.bf16.msra.mxu1 %v803_v36  ;;  %734 = vmatprep.subr.bf16.mxu0 %v733_v37  ;;  %v21_v17 = vld [vmem:[%s1506_s0 + $0x8] sm:$0xff]  ;;  %v749_v22 = vpack.c.bf16 %v133_v16, %v129_v15  ;;  %v130_v25 = vld [vmem:[%s1505_s1 + $0x310] sm:$0xff]  ;;  %v821_v26 = vpack.c.bf16 %v135_v19, %v131_v18  ;;  %v139_v30 = vld [vmem:[%s1505_s1 + $0x358] sm:$0xff]  ;;  %v751_v32 = vpack.c.bf16 %v132_v24, %v128_v23 }
  0x24   :  { %806 = vmatprep.subr.bf16.mxu1 %v805_v41  ;;  %253 = vmatprep.mubr.f32.mxu0 %v21_v17  ;;  %v134_v27 = vld [vmem:[%s1505_s1 + $0x330] sm:$0xff]  ;;  %v137_v28 = vld [vmem:[%s1505_s1 + $0x348] sm:$0xff]  ;;  %v143_v31 = vld [vmem:[%s1505_s1 + $0x378] sm:$0xff] }
  0x25   :  { %431 = vmatprep.mubr.f32.mxu1 %v21_v17  ;;  %v141_v29 = vld [vmem:[%s1505_s1 + $0x368] sm:$0xff]  ;;  %v823_v33 = vpack.c.bf16 %v134_v27, %v130_v25  ;;  %v136_v35 = vld [vmem:[%s1505_s1 + $0x340] sm:$0xff]  ;;  %v138_v37 = vld [vmem:[%s1505_s1 + $0x350] sm:$0xff]  ;;  %v825_v38 = vpack.c.bf16 %v143_v31, %v139_v30 }
  0x26   :  { %736 = vmatpush1.bf16.msra.mxu0 %v735_v47  ;;  %v753_v34 = vpack.c.bf16 %v141_v29, %v137_v28  ;;  %v140_v36 = vld [vmem:[%s1505_s1 + $0x360] sm:$0xff]  ;;  %v142_v39 = vld [vmem:[%s1505_s1 + $0x370] sm:$0xff]  ;;  %v145_v40 = vld [vmem:[%s1505_s1 + $0x388] sm:$0xff] }
  0x27   :  { %808 = vmatpush1.bf16.msra.mxu1 %v807_v48  ;;  %738 = vmatprep.subr.bf16.mxu0 %v737_v49  ;;  %v149_v41 = vld [vmem:[%s1505_s1 + $0x3a8] sm:$0xff]  ;;  %v147_v42 = vld [vmem:[%s1505_s1 + $0x398] sm:$0xff]  ;;  %v755_v44 = vpack.c.bf16 %v140_v36, %v136_v35  ;;  %v547_v45 = vld [vmem:[%s1507_s2 + $0x10] sm:$0xff]  ;;  %v827_v47 = vpack.c.bf16 %v142_v39, %v138_v37 }
  0x28   :  { %810 = vmatprep.subr.bf16.mxu1 %v809_v53  ;;  %v151_v43 = vld [vmem:[%s1505_s1 + $0x3b8] sm:$0xff]  ;;  %v545_v46 = vld [vmem:[%s1507_s2] sm:$0xff]  ;;  %v757_v48 = vpack.c.bf16 %v149_v41, %v145_v40  ;;  %v146_v51 = vld [vmem:[%s1505_s1 + $0x390] sm:$0xff]  ;;  %561 = vperm.xlu1 %864, %v547_v45   ;;  %v866_v41 = vmov 0.0  }
  0x29   :  { %v144_v49 = vld [vmem:[%s1505_s1 + $0x380] sm:$0xff]  ;;  %v829_v52 = vpack.c.bf16 %v151_v43, %v147_v42  ;;  %v150_v53 = vld [vmem:[%s1505_s1 + $0x3b0] sm:$0xff]  ;;  %v153_v54 = vld [vmem:[%s1505_s1 + $0x3c8] sm:$0xff]  ;;  %551 = vperm.xlu0 %863, %v545_v46  }
  0x2a   :  { %740 = vmatpush1.bf16.msra.mxu0 %v739_v59  ;;  %v148_v50 = vld [vmem:[%s1505_s1 + $0x3a0] sm:$0xff]  ;;  %v157_v55 = vld [vmem:[%s1505_s1 + $0x3e8] sm:$0xff]  ;;  %v155_v56 = vld [vmem:[%s1505_s1 + $0x3d8] sm:$0xff] }
  0x2b   :  { %812 = vmatpush1.bf16.msra.mxu1 %v811_v60  ;;  %742 = vmatprep.subr.bf16.mxu0 %v741_v61  ;;  %v159_v57 = vld [vmem:[%s1505_s1 + $0x3f8] sm:$0xff]  ;;  %v759_v59 = vpack.c.bf16 %v148_v50, %v144_v49  ;;  %v546_v60 = vld [vmem:[%s1507_s2 + $0x8] sm:$0xff]  ;;  %v831_v61 = vpack.c.bf16 %v150_v53, %v146_v51  ;;  %v761_v62 = vpack.c.bf16 %v157_v55, %v153_v54  ;;  %v152_v63 = vld [vmem:[%s1505_s1 + $0x3c0] sm:$0xff] }
  0x2c   :  { %814 = vmatprep.subr.bf16.mxu1 %v813_v1  ;;  %v548_v58 = vld [vmem:[%s1507_s2 + $0x18] sm:$0xff]  ;;  %v156_v0 = vld [vmem:[%s1505_s1 + $0x3e0] sm:$0xff]  ;;  %v154_v1 = vld [vmem:[%s1505_s1 + $0x3d0] sm:$0xff]  ;;  %v833_v2 = vpack.c.bf16 %v159_v57, %v155_v56 }
  0x2d   :  { %v158_v3 = vld [vmem:[%s1505_s1 + $0x3f0] sm:$0xff]  ;;  %v161_v4 = vld [vmem:[%s1505_s1 + $0x408] sm:$0xff]  ;;  %566 = vperm.xlu1 %864, %v548_v58   ;;  %v163_v6 = vld [vmem:[%s1505_s1 + $0x418] sm:$0xff]  ;;  %556 = vperm.xlu0 %863, %v546_v60  }
  0x2e   :  { %744 = vmatpush1.bf16.msra.mxu0 %v743_v7  ;;  %v165_v5 = vld [vmem:[%s1505_s1 + $0x428] sm:$0xff]  ;;  %v167_v7 = vld [vmem:[%s1505_s1 + $0x438] sm:$0xff]  ;;  %v835_v11 = vpack.c.bf16 %v158_v3, %v154_v1  ;;  %v160_v13 = vld [vmem:[%s1505_s1 + $0x400] sm:$0xff] }
  0x2f   :  { %816 = vmatpush1.bf16.msra.mxu1 %v815_v9  ;;  %746 = vmatprep.subr.bf16.mxu0 %v745_v10  ;;  %v586_v8 = vld [vmem:[%s1508_s3 + $0x8] sm:$0xff]  ;;  %v763_v9 = vpack.c.bf16 %v156_v0, %v152_v63  ;;  %v585_v10 = vld [vmem:[%s1508_s3] sm:$0xff]  ;;  %v765_v12 = vpack.c.bf16 %v165_v5, %v161_v4  ;;  %v837_v16 = vpack.c.bf16 %v167_v7, %v163_v6  ;;  %v162_v17 = vld [vmem:[%s1505_s1 + $0x410] sm:$0xff] }
  0x30   :  { %818 = vmatprep.subr.bf16.mxu1 %v817_v14  ;;  %v164_v14 = vld [vmem:[%s1505_s1 + $0x420] sm:$0xff]  ;;  %v166_v18 = vld [vmem:[%s1505_s1 + $0x430] sm:$0xff]  ;;  %v169_v19 = vld [vmem:[%s1505_s1 + $0x448] sm:$0xff] }
  0x31   :  { %v20_v15 = vld [vmem:[%s1506_s0] sm:$0xff]  ;;  %596 = vperm.xlu1 %864, %v586_v8   ;;  %591 = vperm.xlu0 %863, %v585_v10   ;;  %v171_v23 = vld [vmem:[%s1505_s1 + $0x458] sm:$0xff]  ;;  %v587_v25 = vld [vmem:[%s1508_s3 + $0x10] sm:$0xff] }
  0x32   :  { %748 = vmatpush1.bf16.msra.mxu0 %v747_v20  ;;  %v173_v20 = vld [vmem:[%s1505_s1 + $0x468] sm:$0xff]  ;;  %v175_v24 = vld [vmem:[%s1505_s1 + $0x478] sm:$0xff]  ;;  %v24_v27 = vld [vmem:[%s1506_s0 + $0x20] sm:$0xff] }
  0x33   :  { %820 = vmatpush1.bf16.msra.mxu1 %v819_v21  ;;  %750 = vmatprep.subr.bf16.mxu0 %v749_v22  ;;  %v588_v21 = vld [vmem:[%s1508_s3 + $0x18] sm:$0xff]  ;;  %v767_v22 = vpack.c.bf16 %v164_v14, %v160_v13  ;;  %v769_v28 = vpack.c.bf16 %v173_v20, %v169_v19  ;;  %v168_v29 = vld [vmem:[%s1505_s1 + $0x440] sm:$0xff]  ;;  %v841_v31 = vpack.c.bf16 %v175_v24, %v171_v23  ;;  %v30_v39 = vld [vmem:[%s1506_s0 + $0x50] sm:$0xff] }
  0x34   :  { %822 = vmatprep.subr.bf16.mxu1 %v821_v26  ;;  %v839_v26 = vpack.c.bf16 %v166_v18, %v162_v17  ;;  %v172_v30 = vld [vmem:[%s1505_s1 + $0x460] sm:$0xff]  ;;  %v27_v35 = vld [vmem:[%s1506_s0 + $0x38] sm:$0xff]  ;;  %v29_v40 = vld [vmem:[%s1506_s0 + $0x48] sm:$0xff] }
  0x35   :  { %606 = vperm.xlu1 %864, %v588_v21   ;;  %601 = vperm.xlu0 %863, %v587_v25   ;;  %v771_v36 = vpack.c.bf16 %v172_v30, %v168_v29  ;;  %v22_v42 = vld [vmem:[%s1506_s0 + $0x10] sm:$0xff]  ;;  %v25_v43 = vld [vmem:[%s1506_s0 + $0x28] sm:$0xff]  ;;  %v31_v45 = vld [vmem:[%s1506_s0 + $0x58] sm:$0xff] }
  0x36   :  { %752 = vmatpush1.bf16.msra.mxu0 %v751_v32  ;;  %v170_v32 = vld [vmem:[%s1505_s1 + $0x450] sm:$0xff]  ;;  %v625_v55 = vld [vmem:[%s1509_s4] sm:$0xff]  ;;  %v628_v1 = vld [vmem:[%s1509_s4 + $0x18] sm:$0xff] }
  0x37   :  { %824 = vmatpush1.bf16.msra.mxu1 %v823_v33  ;;  %754 = vmatprep.subr.bf16.mxu0 %v753_v34  ;;  %v174_v33 = vld [vmem:[%s1505_s1 + $0x470] sm:$0xff]  ;;  %v23_v34 = vld [vmem:[%s1506_s0 + $0x18] sm:$0xff]  ;;  %v630_v19 = vld [vmem:[%s1509_s4 + $0x28] sm:$0xff] }
  0x38   :  { %826 = vmatprep.subr.bf16.mxu1 %v825_v38  ;;  %v843_v37 = vpack.c.bf16 %v174_v33, %v170_v32  ;;  %v26_v38 = vld [vmem:[%s1506_s0 + $0x30] sm:$0xff]  ;;  %v632_v25 = vld [vmem:[%s1509_s4 + $0x38] sm:$0xff] }
  0x39   :  { %v627_v60 = vld [vmem:[%s1509_s4 + $0x10] sm:$0xff] }
  0x3a   :  { %756 = vmatpush1.bf16.msra.mxu0 %v755_v44  ;;  %v28_v44 = vld [vmem:[%s1506_s0 + $0x40] sm:$0xff]  ;;  %v631_v18 = vld [vmem:[%s1509_s4 + $0x30] sm:$0xff] }
  0x3b   :  { %828 = vmatpush1.bf16.msra.mxu1 %v827_v47  ;;  %758 = vmatprep.subr.bf16.mxu0 %v757_v48 }
  0x3c   :  { %830 = vmatprep.subr.bf16.mxu1 %v829_v52 }
  0x3e   :  { %760 = vmatpush1.bf16.msra.mxu0 %v759_v59 }
  0x3f   :  { %832 = vmatpush1.bf16.msra.mxu1 %v831_v61  ;;  %762 = vmatprep.subr.bf16.mxu0 %v761_v62  ;;  %v626_v61 = vld [vmem:[%s1509_s4 + $0x8] sm:$0xff] }
  0x40   :  { %834 = vmatprep.subr.bf16.mxu1 %v833_v2 }
  0x42   :  { %764 = vmatpush1.bf16.msra.mxu0 %v763_v9 }
  0x43   :  { %836 = vmatpush1.bf16.msra.mxu1 %v835_v11  ;;  %766 = vmatprep.subr.bf16.mxu0 %v765_v12  ;;  %v629_v11 = vld [vmem:[%s1509_s4 + $0x20] sm:$0xff] }
  0x44   :  { %838 = vmatprep.subr.bf16.mxu1 %v837_v16 }
  0x45   :  { %254 = vmatmul.mubr.f32.vlgmr.msra.gmra.mrb[0].mxu0 %v20_v15 }
  0x46   :  { %432 = vmatmul.mubr.f32.vlgmr.msra.gmra.mrb[0].mxu1 %v20_v15  ;;  %768 = vmatpush1.bf16.msra.mxu0 %v767_v22 }
  0x47   :  { %840 = vmatpush1.bf16.msra.mxu1 %v839_v26  ;;  %259 = vmatprep.mubr.f32.mxu0 %v24_v27 }
  0x48   :  { %437 = vmatprep.mubr.f32.mxu1 %v24_v27  ;;  %770 = vmatprep.subr.bf16.mxu0 %v769_v28 }
  0x49   :  { %260 = vmatmul.mubr.f32.gmra.mrb[2].mxu0 %v23_v34  ;;  %842 = vmatprep.subr.bf16.mxu1 %v841_v31 }
  0x4a   :  { %438 = vmatmul.mubr.f32.gmra.mrb[2].mxu1 %v23_v34  ;;  %265 = vmatprep.mubr.f32.mxu0 %v27_v35 }
  0x4b   :  { %443 = vmatprep.mubr.f32.mxu1 %v27_v35  ;;  %772 = vmatpush1.bf16.msra.mxu0 %v771_v36  ;;  %v633_v36 = vld [vmem:[%s1509_s4 + $0x40] sm:$0xff] }
  0x4c   :  { %844 = vmatpush1.bf16.msra.mxu1 %v843_v37 }
  0x4d   :  { %266 = vmatmul.mubr.f32.gmra.mrb[4].mxu0 %v26_v38 }
  0x4e   :  { %444 = vmatmul.mubr.f32.gmra.mrb[4].mxu1 %v26_v38  ;;  %271 = vmatprep.mubr.f32.mxu0 %v30_v39 }
  0x4f   :  { %449 = vmatprep.mubr.f32.mxu1 %v30_v39 }
  0x51   :  { %272 = vmatmul.mubr.f32.gmra.mrb[6].mxu0 %v29_v40 }
  0x52   :  { %450 = vmatmul.mubr.f32.gmra.mrb[6].mxu1 %v29_v40  ;;  %342 = vmatprep.mubr.f32.mxu0 %v866_v41 }
  0x53   :  { %520 = vmatprep.mubr.f32.mxu1 %v866_v41 }
  0x55   :  { %693 = vmatmul.mubr.msk.f32.vlgmr.msra.gmra.mrb[0].mxu0 %vm176_vm0, %v22_v42 }
  0x56   :  { %697 = vmatmul.mubr.msk.f32.vlgmr.msra.gmra.mrb[0].mxu1 %vm176_vm0, %v22_v42  ;;  %348 = vmatprep.mubr.f32.mxu0 %v866_v41 }
  0x57   :  { %526 = vmatprep.mubr.f32.mxu1 %v866_v41 }
  0x59   :  { %694 = vmatmul.mubr.msk.f32.gmra.mrb[2].mxu0 %vm176_vm0, %v25_v43 }
  0x5a   :  { %698 = vmatmul.mubr.msk.f32.gmra.mrb[2].mxu1 %vm176_vm0, %v25_v43  ;;  %354 = vmatprep.mubr.f32.mxu0 %v866_v41  ;;  %v635_v43 = vld [vmem:[%s1509_s4 + $0x50] sm:$0xff] }
  0x5b   :  { %532 = vmatprep.mubr.f32.mxu1 %v866_v41 }
  0x5d   :  { %695 = vmatmul.mubr.msk.f32.gmra.mrb[4].mxu0 %vm176_vm0, %v28_v44 }
  0x5e   :  { %699 = vmatmul.mubr.msk.f32.gmra.mrb[4].mxu1 %vm176_vm0, %v28_v44  ;;  %360 = vmatprep.mubr.f32.mxu0 %v866_v41  ;;  %v634_v44 = vld [vmem:[%s1509_s4 + $0x48] sm:$0xff] }
  0x5f   :  { %538 = vmatprep.mubr.f32.mxu1 %v866_v41 }
  0x61   :  { %696 = vmatmul.mubr.msk.f32.gmra.mrb[6].mxu0 %vm176_vm0, %v31_v45 }
  0x62   :  { %700 = vmatmul.mubr.msk.f32.gmra.mrb[6].mxu1 %vm176_vm0, %v31_v45 }
  0xa7   :  { %v1397_v47 = vpop.permute.xlu1 %561 }
  0xa8   :  { %v552_v46 = vpop.permute.xlu0 %551 }
  0xac   :  { %v557_v48 = vpop.permute.xlu0 %556  ;;  %v1399_v49 = vpop.permute.xlu1 %566 }
  0xb0   :  { %v592_v54 = vpop.permute.xlu0 %591  ;;  %v597_v8 = vpop.permute.xlu1 %596 }
  0xb4   :  { %v602_v33 = vpop.permute.xlu0 %601 }
 0x128   :  { %v344_v50 = vpop.f32.mrb[0].mxu0 }
 0x129   :  { %v569_v51 = vmul.f32 %v552_v46, %v344_v50  ;;  %v522_v52 = vpop.f32.mrb[0].mxu1  ;;  %v346_v53 = vpop.f32.mrb[1].mxu0 }
 0x12a   :  { %v571_v56 = vmul.f32 %v552_v46, %v522_v52  ;;  %v570_v57 = vmul.f32 %v552_v46, %v346_v53  ;;  %v524_v58 = vpop.f32.mrb[1].mxu1  ;;  %v636_v52 = vld [vmem:[%s1509_s4 + $0x58] sm:$0xff] }
 0x12b   :  { %v609_v59 = vadd.f32 %v592_v54, %v569_v51  ;;  %v572_v62 = vmul.f32 %v552_v46, %v524_v58 }
 0x12c   :  { %v611_v63 = vadd.f32 %v592_v54, %v571_v56  ;;  %v610_v0 = vadd.f32 %v592_v54, %v570_v57  ;;  %v350_v2 = vpop.f32.mrb[2].mxu0 }
 0x12d   :  { %v641_v3 = vadd.f32 %v625_v55, %v609_v59  ;;  %v612_v4 = vadd.f32 %v592_v54, %v572_v62  ;;  %v573_v5 = vmul.f32 %v557_v48, %v350_v2  ;;  %v528_v6 = vpop.f32.mrb[2].mxu1  ;;  %v352_v7 = vpop.f32.mrb[3].mxu0  ;;  %v637_v62 = vld [vmem:[%s1509_s4 + $0x60] sm:$0xff] }
 0x12e   :  { %v643_v9 = vadd.f32 %v627_v60, %v611_v63  ;;  %v642_v10 = vadd.f32 %v626_v61, %v610_v0  ;;  %v575_v12 = vmul.f32 %v557_v48, %v528_v6  ;;  %v574_v13 = vmul.f32 %v557_v48, %v352_v7  ;;  %v530_v14 = vpop.f32.mrb[3].mxu1  ;;  %v607_v59 = vpop.permute.xlu1 %606  ;;  %v638_v6 = vld [vmem:[%s1509_s4 + $0x68] sm:$0xff] }
 0x12f   :  { %v657_v15 = vmax.f32 %v641_v3, 0.0  ;;  %v644_v16 = vadd.f32 %v628_v1, %v612_v4  ;;  %v613_v17 = vadd.f32 %v597_v8, %v573_v5  ;;  %v576_v20 = vmul.f32 %v557_v48, %v530_v14  ;;  %v639_v5 = vld [vmem:[%s1509_s4 + $0x70] sm:$0xff] }
 0x130   :  { %v659_v21 = vmax.f32 %v643_v9, 0.0  ;;  %v658_v22 = vmax.f32 %v642_v10, 0.0  ;;  %v615_v23 = vadd.f32 %v597_v8, %v575_v12  ;;  %v614_v24 = vadd.f32 %v597_v8, %v574_v13  ;;  %v356_v26 = vpop.f32.mrb[4].mxu0  ;;  %v640_v12 = vld [vmem:[%s1509_s4 + $0x78] sm:$0xff] }
 0x131   :  { %673 = vst [vmem:[%s1510_s5] sm:$0xff] %v657_v15  ;;  %v660_v27 = vmax.f32 %v644_v16, 0.0  ;;  %v645_v28 = vadd.f32 %v629_v11, %v613_v17  ;;  %v616_v29 = vadd.f32 %v597_v8, %v576_v20  ;;  %v577_v30 = vmul.f32 %v1397_v47, %v356_v26  ;;  %v534_v31 = vpop.f32.mrb[4].mxu1  ;;  %v358_v32 = vpop.f32.mrb[5].mxu0 }
 0x132   :  { %675 = vst [vmem:[%s1510_s5 + $0x10] sm:$0xff] %v659_v21  ;;  %674 = vst [vmem:[%s1510_s5 + $0x8] sm:$0xff] %v658_v22  ;;  %v647_v34 = vadd.f32 %v631_v18, %v615_v23  ;;  %v646_v35 = vadd.f32 %v630_v19, %v614_v24  ;;  %v579_v37 = vmul.f32 %v1397_v47, %v534_v31  ;;  %v536_v39 = vpop.f32.mrb[5].mxu1 }
 0x133   :  { %v578_v38 = vmul.f32 %v1397_v47, %v358_v32  ;;  %676 = vst [vmem:[%s1510_s5 + $0x18] sm:$0xff] %v660_v27  ;;  %v661_v40 = vmax.f32 %v645_v28, 0.0  ;;  %v648_v41 = vadd.f32 %v632_v25, %v616_v29  ;;  %v617_v42 = vadd.f32 %v602_v33, %v577_v30 }
 0x134   :  { %v580_v45 = vmul.f32 %v1397_v47, %v536_v39  ;;  %v663_v46 = vmax.f32 %v647_v34, 0.0  ;;  %v662_v48 = vmax.f32 %v646_v35, 0.0  ;;  %v619_v50 = vadd.f32 %v602_v33, %v579_v37  ;;  %v362_v53 = vpop.f32.mrb[6].mxu0 }
 0x135   :  { %v618_v51 = vadd.f32 %v602_v33, %v578_v38  ;;  %677 = vst [vmem:[%s1510_s5 + $0x20] sm:$0xff] %v661_v40  ;;  %v664_v54 = vmax.f32 %v648_v41, 0.0  ;;  %v649_v55 = vadd.f32 %v633_v36, %v617_v42  ;;  %v581_v57 = vmul.f32 %v1399_v49, %v362_v53  ;;  %v540_v58 = vpop.f32.mrb[6].mxu1  ;;  %v364_v47 = vpop.f32.mrb[7].mxu0 }
 0x136   :  { %v620_v56 = vadd.f32 %v602_v33, %v580_v45  ;;  %679 = vst [vmem:[%s1510_s5 + $0x30] sm:$0xff] %v663_v46  ;;  %678 = vst [vmem:[%s1510_s5 + $0x28] sm:$0xff] %v662_v48  ;;  %v651_v60 = vadd.f32 %v635_v43, %v619_v50  ;;  %v583_v63 = vmul.f32 %v1399_v49, %v540_v58  ;;  %v542_v1 = vpop.f32.mrb[7].mxu1 }
 0x137   :  { %v650_v61 = vadd.f32 %v634_v44, %v618_v51  ;;  %v582_v0 = vmul.f32 %v1399_v49, %v364_v47  ;;  %680 = vst [vmem:[%s1510_s5 + $0x38] sm:$0xff] %v664_v54  ;;  %v665_v2 = vmax.f32 %v649_v55, 0.0  ;;  %v621_v4 = vadd.f32 %v607_v59, %v581_v57 }
 0x138   :  { %v652_v3 = vadd.f32 %v636_v52, %v620_v56  ;;  %v584_v7 = vmul.f32 %v1399_v49, %v542_v1  ;;  %v667_v8 = vmax.f32 %v651_v60, 0.0  ;;  %v623_v10 = vadd.f32 %v607_v59, %v583_v63 }
 0x139   :  { %v666_v9 = vmax.f32 %v650_v61, 0.0  ;;  %v622_v11 = vadd.f32 %v607_v59, %v582_v0  ;;  %681 = vst [vmem:[%s1510_s5 + $0x40] sm:$0xff] %v665_v2  ;;  %v653_v14 = vadd.f32 %v637_v62, %v621_v4 }
 0x13a   :  { %v668_v13 = vmax.f32 %v652_v3, 0.0  ;;  %v624_v15 = vadd.f32 %v607_v59, %v584_v7  ;;  %683 = vst [vmem:[%s1510_s5 + $0x50] sm:$0xff] %v667_v8  ;;  %v655_v49 = vadd.f32 %v639_v5, %v623_v10 }
 0x13b   :  { %682 = vst [vmem:[%s1510_s5 + $0x48] sm:$0xff] %v666_v9  ;;  %v654_v16 = vadd.f32 %v638_v6, %v622_v11  ;;  %v669_v17 = vmax.f32 %v653_v14, 0.0 }
 0x13c   :  { %684 = vst [vmem:[%s1510_s5 + $0x58] sm:$0xff] %v668_v13  ;;  %v656_v18 = vadd.f32 %v640_v12, %v624_v15  ;;  %v671_v19 = vmax.f32 %v655_v49, 0.0 }
 0x13d   :  { %v670_v20 = vmax.f32 %v654_v16, 0.0  ;;  %685 = vst [vmem:[%s1510_s5 + $0x60] sm:$0xff] %v669_v17 }
 0x13e   :  { %v672_v21 = vmax.f32 %v656_v18, 0.0  ;;  %687 = vst [vmem:[%s1510_s5 + $0x70] sm:$0xff] %v671_v19 }
 0x13f   :  { %686 = vst [vmem:[%s1510_s5 + $0x68] sm:$0xff] %v670_v20 }
 0x140   :  { %688 = vst [vmem:[%s1510_s5 + $0x78] sm:$0xff] %v672_v21 }

// kernel: forward.24
= control target key start
LH: loop header
LB: loop body
LE: loop exit
PB: predicated region body
PF: predicated region fallthrough
CT: control target
= control target key end

     0   :  { %v830_v3 = vmov 0   ;;  %vm173_vm0 = vcmask 261120   ;;  %s1411_s1 = inlined_call_operand.vmem [shape: f32[288,512], index: 1, kind: input, shape index: {}]   ;;  %s1412_s0 = inlined_call_operand.vmem [shape: f32[32,288], index: 0, kind: input, shape index: {}]   ;;  %s1413_s2 = inlined_call_operand.vmem [shape: f32[32,1], index: 2, kind: input, shape index: {}]   ;;  %s1414_s3 = inlined_call_operand.vmem [shape: f32[32,1], index: 3, kind: input, shape index: {}]   ;;  %s1415_s4 = inlined_call_operand.vmem [shape: f32[32,512], index: 4, kind: output, shape index: {}]  }
   0x1   :  { %v30_v0 = vld [vmem:[%s1411_s1 + $0x8] sm:$0xff]  ;;  %v32_v2 = vld [vmem:[%s1411_s1 + $0x18] sm:$0xff]  ;;  %829 = vset.pattern.permute.xlu1 %v830_v3  ;;  %828 = vset.pattern.permute.xlu0 %v830_v3  ;;  %v29_v6 = vld [vmem:[%s1411_s1] sm:$0xff] }
   0x2   :  { %v34_v1 = vld [vmem:[%s1411_s1 + $0x28] sm:$0xff]  ;;  %v36_v5 = vld [vmem:[%s1411_s1 + $0x38] sm:$0xff]  ;;  %v33_v7 = vld [vmem:[%s1411_s1 + $0x20] sm:$0xff] }
   0x3   :  { %v666_v4 = vpack.c.bf16 %v34_v1, %v30_v0  ;;  %v738_v8 = vpack.c.bf16 %v36_v5, %v32_v2  ;;  %v668_v9 = vpack.c.bf16 %v33_v7, %v29_v6  ;;  %v31_v10 = vld [vmem:[%s1411_s1 + $0x10] sm:$0xff]  ;;  %v38_v12 = vld [vmem:[%s1411_s1 + $0x48] sm:$0xff]  ;;  %v40_v15 = vld [vmem:[%s1411_s1 + $0x58] sm:$0xff] }
   0x4   :  { %v35_v11 = vld [vmem:[%s1411_s1 + $0x30] sm:$0xff]  ;;  %v42_v14 = vld [vmem:[%s1411_s1 + $0x68] sm:$0xff]  ;;  %v44_v16 = vld [vmem:[%s1411_s1 + $0x78] sm:$0xff] }
   0x5   :  { %667 = vmatprep.subr.bf16.mxu0 %v666_v4  ;;  %v740_v13 = vpack.c.bf16 %v35_v11, %v31_v10  ;;  %739 = vmatprep.subr.bf16.mxu1 %v738_v8  ;;  %v670_v17 = vpack.c.bf16 %v42_v14, %v38_v12  ;;  %v742_v18 = vpack.c.bf16 %v44_v16, %v40_v15  ;;  %v37_v19 = vld [vmem:[%s1411_s1 + $0x40] sm:$0xff]  ;;  %v39_v21 = vld [vmem:[%s1411_s1 + $0x50] sm:$0xff]  ;;  %v46_v24 = vld [vmem:[%s1411_s1 + $0x88] sm:$0xff] }
   0x6   :  { %669 = vmatpush1.bf16.msra.mxu0 %v668_v9  ;;  %v41_v20 = vld [vmem:[%s1411_s1 + $0x60] sm:$0xff]  ;;  %v43_v23 = vld [vmem:[%s1411_s1 + $0x70] sm:$0xff]  ;;  %v50_v25 = vld [vmem:[%s1411_s1 + $0xa8] sm:$0xff] }
   0x7   :  { %741 = vmatpush1.bf16.msra.mxu1 %v740_v13  ;;  %v672_v22 = vpack.c.bf16 %v41_v20, %v37_v19  ;;  %671 = vmatprep.subr.bf16.mxu0 %v670_v17  ;;  %v744_v26 = vpack.c.bf16 %v43_v23, %v39_v21  ;;  %v674_v27 = vpack.c.bf16 %v50_v25, %v46_v24  ;;  %v48_v28 = vld [vmem:[%s1411_s1 + $0x98] sm:$0xff]  ;;  %v45_v30 = vld [vmem:[%s1411_s1 + $0x80] sm:$0xff]  ;;  %v47_v33 = vld [vmem:[%s1411_s1 + $0x90] sm:$0xff] }
   0x8   :  { %743 = vmatprep.subr.bf16.mxu1 %v742_v18  ;;  %v52_v29 = vld [vmem:[%s1411_s1 + $0xb8] sm:$0xff]  ;;  %v49_v32 = vld [vmem:[%s1411_s1 + $0xa0] sm:$0xff]  ;;  %v51_v34 = vld [vmem:[%s1411_s1 + $0xb0] sm:$0xff] }
   0x9   :  { %v746_v31 = vpack.c.bf16 %v52_v29, %v48_v28  ;;  %v676_v35 = vpack.c.bf16 %v49_v32, %v45_v30  ;;  %v54_v36 = vld [vmem:[%s1411_s1 + $0xc8] sm:$0xff]  ;;  %v56_v38 = vld [vmem:[%s1411_s1 + $0xd8] sm:$0xff]  ;;  %v748_v39 = vpack.c.bf16 %v51_v34, %v47_v33  ;;  %v53_v42 = vld [vmem:[%s1411_s1 + $0xc0] sm:$0xff] }
   0xa   :  { %673 = vmatpush1.bf16.msra.mxu0 %v672_v22  ;;  %v58_v37 = vld [vmem:[%s1411_s1 + $0xe8] sm:$0xff]  ;;  %v60_v41 = vld [vmem:[%s1411_s1 + $0xf8] sm:$0xff]  ;;  %v57_v43 = vld [vmem:[%s1411_s1 + $0xe0] sm:$0xff] }
   0xb   :  { %745 = vmatpush1.bf16.msra.mxu1 %v744_v26  ;;  %675 = vmatprep.subr.bf16.mxu0 %v674_v27  ;;  %v678_v40 = vpack.c.bf16 %v58_v37, %v54_v36  ;;  %v750_v44 = vpack.c.bf16 %v60_v41, %v56_v38  ;;  %v55_v45 = vld [vmem:[%s1411_s1 + $0xd0] sm:$0xff]  ;;  %v62_v47 = vld [vmem:[%s1411_s1 + $0x108] sm:$0xff]  ;;  %v64_v49 = vld [vmem:[%s1411_s1 + $0x118] sm:$0xff]  ;;  %v680_v51 = vpack.c.bf16 %v57_v43, %v53_v42 }
   0xc   :  { %747 = vmatprep.subr.bf16.mxu1 %v746_v31  ;;  %v59_v46 = vld [vmem:[%s1411_s1 + $0xf0] sm:$0xff]  ;;  %v66_v48 = vld [vmem:[%s1411_s1 + $0x128] sm:$0xff]  ;;  %v68_v50 = vld [vmem:[%s1411_s1 + $0x138] sm:$0xff] }
   0xd   :  { %v752_v52 = vpack.c.bf16 %v59_v46, %v55_v45  ;;  %v682_v53 = vpack.c.bf16 %v66_v48, %v62_v47  ;;  %v61_v54 = vld [vmem:[%s1411_s1 + $0x100] sm:$0xff]  ;;  %v63_v56 = vld [vmem:[%s1411_s1 + $0x110] sm:$0xff]  ;;  %v754_v57 = vpack.c.bf16 %v68_v50, %v64_v49  ;;  %v70_v59 = vld [vmem:[%s1411_s1 + $0x148] sm:$0xff] }
   0xe   :  { %677 = vmatpush1.bf16.msra.mxu0 %v676_v35  ;;  %v65_v55 = vld [vmem:[%s1411_s1 + $0x120] sm:$0xff]  ;;  %v67_v58 = vld [vmem:[%s1411_s1 + $0x130] sm:$0xff]  ;;  %v74_v60 = vld [vmem:[%s1411_s1 + $0x168] sm:$0xff] }
   0xf   :  { %749 = vmatpush1.bf16.msra.mxu1 %v748_v39  ;;  %679 = vmatprep.subr.bf16.mxu0 %v678_v40  ;;  %v72_v61 = vld [vmem:[%s1411_s1 + $0x158] sm:$0xff]  ;;  %v684_v63 = vpack.c.bf16 %v65_v55, %v61_v54  ;;  %v756_v0 = vpack.c.bf16 %v67_v58, %v63_v56  ;;  %v686_v1 = vpack.c.bf16 %v74_v60, %v70_v59  ;;  %v69_v2 = vld [vmem:[%s1411_s1 + $0x140] sm:$0xff]  ;;  %v71_v4 = vld [vmem:[%s1411_s1 + $0x150] sm:$0xff] }
  0x10   :  { %751 = vmatprep.subr.bf16.mxu1 %v750_v44  ;;  %v76_v62 = vld [vmem:[%s1411_s1 + $0x178] sm:$0xff]  ;;  %v73_v3 = vld [vmem:[%s1411_s1 + $0x160] sm:$0xff]  ;;  %v75_v6 = vld [vmem:[%s1411_s1 + $0x170] sm:$0xff] }
  0x11   :  { %v758_v5 = vpack.c.bf16 %v76_v62, %v72_v61  ;;  %v78_v7 = vld [vmem:[%s1411_s1 + $0x188] sm:$0xff]  ;;  %v80_v9 = vld [vmem:[%s1411_s1 + $0x198] sm:$0xff]  ;;  %v688_v11 = vpack.c.bf16 %v73_v3, %v69_v2  ;;  %v760_v12 = vpack.c.bf16 %v75_v6, %v71_v4  ;;  %v77_v14 = vld [vmem:[%s1411_s1 + $0x180] sm:$0xff] }
  0x12   :  { %681 = vmatpush1.bf16.msra.mxu0 %v680_v51  ;;  %v82_v8 = vld [vmem:[%s1411_s1 + $0x1a8] sm:$0xff]  ;;  %v84_v10 = vld [vmem:[%s1411_s1 + $0x1b8] sm:$0xff]  ;;  %v81_v15 = vld [vmem:[%s1411_s1 + $0x1a0] sm:$0xff] }
  0x13   :  { %753 = vmatpush1.bf16.msra.mxu1 %v752_v52  ;;  %683 = vmatprep.subr.bf16.mxu0 %v682_v53  ;;  %v690_v13 = vpack.c.bf16 %v82_v8, %v78_v7  ;;  %v79_v16 = vld [vmem:[%s1411_s1 + $0x190] sm:$0xff]  ;;  %v762_v17 = vpack.c.bf16 %v84_v10, %v80_v9  ;;  %v86_v19 = vld [vmem:[%s1411_s1 + $0x1c8] sm:$0xff]  ;;  %v88_v21 = vld [vmem:[%s1411_s1 + $0x1d8] sm:$0xff]  ;;  %v692_v23 = vpack.c.bf16 %v81_v15, %v77_v14 }
  0x14   :  { %755 = vmatprep.subr.bf16.mxu1 %v754_v57  ;;  %v83_v18 = vld [vmem:[%s1411_s1 + $0x1b0] sm:$0xff]  ;;  %v90_v20 = vld [vmem:[%s1411_s1 + $0x1e8] sm:$0xff]  ;;  %v92_v22 = vld [vmem:[%s1411_s1 + $0x1f8] sm:$0xff] }
  0x15   :  { %v764_v24 = vpack.c.bf16 %v83_v18, %v79_v16  ;;  %v694_v25 = vpack.c.bf16 %v90_v20, %v86_v19  ;;  %v85_v26 = vld [vmem:[%s1411_s1 + $0x1c0] sm:$0xff]  ;;  %v87_v28 = vld [vmem:[%s1411_s1 + $0x1d0] sm:$0xff]  ;;  %v766_v29 = vpack.c.bf16 %v92_v22, %v88_v21  ;;  %v94_v31 = vld [vmem:[%s1411_s1 + $0x208] sm:$0xff] }
  0x16   :  { %685 = vmatpush1.bf16.msra.mxu0 %v684_v63  ;;  %v89_v27 = vld [vmem:[%s1411_s1 + $0x1e0] sm:$0xff]  ;;  %v91_v30 = vld [vmem:[%s1411_s1 + $0x1f0] sm:$0xff]  ;;  %v98_v32 = vld [vmem:[%s1411_s1 + $0x228] sm:$0xff] }
  0x17   :  { %757 = vmatpush1.bf16.msra.mxu1 %v756_v0  ;;  %687 = vmatprep.subr.bf16.mxu0 %v686_v1  ;;  %v96_v33 = vld [vmem:[%s1411_s1 + $0x218] sm:$0xff]  ;;  %v696_v35 = vpack.c.bf16 %v89_v27, %v85_v26  ;;  %v768_v36 = vpack.c.bf16 %v91_v30, %v87_v28  ;;  %v698_v37 = vpack.c.bf16 %v98_v32, %v94_v31  ;;  %v93_v38 = vld [vmem:[%s1411_s1 + $0x200] sm:$0xff]  ;;  %v95_v40 = vld [vmem:[%s1411_s1 + $0x210] sm:$0xff] }
  0x18   :  { %759 = vmatprep.subr.bf16.mxu1 %v758_v5  ;;  %v100_v34 = vld [vmem:[%s1411_s1 + $0x238] sm:$0xff]  ;;  %v97_v39 = vld [vmem:[%s1411_s1 + $0x220] sm:$0xff]  ;;  %v99_v42 = vld [vmem:[%s1411_s1 + $0x230] sm:$0xff] }
  0x19   :  { %v770_v41 = vpack.c.bf16 %v100_v34, %v96_v33  ;;  %v102_v43 = vld [vmem:[%s1411_s1 + $0x248] sm:$0xff]  ;;  %v104_v45 = vld [vmem:[%s1411_s1 + $0x258] sm:$0xff]  ;;  %v700_v47 = vpack.c.bf16 %v97_v39, %v93_v38  ;;  %v772_v48 = vpack.c.bf16 %v99_v42, %v95_v40  ;;  %v101_v50 = vld [vmem:[%s1411_s1 + $0x240] sm:$0xff] }
  0x1a   :  { %689 = vmatpush1.bf16.msra.mxu0 %v688_v11  ;;  %v106_v44 = vld [vmem:[%s1411_s1 + $0x268] sm:$0xff]  ;;  %v108_v46 = vld [vmem:[%s1411_s1 + $0x278] sm:$0xff]  ;;  %v105_v51 = vld [vmem:[%s1411_s1 + $0x260] sm:$0xff] }
  0x1b   :  { %761 = vmatpush1.bf16.msra.mxu1 %v760_v12  ;;  %691 = vmatprep.subr.bf16.mxu0 %v690_v13  ;;  %v702_v49 = vpack.c.bf16 %v106_v44, %v102_v43  ;;  %v103_v52 = vld [vmem:[%s1411_s1 + $0x250] sm:$0xff]  ;;  %v774_v53 = vpack.c.bf16 %v108_v46, %v104_v45  ;;  %v110_v55 = vld [vmem:[%s1411_s1 + $0x288] sm:$0xff]  ;;  %v112_v57 = vld [vmem:[%s1411_s1 + $0x298] sm:$0xff]  ;;  %v704_v59 = vpack.c.bf16 %v105_v51, %v101_v50 }
  0x1c   :  { %763 = vmatprep.subr.bf16.mxu1 %v762_v17  ;;  %v107_v54 = vld [vmem:[%s1411_s1 + $0x270] sm:$0xff]  ;;  %v114_v56 = vld [vmem:[%s1411_s1 + $0x2a8] sm:$0xff]  ;;  %v116_v58 = vld [vmem:[%s1411_s1 + $0x2b8] sm:$0xff] }
  0x1d   :  { %v776_v60 = vpack.c.bf16 %v107_v54, %v103_v52  ;;  %v706_v61 = vpack.c.bf16 %v114_v56, %v110_v55  ;;  %v109_v62 = vld [vmem:[%s1411_s1 + $0x280] sm:$0xff]  ;;  %v111_v0 = vld [vmem:[%s1411_s1 + $0x290] sm:$0xff]  ;;  %v778_v1 = vpack.c.bf16 %v116_v58, %v112_v57  ;;  %v118_v3 = vld [vmem:[%s1411_s1 + $0x2c8] sm:$0xff] }
  0x1e   :  { %693 = vmatpush1.bf16.msra.mxu0 %v692_v23  ;;  %v113_v63 = vld [vmem:[%s1411_s1 + $0x2a0] sm:$0xff]  ;;  %v115_v2 = vld [vmem:[%s1411_s1 + $0x2b0] sm:$0xff]  ;;  %v122_v4 = vld [vmem:[%s1411_s1 + $0x2e8] sm:$0xff] }
  0x1f   :  { %765 = vmatpush1.bf16.msra.mxu1 %v764_v24  ;;  %695 = vmatprep.subr.bf16.mxu0 %v694_v25  ;;  %v120_v5 = vld [vmem:[%s1411_s1 + $0x2d8] sm:$0xff]  ;;  %v708_v7 = vpack.c.bf16 %v113_v63, %v109_v62  ;;  %v117_v8 = vld [vmem:[%s1411_s1 + $0x2c0] sm:$0xff]  ;;  %v780_v9 = vpack.c.bf16 %v115_v2, %v111_v0  ;;  %v710_v10 = vpack.c.bf16 %v122_v4, %v118_v3  ;;  %v119_v12 = vld [vmem:[%s1411_s1 + $0x2d0] sm:$0xff] }
  0x20   :  { %767 = vmatprep.subr.bf16.mxu1 %v766_v29  ;;  %v124_v6 = vld [vmem:[%s1411_s1 + $0x2f8] sm:$0xff]  ;;  %v121_v11 = vld [vmem:[%s1411_s1 + $0x2e0] sm:$0xff]  ;;  %v123_v13 = vld [vmem:[%s1411_s1 + $0x2f0] sm:$0xff] }
  0x21   :  { %v782_v14 = vpack.c.bf16 %v124_v6, %v120_v5  ;;  %v126_v15 = vld [vmem:[%s1411_s1 + $0x308] sm:$0xff]  ;;  %v128_v18 = vld [vmem:[%s1411_s1 + $0x318] sm:$0xff]  ;;  %v712_v20 = vpack.c.bf16 %v121_v11, %v117_v8  ;;  %v784_v21 = vpack.c.bf16 %v123_v13, %v119_v12  ;;  %v125_v23 = vld [vmem:[%s1411_s1 + $0x300] sm:$0xff] }
  0x22   :  { %697 = vmatpush1.bf16.msra.mxu0 %v696_v35  ;;  %v130_v16 = vld [vmem:[%s1411_s1 + $0x328] sm:$0xff]  ;;  %v132_v19 = vld [vmem:[%s1411_s1 + $0x338] sm:$0xff]  ;;  %v129_v24 = vld [vmem:[%s1411_s1 + $0x320] sm:$0xff] }
  0x23   :  { %769 = vmatpush1.bf16.msra.mxu1 %v768_v36  ;;  %699 = vmatprep.subr.bf16.mxu0 %v698_v37  ;;  %v18_v17 = vld [vmem:[%s1412_s0 + $0x8] sm:$0xff]  ;;  %v714_v22 = vpack.c.bf16 %v130_v16, %v126_v15  ;;  %v127_v25 = vld [vmem:[%s1411_s1 + $0x310] sm:$0xff]  ;;  %v786_v26 = vpack.c.bf16 %v132_v19, %v128_v18  ;;  %v136_v30 = vld [vmem:[%s1411_s1 + $0x358] sm:$0xff]  ;;  %v716_v32 = vpack.c.bf16 %v129_v24, %v125_v23 }
  0x24   :  { %771 = vmatprep.subr.bf16.mxu1 %v770_v41  ;;  %250 = vmatprep.mubr.f32.mxu0 %v18_v17  ;;  %v131_v27 = vld [vmem:[%s1411_s1 + $0x330] sm:$0xff]  ;;  %v134_v28 = vld [vmem:[%s1411_s1 + $0x348] sm:$0xff]  ;;  %v140_v31 = vld [vmem:[%s1411_s1 + $0x378] sm:$0xff] }
  0x25   :  { %428 = vmatprep.mubr.f32.mxu1 %v18_v17  ;;  %v138_v29 = vld [vmem:[%s1411_s1 + $0x368] sm:$0xff]  ;;  %v788_v33 = vpack.c.bf16 %v131_v27, %v127_v25  ;;  %v133_v35 = vld [vmem:[%s1411_s1 + $0x340] sm:$0xff]  ;;  %v135_v37 = vld [vmem:[%s1411_s1 + $0x350] sm:$0xff]  ;;  %v790_v38 = vpack.c.bf16 %v140_v31, %v136_v30 }
  0x26   :  { %701 = vmatpush1.bf16.msra.mxu0 %v700_v47  ;;  %v718_v34 = vpack.c.bf16 %v138_v29, %v134_v28  ;;  %v137_v36 = vld [vmem:[%s1411_s1 + $0x360] sm:$0xff]  ;;  %v139_v39 = vld [vmem:[%s1411_s1 + $0x370] sm:$0xff]  ;;  %v142_v40 = vld [vmem:[%s1411_s1 + $0x388] sm:$0xff] }
  0x27   :  { %773 = vmatpush1.bf16.msra.mxu1 %v772_v48  ;;  %703 = vmatprep.subr.bf16.mxu0 %v702_v49  ;;  %v146_v41 = vld [vmem:[%s1411_s1 + $0x3a8] sm:$0xff]  ;;  %v144_v42 = vld [vmem:[%s1411_s1 + $0x398] sm:$0xff]  ;;  %v720_v44 = vpack.c.bf16 %v137_v36, %v133_v35  ;;  %v544_v45 = vld [vmem:[%s1413_s2 + $0x10] sm:$0xff]  ;;  %v792_v47 = vpack.c.bf16 %v139_v39, %v135_v37 }
  0x28   :  { %775 = vmatprep.subr.bf16.mxu1 %v774_v53  ;;  %v148_v43 = vld [vmem:[%s1411_s1 + $0x3b8] sm:$0xff]  ;;  %v542_v46 = vld [vmem:[%s1413_s2] sm:$0xff]  ;;  %v722_v48 = vpack.c.bf16 %v146_v41, %v142_v40  ;;  %v143_v51 = vld [vmem:[%s1411_s1 + $0x390] sm:$0xff]  ;;  %558 = vperm.xlu1 %829, %v544_v45   ;;  %v831_v41 = vmov 0.0  }
  0x29   :  { %v141_v49 = vld [vmem:[%s1411_s1 + $0x380] sm:$0xff]  ;;  %v794_v52 = vpack.c.bf16 %v148_v43, %v144_v42  ;;  %v147_v53 = vld [vmem:[%s1411_s1 + $0x3b0] sm:$0xff]  ;;  %v150_v54 = vld [vmem:[%s1411_s1 + $0x3c8] sm:$0xff]  ;;  %548 = vperm.xlu0 %828, %v542_v46  }
  0x2a   :  { %705 = vmatpush1.bf16.msra.mxu0 %v704_v59  ;;  %v145_v50 = vld [vmem:[%s1411_s1 + $0x3a0] sm:$0xff]  ;;  %v154_v55 = vld [vmem:[%s1411_s1 + $0x3e8] sm:$0xff]  ;;  %v152_v56 = vld [vmem:[%s1411_s1 + $0x3d8] sm:$0xff] }
  0x2b   :  { %777 = vmatpush1.bf16.msra.mxu1 %v776_v60  ;;  %707 = vmatprep.subr.bf16.mxu0 %v706_v61  ;;  %v156_v57 = vld [vmem:[%s1411_s1 + $0x3f8] sm:$0xff]  ;;  %v724_v59 = vpack.c.bf16 %v145_v50, %v141_v49  ;;  %v543_v60 = vld [vmem:[%s1413_s2 + $0x8] sm:$0xff]  ;;  %v796_v61 = vpack.c.bf16 %v147_v53, %v143_v51  ;;  %v726_v62 = vpack.c.bf16 %v154_v55, %v150_v54  ;;  %v149_v63 = vld [vmem:[%s1411_s1 + $0x3c0] sm:$0xff] }
  0x2c   :  { %779 = vmatprep.subr.bf16.mxu1 %v778_v1  ;;  %v545_v58 = vld [vmem:[%s1413_s2 + $0x18] sm:$0xff]  ;;  %v153_v0 = vld [vmem:[%s1411_s1 + $0x3e0] sm:$0xff]  ;;  %v151_v1 = vld [vmem:[%s1411_s1 + $0x3d0] sm:$0xff]  ;;  %v798_v2 = vpack.c.bf16 %v156_v57, %v152_v56 }
  0x2d   :  { %v155_v3 = vld [vmem:[%s1411_s1 + $0x3f0] sm:$0xff]  ;;  %v158_v4 = vld [vmem:[%s1411_s1 + $0x408] sm:$0xff]  ;;  %563 = vperm.xlu1 %829, %v545_v58   ;;  %v160_v6 = vld [vmem:[%s1411_s1 + $0x418] sm:$0xff]  ;;  %553 = vperm.xlu0 %828, %v543_v60  }
  0x2e   :  { %709 = vmatpush1.bf16.msra.mxu0 %v708_v7  ;;  %v162_v5 = vld [vmem:[%s1411_s1 + $0x428] sm:$0xff]  ;;  %v164_v7 = vld [vmem:[%s1411_s1 + $0x438] sm:$0xff]  ;;  %v800_v11 = vpack.c.bf16 %v155_v3, %v151_v1  ;;  %v157_v13 = vld [vmem:[%s1411_s1 + $0x400] sm:$0xff] }
  0x2f   :  { %781 = vmatpush1.bf16.msra.mxu1 %v780_v9  ;;  %711 = vmatprep.subr.bf16.mxu0 %v710_v10  ;;  %v583_v8 = vld [vmem:[%s1414_s3 + $0x8] sm:$0xff]  ;;  %v728_v9 = vpack.c.bf16 %v153_v0, %v149_v63  ;;  %v582_v10 = vld [vmem:[%s1414_s3] sm:$0xff]  ;;  %v730_v12 = vpack.c.bf16 %v162_v5, %v158_v4  ;;  %v802_v16 = vpack.c.bf16 %v164_v7, %v160_v6  ;;  %v159_v17 = vld [vmem:[%s1411_s1 + $0x410] sm:$0xff] }
  0x30   :  { %783 = vmatprep.subr.bf16.mxu1 %v782_v14  ;;  %v161_v14 = vld [vmem:[%s1411_s1 + $0x420] sm:$0xff]  ;;  %v163_v18 = vld [vmem:[%s1411_s1 + $0x430] sm:$0xff]  ;;  %v166_v19 = vld [vmem:[%s1411_s1 + $0x448] sm:$0xff] }
  0x31   :  { %v17_v15 = vld [vmem:[%s1412_s0] sm:$0xff]  ;;  %593 = vperm.xlu1 %829, %v583_v8   ;;  %588 = vperm.xlu0 %828, %v582_v10   ;;  %v168_v23 = vld [vmem:[%s1411_s1 + $0x458] sm:$0xff]  ;;  %v584_v25 = vld [vmem:[%s1414_s3 + $0x10] sm:$0xff] }
  0x32   :  { %713 = vmatpush1.bf16.msra.mxu0 %v712_v20  ;;  %v170_v20 = vld [vmem:[%s1411_s1 + $0x468] sm:$0xff]  ;;  %v172_v24 = vld [vmem:[%s1411_s1 + $0x478] sm:$0xff]  ;;  %v21_v27 = vld [vmem:[%s1412_s0 + $0x20] sm:$0xff] }
  0x33   :  { %785 = vmatpush1.bf16.msra.mxu1 %v784_v21  ;;  %715 = vmatprep.subr.bf16.mxu0 %v714_v22  ;;  %v585_v21 = vld [vmem:[%s1414_s3 + $0x18] sm:$0xff]  ;;  %v732_v22 = vpack.c.bf16 %v161_v14, %v157_v13  ;;  %v734_v28 = vpack.c.bf16 %v170_v20, %v166_v19  ;;  %v165_v29 = vld [vmem:[%s1411_s1 + $0x440] sm:$0xff]  ;;  %v806_v31 = vpack.c.bf16 %v172_v24, %v168_v23  ;;  %v27_v39 = vld [vmem:[%s1412_s0 + $0x50] sm:$0xff] }
  0x34   :  { %787 = vmatprep.subr.bf16.mxu1 %v786_v26  ;;  %v804_v26 = vpack.c.bf16 %v163_v18, %v159_v17  ;;  %v169_v30 = vld [vmem:[%s1411_s1 + $0x460] sm:$0xff]  ;;  %v24_v35 = vld [vmem:[%s1412_s0 + $0x38] sm:$0xff]  ;;  %v26_v40 = vld [vmem:[%s1412_s0 + $0x48] sm:$0xff] }
  0x35   :  { %603 = vperm.xlu1 %829, %v585_v21   ;;  %598 = vperm.xlu0 %828, %v584_v25   ;;  %v736_v36 = vpack.c.bf16 %v169_v30, %v165_v29  ;;  %v19_v42 = vld [vmem:[%s1412_s0 + $0x10] sm:$0xff]  ;;  %v22_v43 = vld [vmem:[%s1412_s0 + $0x28] sm:$0xff]  ;;  %v28_v45 = vld [vmem:[%s1412_s0 + $0x58] sm:$0xff] }
  0x36   :  { %717 = vmatpush1.bf16.msra.mxu0 %v716_v32  ;;  %v167_v32 = vld [vmem:[%s1411_s1 + $0x450] sm:$0xff] }
  0x37   :  { %789 = vmatpush1.bf16.msra.mxu1 %v788_v33  ;;  %719 = vmatprep.subr.bf16.mxu0 %v718_v34  ;;  %v171_v33 = vld [vmem:[%s1411_s1 + $0x470] sm:$0xff]  ;;  %v20_v34 = vld [vmem:[%s1412_s0 + $0x18] sm:$0xff] }
  0x38   :  { %791 = vmatprep.subr.bf16.mxu1 %v790_v38  ;;  %v808_v37 = vpack.c.bf16 %v171_v33, %v167_v32  ;;  %v23_v38 = vld [vmem:[%s1412_s0 + $0x30] sm:$0xff] }
  0x3a   :  { %721 = vmatpush1.bf16.msra.mxu0 %v720_v44  ;;  %v25_v44 = vld [vmem:[%s1412_s0 + $0x40] sm:$0xff] }
  0x3b   :  { %793 = vmatpush1.bf16.msra.mxu1 %v792_v47  ;;  %723 = vmatprep.subr.bf16.mxu0 %v722_v48 }
  0x3c   :  { %795 = vmatprep.subr.bf16.mxu1 %v794_v52 }
  0x3e   :  { %725 = vmatpush1.bf16.msra.mxu0 %v724_v59 }
  0x3f   :  { %797 = vmatpush1.bf16.msra.mxu1 %v796_v61  ;;  %727 = vmatprep.subr.bf16.mxu0 %v726_v62 }
  0x40   :  { %799 = vmatprep.subr.bf16.mxu1 %v798_v2 }
  0x42   :  { %729 = vmatpush1.bf16.msra.mxu0 %v728_v9 }
  0x43   :  { %801 = vmatpush1.bf16.msra.mxu1 %v800_v11  ;;  %731 = vmatprep.subr.bf16.mxu0 %v730_v12 }
  0x44   :  { %803 = vmatprep.subr.bf16.mxu1 %v802_v16 }
  0x45   :  { %251 = vmatmul.mubr.f32.vlgmr.msra.gmra.mrb[0].mxu0 %v17_v15 }
  0x46   :  { %429 = vmatmul.mubr.f32.vlgmr.msra.gmra.mrb[0].mxu1 %v17_v15  ;;  %733 = vmatpush1.bf16.msra.mxu0 %v732_v22 }
  0x47   :  { %805 = vmatpush1.bf16.msra.mxu1 %v804_v26  ;;  %256 = vmatprep.mubr.f32.mxu0 %v21_v27 }
  0x48   :  { %434 = vmatprep.mubr.f32.mxu1 %v21_v27  ;;  %735 = vmatprep.subr.bf16.mxu0 %v734_v28 }
  0x49   :  { %257 = vmatmul.mubr.f32.gmra.mrb[2].mxu0 %v20_v34  ;;  %807 = vmatprep.subr.bf16.mxu1 %v806_v31 }
  0x4a   :  { %435 = vmatmul.mubr.f32.gmra.mrb[2].mxu1 %v20_v34  ;;  %262 = vmatprep.mubr.f32.mxu0 %v24_v35 }
  0x4b   :  { %440 = vmatprep.mubr.f32.mxu1 %v24_v35  ;;  %737 = vmatpush1.bf16.msra.mxu0 %v736_v36 }
  0x4c   :  { %809 = vmatpush1.bf16.msra.mxu1 %v808_v37 }
  0x4d   :  { %263 = vmatmul.mubr.f32.gmra.mrb[4].mxu0 %v23_v38 }
  0x4e   :  { %441 = vmatmul.mubr.f32.gmra.mrb[4].mxu1 %v23_v38  ;;  %268 = vmatprep.mubr.f32.mxu0 %v27_v39 }
  0x4f   :  { %446 = vmatprep.mubr.f32.mxu1 %v27_v39 }
  0x51   :  { %269 = vmatmul.mubr.f32.gmra.mrb[6].mxu0 %v26_v40 }
  0x52   :  { %447 = vmatmul.mubr.f32.gmra.mrb[6].mxu1 %v26_v40  ;;  %339 = vmatprep.mubr.f32.mxu0 %v831_v41 }
  0x53   :  { %517 = vmatprep.mubr.f32.mxu1 %v831_v41 }
  0x55   :  { %658 = vmatmul.mubr.msk.f32.vlgmr.msra.gmra.mrb[0].mxu0 %vm173_vm0, %v19_v42 }
  0x56   :  { %662 = vmatmul.mubr.msk.f32.vlgmr.msra.gmra.mrb[0].mxu1 %vm173_vm0, %v19_v42  ;;  %345 = vmatprep.mubr.f32.mxu0 %v831_v41 }
  0x57   :  { %523 = vmatprep.mubr.f32.mxu1 %v831_v41 }
  0x59   :  { %659 = vmatmul.mubr.msk.f32.gmra.mrb[2].mxu0 %vm173_vm0, %v22_v43 }
  0x5a   :  { %663 = vmatmul.mubr.msk.f32.gmra.mrb[2].mxu1 %vm173_vm0, %v22_v43  ;;  %351 = vmatprep.mubr.f32.mxu0 %v831_v41 }
  0x5b   :  { %529 = vmatprep.mubr.f32.mxu1 %v831_v41 }
  0x5d   :  { %660 = vmatmul.mubr.msk.f32.gmra.mrb[4].mxu0 %vm173_vm0, %v25_v44 }
  0x5e   :  { %664 = vmatmul.mubr.msk.f32.gmra.mrb[4].mxu1 %vm173_vm0, %v25_v44  ;;  %357 = vmatprep.mubr.f32.mxu0 %v831_v41 }
  0x5f   :  { %535 = vmatprep.mubr.f32.mxu1 %v831_v41 }
  0x61   :  { %661 = vmatmul.mubr.msk.f32.gmra.mrb[6].mxu0 %vm173_vm0, %v28_v45 }
  0x62   :  { %665 = vmatmul.mubr.msk.f32.gmra.mrb[6].mxu1 %vm173_vm0, %v28_v45 }
  0xa7   :  { %v559_v47 = vpop.permute.xlu1 %558 }
  0xa8   :  { %v549_v46 = vpop.permute.xlu0 %548 }
  0xac   :  { %v554_v48 = vpop.permute.xlu0 %553  ;;  %v1357_v49 = vpop.permute.xlu1 %563 }
  0xb0   :  { %v589_v54 = vpop.permute.xlu0 %588  ;;  %v594_v4 = vpop.permute.xlu1 %593 }
  0xb4   :  { %v599_v21 = vpop.permute.xlu0 %598  ;;  %v604_v38 = vpop.permute.xlu1 %603 }
 0x128   :  { %v341_v50 = vpop.f32.mrb[0].mxu0 }
 0x129   :  { %v566_v51 = vmul.f32 %v549_v46, %v341_v50  ;;  %v519_v52 = vpop.f32.mrb[0].mxu1  ;;  %v343_v53 = vpop.f32.mrb[1].mxu0 }
 0x12a   :  { %v568_v55 = vmul.f32 %v549_v46, %v519_v52  ;;  %v567_v56 = vmul.f32 %v549_v46, %v343_v53  ;;  %v521_v57 = vpop.f32.mrb[1].mxu1 }
 0x12b   :  { %v606_v58 = vadd.f32 %v589_v54, %v566_v51  ;;  %v569_v59 = vmul.f32 %v549_v46, %v521_v57 }
 0x12c   :  { %v608_v60 = vadd.f32 %v589_v54, %v568_v55  ;;  %v607_v61 = vadd.f32 %v589_v54, %v567_v56  ;;  %v347_v62 = vpop.f32.mrb[2].mxu0 }
 0x12d   :  { %v622_v63 = vmax.f32 %v606_v58, 0.0  ;;  %v609_v0 = vadd.f32 %v589_v54, %v569_v59  ;;  %v570_v1 = vmul.f32 %v554_v48, %v347_v62  ;;  %v525_v2 = vpop.f32.mrb[2].mxu1  ;;  %v349_v3 = vpop.f32.mrb[3].mxu0 }
 0x12e   :  { %v624_v5 = vmax.f32 %v608_v60, 0.0  ;;  %v623_v6 = vmax.f32 %v607_v61, 0.0  ;;  %v572_v7 = vmul.f32 %v554_v48, %v525_v2  ;;  %v571_v8 = vmul.f32 %v554_v48, %v349_v3  ;;  %v527_v9 = vpop.f32.mrb[3].mxu1 }
 0x12f   :  { %638 = vst [vmem:[%s1415_s4] sm:$0xff] %v622_v63  ;;  %v625_v10 = vmax.f32 %v609_v0, 0.0  ;;  %v610_v11 = vadd.f32 %v594_v4, %v570_v1  ;;  %v573_v12 = vmul.f32 %v554_v48, %v527_v9 }
 0x130   :  { %640 = vst [vmem:[%s1415_s4 + $0x10] sm:$0xff] %v624_v5  ;;  %639 = vst [vmem:[%s1415_s4 + $0x8] sm:$0xff] %v623_v6  ;;  %v612_v13 = vadd.f32 %v594_v4, %v572_v7  ;;  %v611_v14 = vadd.f32 %v594_v4, %v571_v8  ;;  %v353_v15 = vpop.f32.mrb[4].mxu0 }
 0x131   :  { %641 = vst [vmem:[%s1415_s4 + $0x18] sm:$0xff] %v625_v10  ;;  %v626_v16 = vmax.f32 %v610_v11, 0.0  ;;  %v613_v17 = vadd.f32 %v594_v4, %v573_v12  ;;  %v574_v18 = vmul.f32 %v559_v47, %v353_v15  ;;  %v531_v19 = vpop.f32.mrb[4].mxu1  ;;  %v355_v20 = vpop.f32.mrb[5].mxu0 }
 0x132   :  { %v628_v22 = vmax.f32 %v612_v13, 0.0  ;;  %v627_v23 = vmax.f32 %v611_v14, 0.0  ;;  %v576_v24 = vmul.f32 %v559_v47, %v531_v19  ;;  %v575_v25 = vmul.f32 %v559_v47, %v355_v20  ;;  %v533_v26 = vpop.f32.mrb[5].mxu1 }
 0x133   :  { %642 = vst [vmem:[%s1415_s4 + $0x20] sm:$0xff] %v626_v16  ;;  %v629_v27 = vmax.f32 %v613_v17, 0.0  ;;  %v614_v28 = vadd.f32 %v599_v21, %v574_v18  ;;  %v577_v29 = vmul.f32 %v559_v47, %v533_v26 }
 0x134   :  { %644 = vst [vmem:[%s1415_s4 + $0x30] sm:$0xff] %v628_v22  ;;  %643 = vst [vmem:[%s1415_s4 + $0x28] sm:$0xff] %v627_v23  ;;  %v616_v30 = vadd.f32 %v599_v21, %v576_v24  ;;  %v615_v31 = vadd.f32 %v599_v21, %v575_v25  ;;  %v359_v32 = vpop.f32.mrb[6].mxu0 }
 0x135   :  { %645 = vst [vmem:[%s1415_s4 + $0x38] sm:$0xff] %v629_v27  ;;  %v630_v33 = vmax.f32 %v614_v28, 0.0  ;;  %v617_v34 = vadd.f32 %v599_v21, %v577_v29  ;;  %v578_v35 = vmul.f32 %v1357_v49, %v359_v32  ;;  %v537_v36 = vpop.f32.mrb[6].mxu1  ;;  %v361_v37 = vpop.f32.mrb[7].mxu0 }
 0x136   :  { %v632_v39 = vmax.f32 %v616_v30, 0.0  ;;  %v631_v40 = vmax.f32 %v615_v31, 0.0  ;;  %v580_v41 = vmul.f32 %v1357_v49, %v537_v36  ;;  %v579_v42 = vmul.f32 %v1357_v49, %v361_v37  ;;  %v539_v43 = vpop.f32.mrb[7].mxu1 }
 0x137   :  { %646 = vst [vmem:[%s1415_s4 + $0x40] sm:$0xff] %v630_v33  ;;  %v633_v44 = vmax.f32 %v617_v34, 0.0  ;;  %v618_v45 = vadd.f32 %v604_v38, %v578_v35  ;;  %v581_v46 = vmul.f32 %v1357_v49, %v539_v43 }
 0x138   :  { %648 = vst [vmem:[%s1415_s4 + $0x50] sm:$0xff] %v632_v39  ;;  %647 = vst [vmem:[%s1415_s4 + $0x48] sm:$0xff] %v631_v40  ;;  %v620_v47 = vadd.f32 %v604_v38, %v580_v41  ;;  %v619_v48 = vadd.f32 %v604_v38, %v579_v42 }
 0x139   :  { %649 = vst [vmem:[%s1415_s4 + $0x58] sm:$0xff] %v633_v44  ;;  %v634_v50 = vmax.f32 %v618_v45, 0.0  ;;  %v621_v51 = vadd.f32 %v604_v38, %v581_v46 }
 0x13a   :  { %v636_v52 = vmax.f32 %v620_v47, 0.0  ;;  %v635_v53 = vmax.f32 %v619_v48, 0.0 }
 0x13b   :  { %650 = vst [vmem:[%s1415_s4 + $0x60] sm:$0xff] %v634_v50  ;;  %v637_v49 = vmax.f32 %v621_v51, 0.0 }
 0x13c   :  { %652 = vst [vmem:[%s1415_s4 + $0x70] sm:$0xff] %v636_v52  ;;  %651 = vst [vmem:[%s1415_s4 + $0x68] sm:$0xff] %v635_v53 }
 0x13d   :  { %653 = vst [vmem:[%s1415_s4 + $0x78] sm:$0xff] %v637_v49 }

// kernel: forward.26
= control target key start
LH: loop header
LB: loop body
LE: loop exit
PB: predicated region body
PF: predicated region fallthrough
CT: control target
= control target key end

     0   :  { %v599_v3 = vmov 0   ;;  %vm77_vm0 = vcmask 261120   ;;  %s894_s1 = inlined_call_operand.vmem [shape: f32[288,128], index: 1, kind: input, shape index: {}]   ;;  %s895_s0 = inlined_call_operand.vmem [shape: f32[64,288], index: 0, kind: input, shape index: {}]   ;;  %s896_s2 = inlined_call_operand.vmem [shape: f32[64,1], index: 2, kind: input, shape index: {}]   ;;  %s897_s3 = inlined_call_operand.vmem [shape: f32[64,1], index: 3, kind: input, shape index: {}]   ;;  %s898_s4 = inlined_call_operand.vmem [shape: f32[64,128], index: 4, kind: output, shape index: {}]  }
   0x1   :  { %v57_v0 = vld [vmem:[%s894_s1 + $0x80] sm:$0xff]  ;;  %v58_v1 = vld [vmem:[%s894_s1 + $0x88] sm:$0xff]  ;;  %598 = vset.pattern.permute.xlu1 %v599_v3  ;;  %597 = vset.pattern.permute.xlu0 %v599_v3  ;;  %v59_v6 = vld [vmem:[%s894_s1 + $0x90] sm:$0xff] }
   0x2   :  { %v41_v2 = vld [vmem:[%s894_s1] sm:$0xff]  ;;  %v540_v4 = vpack.c.bf16 %v58_v1, %v57_v0  ;;  %v42_v5 = vld [vmem:[%s894_s1 + $0x8] sm:$0xff]  ;;  %v60_v7 = vld [vmem:[%s894_s1 + $0x98] sm:$0xff] }
   0x3   :  { %v542_v8 = vpack.c.bf16 %v42_v5, %v41_v2  ;;  %v544_v9 = vpack.c.bf16 %v60_v7, %v59_v6  ;;  %v43_v10 = vld [vmem:[%s894_s1 + $0x10] sm:$0xff]  ;;  %v44_v11 = vld [vmem:[%s894_s1 + $0x18] sm:$0xff]  ;;  %v61_v12 = vld [vmem:[%s894_s1 + $0xa0] sm:$0xff] }
   0x4   :  { %541 = vmatprep.subr.bf16.mxu0 %v540_v4  ;;  %580 = vmatprep.subr.bf16.mxu1 %v540_v4  ;;  %v62_v13 = vld [vmem:[%s894_s1 + $0xa8] sm:$0xff]  ;;  %v546_v14 = vpack.c.bf16 %v44_v11, %v43_v10  ;;  %v45_v16 = vld [vmem:[%s894_s1 + $0x20] sm:$0xff]  ;;  %v63_v18 = vld [vmem:[%s894_s1 + $0xb0] sm:$0xff] }
   0x5   :  { %543 = vmatpush3.bf16.msra.mxu0 %v542_v8  ;;  %588 = vmatpush3.bf16.msra.mxu1 %v542_v8  ;;  %v548_v15 = vpack.c.bf16 %v62_v13, %v61_v12  ;;  %v46_v17 = vld [vmem:[%s894_s1 + $0x28] sm:$0xff]  ;;  %v64_v19 = vld [vmem:[%s894_s1 + $0xb8] sm:$0xff]  ;;  %v47_v22 = vld [vmem:[%s894_s1 + $0x30] sm:$0xff] }
   0x6   :  { %545 = vmatprep.subr.bf16.mxu0 %v544_v9  ;;  %581 = vmatprep.subr.bf16.mxu1 %v544_v9  ;;  %v550_v20 = vpack.c.bf16 %v46_v17, %v45_v16  ;;  %v552_v21 = vpack.c.bf16 %v64_v19, %v63_v18  ;;  %v48_v23 = vld [vmem:[%s894_s1 + $0x38] sm:$0xff]  ;;  %v65_v24 = vld [vmem:[%s894_s1 + $0xc0] sm:$0xff]  ;;  %v66_v25 = vld [vmem:[%s894_s1 + $0xc8] sm:$0xff] }
   0x7   :  { %v18_v26 = vld [vmem:[%s895_s0 + $0x8] sm:$0xff]  ;;  %v36_v27 = vld [vmem:[%s895_s0 + $0x98] sm:$0xff]  ;;  %v554_v28 = vpack.c.bf16 %v48_v23, %v47_v22  ;;  %v556_v29 = vpack.c.bf16 %v66_v25, %v65_v24  ;;  %v49_v30 = vld [vmem:[%s894_s1 + $0x40] sm:$0xff] }
   0x8   :  { %166 = vmatprep.mubr.f32.mxu0 %v18_v26  ;;  %v50_v31 = vld [vmem:[%s894_s1 + $0x48] sm:$0xff]  ;;  %v67_v32 = vld [vmem:[%s894_s1 + $0xd0] sm:$0xff]  ;;  %v68_v33 = vld [vmem:[%s894_s1 + $0xd8] sm:$0xff]  ;;  %196 = vmatprep.mubr.f32.mxu1 %v36_v27 }
   0x9   :  { %547 = vmatpush3.bf16.msra.mxu0 %v546_v14  ;;  %589 = vmatpush3.bf16.msra.mxu1 %v546_v14  ;;  %v558_v34 = vpack.c.bf16 %v50_v31, %v49_v30  ;;  %v560_v35 = vpack.c.bf16 %v68_v33, %v67_v32  ;;  %v51_v36 = vld [vmem:[%s894_s1 + $0x50] sm:$0xff]  ;;  %v52_v37 = vld [vmem:[%s894_s1 + $0x58] sm:$0xff]  ;;  %v69_v38 = vld [vmem:[%s894_s1 + $0xe0] sm:$0xff] }
   0xa   :  { %549 = vmatprep.subr.bf16.mxu0 %v548_v15  ;;  %582 = vmatprep.subr.bf16.mxu1 %v548_v15  ;;  %v70_v39 = vld [vmem:[%s894_s1 + $0xe8] sm:$0xff]  ;;  %v562_v40 = vpack.c.bf16 %v52_v37, %v51_v36  ;;  %v314_v41 = vld [vmem:[%s896_s2 + $0x10] sm:$0xff]  ;;  %v312_v42 = vld [vmem:[%s896_s2] sm:$0xff] }
   0xb   :  { %v564_v43 = vpack.c.bf16 %v70_v39, %v69_v38  ;;  %v53_v44 = vld [vmem:[%s894_s1 + $0x60] sm:$0xff]  ;;  %v54_v45 = vld [vmem:[%s894_s1 + $0x68] sm:$0xff]  ;;  %v71_v46 = vld [vmem:[%s894_s1 + $0xf0] sm:$0xff]  ;;  %332 = vperm.xlu1 %598, %v314_v41   ;;  %322 = vperm.xlu0 %597, %v312_v42  }
   0xc   :  { %v72_v47 = vld [vmem:[%s894_s1 + $0xf8] sm:$0xff]  ;;  %v313_v49 = vld [vmem:[%s896_s2 + $0x8] sm:$0xff]  ;;  %v566_v50 = vpack.c.bf16 %v54_v45, %v53_v44  ;;  %v55_v52 = vld [vmem:[%s894_s1 + $0x70] sm:$0xff] }
   0xd   :  { %551 = vmatpush3.bf16.msra.mxu0 %v550_v20  ;;  %590 = vmatpush3.bf16.msra.mxu1 %v550_v20  ;;  %v315_v48 = vld [vmem:[%s896_s2 + $0x18] sm:$0xff]  ;;  %v568_v51 = vpack.c.bf16 %v72_v47, %v71_v46  ;;  %v73_v54 = vld [vmem:[%s894_s1 + $0x100] sm:$0xff]  ;;  %v74_v55 = vld [vmem:[%s894_s1 + $0x108] sm:$0xff] }
   0xe   :  { %553 = vmatprep.subr.bf16.mxu0 %v552_v21  ;;  %583 = vmatprep.subr.bf16.mxu1 %v552_v21  ;;  %v56_v53 = vld [vmem:[%s894_s1 + $0x78] sm:$0xff]  ;;  %v317_v56 = vld [vmem:[%s896_s2 + $0x28] sm:$0xff]  ;;  %v316_v57 = vld [vmem:[%s896_s2 + $0x20] sm:$0xff]  ;;  %v572_v59 = vpack.c.bf16 %v74_v55, %v73_v54 }
   0xf   :  { %337 = vperm.xlu1 %598, %v315_v48   ;;  %327 = vperm.xlu0 %597, %v313_v49   ;;  %v570_v58 = vpack.c.bf16 %v56_v53, %v55_v52  ;;  %v75_v60 = vld [vmem:[%s894_s1 + $0x110] sm:$0xff]  ;;  %v76_v61 = vld [vmem:[%s894_s1 + $0x118] sm:$0xff]  ;;  %v17_v0 = vld [vmem:[%s895_s0] sm:$0xff] }
  0x10   :  { %v319_v62 = vld [vmem:[%s896_s2 + $0x38] sm:$0xff]  ;;  %v318_v63 = vld [vmem:[%s896_s2 + $0x30] sm:$0xff]  ;;  %v21_v2 = vld [vmem:[%s895_s0 + $0x20] sm:$0xff]  ;;  %v576_v3 = vpack.c.bf16 %v76_v61, %v75_v60 }
  0x11   :  { %555 = vmatpush3.bf16.msra.mxu0 %v554_v28  ;;  %591 = vmatpush3.bf16.msra.mxu1 %v554_v28  ;;  %v35_v1 = vld [vmem:[%s895_s0 + $0x90] sm:$0xff]  ;;  %v369_v5 = vld [vmem:[%s897_s3 + $0x8] sm:$0xff]  ;;  %v368_v6 = vld [vmem:[%s897_s3] sm:$0xff] }
  0x12   :  { %557 = vmatprep.subr.bf16.mxu0 %v556_v29  ;;  %584 = vmatprep.subr.bf16.mxu1 %v556_v29  ;;  %v39_v4 = vld [vmem:[%s895_s0 + $0xb0] sm:$0xff]  ;;  %v20_v7 = vld [vmem:[%s895_s0 + $0x18] sm:$0xff]  ;;  %v38_v8 = vld [vmem:[%s895_s0 + $0xa8] sm:$0xff] }
  0x13   :  { %347 = vperm.xlu1 %598, %v317_v56   ;;  %342 = vperm.xlu0 %597, %v316_v57   ;;  %v24_v9 = vld [vmem:[%s895_s0 + $0x38] sm:$0xff]  ;;  %v19_v10 = vld [vmem:[%s895_s0 + $0x10] sm:$0xff]  ;;  %v22_v14 = vld [vmem:[%s895_s0 + $0x28] sm:$0xff] }
  0x14   :  { %v371_v11 = vld [vmem:[%s897_s3 + $0x18] sm:$0xff]  ;;  %v370_v12 = vld [vmem:[%s897_s3 + $0x10] sm:$0xff]  ;;  %v25_v16 = vld [vmem:[%s895_s0 + $0x40] sm:$0xff] }
  0x15   :  { %559 = vmatpush3.bf16.msra.mxu0 %v558_v34  ;;  %592 = vmatpush3.bf16.msra.mxu1 %v558_v34  ;;  %v23_v13 = vld [vmem:[%s895_s0 + $0x30] sm:$0xff]  ;;  %v373_v17 = vld [vmem:[%s897_s3 + $0x28] sm:$0xff]  ;;  %v372_v18 = vld [vmem:[%s897_s3 + $0x20] sm:$0xff] }
  0x16   :  { %561 = vmatprep.subr.bf16.mxu0 %v560_v35  ;;  %585 = vmatprep.subr.bf16.mxu1 %v560_v35  ;;  %v27_v15 = vld [vmem:[%s895_s0 + $0x50] sm:$0xff]  ;;  %v26_v19 = vld [vmem:[%s895_s0 + $0x48] sm:$0xff]  ;;  %v28_v20 = vld [vmem:[%s895_s0 + $0x58] sm:$0xff] }
  0x17   :  { %357 = vperm.xlu1 %598, %v319_v62   ;;  %352 = vperm.xlu0 %597, %v318_v63   ;;  %v30_v21 = vld [vmem:[%s895_s0 + $0x68] sm:$0xff]  ;;  %v31_v22 = vld [vmem:[%s895_s0 + $0x70] sm:$0xff]  ;;  %v375_v23 = vld [vmem:[%s897_s3 + $0x38] sm:$0xff] }
  0x18   :  { %v374_v24 = vld [vmem:[%s897_s3 + $0x30] sm:$0xff]  ;;  %v29_v25 = vld [vmem:[%s895_s0 + $0x60] sm:$0xff]  ;;  %v34_v26 = vld [vmem:[%s895_s0 + $0x88] sm:$0xff] }
  0x19   :  { %563 = vmatpush3.bf16.msra.mxu0 %v562_v40  ;;  %593 = vmatpush3.bf16.msra.mxu1 %v562_v40  ;;  %v33_v27 = vld [vmem:[%s895_s0 + $0x80] sm:$0xff]  ;;  %v32_v29 = vld [vmem:[%s895_s0 + $0x78] sm:$0xff] }
  0x1a   :  { %565 = vmatprep.subr.bf16.mxu0 %v564_v43  ;;  %586 = vmatprep.subr.bf16.mxu1 %v564_v43  ;;  %v37_v28 = vld [vmem:[%s895_s0 + $0xa0] sm:$0xff]  ;;  %v40_v30 = vld [vmem:[%s895_s0 + $0xb8] sm:$0xff] }
  0x1b   :  { %383 = vperm.xlu1 %598, %v369_v5   ;;  %378 = vperm.xlu0 %597, %v368_v6  }
  0x1d   :  { %567 = vmatpush3.bf16.msra.mxu0 %v566_v50  ;;  %594 = vmatpush3.bf16.msra.mxu1 %v566_v50 }
  0x1e   :  { %569 = vmatprep.subr.bf16.mxu0 %v568_v51  ;;  %587 = vmatprep.subr.bf16.mxu1 %v568_v51 }
  0x1f   :  { %393 = vperm.xlu1 %598, %v371_v11   ;;  %388 = vperm.xlu0 %597, %v370_v12  }
  0x21   :  { %571 = vmatpush3.bf16.msra.mxu0 %v570_v58  ;;  %595 = vmatpush3.bf16.msra.mxu1 %v570_v58 }
  0x22   :  { %573 = vmatprep.subr.bf16.mxu1 %v572_v59 }
  0x23   :  { %403 = vperm.xlu1 %598, %v373_v17   ;;  %398 = vperm.xlu0 %597, %v372_v18  }
  0x24   :  { %167 = vmatmul.mubr.f32.vlgmr.msra.gmra.mrb[0].mxu0 %v17_v0  ;;  %197 = vmatmul.mubr.f32.vlgmr.msra.gmra.mrb[0].mxu1 %v35_v1 }
  0x25   :  { %575 = vmatpush3.bf16.msra.mxu1 %v572_v59  ;;  %171 = vmatprep.mubr.f32.mxu0 %v21_v2 }
  0x26   :  { %201 = vmatprep.mubr.f32.mxu1 %v39_v4  ;;  %577 = vmatprep.subr.bf16.mxu1 %v576_v3 }
  0x27   :  { %413 = vperm.xlu1 %598, %v375_v23   ;;  %408 = vperm.xlu0 %597, %v374_v24  }
  0x28   :  { %172 = vmatmul.mubr.f32.gmra.mrb[2].mxu0 %v20_v7  ;;  %202 = vmatmul.mubr.f32.gmra.mrb[2].mxu1 %v38_v8 }
  0x29   :  { %579 = vmatpush3.bf16.msra.mxu1 %v576_v3  ;;  %176 = vmatprep.mubr.f32.mxu0 %v24_v9 }
  0x2a   :  { %528 = vmatprep.mubr.msk.f32.mxu1 %vm77_vm0, %v19_v10 }
  0x2c   :  { %177 = vmatmul.mubr.f32.gmra.mrb[4].mxu0 %v23_v13  ;;  %529 = vmatmul.mubr.msk.f32.vlgmr.msra.gmra.mrb[4].mxu1 %vm77_vm0, %v22_v14 }
  0x2d   :  { %181 = vmatprep.mubr.f32.mxu0 %v27_v15  ;;  %531 = vmatprep.mubr.msk.f32.mxu1 %vm77_vm0, %v25_v16 }
  0x30   :  { %182 = vmatmul.mubr.f32.gmra.mrb[6].mxu0 %v26_v19  ;;  %532 = vmatmul.mubr.msk.f32.gmra.mrb[6].mxu1 %vm77_vm0, %v28_v20 }
  0x31   :  { %186 = vmatprep.mubr.f32.mxu0 %v30_v21  ;;  %534 = vmatprep.mubr.msk.f32.mxu1 %vm77_vm0, %v31_v22 }
  0x34   :  { %187 = vmatmul.mubr.f32.gmra.mrb[8].mxu0 %v29_v25  ;;  %535 = vmatmul.mubr.msk.f32.gmra.mrb[8].mxu1 %vm77_vm0, %v34_v26 }
  0x35   :  { %191 = vmatprep.mubr.f32.mxu0 %v33_v27  ;;  %537 = vmatprep.mubr.msk.f32.mxu1 %vm77_vm0, %v37_v28 }
  0x38   :  { %192 = vmatmul.mubr.f32.gmra.mrb[10].mxu0 %v32_v29  ;;  %538 = vmatmul.mubr.msk.f32.gmra.mrb[10].mxu1 %vm77_vm0, %v40_v30 }
  0x8a   :  { %v333_v31 = vpop.permute.xlu1 %332  ;;  %v323_v32 = vpop.permute.xlu0 %322 }
  0x8e   :  { %v338_v33 = vpop.permute.xlu1 %337  ;;  %v328_v34 = vpop.permute.xlu0 %327 }
  0x92   :  { %v861_v35 = vpop.permute.xlu1 %347  ;;  %v343_v36 = vpop.permute.xlu0 %342 }
  0x96   :  { %v863_v37 = vpop.permute.xlu1 %357  ;;  %v865_v38 = vpop.permute.xlu0 %352 }
  0x9a   :  { %v384_v45 = vpop.permute.xlu1 %383  ;;  %v379_v46 = vpop.permute.xlu0 %378 }
  0x9e   :  { %v394_v60 = vpop.permute.xlu1 %393  ;;  %v389_v61 = vpop.permute.xlu0 %388 }
  0xa2   :  { %v404_v16 = vpop.permute.xlu1 %403  ;;  %v399_v20 = vpop.permute.xlu0 %398 }
  0xf7   :  { %v484_v39 = vpop.f32.mrb[0].mxu0  ;;  %v502_v40 = vpop.f32.mrb[0].mxu1 }
  0xf8   :  { %v485_v41 = vpop.f32.mrb[1].mxu0  ;;  %v503_v42 = vpop.f32.mrb[1].mxu1 }
  0xf9   :  { %v486_v43 = vadd.f32 %v485_v41, %v484_v39  ;;  %v504_v44 = vadd.f32 %v503_v42, %v502_v40  ;;  %v409_v42 = vpop.permute.xlu0 %408 }
  0xfb   :  { %v487_v47 = vpop.f32.mrb[2].mxu0  ;;  %v505_v48 = vpop.f32.mrb[2].mxu1 }
  0xfc   :  { %v488_v49 = vpop.f32.mrb[3].mxu0  ;;  %v506_v50 = vpop.f32.mrb[3].mxu1 }
  0xfd   :  { %v489_v51 = vadd.f32 %v488_v49, %v487_v47  ;;  %v507_v52 = vadd.f32 %v506_v50, %v505_v48 }
  0xff   :  { %v490_v53 = vpop.f32.mrb[4].mxu0  ;;  %v530_v54 = vpop.f32.mrb[4].mxu1 }
 0x100   :  { %v279_v55 = vadd.f32 %v530_v54, %v489_v51  ;;  %v491_v56 = vpop.f32.mrb[5].mxu0  ;;  %v273_v57 = vpop.f32.mrb[5].mxu1 }
 0x101   :  { %v492_v58 = vadd.f32 %v491_v56, %v490_v53  ;;  %v274_v59 = vadd.f32 %v486_v43, %v273_v57 }
 0x102   :  { %v361_v62 = vmul.f32 %v328_v34, %v279_v55  ;;  %v414_v34 = vpop.permute.xlu1 %413 }
 0x103   :  { %v360_v63 = vmul.f32 %v323_v32, %v274_v59  ;;  %v493_v0 = vpop.f32.mrb[6].mxu0  ;;  %v533_v1 = vpop.f32.mrb[6].mxu1 }
 0x104   :  { %v417_v2 = vadd.f32 %v384_v45, %v361_v62  ;;  %v494_v3 = vpop.f32.mrb[7].mxu0  ;;  %v283_v4 = vpop.f32.mrb[7].mxu1 }
 0x105   :  { %v416_v5 = vadd.f32 %v379_v46, %v360_v63  ;;  %v495_v6 = vadd.f32 %v494_v3, %v493_v0  ;;  %v284_v7 = vadd.f32 %v492_v58, %v283_v4 }
 0x106   :  { %v425_v8 = vmax.f32 %v417_v2, 0.0 }
 0x107   :  { %v424_v9 = vmax.f32 %v416_v5, 0.0  ;;  %v289_v10 = vadd.f32 %v533_v1, %v495_v6  ;;  %v362_v11 = vmul.f32 %v333_v31, %v284_v7  ;;  %v496_v12 = vpop.f32.mrb[8].mxu0  ;;  %v536_v13 = vpop.f32.mrb[8].mxu1 }
 0x108   :  { %433 = vst [vmem:[%s898_s4 + $0x8] sm:$0xff] %v425_v8  ;;  %v497_v14 = vpop.f32.mrb[9].mxu0  ;;  %v293_v15 = vpop.f32.mrb[9].mxu1 }
 0x109   :  { %432 = vst [vmem:[%s898_s4] sm:$0xff] %v424_v9  ;;  %v363_v17 = vmul.f32 %v338_v33, %v289_v10  ;;  %v418_v18 = vadd.f32 %v389_v61, %v362_v11  ;;  %v498_v19 = vadd.f32 %v497_v14, %v496_v12 }
 0x10b   :  { %v419_v21 = vadd.f32 %v394_v60, %v363_v17  ;;  %v426_v22 = vmax.f32 %v418_v18, 0.0  ;;  %v294_v23 = vadd.f32 %v498_v19, %v293_v15  ;;  %v499_v24 = vpop.f32.mrb[10].mxu0  ;;  %v539_v25 = vpop.f32.mrb[10].mxu1 }
 0x10c   :  { %v309_v26 = vadd.f32 %v539_v25, %v507_v52  ;;  %v500_v27 = vpop.f32.mrb[11].mxu0  ;;  %v303_v28 = vpop.f32.mrb[11].mxu1 }
 0x10d   :  { %v427_v29 = vmax.f32 %v419_v21, 0.0  ;;  %434 = vst [vmem:[%s898_s4 + $0x10] sm:$0xff] %v426_v22  ;;  %v364_v30 = vmul.f32 %v343_v36, %v294_v23  ;;  %v501_v31 = vadd.f32 %v500_v27, %v499_v24  ;;  %v304_v32 = vadd.f32 %v504_v44, %v303_v28 }
 0x10e   :  { %v367_v33 = vmul.f32 %v863_v37, %v309_v26 }
 0x10f   :  { %435 = vst [vmem:[%s898_s4 + $0x18] sm:$0xff] %v427_v29  ;;  %v420_v39 = vadd.f32 %v399_v20, %v364_v30  ;;  %v299_v40 = vadd.f32 %v536_v13, %v501_v31  ;;  %v366_v41 = vmul.f32 %v865_v38, %v304_v32 }
 0x110   :  { %v423_v43 = vadd.f32 %v414_v34, %v367_v33 }
 0x111   :  { %v428_v45 = vmax.f32 %v420_v39, 0.0  ;;  %v365_v46 = vmul.f32 %v861_v35, %v299_v40  ;;  %v422_v47 = vadd.f32 %v409_v42, %v366_v41 }
 0x112   :  { %v431_v36 = vmax.f32 %v423_v43, 0.0 }
 0x113   :  { %436 = vst [vmem:[%s898_s4 + $0x20] sm:$0xff] %v428_v45  ;;  %v421_v37 = vadd.f32 %v404_v16, %v365_v46  ;;  %v430_v44 = vmax.f32 %v422_v47, 0.0 }
 0x114   :  { %439 = vst [vmem:[%s898_s4 + $0x38] sm:$0xff] %v431_v36 }
 0x115   :  { %v429_v48 = vmax.f32 %v421_v37, 0.0  ;;  %438 = vst [vmem:[%s898_s4 + $0x30] sm:$0xff] %v430_v44 }
 0x117   :  { %437 = vst [vmem:[%s898_s4 + $0x28] sm:$0xff] %v429_v48 }

// kernel: forward.27
= control target key start
LH: loop header
LB: loop body
LE: loop exit
PB: predicated region body
PF: predicated region fallthrough
CT: control target
= control target key end

     0   :  { %vm29_vm0 = vcmask 261120   ;;  %v338_v3 = vmov 0   ;;  %s480_s1 = inlined_call_operand.vmem [shape: f32[32,128], index: 1, kind: input, shape index: {}]   ;;  %s481_s0 = inlined_call_operand.vmem [shape: f32[64,32], index: 0, kind: input, shape index: {}]   ;;  %s482_s2 = inlined_call_operand.vmem [shape: f32[64,1], index: 2, kind: input, shape index: {}]   ;;  %s483_s3 = inlined_call_operand.vmem [shape: f32[64,1], index: 3, kind: input, shape index: {}]   ;;  %s484_s4 = inlined_call_operand.vmem [shape: f32[64,128], index: 4, kind: output, shape index: {}]  }
   0x1   :  { %v25_v0 = vld [vmem:[%s480_s1] sm:$0xff]  ;;  %v26_v1 = vld [vmem:[%s480_s1 + $0x8] sm:$0xff]  ;;  %v27_v2 = vld [vmem:[%s480_s1 + $0x10] sm:$0xff]  ;;  %337 = vset.pattern.permute.xlu1 %v338_v3  ;;  %336 = vset.pattern.permute.xlu0 %v338_v3 }
   0x2   :  { %v323_v4 = vpack.c.bf16 %v26_v1, %v25_v0  ;;  %v28_v5 = vld [vmem:[%s480_s1 + $0x18] sm:$0xff]  ;;  %v17_v6 = vld [vmem:[%s481_s0] sm:$0xff]  ;;  %v161_v9 = vld [vmem:[%s482_s2 + $0x10] sm:$0xff] }
   0x3   :  { %v21_v7 = vld [vmem:[%s481_s0 + $0x20] sm:$0xff]  ;;  %v327_v8 = vpack.c.bf16 %v28_v5, %v27_v2  ;;  %311 = vmatprep.mubr.msk.f32.mxu0 %vm29_vm0, %v17_v6  ;;  %179 = vperm.xlu1 %337, %v161_v9   ;;  %v162_v11 = vld [vmem:[%s482_s2 + $0x18] sm:$0xff]  ;;  %v160_v12 = vld [vmem:[%s482_s2 + $0x8] sm:$0xff] }
   0x4   :  { %317 = vmatprep.mubr.msk.f32.mxu1 %vm29_vm0, %v21_v7  ;;  %324 = vmatprep.subr.bf16.mxu0 %v323_v4  ;;  %v159_v10 = vld [vmem:[%s482_s2] sm:$0xff]  ;;  %v18_v13 = vld [vmem:[%s481_s0 + $0x8] sm:$0xff]  ;;  %v19_v15 = vld [vmem:[%s481_s0 + $0x10] sm:$0xff] }
   0x5   :  { %331 = vmatprep.subr.bf16.mxu1 %v323_v4  ;;  %326 = vmatpush3.bf16.msra.mxu0 %v323_v4  ;;  %v22_v14 = vld [vmem:[%s481_s0 + $0x28] sm:$0xff]  ;;  %v23_v16 = vld [vmem:[%s481_s0 + $0x30] sm:$0xff]  ;;  %v163_v18 = vld [vmem:[%s482_s2 + $0x20] sm:$0xff] }
   0x6   :  { %333 = vmatpush3.bf16.msra.mxu1 %v323_v4  ;;  %328 = vmatprep.subr.bf16.mxu0 %v327_v8  ;;  %v164_v17 = vld [vmem:[%s482_s2 + $0x28] sm:$0xff]  ;;  %v20_v19 = vld [vmem:[%s481_s0 + $0x18] sm:$0xff]  ;;  %v165_v22 = vld [vmem:[%s482_s2 + $0x30] sm:$0xff] }
   0x7   :  { %332 = vmatprep.subr.bf16.mxu1 %v327_v8  ;;  %169 = vperm.xlu0 %336, %v159_v10   ;;  %v24_v20 = vld [vmem:[%s481_s0 + $0x38] sm:$0xff]  ;;  %v216_v23 = vld [vmem:[%s483_s3 + $0x8] sm:$0xff]  ;;  %v215_v24 = vld [vmem:[%s483_s3] sm:$0xff] }
   0x8   :  { %184 = vperm.xlu1 %337, %v162_v11   ;;  %v166_v21 = vld [vmem:[%s482_s2 + $0x38] sm:$0xff]  ;;  %v217_v26 = vld [vmem:[%s483_s3 + $0x10] sm:$0xff]  ;;  %v220_v27 = vld [vmem:[%s483_s3 + $0x28] sm:$0xff] }
   0x9   :  { %330 = vmatpush3.bf16.msra.mxu0 %v327_v8  ;;  %v218_v25 = vld [vmem:[%s483_s3 + $0x18] sm:$0xff]  ;;  %v219_v28 = vld [vmem:[%s483_s3 + $0x20] sm:$0xff]  ;;  %v221_v30 = vld [vmem:[%s483_s3 + $0x30] sm:$0xff] }
   0xa   :  { %334 = vmatpush3.bf16.msra.mxu1 %v327_v8  ;;  %v222_v29 = vld [vmem:[%s483_s3 + $0x38] sm:$0xff] }
   0xb   :  { %174 = vperm.xlu0 %336, %v160_v12  }
   0xc   :  { %312 = vmatmul.mubr.msk.f32.vlgmr.msra.gmra.mrb[0].mxu0 %vm29_vm0, %v18_v13  ;;  %194 = vperm.xlu1 %337, %v164_v17  }
   0xd   :  { %318 = vmatmul.mubr.msk.f32.vlgmr.msra.gmra.mrb[0].mxu1 %vm29_vm0, %v22_v14  ;;  %314 = vmatprep.mubr.msk.f32.mxu0 %vm29_vm0, %v19_v15 }
   0xe   :  { %320 = vmatprep.mubr.msk.f32.mxu1 %vm29_vm0, %v23_v16 }
   0xf   :  { %189 = vperm.xlu0 %336, %v163_v18  }
  0x10   :  { %315 = vmatmul.mubr.msk.f32.gmra.mrb[2].mxu0 %vm29_vm0, %v20_v19  ;;  %204 = vperm.xlu1 %337, %v166_v21  }
  0x11   :  { %321 = vmatmul.mubr.msk.f32.gmra.mrb[2].mxu1 %vm29_vm0, %v24_v20 }
  0x13   :  { %199 = vperm.xlu0 %336, %v165_v22  }
  0x14   :  { %230 = vperm.xlu1 %337, %v216_v23  }
  0x17   :  { %225 = vperm.xlu0 %336, %v215_v24  }
  0x18   :  { %240 = vperm.xlu1 %337, %v218_v25  }
  0x1b   :  { %235 = vperm.xlu0 %336, %v217_v26  }
  0x1c   :  { %250 = vperm.xlu1 %337, %v220_v27  }
  0x1f   :  { %245 = vperm.xlu0 %336, %v219_v28  }
  0x20   :  { %260 = vperm.xlu1 %337, %v222_v29  }
  0x23   :  { %255 = vperm.xlu0 %336, %v221_v30  }
  0x82   :  { %v180_v31 = vpop.permute.xlu1 %179 }
  0x86   :  { %v170_v32 = vpop.permute.xlu0 %169 }
  0x87   :  { %v185_v33 = vpop.permute.xlu1 %184 }
  0x8a   :  { %v175_v34 = vpop.permute.xlu0 %174 }
  0x8b   :  { %v195_v35 = vpop.permute.xlu1 %194 }
  0x8e   :  { %v190_v36 = vpop.permute.xlu0 %189 }
  0x8f   :  { %v205_v37 = vpop.permute.xlu1 %204 }
  0x92   :  { %v200_v38 = vpop.permute.xlu0 %199 }
  0x93   :  { %v231_v39 = vpop.permute.xlu1 %230 }
  0x96   :  { %v226_v40 = vpop.permute.xlu0 %225 }
  0x97   :  { %v241_v41 = vpop.permute.xlu1 %240 }
  0x9a   :  { %v236_v42 = vpop.permute.xlu0 %235 }
  0x9b   :  { %v251_v43 = vpop.permute.xlu1 %250 }
  0x9e   :  { %v246_v44 = vpop.permute.xlu0 %245 }
  0x9f   :  { %v261_v63 = vpop.permute.xlu1 %260 }
  0xa2   :  { %v256_v2 = vpop.permute.xlu0 %255 }
  0xdf   :  { %v313_v45 = vpop.f32.mrb[0].mxu0 }
  0xe0   :  { %v319_v46 = vpop.f32.mrb[0].mxu1  ;;  %v208_v47 = vmul.f32 %v313_v45, %v175_v34  ;;  %v120_v49 = vpop.f32.mrb[1].mxu0 }
  0xe1   :  { %v212_v48 = vmul.f32 %v319_v46, %v195_v35  ;;  %v140_v50 = vpop.f32.mrb[1].mxu1  ;;  %v207_v51 = vmul.f32 %v170_v32, %v120_v49 }
  0xe2   :  { %v211_v52 = vmul.f32 %v190_v36, %v140_v50  ;;  %v264_v53 = vadd.f32 %v231_v39, %v208_v47 }
  0xe3   :  { %v268_v54 = vadd.f32 %v251_v43, %v212_v48  ;;  %v263_v55 = vadd.f32 %v226_v40, %v207_v51  ;;  %v316_v57 = vpop.f32.mrb[2].mxu0 }
  0xe4   :  { %v267_v56 = vadd.f32 %v246_v44, %v211_v52  ;;  %v322_v58 = vpop.f32.mrb[2].mxu1  ;;  %272 = vst [vmem:[%s484_s4 + $0x8] sm:$0xff] %v264_v53  ;;  %v210_v59 = vmul.f32 %v316_v57, %v185_v33  ;;  %v130_v61 = vpop.f32.mrb[3].mxu0 }
  0xe5   :  { %276 = vst [vmem:[%s484_s4 + $0x28] sm:$0xff] %v268_v54  ;;  %v214_v60 = vmul.f32 %v322_v58, %v205_v37  ;;  %v150_v62 = vpop.f32.mrb[3].mxu1  ;;  %271 = vst [vmem:[%s484_s4] sm:$0xff] %v263_v55  ;;  %v209_v0 = vmul.f32 %v180_v31, %v130_v61 }
  0xe6   :  { %275 = vst [vmem:[%s484_s4 + $0x20] sm:$0xff] %v267_v56  ;;  %v213_v1 = vmul.f32 %v200_v38, %v150_v62  ;;  %v266_v3 = vadd.f32 %v241_v41, %v210_v59 }
  0xe7   :  { %v270_v4 = vadd.f32 %v261_v63, %v214_v60  ;;  %v265_v5 = vadd.f32 %v236_v42, %v209_v0 }
  0xe8   :  { %v269_v6 = vadd.f32 %v256_v2, %v213_v1  ;;  %274 = vst [vmem:[%s484_s4 + $0x18] sm:$0xff] %v266_v3 }
  0xe9   :  { %278 = vst [vmem:[%s484_s4 + $0x38] sm:$0xff] %v270_v4  ;;  %273 = vst [vmem:[%s484_s4 + $0x10] sm:$0xff] %v265_v5 }
  0xea   :  { %277 = vst [vmem:[%s484_s4 + $0x30] sm:$0xff] %v269_v6 }

// kernel: forward.28
= control target key start
LH: loop header
LB: loop body
LE: loop exit
PB: predicated region body
PF: predicated region fallthrough
CT: control target
= control target key end

     0   :  { %v875_v3 = vmov 0   ;;  %vm132_vm0 = vcmask 523264   ;;  %s1367_s1 = inlined_call_operand.vmem [shape: f32[576,128], index: 1, kind: input, shape index: {}]   ;;  %s1368_s0 = inlined_call_operand.vmem [shape: f32[64,576], index: 0, kind: input, shape index: {}]   ;;  %s1369_s2 = inlined_call_operand.vmem [shape: f32[64,1], index: 2, kind: input, shape index: {}]   ;;  %s1370_s3 = inlined_call_operand.vmem [shape: f32[64,1], index: 3, kind: input, shape index: {}]   ;;  %s1371_s4 = inlined_call_operand.vmem [shape: f32[64,128], index: 4, kind: input, shape index: {}]   ;;  %s1372_s5 = inlined_call_operand.vmem [shape: f32[64,128], index: 5, kind: output, shape index: {}]  }
   0x1   :  { %v76_v0 = vld [vmem:[%s1367_s1 + $0x80] sm:$0xff]  ;;  %v77_v1 = vld [vmem:[%s1367_s1 + $0x88] sm:$0xff]  ;;  %874 = vset.pattern.permute.xlu1 %v875_v3  ;;  %873 = vset.pattern.permute.xlu0 %v875_v3  ;;  %v78_v12 = vld [vmem:[%s1367_s1 + $0x90] sm:$0xff] }
   0x2   :  { %v108_v2 = vld [vmem:[%s1367_s1 + $0x180] sm:$0xff]  ;;  %v784_v4 = vpack.c.bf16 %v77_v1, %v76_v0  ;;  %v109_v5 = vld [vmem:[%s1367_s1 + $0x188] sm:$0xff]  ;;  %v79_v14 = vld [vmem:[%s1367_s1 + $0x98] sm:$0xff] }
   0x3   :  { %v60_v6 = vld [vmem:[%s1367_s1] sm:$0xff]  ;;  %v61_v7 = vld [vmem:[%s1367_s1 + $0x8] sm:$0xff]  ;;  %v816_v8 = vpack.c.bf16 %v109_v5, %v108_v2  ;;  %v110_v15 = vld [vmem:[%s1367_s1 + $0x190] sm:$0xff]  ;;  %v788_v17 = vpack.c.bf16 %v79_v14, %v78_v12 }
   0x4   :  { %v786_v9 = vpack.c.bf16 %v61_v7, %v60_v6  ;;  %v92_v10 = vld [vmem:[%s1367_s1 + $0x100] sm:$0xff]  ;;  %v93_v11 = vld [vmem:[%s1367_s1 + $0x108] sm:$0xff]  ;;  %785 = vmatprep.subr.bf16.mxu0 %v784_v4  ;;  %v111_v16 = vld [vmem:[%s1367_s1 + $0x198] sm:$0xff] }
   0x5   :  { %v818_v13 = vpack.c.bf16 %v93_v11, %v92_v10  ;;  %817 = vmatprep.subr.bf16.mxu1 %v816_v8  ;;  %v820_v18 = vpack.c.bf16 %v111_v16, %v110_v15  ;;  %v62_v19 = vld [vmem:[%s1367_s1 + $0x10] sm:$0xff]  ;;  %v63_v20 = vld [vmem:[%s1367_s1 + $0x18] sm:$0xff]  ;;  %v80_v24 = vld [vmem:[%s1367_s1 + $0xa0] sm:$0xff] }
   0x6   :  { %787 = vmatpush3.bf16.msra.mxu0 %v786_v9  ;;  %v94_v21 = vld [vmem:[%s1367_s1 + $0x110] sm:$0xff]  ;;  %v790_v22 = vpack.c.bf16 %v63_v20, %v62_v19  ;;  %v95_v23 = vld [vmem:[%s1367_s1 + $0x118] sm:$0xff]  ;;  %v81_v25 = vld [vmem:[%s1367_s1 + $0xa8] sm:$0xff] }
   0x7   :  { %819 = vmatpush3.bf16.msra.mxu1 %v818_v13  ;;  %789 = vmatprep.subr.bf16.mxu0 %v788_v17  ;;  %v822_v26 = vpack.c.bf16 %v95_v23, %v94_v21  ;;  %v792_v27 = vpack.c.bf16 %v81_v25, %v80_v24  ;;  %v112_v28 = vld [vmem:[%s1367_s1 + $0x1a0] sm:$0xff]  ;;  %v113_v29 = vld [vmem:[%s1367_s1 + $0x1a8] sm:$0xff]  ;;  %v82_v36 = vld [vmem:[%s1367_s1 + $0xb0] sm:$0xff] }
   0x8   :  { %821 = vmatprep.subr.bf16.mxu1 %v820_v18  ;;  %v64_v30 = vld [vmem:[%s1367_s1 + $0x20] sm:$0xff]  ;;  %v824_v31 = vpack.c.bf16 %v113_v29, %v112_v28  ;;  %v65_v32 = vld [vmem:[%s1367_s1 + $0x28] sm:$0xff]  ;;  %v83_v37 = vld [vmem:[%s1367_s1 + $0xb8] sm:$0xff] }
   0x9   :  { %v96_v33 = vld [vmem:[%s1367_s1 + $0x120] sm:$0xff]  ;;  %v97_v34 = vld [vmem:[%s1367_s1 + $0x128] sm:$0xff]  ;;  %v794_v35 = vpack.c.bf16 %v65_v32, %v64_v30  ;;  %v114_v38 = vld [vmem:[%s1367_s1 + $0x1b0] sm:$0xff]  ;;  %v796_v40 = vpack.c.bf16 %v83_v37, %v82_v36 }
   0xa   :  { %791 = vmatpush3.bf16.msra.mxu0 %v790_v22  ;;  %v826_v39 = vpack.c.bf16 %v97_v34, %v96_v33  ;;  %v115_v41 = vld [vmem:[%s1367_s1 + $0x1b8] sm:$0xff]  ;;  %v66_v42 = vld [vmem:[%s1367_s1 + $0x30] sm:$0xff]  ;;  %v84_v47 = vld [vmem:[%s1367_s1 + $0xc0] sm:$0xff] }
   0xb   :  { %823 = vmatpush3.bf16.msra.mxu1 %v822_v26  ;;  %793 = vmatprep.subr.bf16.mxu0 %v792_v27  ;;  %v67_v43 = vld [vmem:[%s1367_s1 + $0x38] sm:$0xff]  ;;  %v828_v44 = vpack.c.bf16 %v115_v41, %v114_v38  ;;  %v98_v45 = vld [vmem:[%s1367_s1 + $0x130] sm:$0xff]  ;;  %v85_v48 = vld [vmem:[%s1367_s1 + $0xc8] sm:$0xff] }
   0xc   :  { %825 = vmatprep.subr.bf16.mxu1 %v824_v31  ;;  %v99_v46 = vld [vmem:[%s1367_s1 + $0x138] sm:$0xff]  ;;  %v116_v49 = vld [vmem:[%s1367_s1 + $0x1c0] sm:$0xff]  ;;  %v117_v50 = vld [vmem:[%s1367_s1 + $0x1c8] sm:$0xff]  ;;  %v798_v51 = vpack.c.bf16 %v67_v43, %v66_v42  ;;  %v800_v53 = vpack.c.bf16 %v85_v48, %v84_v47 }
   0xd   :  { %v830_v52 = vpack.c.bf16 %v99_v46, %v98_v45  ;;  %v68_v54 = vld [vmem:[%s1367_s1 + $0x40] sm:$0xff]  ;;  %v69_v55 = vld [vmem:[%s1367_s1 + $0x48] sm:$0xff]  ;;  %v832_v57 = vpack.c.bf16 %v117_v50, %v116_v49  ;;  %v86_v59 = vld [vmem:[%s1367_s1 + $0xd0] sm:$0xff] }
   0xe   :  { %795 = vmatpush3.bf16.msra.mxu0 %v794_v35  ;;  %v100_v56 = vld [vmem:[%s1367_s1 + $0x140] sm:$0xff]  ;;  %v101_v58 = vld [vmem:[%s1367_s1 + $0x148] sm:$0xff]  ;;  %v87_v60 = vld [vmem:[%s1367_s1 + $0xd8] sm:$0xff]  ;;  %v802_v63 = vpack.c.bf16 %v69_v55, %v68_v54 }
   0xf   :  { %827 = vmatpush3.bf16.msra.mxu1 %v826_v39  ;;  %797 = vmatprep.subr.bf16.mxu0 %v796_v40  ;;  %v118_v61 = vld [vmem:[%s1367_s1 + $0x1d0] sm:$0xff]  ;;  %v119_v62 = vld [vmem:[%s1367_s1 + $0x1d8] sm:$0xff]  ;;  %v834_v0 = vpack.c.bf16 %v101_v58, %v100_v56  ;;  %v804_v1 = vpack.c.bf16 %v87_v60, %v86_v59  ;;  %v88_v7 = vld [vmem:[%s1367_s1 + $0xe0] sm:$0xff] }
  0x10   :  { %829 = vmatprep.subr.bf16.mxu1 %v828_v44  ;;  %v70_v2 = vld [vmem:[%s1367_s1 + $0x50] sm:$0xff]  ;;  %v71_v3 = vld [vmem:[%s1367_s1 + $0x58] sm:$0xff]  ;;  %v836_v5 = vpack.c.bf16 %v119_v62, %v118_v61  ;;  %v89_v8 = vld [vmem:[%s1367_s1 + $0xe8] sm:$0xff] }
  0x11   :  { %v102_v4 = vld [vmem:[%s1367_s1 + $0x150] sm:$0xff]  ;;  %v103_v6 = vld [vmem:[%s1367_s1 + $0x158] sm:$0xff]  ;;  %v120_v9 = vld [vmem:[%s1367_s1 + $0x1e0] sm:$0xff]  ;;  %v806_v11 = vpack.c.bf16 %v71_v3, %v70_v2  ;;  %v808_v15 = vpack.c.bf16 %v89_v8, %v88_v7 }
  0x12   :  { %799 = vmatpush3.bf16.msra.mxu0 %v798_v51  ;;  %v121_v10 = vld [vmem:[%s1367_s1 + $0x1e8] sm:$0xff]  ;;  %v72_v12 = vld [vmem:[%s1367_s1 + $0x60] sm:$0xff]  ;;  %v838_v14 = vpack.c.bf16 %v103_v6, %v102_v4  ;;  %v23_v18 = vld [vmem:[%s1368_s0 + $0x18] sm:$0xff] }
  0x13   :  { %831 = vmatpush3.bf16.msra.mxu1 %v830_v52  ;;  %801 = vmatprep.subr.bf16.mxu0 %v800_v53  ;;  %v73_v13 = vld [vmem:[%s1367_s1 + $0x68] sm:$0xff]  ;;  %v104_v16 = vld [vmem:[%s1367_s1 + $0x160] sm:$0xff]  ;;  %v840_v19 = vpack.c.bf16 %v121_v10, %v120_v9  ;;  %v90_v21 = vld [vmem:[%s1367_s1 + $0xf0] sm:$0xff] }
  0x14   :  { %833 = vmatprep.subr.bf16.mxu1 %v832_v57  ;;  %v21_v17 = vld [vmem:[%s1368_s0 + $0x8] sm:$0xff]  ;;  %v91_v22 = vld [vmem:[%s1367_s1 + $0xf8] sm:$0xff]  ;;  %v122_v23 = vld [vmem:[%s1367_s1 + $0x1f0] sm:$0xff]  ;;  %326 = vmatprep.mubr.f32.mxu1 %v23_v18  ;;  %v810_v25 = vpack.c.bf16 %v73_v13, %v72_v12 }
  0x15   :  { %v105_v20 = vld [vmem:[%s1367_s1 + $0x168] sm:$0xff]  ;;  %221 = vmatprep.mubr.f32.mxu0 %v21_v17  ;;  %v123_v24 = vld [vmem:[%s1367_s1 + $0x1f8] sm:$0xff]  ;;  %v812_v27 = vpack.c.bf16 %v91_v22, %v90_v21  ;;  %v74_v28 = vld [vmem:[%s1367_s1 + $0x70] sm:$0xff] }
  0x16   :  { %803 = vmatpush3.bf16.msra.mxu0 %v802_v63  ;;  %v842_v26 = vpack.c.bf16 %v105_v20, %v104_v16  ;;  %v75_v29 = vld [vmem:[%s1367_s1 + $0x78] sm:$0xff]  ;;  %v106_v30 = vld [vmem:[%s1367_s1 + $0x170] sm:$0xff]  ;;  %v844_v31 = vpack.c.bf16 %v123_v24, %v122_v23  ;;  %v124_v33 = vld [vmem:[%s1367_s1 + $0x200] sm:$0xff] }
  0x17   :  { %835 = vmatpush3.bf16.msra.mxu1 %v834_v0  ;;  %805 = vmatprep.subr.bf16.mxu0 %v804_v1  ;;  %v107_v32 = vld [vmem:[%s1367_s1 + $0x178] sm:$0xff]  ;;  %v125_v34 = vld [vmem:[%s1367_s1 + $0x208] sm:$0xff]  ;;  %v814_v35 = vpack.c.bf16 %v75_v29, %v74_v28  ;;  %v126_v38 = vld [vmem:[%s1367_s1 + $0x210] sm:$0xff] }
  0x18   :  { %837 = vmatprep.subr.bf16.mxu1 %v836_v5  ;;  %v846_v36 = vpack.c.bf16 %v107_v32, %v106_v30  ;;  %v848_v37 = vpack.c.bf16 %v125_v34, %v124_v33  ;;  %v127_v39 = vld [vmem:[%s1367_s1 + $0x218] sm:$0xff]  ;;  %v20_v40 = vld [vmem:[%s1368_s0] sm:$0xff]  ;;  %v22_v41 = vld [vmem:[%s1368_s0 + $0x10] sm:$0xff] }
  0x19   :  { %v26_v42 = vld [vmem:[%s1368_s0 + $0x30] sm:$0xff]  ;;  %v852_v43 = vpack.c.bf16 %v127_v39, %v126_v38  ;;  %v28_v44 = vld [vmem:[%s1368_s0 + $0x40] sm:$0xff]  ;;  %v129_v46 = vld [vmem:[%s1367_s1 + $0x228] sm:$0xff] }
  0x1a   :  { %807 = vmatpush3.bf16.msra.mxu0 %v806_v11  ;;  %v128_v45 = vld [vmem:[%s1367_s1 + $0x220] sm:$0xff]  ;;  %v25_v47 = vld [vmem:[%s1368_s0 + $0x28] sm:$0xff]  ;;  %v27_v48 = vld [vmem:[%s1368_s0 + $0x38] sm:$0xff] }
  0x1b   :  { %839 = vmatpush3.bf16.msra.mxu1 %v838_v14  ;;  %809 = vmatprep.subr.bf16.mxu0 %v808_v15  ;;  %v31_v49 = vld [vmem:[%s1368_s0 + $0x58] sm:$0xff]  ;;  %v33_v50 = vld [vmem:[%s1368_s0 + $0x68] sm:$0xff]  ;;  %v856_v51 = vpack.c.bf16 %v129_v46, %v128_v45  ;;  %v130_v52 = vld [vmem:[%s1367_s1 + $0x230] sm:$0xff] }
  0x1c   :  { %841 = vmatprep.subr.bf16.mxu1 %v840_v19  ;;  %v131_v53 = vld [vmem:[%s1367_s1 + $0x238] sm:$0xff]  ;;  %v30_v54 = vld [vmem:[%s1368_s0 + $0x50] sm:$0xff]  ;;  %v32_v55 = vld [vmem:[%s1368_s0 + $0x60] sm:$0xff] }
  0x1d   :  { %v36_v56 = vld [vmem:[%s1368_s0 + $0x80] sm:$0xff]  ;;  %v38_v57 = vld [vmem:[%s1368_s0 + $0x90] sm:$0xff]  ;;  %v860_v58 = vpack.c.bf16 %v131_v53, %v130_v52  ;;  %v35_v59 = vld [vmem:[%s1368_s0 + $0x78] sm:$0xff] }
  0x1e   :  { %811 = vmatpush3.bf16.msra.mxu0 %v810_v25  ;;  %v37_v60 = vld [vmem:[%s1368_s0 + $0x88] sm:$0xff]  ;;  %v43_v62 = vld [vmem:[%s1368_s0 + $0xb8] sm:$0xff]  ;;  %v474_v63 = vld [vmem:[%s1369_s2 + $0x10] sm:$0xff] }
  0x1f   :  { %843 = vmatpush3.bf16.msra.mxu1 %v842_v26  ;;  %813 = vmatprep.subr.bf16.mxu0 %v812_v27  ;;  %v41_v61 = vld [vmem:[%s1368_s0 + $0xa8] sm:$0xff]  ;;  %v40_v0 = vld [vmem:[%s1368_s0 + $0xa0] sm:$0xff]  ;;  %v42_v2 = vld [vmem:[%s1368_s0 + $0xb0] sm:$0xff] }
  0x20   :  { %845 = vmatprep.subr.bf16.mxu1 %v844_v31  ;;  %v472_v1 = vld [vmem:[%s1369_s2] sm:$0xff]  ;;  %v46_v3 = vld [vmem:[%s1368_s0 + $0xd0] sm:$0xff]  ;;  %492 = vperm.xlu1 %874, %v474_v63   ;;  %v475_v5 = vld [vmem:[%s1369_s2 + $0x18] sm:$0xff] }
  0x21   :  { %v48_v4 = vld [vmem:[%s1368_s0 + $0xe0] sm:$0xff]  ;;  %482 = vperm.xlu0 %873, %v472_v1   ;;  %v45_v6 = vld [vmem:[%s1368_s0 + $0xc8] sm:$0xff]  ;;  %v47_v8 = vld [vmem:[%s1368_s0 + $0xd8] sm:$0xff] }
  0x22   :  { %815 = vmatpush3.bf16.msra.mxu0 %v814_v35  ;;  %v473_v7 = vld [vmem:[%s1369_s2 + $0x8] sm:$0xff]  ;;  %v51_v9 = vld [vmem:[%s1368_s0 + $0xf8] sm:$0xff]  ;;  %v50_v12 = vld [vmem:[%s1368_s0 + $0xf0] sm:$0xff] }
  0x23   :  { %847 = vmatpush3.bf16.msra.mxu1 %v846_v36  ;;  %849 = vmatprep.subr.bf16.mxu0 %v848_v37  ;;  %v53_v10 = vld [vmem:[%s1368_s0 + $0x108] sm:$0xff]  ;;  %v476_v13 = vld [vmem:[%s1369_s2 + $0x20] sm:$0xff]  ;;  %v58_v16 = vld [vmem:[%s1368_s0 + $0x130] sm:$0xff] }
  0x24   :  { %864 = vmatprep.subr.bf16.mxu1 %v848_v37  ;;  %497 = vperm.xlu1 %874, %v475_v5   ;;  %v477_v11 = vld [vmem:[%s1369_s2 + $0x28] sm:$0xff]  ;;  %v52_v14 = vld [vmem:[%s1368_s0 + $0x100] sm:$0xff]  ;;  %v479_v17 = vld [vmem:[%s1369_s2 + $0x38] sm:$0xff] }
  0x25   :  { %222 = vmatmul.mubr.f32.vlgmr.msra.gmra.mrb[0].mxu0 %v20_v40  ;;  %487 = vperm.xlu0 %873, %v473_v7   ;;  %v56_v15 = vld [vmem:[%s1368_s0 + $0x120] sm:$0xff]  ;;  %v55_v18 = vld [vmem:[%s1368_s0 + $0x118] sm:$0xff]  ;;  %v478_v19 = vld [vmem:[%s1369_s2 + $0x30] sm:$0xff] }
  0x26   :  { %327 = vmatmul.mubr.f32.vlgmr.msra.gmra.mrb[0].mxu1 %v22_v41  ;;  %851 = vmatpush3.bf16.msra.mxu0 %v848_v37  ;;  %v57_v20 = vld [vmem:[%s1368_s0 + $0x128] sm:$0xff]  ;;  %v24_v21 = vld [vmem:[%s1368_s0 + $0x20] sm:$0xff]  ;;  %v34_v27 = vld [vmem:[%s1368_s0 + $0x70] sm:$0xff] }
  0x27   :  { %868 = vmatpush3.bf16.msra.mxu1 %v848_v37  ;;  %226 = vmatprep.mubr.f32.mxu0 %v26_v42  ;;  %v44_v22 = vld [vmem:[%s1368_s0 + $0xc0] sm:$0xff]  ;;  %v529_v23 = vld [vmem:[%s1370_s3 + $0x8] sm:$0xff]  ;;  %v54_v28 = vld [vmem:[%s1368_s0 + $0x110] sm:$0xff] }
  0x28   :  { %331 = vmatprep.mubr.f32.mxu1 %v28_v44  ;;  %853 = vmatprep.subr.bf16.mxu0 %v852_v43  ;;  %v29_v24 = vld [vmem:[%s1368_s0 + $0x48] sm:$0xff]  ;;  %v528_v25 = vld [vmem:[%s1370_s3] sm:$0xff]  ;;  %v531_v29 = vld [vmem:[%s1370_s3 + $0x18] sm:$0xff] }
  0x29   :  { %227 = vmatmul.mubr.f32.gmra.mrb[2].mxu0 %v25_v47  ;;  %865 = vmatprep.subr.bf16.mxu1 %v852_v43  ;;  %v49_v26 = vld [vmem:[%s1368_s0 + $0xe8] sm:$0xff]  ;;  %v39_v30 = vld [vmem:[%s1368_s0 + $0x98] sm:$0xff]  ;;  %v530_v31 = vld [vmem:[%s1370_s3 + $0x10] sm:$0xff] }
  0x2a   :  { %332 = vmatmul.mubr.f32.gmra.mrb[2].mxu1 %v27_v48  ;;  %231 = vmatprep.mubr.f32.mxu0 %v31_v49  ;;  %v59_v32 = vld [vmem:[%s1368_s0 + $0x138] sm:$0xff]  ;;  %v533_v33 = vld [vmem:[%s1370_s3 + $0x28] sm:$0xff]  ;;  %v532_v34 = vld [vmem:[%s1370_s3 + $0x20] sm:$0xff] }
  0x2b   :  { %336 = vmatprep.mubr.f32.mxu1 %v33_v50  ;;  %855 = vmatpush3.bf16.msra.mxu0 %v852_v43  ;;  %v535_v35 = vld [vmem:[%s1370_s3 + $0x38] sm:$0xff]  ;;  %v534_v36 = vld [vmem:[%s1370_s3 + $0x30] sm:$0xff] }
  0x2c   :  { %869 = vmatpush3.bf16.msra.mxu1 %v852_v43  ;;  %857 = vmatprep.subr.bf16.mxu0 %v856_v51 }
  0x2d   :  { %232 = vmatmul.mubr.f32.gmra.mrb[4].mxu0 %v30_v54  ;;  %866 = vmatprep.subr.bf16.mxu1 %v856_v51 }
  0x2e   :  { %337 = vmatmul.mubr.f32.gmra.mrb[4].mxu1 %v32_v55  ;;  %236 = vmatprep.mubr.f32.mxu0 %v36_v56 }
  0x2f   :  { %341 = vmatprep.mubr.f32.mxu1 %v38_v57  ;;  %859 = vmatpush3.bf16.msra.mxu0 %v856_v51 }
  0x30   :  { %870 = vmatpush3.bf16.msra.mxu1 %v856_v51  ;;  %861 = vmatprep.subr.bf16.mxu0 %v860_v58 }
  0x31   :  { %237 = vmatmul.mubr.f32.gmra.mrb[6].mxu0 %v35_v59  ;;  %867 = vmatprep.subr.bf16.mxu1 %v860_v58 }
  0x32   :  { %342 = vmatmul.mubr.f32.gmra.mrb[6].mxu1 %v37_v60  ;;  %241 = vmatprep.mubr.f32.mxu0 %v41_v61 }
  0x33   :  { %346 = vmatprep.mubr.f32.mxu1 %v43_v62  ;;  %863 = vmatpush3.bf16.msra.mxu0 %v860_v58 }
  0x34   :  { %871 = vmatpush3.bf16.msra.mxu1 %v860_v58  ;;  %507 = vperm.xlu1 %874, %v477_v11  }
  0x35   :  { %242 = vmatmul.mubr.f32.gmra.mrb[8].mxu0 %v40_v0  ;;  %502 = vperm.xlu0 %873, %v476_v13  }
  0x36   :  { %347 = vmatmul.mubr.f32.gmra.mrb[8].mxu1 %v42_v2  ;;  %246 = vmatprep.mubr.f32.mxu0 %v46_v3 }
  0x37   :  { %351 = vmatprep.mubr.f32.mxu1 %v48_v4 }
  0x38   :  { %517 = vperm.xlu1 %874, %v479_v17  }
  0x39   :  { %247 = vmatmul.mubr.f32.gmra.mrb[10].mxu0 %v45_v6  ;;  %512 = vperm.xlu0 %873, %v478_v19  }
  0x3a   :  { %352 = vmatmul.mubr.f32.gmra.mrb[10].mxu1 %v47_v8  ;;  %251 = vmatprep.mubr.f32.mxu0 %v51_v9 }
  0x3b   :  { %356 = vmatprep.mubr.f32.mxu1 %v53_v10 }
  0x3c   :  { %543 = vperm.xlu1 %874, %v529_v23  }
  0x3d   :  { %252 = vmatmul.mubr.f32.gmra.mrb[12].mxu0 %v50_v12  ;;  %538 = vperm.xlu0 %873, %v528_v25  }
  0x3e   :  { %357 = vmatmul.mubr.f32.gmra.mrb[12].mxu1 %v52_v14  ;;  %256 = vmatprep.mubr.f32.mxu0 %v56_v15 }
  0x3f   :  { %361 = vmatprep.mubr.f32.mxu1 %v58_v16 }
  0x40   :  { %553 = vperm.xlu1 %874, %v531_v29  }
  0x41   :  { %257 = vmatmul.mubr.f32.gmra.mrb[14].mxu0 %v55_v18  ;;  %548 = vperm.xlu0 %873, %v530_v31  }
  0x42   :  { %362 = vmatmul.mubr.f32.gmra.mrb[14].mxu1 %v57_v20  ;;  %772 = vmatprep.mubr.msk.f32.mxu0 %vm132_vm0, %v24_v21 }
  0x43   :  { %778 = vmatprep.mubr.msk.f32.mxu1 %vm132_vm0, %v44_v22 }
  0x44   :  { %563 = vperm.xlu1 %874, %v533_v33  }
  0x45   :  { %773 = vmatmul.mubr.msk.f32.vlgmr.msra.gmra.mrb[16].mxu0 %vm132_vm0, %v29_v24  ;;  %558 = vperm.xlu0 %873, %v532_v34  }
  0x46   :  { %779 = vmatmul.mubr.msk.f32.vlgmr.msra.gmra.mrb[16].mxu1 %vm132_vm0, %v49_v26  ;;  %775 = vmatprep.mubr.msk.f32.mxu0 %vm132_vm0, %v34_v27 }
  0x47   :  { %781 = vmatprep.mubr.msk.f32.mxu1 %vm132_vm0, %v54_v28 }
  0x48   :  { %573 = vperm.xlu1 %874, %v535_v35  }
  0x49   :  { %776 = vmatmul.mubr.msk.f32.gmra.mrb[18].mxu0 %vm132_vm0, %v39_v30  ;;  %568 = vperm.xlu0 %873, %v534_v36  }
  0x4a   :  { %782 = vmatmul.mubr.msk.f32.gmra.mrb[18].mxu1 %vm132_vm0, %v59_v32 }
  0x9f   :  { %v1298_v37 = vpop.permute.xlu1 %492 }
  0xa0   :  { %v1300_v38 = vpop.permute.xlu0 %482 }
  0xa3   :  { %v1302_v45 = vpop.permute.xlu1 %497 }
  0xa4   :  { %v1304_v50 = vpop.permute.xlu0 %487 }
  0xb3   :  { %v508_v58 = vpop.permute.xlu1 %507 }
  0xb4   :  { %v503_v62 = vpop.permute.xlu0 %502 }
  0xb7   :  { %v1308_v6 = vpop.permute.xlu1 %517 }
  0xb8   :  { %v1310_v11 = vpop.permute.xlu0 %512 }
  0xbb   :  { %v544_v19 = vpop.permute.xlu1 %543 }
  0xbc   :  { %v539_v23 = vpop.permute.xlu0 %538 }
  0xbf   :  { %v554_v31 = vpop.permute.xlu1 %553 }
  0xc0   :  { %v549_v36 = vpop.permute.xlu0 %548 }
  0xf8   :  { %v660_v39 = vpop.f32.mrb[0].mxu0 }
  0xf9   :  { %v716_v40 = vpop.f32.mrb[0].mxu1  ;;  %v661_v41 = vpop.f32.mrb[1].mxu0 }
  0xfa   :  { %v662_v42 = vadd.f32 %v661_v41, %v660_v39  ;;  %v717_v43 = vpop.f32.mrb[1].mxu1 }
  0xfb   :  { %v718_v44 = vadd.f32 %v717_v43, %v716_v40 }
  0xfc   :  { %v663_v46 = vpop.f32.mrb[2].mxu0 }
  0xfd   :  { %v719_v47 = vpop.f32.mrb[2].mxu1  ;;  %v664_v48 = vpop.f32.mrb[3].mxu0  ;;  %v329_v49 = vadd.f32 %v718_v44, %v662_v42 }
  0xfe   :  { %v665_v51 = vadd.f32 %v664_v48, %v663_v46  ;;  %v720_v52 = vpop.f32.mrb[3].mxu1 }
  0xff   :  { %v721_v53 = vadd.f32 %v720_v52, %v719_v47 }
 0x100   :  { %v666_v54 = vpop.f32.mrb[4].mxu0 }
 0x101   :  { %v722_v55 = vpop.f32.mrb[4].mxu1  ;;  %v667_v56 = vpop.f32.mrb[5].mxu0  ;;  %v334_v57 = vadd.f32 %v721_v53, %v665_v51 }
 0x102   :  { %v668_v59 = vadd.f32 %v667_v56, %v666_v54  ;;  %v723_v60 = vpop.f32.mrb[5].mxu1  ;;  %v564_v53 = vpop.permute.xlu1 %563 }
 0x103   :  { %v724_v61 = vadd.f32 %v723_v60, %v722_v55  ;;  %v559_v56 = vpop.permute.xlu0 %558 }
 0x104   :  { %v669_v63 = vpop.f32.mrb[6].mxu0 }
 0x105   :  { %v725_v0 = vpop.f32.mrb[6].mxu1  ;;  %v670_v1 = vpop.f32.mrb[7].mxu0  ;;  %v1306_v2 = vadd.f32 %v724_v61, %v668_v59  ;;  %v585_v59 = vld [vmem:[%s1371_s4 + $0x8] sm:$0xff] }
 0x106   :  { %v671_v3 = vadd.f32 %v670_v1, %v669_v63  ;;  %v726_v4 = vpop.f32.mrb[7].mxu1 }
 0x107   :  { %v727_v5 = vadd.f32 %v726_v4, %v725_v0  ;;  %v589_v0 = vld [vmem:[%s1371_s4 + $0x28] sm:$0xff] }
 0x108   :  { %v672_v7 = vpop.f32.mrb[8].mxu0 }
 0x109   :  { %v728_v8 = vpop.f32.mrb[8].mxu1  ;;  %v673_v9 = vpop.f32.mrb[9].mxu0  ;;  %v344_v10 = vadd.f32 %v727_v5, %v671_v3 }
 0x10a   :  { %v674_v12 = vadd.f32 %v673_v9, %v672_v7  ;;  %v729_v13 = vpop.f32.mrb[9].mxu1 }
 0x10b   :  { %v730_v14 = vadd.f32 %v729_v13, %v728_v8 }
 0x10c   :  { %v675_v15 = vpop.f32.mrb[10].mxu0 }
 0x10d   :  { %v731_v16 = vpop.f32.mrb[10].mxu1  ;;  %v676_v17 = vpop.f32.mrb[11].mxu0  ;;  %v349_v18 = vadd.f32 %v730_v14, %v674_v12 }
 0x10e   :  { %v677_v20 = vadd.f32 %v676_v17, %v675_v15  ;;  %v732_v21 = vpop.f32.mrb[11].mxu1 }
 0x10f   :  { %v733_v22 = vadd.f32 %v732_v21, %v731_v16 }
 0x110   :  { %v678_v24 = vpop.f32.mrb[12].mxu0 }
 0x111   :  { %v734_v25 = vpop.f32.mrb[12].mxu1  ;;  %v679_v26 = vpop.f32.mrb[13].mxu0  ;;  %v354_v27 = vadd.f32 %v733_v22, %v677_v20  ;;  %v591_v22 = vld [vmem:[%s1371_s4 + $0x38] sm:$0xff] }
 0x112   :  { %v680_v28 = vadd.f32 %v679_v26, %v678_v24  ;;  %v735_v29 = vpop.f32.mrb[13].mxu1  ;;  %v569_v24 = vpop.permute.xlu0 %568 }
 0x113   :  { %v736_v30 = vadd.f32 %v735_v29, %v734_v25 }
 0x114   :  { %v681_v32 = vpop.f32.mrb[14].mxu0 }
 0x115   :  { %v737_v33 = vpop.f32.mrb[14].mxu1  ;;  %v682_v34 = vpop.f32.mrb[15].mxu0  ;;  %v359_v35 = vadd.f32 %v736_v30, %v680_v28 }
 0x116   :  { %v683_v39 = vadd.f32 %v682_v34, %v681_v32  ;;  %v738_v40 = vpop.f32.mrb[15].mxu1 }
 0x117   :  { %v739_v41 = vadd.f32 %v738_v40, %v737_v33 }
 0x118   :  { %v774_v42 = vpop.f32.mrb[16].mxu0 }
 0x119   :  { %v439_v43 = vadd.f32 %v774_v42, %v334_v57  ;;  %v780_v44 = vpop.f32.mrb[16].mxu1  ;;  %v433_v46 = vpop.f32.mrb[17].mxu0  ;;  %v364_v47 = vadd.f32 %v739_v41, %v683_v39 }
 0x11a   :  { %v459_v48 = vadd.f32 %v780_v44, %v354_v27  ;;  %v434_v51 = vadd.f32 %v433_v46, %v329_v49  ;;  %v453_v52 = vpop.f32.mrb[17].mxu1  ;;  %v584_v49 = vld [vmem:[%s1371_s4] sm:$0xff] }
 0x11b   :  { %v521_v54 = vmul.f32 %v1304_v50, %v439_v43  ;;  %v454_v55 = vadd.f32 %v453_v52, %v349_v18 }
 0x11c   :  { %v525_v60 = vmul.f32 %v508_v58, %v459_v48  ;;  %v520_v61 = vmul.f32 %v1300_v38, %v434_v51  ;;  %v777_v63 = vpop.f32.mrb[18].mxu0  ;;  %v588_v38 = vld [vmem:[%s1371_s4 + $0x20] sm:$0xff] }
 0x11d   :  { %v577_v57 = vadd.f32 %v544_v19, %v521_v54  ;;  %v524_v50 = vmul.f32 %v503_v62, %v454_v55  ;;  %v449_v1 = vadd.f32 %v777_v63, %v344_v10  ;;  %v783_v3 = vpop.f32.mrb[18].mxu1  ;;  %v443_v4 = vpop.f32.mrb[19].mxu0  ;;  %v587_v10 = vld [vmem:[%s1371_s4 + $0x18] sm:$0xff] }
 0x11e   :  { %v581_v5 = vadd.f32 %v564_v53, %v525_v60  ;;  %v576_v7 = vadd.f32 %v539_v23, %v520_v61  ;;  %v469_v58 = vadd.f32 %v783_v3, %v364_v47  ;;  %v444_v8 = vadd.f32 %v443_v4, %v1306_v2  ;;  %v463_v9 = vpop.f32.mrb[19].mxu1  ;;  %v574_v19 = vpop.permute.xlu1 %573 }
 0x11f   :  { %v593_v12 = vadd.f32 %v585_v59, %v577_v57  ;;  %v580_v13 = vadd.f32 %v559_v56, %v524_v50  ;;  %v523_v14 = vmul.f32 %v1302_v45, %v449_v1  ;;  %v464_v15 = vadd.f32 %v463_v9, %v359_v35  ;;  %v586_v45 = vld [vmem:[%s1371_s4 + $0x10] sm:$0xff] }
 0x120   :  { %v597_v16 = vadd.f32 %v589_v0, %v581_v5  ;;  %v592_v62 = vadd.f32 %v584_v49, %v576_v7  ;;  %v527_v17 = vmul.f32 %v1308_v6, %v469_v58  ;;  %v522_v18 = vmul.f32 %v1298_v37, %v444_v8  ;;  %v590_v37 = vld [vmem:[%s1371_s4 + $0x30] sm:$0xff] }
 0x121   :  { %v601_v20 = vmax.f32 %v593_v12, 0.0  ;;  %v596_v21 = vadd.f32 %v588_v38, %v580_v13  ;;  %v579_v2 = vadd.f32 %v554_v31, %v523_v14  ;;  %v526_v23 = vmul.f32 %v1310_v11, %v464_v15 }
 0x122   :  { %v605_v25 = vmax.f32 %v597_v16, 0.0  ;;  %v600_v26 = vmax.f32 %v592_v62, 0.0  ;;  %v583_v6 = vadd.f32 %v574_v19, %v527_v17  ;;  %v578_v27 = vadd.f32 %v549_v36, %v522_v18 }
 0x123   :  { %609 = vst [vmem:[%s1372_s5 + $0x8] sm:$0xff] %v601_v20  ;;  %v604_v28 = vmax.f32 %v596_v21, 0.0  ;;  %v595_v29 = vadd.f32 %v587_v10, %v579_v2  ;;  %v582_v30 = vadd.f32 %v569_v24, %v526_v23 }
 0x124   :  { %613 = vst [vmem:[%s1372_s5 + $0x28] sm:$0xff] %v605_v25  ;;  %608 = vst [vmem:[%s1372_s5] sm:$0xff] %v600_v26  ;;  %v599_v11 = vadd.f32 %v591_v22, %v583_v6  ;;  %v594_v31 = vadd.f32 %v586_v45, %v578_v27 }
 0x125   :  { %612 = vst [vmem:[%s1372_s5 + $0x20] sm:$0xff] %v604_v28  ;;  %v603_v32 = vmax.f32 %v595_v29, 0.0  ;;  %v598_v33 = vadd.f32 %v590_v37, %v582_v30 }
 0x126   :  { %v607_v34 = vmax.f32 %v599_v11, 0.0  ;;  %v602_v35 = vmax.f32 %v594_v31, 0.0 }
 0x127   :  { %611 = vst [vmem:[%s1372_s5 + $0x18] sm:$0xff] %v603_v32  ;;  %v606_v36 = vmax.f32 %v598_v33, 0.0 }
 0x128   :  { %615 = vst [vmem:[%s1372_s5 + $0x38] sm:$0xff] %v607_v34  ;;  %610 = vst [vmem:[%s1372_s5 + $0x10] sm:$0xff] %v602_v35 }
 0x129   :  { %614 = vst [vmem:[%s1372_s5 + $0x30] sm:$0xff] %v606_v36 }

// kernel: forward.29
= control target key start
LH: loop header
LB: loop body
LE: loop exit
PB: predicated region body
PF: predicated region fallthrough
CT: control target
= control target key end

     0   :  { %v856_v3 = vmov 0   ;;  %vm129_vm0 = vcmask 523264   ;;  %s1316_s1 = inlined_call_operand.vmem [shape: f32[576,128], index: 1, kind: input, shape index: {}]   ;;  %s1317_s0 = inlined_call_operand.vmem [shape: f32[64,576], index: 0, kind: input, shape index: {}]   ;;  %s1318_s2 = inlined_call_operand.vmem [shape: f32[64,1], index: 2, kind: input, shape index: {}]   ;;  %s1319_s3 = inlined_call_operand.vmem [shape: f32[64,1], index: 3, kind: input, shape index: {}]   ;;  %s1320_s4 = inlined_call_operand.vmem [shape: f32[64,128], index: 4, kind: output, shape index: {}]  }
   0x1   :  { %v73_v0 = vld [vmem:[%s1316_s1 + $0x80] sm:$0xff]  ;;  %v74_v1 = vld [vmem:[%s1316_s1 + $0x88] sm:$0xff]  ;;  %855 = vset.pattern.permute.xlu1 %v856_v3  ;;  %854 = vset.pattern.permute.xlu0 %v856_v3  ;;  %v75_v12 = vld [vmem:[%s1316_s1 + $0x90] sm:$0xff] }
   0x2   :  { %v105_v2 = vld [vmem:[%s1316_s1 + $0x180] sm:$0xff]  ;;  %v765_v4 = vpack.c.bf16 %v74_v1, %v73_v0  ;;  %v106_v5 = vld [vmem:[%s1316_s1 + $0x188] sm:$0xff]  ;;  %v76_v14 = vld [vmem:[%s1316_s1 + $0x98] sm:$0xff] }
   0x3   :  { %v57_v6 = vld [vmem:[%s1316_s1] sm:$0xff]  ;;  %v58_v7 = vld [vmem:[%s1316_s1 + $0x8] sm:$0xff]  ;;  %v797_v8 = vpack.c.bf16 %v106_v5, %v105_v2  ;;  %v107_v15 = vld [vmem:[%s1316_s1 + $0x190] sm:$0xff]  ;;  %v769_v17 = vpack.c.bf16 %v76_v14, %v75_v12 }
   0x4   :  { %v767_v9 = vpack.c.bf16 %v58_v7, %v57_v6  ;;  %v89_v10 = vld [vmem:[%s1316_s1 + $0x100] sm:$0xff]  ;;  %v90_v11 = vld [vmem:[%s1316_s1 + $0x108] sm:$0xff]  ;;  %766 = vmatprep.subr.bf16.mxu0 %v765_v4  ;;  %v108_v16 = vld [vmem:[%s1316_s1 + $0x198] sm:$0xff] }
   0x5   :  { %v799_v13 = vpack.c.bf16 %v90_v11, %v89_v10  ;;  %798 = vmatprep.subr.bf16.mxu1 %v797_v8  ;;  %v801_v18 = vpack.c.bf16 %v108_v16, %v107_v15  ;;  %v59_v19 = vld [vmem:[%s1316_s1 + $0x10] sm:$0xff]  ;;  %v60_v20 = vld [vmem:[%s1316_s1 + $0x18] sm:$0xff]  ;;  %v77_v24 = vld [vmem:[%s1316_s1 + $0xa0] sm:$0xff] }
   0x6   :  { %768 = vmatpush3.bf16.msra.mxu0 %v767_v9  ;;  %v91_v21 = vld [vmem:[%s1316_s1 + $0x110] sm:$0xff]  ;;  %v771_v22 = vpack.c.bf16 %v60_v20, %v59_v19  ;;  %v92_v23 = vld [vmem:[%s1316_s1 + $0x118] sm:$0xff]  ;;  %v78_v25 = vld [vmem:[%s1316_s1 + $0xa8] sm:$0xff] }
   0x7   :  { %800 = vmatpush3.bf16.msra.mxu1 %v799_v13  ;;  %770 = vmatprep.subr.bf16.mxu0 %v769_v17  ;;  %v803_v26 = vpack.c.bf16 %v92_v23, %v91_v21  ;;  %v773_v27 = vpack.c.bf16 %v78_v25, %v77_v24  ;;  %v109_v28 = vld [vmem:[%s1316_s1 + $0x1a0] sm:$0xff]  ;;  %v110_v29 = vld [vmem:[%s1316_s1 + $0x1a8] sm:$0xff]  ;;  %v79_v36 = vld [vmem:[%s1316_s1 + $0xb0] sm:$0xff] }
   0x8   :  { %802 = vmatprep.subr.bf16.mxu1 %v801_v18  ;;  %v61_v30 = vld [vmem:[%s1316_s1 + $0x20] sm:$0xff]  ;;  %v805_v31 = vpack.c.bf16 %v110_v29, %v109_v28  ;;  %v62_v32 = vld [vmem:[%s1316_s1 + $0x28] sm:$0xff]  ;;  %v80_v37 = vld [vmem:[%s1316_s1 + $0xb8] sm:$0xff] }
   0x9   :  { %v93_v33 = vld [vmem:[%s1316_s1 + $0x120] sm:$0xff]  ;;  %v94_v34 = vld [vmem:[%s1316_s1 + $0x128] sm:$0xff]  ;;  %v775_v35 = vpack.c.bf16 %v62_v32, %v61_v30  ;;  %v111_v38 = vld [vmem:[%s1316_s1 + $0x1b0] sm:$0xff]  ;;  %v777_v40 = vpack.c.bf16 %v80_v37, %v79_v36 }
   0xa   :  { %772 = vmatpush3.bf16.msra.mxu0 %v771_v22  ;;  %v807_v39 = vpack.c.bf16 %v94_v34, %v93_v33  ;;  %v112_v41 = vld [vmem:[%s1316_s1 + $0x1b8] sm:$0xff]  ;;  %v63_v42 = vld [vmem:[%s1316_s1 + $0x30] sm:$0xff]  ;;  %v81_v47 = vld [vmem:[%s1316_s1 + $0xc0] sm:$0xff] }
   0xb   :  { %804 = vmatpush3.bf16.msra.mxu1 %v803_v26  ;;  %774 = vmatprep.subr.bf16.mxu0 %v773_v27  ;;  %v64_v43 = vld [vmem:[%s1316_s1 + $0x38] sm:$0xff]  ;;  %v809_v44 = vpack.c.bf16 %v112_v41, %v111_v38  ;;  %v95_v45 = vld [vmem:[%s1316_s1 + $0x130] sm:$0xff]  ;;  %v82_v48 = vld [vmem:[%s1316_s1 + $0xc8] sm:$0xff] }
   0xc   :  { %806 = vmatprep.subr.bf16.mxu1 %v805_v31  ;;  %v96_v46 = vld [vmem:[%s1316_s1 + $0x138] sm:$0xff]  ;;  %v113_v49 = vld [vmem:[%s1316_s1 + $0x1c0] sm:$0xff]  ;;  %v114_v50 = vld [vmem:[%s1316_s1 + $0x1c8] sm:$0xff]  ;;  %v779_v51 = vpack.c.bf16 %v64_v43, %v63_v42  ;;  %v781_v53 = vpack.c.bf16 %v82_v48, %v81_v47 }
   0xd   :  { %v811_v52 = vpack.c.bf16 %v96_v46, %v95_v45  ;;  %v65_v54 = vld [vmem:[%s1316_s1 + $0x40] sm:$0xff]  ;;  %v66_v55 = vld [vmem:[%s1316_s1 + $0x48] sm:$0xff]  ;;  %v813_v57 = vpack.c.bf16 %v114_v50, %v113_v49  ;;  %v83_v59 = vld [vmem:[%s1316_s1 + $0xd0] sm:$0xff] }
   0xe   :  { %776 = vmatpush3.bf16.msra.mxu0 %v775_v35  ;;  %v97_v56 = vld [vmem:[%s1316_s1 + $0x140] sm:$0xff]  ;;  %v98_v58 = vld [vmem:[%s1316_s1 + $0x148] sm:$0xff]  ;;  %v84_v60 = vld [vmem:[%s1316_s1 + $0xd8] sm:$0xff]  ;;  %v783_v63 = vpack.c.bf16 %v66_v55, %v65_v54 }
   0xf   :  { %808 = vmatpush3.bf16.msra.mxu1 %v807_v39  ;;  %778 = vmatprep.subr.bf16.mxu0 %v777_v40  ;;  %v115_v61 = vld [vmem:[%s1316_s1 + $0x1d0] sm:$0xff]  ;;  %v116_v62 = vld [vmem:[%s1316_s1 + $0x1d8] sm:$0xff]  ;;  %v815_v0 = vpack.c.bf16 %v98_v58, %v97_v56  ;;  %v785_v1 = vpack.c.bf16 %v84_v60, %v83_v59  ;;  %v85_v7 = vld [vmem:[%s1316_s1 + $0xe0] sm:$0xff] }
  0x10   :  { %810 = vmatprep.subr.bf16.mxu1 %v809_v44  ;;  %v67_v2 = vld [vmem:[%s1316_s1 + $0x50] sm:$0xff]  ;;  %v68_v3 = vld [vmem:[%s1316_s1 + $0x58] sm:$0xff]  ;;  %v817_v5 = vpack.c.bf16 %v116_v62, %v115_v61  ;;  %v86_v8 = vld [vmem:[%s1316_s1 + $0xe8] sm:$0xff] }
  0x11   :  { %v99_v4 = vld [vmem:[%s1316_s1 + $0x150] sm:$0xff]  ;;  %v100_v6 = vld [vmem:[%s1316_s1 + $0x158] sm:$0xff]  ;;  %v117_v9 = vld [vmem:[%s1316_s1 + $0x1e0] sm:$0xff]  ;;  %v787_v11 = vpack.c.bf16 %v68_v3, %v67_v2  ;;  %v789_v15 = vpack.c.bf16 %v86_v8, %v85_v7 }
  0x12   :  { %780 = vmatpush3.bf16.msra.mxu0 %v779_v51  ;;  %v118_v10 = vld [vmem:[%s1316_s1 + $0x1e8] sm:$0xff]  ;;  %v69_v12 = vld [vmem:[%s1316_s1 + $0x60] sm:$0xff]  ;;  %v819_v14 = vpack.c.bf16 %v100_v6, %v99_v4  ;;  %v20_v18 = vld [vmem:[%s1317_s0 + $0x18] sm:$0xff] }
  0x13   :  { %812 = vmatpush3.bf16.msra.mxu1 %v811_v52  ;;  %782 = vmatprep.subr.bf16.mxu0 %v781_v53  ;;  %v70_v13 = vld [vmem:[%s1316_s1 + $0x68] sm:$0xff]  ;;  %v101_v16 = vld [vmem:[%s1316_s1 + $0x160] sm:$0xff]  ;;  %v821_v19 = vpack.c.bf16 %v118_v10, %v117_v9  ;;  %v87_v21 = vld [vmem:[%s1316_s1 + $0xf0] sm:$0xff] }
  0x14   :  { %814 = vmatprep.subr.bf16.mxu1 %v813_v57  ;;  %v18_v17 = vld [vmem:[%s1317_s0 + $0x8] sm:$0xff]  ;;  %v88_v22 = vld [vmem:[%s1316_s1 + $0xf8] sm:$0xff]  ;;  %v119_v23 = vld [vmem:[%s1316_s1 + $0x1f0] sm:$0xff]  ;;  %323 = vmatprep.mubr.f32.mxu1 %v20_v18  ;;  %v791_v25 = vpack.c.bf16 %v70_v13, %v69_v12 }
  0x15   :  { %v102_v20 = vld [vmem:[%s1316_s1 + $0x168] sm:$0xff]  ;;  %218 = vmatprep.mubr.f32.mxu0 %v18_v17  ;;  %v120_v24 = vld [vmem:[%s1316_s1 + $0x1f8] sm:$0xff]  ;;  %v793_v27 = vpack.c.bf16 %v88_v22, %v87_v21  ;;  %v71_v28 = vld [vmem:[%s1316_s1 + $0x70] sm:$0xff] }
  0x16   :  { %784 = vmatpush3.bf16.msra.mxu0 %v783_v63  ;;  %v823_v26 = vpack.c.bf16 %v102_v20, %v101_v16  ;;  %v72_v29 = vld [vmem:[%s1316_s1 + $0x78] sm:$0xff]  ;;  %v103_v30 = vld [vmem:[%s1316_s1 + $0x170] sm:$0xff]  ;;  %v825_v31 = vpack.c.bf16 %v120_v24, %v119_v23  ;;  %v121_v33 = vld [vmem:[%s1316_s1 + $0x200] sm:$0xff] }
  0x17   :  { %816 = vmatpush3.bf16.msra.mxu1 %v815_v0  ;;  %786 = vmatprep.subr.bf16.mxu0 %v785_v1  ;;  %v104_v32 = vld [vmem:[%s1316_s1 + $0x178] sm:$0xff]  ;;  %v122_v34 = vld [vmem:[%s1316_s1 + $0x208] sm:$0xff]  ;;  %v795_v35 = vpack.c.bf16 %v72_v29, %v71_v28  ;;  %v123_v38 = vld [vmem:[%s1316_s1 + $0x210] sm:$0xff] }
  0x18   :  { %818 = vmatprep.subr.bf16.mxu1 %v817_v5  ;;  %v827_v36 = vpack.c.bf16 %v104_v32, %v103_v30  ;;  %v829_v37 = vpack.c.bf16 %v122_v34, %v121_v33  ;;  %v124_v39 = vld [vmem:[%s1316_s1 + $0x218] sm:$0xff]  ;;  %v17_v40 = vld [vmem:[%s1317_s0] sm:$0xff]  ;;  %v19_v41 = vld [vmem:[%s1317_s0 + $0x10] sm:$0xff] }
  0x19   :  { %v23_v42 = vld [vmem:[%s1317_s0 + $0x30] sm:$0xff]  ;;  %v833_v43 = vpack.c.bf16 %v124_v39, %v123_v38  ;;  %v25_v44 = vld [vmem:[%s1317_s0 + $0x40] sm:$0xff]  ;;  %v126_v46 = vld [vmem:[%s1316_s1 + $0x228] sm:$0xff] }
  0x1a   :  { %788 = vmatpush3.bf16.msra.mxu0 %v787_v11  ;;  %v125_v45 = vld [vmem:[%s1316_s1 + $0x220] sm:$0xff]  ;;  %v22_v47 = vld [vmem:[%s1317_s0 + $0x28] sm:$0xff]  ;;  %v24_v48 = vld [vmem:[%s1317_s0 + $0x38] sm:$0xff] }
  0x1b   :  { %820 = vmatpush3.bf16.msra.mxu1 %v819_v14  ;;  %790 = vmatprep.subr.bf16.mxu0 %v789_v15  ;;  %v28_v49 = vld [vmem:[%s1317_s0 + $0x58] sm:$0xff]  ;;  %v30_v50 = vld [vmem:[%s1317_s0 + $0x68] sm:$0xff]  ;;  %v837_v51 = vpack.c.bf16 %v126_v46, %v125_v45  ;;  %v127_v52 = vld [vmem:[%s1316_s1 + $0x230] sm:$0xff] }
  0x1c   :  { %822 = vmatprep.subr.bf16.mxu1 %v821_v19  ;;  %v128_v53 = vld [vmem:[%s1316_s1 + $0x238] sm:$0xff]  ;;  %v27_v54 = vld [vmem:[%s1317_s0 + $0x50] sm:$0xff]  ;;  %v29_v55 = vld [vmem:[%s1317_s0 + $0x60] sm:$0xff] }
  0x1d   :  { %v33_v56 = vld [vmem:[%s1317_s0 + $0x80] sm:$0xff]  ;;  %v35_v57 = vld [vmem:[%s1317_s0 + $0x90] sm:$0xff]  ;;  %v841_v58 = vpack.c.bf16 %v128_v53, %v127_v52  ;;  %v32_v59 = vld [vmem:[%s1317_s0 + $0x78] sm:$0xff] }
  0x1e   :  { %792 = vmatpush3.bf16.msra.mxu0 %v791_v25  ;;  %v34_v60 = vld [vmem:[%s1317_s0 + $0x88] sm:$0xff]  ;;  %v40_v62 = vld [vmem:[%s1317_s0 + $0xb8] sm:$0xff]  ;;  %v471_v63 = vld [vmem:[%s1318_s2 + $0x10] sm:$0xff] }
  0x1f   :  { %824 = vmatpush3.bf16.msra.mxu1 %v823_v26  ;;  %794 = vmatprep.subr.bf16.mxu0 %v793_v27  ;;  %v38_v61 = vld [vmem:[%s1317_s0 + $0xa8] sm:$0xff]  ;;  %v37_v0 = vld [vmem:[%s1317_s0 + $0xa0] sm:$0xff]  ;;  %v39_v2 = vld [vmem:[%s1317_s0 + $0xb0] sm:$0xff] }
  0x20   :  { %826 = vmatprep.subr.bf16.mxu1 %v825_v31  ;;  %v469_v1 = vld [vmem:[%s1318_s2] sm:$0xff]  ;;  %v43_v3 = vld [vmem:[%s1317_s0 + $0xd0] sm:$0xff]  ;;  %489 = vperm.xlu1 %855, %v471_v63   ;;  %v472_v5 = vld [vmem:[%s1318_s2 + $0x18] sm:$0xff] }
  0x21   :  { %v45_v4 = vld [vmem:[%s1317_s0 + $0xe0] sm:$0xff]  ;;  %479 = vperm.xlu0 %854, %v469_v1   ;;  %v42_v6 = vld [vmem:[%s1317_s0 + $0xc8] sm:$0xff]  ;;  %v44_v8 = vld [vmem:[%s1317_s0 + $0xd8] sm:$0xff] }
  0x22   :  { %796 = vmatpush3.bf16.msra.mxu0 %v795_v35  ;;  %v470_v7 = vld [vmem:[%s1318_s2 + $0x8] sm:$0xff]  ;;  %v48_v9 = vld [vmem:[%s1317_s0 + $0xf8] sm:$0xff]  ;;  %v47_v12 = vld [vmem:[%s1317_s0 + $0xf0] sm:$0xff] }
  0x23   :  { %828 = vmatpush3.bf16.msra.mxu1 %v827_v36  ;;  %830 = vmatprep.subr.bf16.mxu0 %v829_v37  ;;  %v50_v10 = vld [vmem:[%s1317_s0 + $0x108] sm:$0xff]  ;;  %v473_v13 = vld [vmem:[%s1318_s2 + $0x20] sm:$0xff]  ;;  %v55_v16 = vld [vmem:[%s1317_s0 + $0x130] sm:$0xff] }
  0x24   :  { %845 = vmatprep.subr.bf16.mxu1 %v829_v37  ;;  %494 = vperm.xlu1 %855, %v472_v5   ;;  %v474_v11 = vld [vmem:[%s1318_s2 + $0x28] sm:$0xff]  ;;  %v49_v14 = vld [vmem:[%s1317_s0 + $0x100] sm:$0xff]  ;;  %v476_v17 = vld [vmem:[%s1318_s2 + $0x38] sm:$0xff] }
  0x25   :  { %219 = vmatmul.mubr.f32.vlgmr.msra.gmra.mrb[0].mxu0 %v17_v40  ;;  %484 = vperm.xlu0 %854, %v470_v7   ;;  %v53_v15 = vld [vmem:[%s1317_s0 + $0x120] sm:$0xff]  ;;  %v52_v18 = vld [vmem:[%s1317_s0 + $0x118] sm:$0xff]  ;;  %v475_v19 = vld [vmem:[%s1318_s2 + $0x30] sm:$0xff] }
  0x26   :  { %324 = vmatmul.mubr.f32.vlgmr.msra.gmra.mrb[0].mxu1 %v19_v41  ;;  %832 = vmatpush3.bf16.msra.mxu0 %v829_v37  ;;  %v54_v20 = vld [vmem:[%s1317_s0 + $0x128] sm:$0xff]  ;;  %v21_v21 = vld [vmem:[%s1317_s0 + $0x20] sm:$0xff]  ;;  %v31_v27 = vld [vmem:[%s1317_s0 + $0x70] sm:$0xff] }
  0x27   :  { %849 = vmatpush3.bf16.msra.mxu1 %v829_v37  ;;  %223 = vmatprep.mubr.f32.mxu0 %v23_v42  ;;  %v41_v22 = vld [vmem:[%s1317_s0 + $0xc0] sm:$0xff]  ;;  %v526_v23 = vld [vmem:[%s1319_s3 + $0x8] sm:$0xff]  ;;  %v51_v28 = vld [vmem:[%s1317_s0 + $0x110] sm:$0xff] }
  0x28   :  { %328 = vmatprep.mubr.f32.mxu1 %v25_v44  ;;  %834 = vmatprep.subr.bf16.mxu0 %v833_v43  ;;  %v26_v24 = vld [vmem:[%s1317_s0 + $0x48] sm:$0xff]  ;;  %v525_v25 = vld [vmem:[%s1319_s3] sm:$0xff]  ;;  %v528_v29 = vld [vmem:[%s1319_s3 + $0x18] sm:$0xff] }
  0x29   :  { %224 = vmatmul.mubr.f32.gmra.mrb[2].mxu0 %v22_v47  ;;  %846 = vmatprep.subr.bf16.mxu1 %v833_v43  ;;  %v46_v26 = vld [vmem:[%s1317_s0 + $0xe8] sm:$0xff]  ;;  %v36_v30 = vld [vmem:[%s1317_s0 + $0x98] sm:$0xff]  ;;  %v527_v31 = vld [vmem:[%s1319_s3 + $0x10] sm:$0xff] }
  0x2a   :  { %329 = vmatmul.mubr.f32.gmra.mrb[2].mxu1 %v24_v48  ;;  %228 = vmatprep.mubr.f32.mxu0 %v28_v49  ;;  %v56_v32 = vld [vmem:[%s1317_s0 + $0x138] sm:$0xff]  ;;  %v530_v33 = vld [vmem:[%s1319_s3 + $0x28] sm:$0xff]  ;;  %v529_v34 = vld [vmem:[%s1319_s3 + $0x20] sm:$0xff] }
  0x2b   :  { %333 = vmatprep.mubr.f32.mxu1 %v30_v50  ;;  %836 = vmatpush3.bf16.msra.mxu0 %v833_v43  ;;  %v532_v35 = vld [vmem:[%s1319_s3 + $0x38] sm:$0xff]  ;;  %v531_v36 = vld [vmem:[%s1319_s3 + $0x30] sm:$0xff] }
  0x2c   :  { %850 = vmatpush3.bf16.msra.mxu1 %v833_v43  ;;  %838 = vmatprep.subr.bf16.mxu0 %v837_v51 }
  0x2d   :  { %229 = vmatmul.mubr.f32.gmra.mrb[4].mxu0 %v27_v54  ;;  %847 = vmatprep.subr.bf16.mxu1 %v837_v51 }
  0x2e   :  { %334 = vmatmul.mubr.f32.gmra.mrb[4].mxu1 %v29_v55  ;;  %233 = vmatprep.mubr.f32.mxu0 %v33_v56 }
  0x2f   :  { %338 = vmatprep.mubr.f32.mxu1 %v35_v57  ;;  %840 = vmatpush3.bf16.msra.mxu0 %v837_v51 }
  0x30   :  { %851 = vmatpush3.bf16.msra.mxu1 %v837_v51  ;;  %842 = vmatprep.subr.bf16.mxu0 %v841_v58 }
  0x31   :  { %234 = vmatmul.mubr.f32.gmra.mrb[6].mxu0 %v32_v59  ;;  %848 = vmatprep.subr.bf16.mxu1 %v841_v58 }
  0x32   :  { %339 = vmatmul.mubr.f32.gmra.mrb[6].mxu1 %v34_v60  ;;  %238 = vmatprep.mubr.f32.mxu0 %v38_v61 }
  0x33   :  { %343 = vmatprep.mubr.f32.mxu1 %v40_v62  ;;  %844 = vmatpush3.bf16.msra.mxu0 %v841_v58 }
  0x34   :  { %852 = vmatpush3.bf16.msra.mxu1 %v841_v58  ;;  %504 = vperm.xlu1 %855, %v474_v11  }
  0x35   :  { %239 = vmatmul.mubr.f32.gmra.mrb[8].mxu0 %v37_v0  ;;  %499 = vperm.xlu0 %854, %v473_v13  }
  0x36   :  { %344 = vmatmul.mubr.f32.gmra.mrb[8].mxu1 %v39_v2  ;;  %243 = vmatprep.mubr.f32.mxu0 %v43_v3 }
  0x37   :  { %348 = vmatprep.mubr.f32.mxu1 %v45_v4 }
  0x38   :  { %514 = vperm.xlu1 %855, %v476_v17  }
  0x39   :  { %244 = vmatmul.mubr.f32.gmra.mrb[10].mxu0 %v42_v6  ;;  %509 = vperm.xlu0 %854, %v475_v19  }
  0x3a   :  { %349 = vmatmul.mubr.f32.gmra.mrb[10].mxu1 %v44_v8  ;;  %248 = vmatprep.mubr.f32.mxu0 %v48_v9 }
  0x3b   :  { %353 = vmatprep.mubr.f32.mxu1 %v50_v10 }
  0x3c   :  { %540 = vperm.xlu1 %855, %v526_v23  }
  0x3d   :  { %249 = vmatmul.mubr.f32.gmra.mrb[12].mxu0 %v47_v12  ;;  %535 = vperm.xlu0 %854, %v525_v25  }
  0x3e   :  { %354 = vmatmul.mubr.f32.gmra.mrb[12].mxu1 %v49_v14  ;;  %253 = vmatprep.mubr.f32.mxu0 %v53_v15 }
  0x3f   :  { %358 = vmatprep.mubr.f32.mxu1 %v55_v16 }
  0x40   :  { %550 = vperm.xlu1 %855, %v528_v29  }
  0x41   :  { %254 = vmatmul.mubr.f32.gmra.mrb[14].mxu0 %v52_v18  ;;  %545 = vperm.xlu0 %854, %v527_v31  }
  0x42   :  { %359 = vmatmul.mubr.f32.gmra.mrb[14].mxu1 %v54_v20  ;;  %753 = vmatprep.mubr.msk.f32.mxu0 %vm129_vm0, %v21_v21 }
  0x43   :  { %759 = vmatprep.mubr.msk.f32.mxu1 %vm129_vm0, %v41_v22 }
  0x44   :  { %560 = vperm.xlu1 %855, %v530_v33  }
  0x45   :  { %754 = vmatmul.mubr.msk.f32.vlgmr.msra.gmra.mrb[16].mxu0 %vm129_vm0, %v26_v24  ;;  %555 = vperm.xlu0 %854, %v529_v34  }
  0x46   :  { %760 = vmatmul.mubr.msk.f32.vlgmr.msra.gmra.mrb[16].mxu1 %vm129_vm0, %v46_v26  ;;  %756 = vmatprep.mubr.msk.f32.mxu0 %vm129_vm0, %v31_v27 }
  0x47   :  { %762 = vmatprep.mubr.msk.f32.mxu1 %vm129_vm0, %v51_v28 }
  0x48   :  { %570 = vperm.xlu1 %855, %v532_v35  }
  0x49   :  { %757 = vmatmul.mubr.msk.f32.gmra.mrb[18].mxu0 %vm129_vm0, %v36_v30  ;;  %565 = vperm.xlu0 %854, %v531_v36  }
  0x4a   :  { %763 = vmatmul.mubr.msk.f32.gmra.mrb[18].mxu1 %vm129_vm0, %v56_v32 }
  0x9f   :  { %v1274_v37 = vpop.permute.xlu1 %489 }
  0xa0   :  { %v1276_v38 = vpop.permute.xlu0 %479 }
  0xa3   :  { %v1278_v45 = vpop.permute.xlu1 %494 }
  0xa4   :  { %v1280_v50 = vpop.permute.xlu0 %484 }
  0xb3   :  { %v505_v58 = vpop.permute.xlu1 %504 }
  0xb4   :  { %v500_v62 = vpop.permute.xlu0 %499 }
  0xb7   :  { %v1282_v6 = vpop.permute.xlu1 %514 }
  0xb8   :  { %v1284_v11 = vpop.permute.xlu0 %509 }
  0xbb   :  { %v541_v19 = vpop.permute.xlu1 %540 }
  0xbc   :  { %v536_v23 = vpop.permute.xlu0 %535 }
  0xbf   :  { %v551_v31 = vpop.permute.xlu1 %550 }
  0xc0   :  { %v546_v36 = vpop.permute.xlu0 %545 }
  0xf8   :  { %v641_v39 = vpop.f32.mrb[0].mxu0 }
  0xf9   :  { %v697_v40 = vpop.f32.mrb[0].mxu1  ;;  %v642_v41 = vpop.f32.mrb[1].mxu0 }
  0xfa   :  { %v643_v42 = vadd.f32 %v642_v41, %v641_v39  ;;  %v698_v43 = vpop.f32.mrb[1].mxu1 }
  0xfb   :  { %v699_v44 = vadd.f32 %v698_v43, %v697_v40 }
  0xfc   :  { %v644_v46 = vpop.f32.mrb[2].mxu0 }
  0xfd   :  { %v700_v47 = vpop.f32.mrb[2].mxu1  ;;  %v645_v48 = vpop.f32.mrb[3].mxu0  ;;  %v326_v49 = vadd.f32 %v699_v44, %v643_v42 }
  0xfe   :  { %v646_v51 = vadd.f32 %v645_v48, %v644_v46  ;;  %v701_v52 = vpop.f32.mrb[3].mxu1 }
  0xff   :  { %v702_v53 = vadd.f32 %v701_v52, %v700_v47 }
 0x100   :  { %v647_v54 = vpop.f32.mrb[4].mxu0 }
 0x101   :  { %v703_v55 = vpop.f32.mrb[4].mxu1  ;;  %v648_v56 = vpop.f32.mrb[5].mxu0  ;;  %v331_v57 = vadd.f32 %v702_v53, %v646_v51 }
 0x102   :  { %v649_v59 = vadd.f32 %v648_v56, %v647_v54  ;;  %v704_v60 = vpop.f32.mrb[5].mxu1  ;;  %v561_v53 = vpop.permute.xlu1 %560 }
 0x103   :  { %v705_v61 = vadd.f32 %v704_v60, %v703_v55  ;;  %v556_v56 = vpop.permute.xlu0 %555 }
 0x104   :  { %v650_v63 = vpop.f32.mrb[6].mxu0 }
 0x105   :  { %v706_v0 = vpop.f32.mrb[6].mxu1  ;;  %v651_v1 = vpop.f32.mrb[7].mxu0  ;;  %v336_v2 = vadd.f32 %v705_v61, %v649_v59 }
 0x106   :  { %v652_v3 = vadd.f32 %v651_v1, %v650_v63  ;;  %v707_v4 = vpop.f32.mrb[7].mxu1 }
 0x107   :  { %v708_v5 = vadd.f32 %v707_v4, %v706_v0 }
 0x108   :  { %v653_v7 = vpop.f32.mrb[8].mxu0 }
 0x109   :  { %v709_v8 = vpop.f32.mrb[8].mxu1  ;;  %v654_v9 = vpop.f32.mrb[9].mxu0  ;;  %v341_v10 = vadd.f32 %v708_v5, %v652_v3 }
 0x10a   :  { %v655_v12 = vadd.f32 %v654_v9, %v653_v7  ;;  %v710_v13 = vpop.f32.mrb[9].mxu1 }
 0x10b   :  { %v711_v14 = vadd.f32 %v710_v13, %v709_v8 }
 0x10c   :  { %v656_v15 = vpop.f32.mrb[10].mxu0 }
 0x10d   :  { %v712_v16 = vpop.f32.mrb[10].mxu1  ;;  %v657_v17 = vpop.f32.mrb[11].mxu0  ;;  %v346_v18 = vadd.f32 %v711_v14, %v655_v12 }
 0x10e   :  { %v658_v20 = vadd.f32 %v657_v17, %v656_v15  ;;  %v713_v21 = vpop.f32.mrb[11].mxu1  ;;  %v566_v17 = vpop.permute.xlu0 %565 }
 0x10f   :  { %v714_v22 = vadd.f32 %v713_v21, %v712_v16 }
 0x110   :  { %v659_v24 = vpop.f32.mrb[12].mxu0 }
 0x111   :  { %v715_v25 = vpop.f32.mrb[12].mxu1  ;;  %v660_v26 = vpop.f32.mrb[13].mxu0  ;;  %v351_v27 = vadd.f32 %v714_v22, %v658_v20 }
 0x112   :  { %v661_v28 = vadd.f32 %v660_v26, %v659_v24  ;;  %v716_v29 = vpop.f32.mrb[13].mxu1 }
 0x113   :  { %v717_v30 = vadd.f32 %v716_v29, %v715_v25 }
 0x114   :  { %v662_v32 = vpop.f32.mrb[14].mxu0 }
 0x115   :  { %v718_v33 = vpop.f32.mrb[14].mxu1  ;;  %v663_v34 = vpop.f32.mrb[15].mxu0  ;;  %v356_v35 = vadd.f32 %v717_v30, %v661_v28 }
 0x116   :  { %v664_v39 = vadd.f32 %v663_v34, %v662_v32  ;;  %v719_v40 = vpop.f32.mrb[15].mxu1 }
 0x117   :  { %v720_v41 = vadd.f32 %v719_v40, %v718_v33 }
 0x118   :  { %v755_v42 = vpop.f32.mrb[16].mxu0 }
 0x119   :  { %v436_v43 = vadd.f32 %v755_v42, %v331_v57  ;;  %v761_v44 = vpop.f32.mrb[16].mxu1  ;;  %v430_v46 = vpop.f32.mrb[17].mxu0  ;;  %v361_v47 = vadd.f32 %v720_v41, %v664_v39 }
 0x11a   :  { %v456_v48 = vadd.f32 %v761_v44, %v351_v27  ;;  %v431_v51 = vadd.f32 %v430_v46, %v326_v49  ;;  %v450_v52 = vpop.f32.mrb[17].mxu1 }
 0x11b   :  { %v518_v54 = vmul.f32 %v1280_v50, %v436_v43  ;;  %v451_v55 = vadd.f32 %v450_v52, %v346_v18 }
 0x11c   :  { %v522_v59 = vmul.f32 %v505_v58, %v456_v48  ;;  %v517_v60 = vmul.f32 %v1276_v38, %v431_v51  ;;  %v758_v61 = vpop.f32.mrb[18].mxu0 }
 0x11d   :  { %v574_v63 = vadd.f32 %v541_v19, %v518_v54  ;;  %v521_v0 = vmul.f32 %v500_v62, %v451_v55  ;;  %v446_v1 = vadd.f32 %v758_v61, %v341_v10  ;;  %v764_v3 = vpop.f32.mrb[18].mxu1  ;;  %v440_v57 = vpop.f32.mrb[19].mxu0 }
 0x11e   :  { %v578_v4 = vadd.f32 %v561_v53, %v522_v59  ;;  %v573_v5 = vadd.f32 %v536_v23, %v517_v60  ;;  %v466_v7 = vadd.f32 %v764_v3, %v361_v47  ;;  %v441_v8 = vadd.f32 %v440_v57, %v336_v2  ;;  %v460_v49 = vpop.f32.mrb[19].mxu1  ;;  %v571_v62 = vpop.permute.xlu1 %570 }
 0x11f   :  { %v582_v9 = vmax.f32 %v574_v63, 0.0  ;;  %v577_v12 = vadd.f32 %v556_v56, %v521_v0  ;;  %v520_v50 = vmul.f32 %v1278_v45, %v446_v1  ;;  %v461_v13 = vadd.f32 %v460_v49, %v356_v35 }
 0x120   :  { %v586_v14 = vmax.f32 %v578_v4, 0.0  ;;  %v581_v58 = vmax.f32 %v573_v5, 0.0  ;;  %v524_v38 = vmul.f32 %v1282_v6, %v466_v7  ;;  %v519_v15 = vmul.f32 %v1274_v37, %v441_v8 }
 0x121   :  { %590 = vst [vmem:[%s1320_s4 + $0x8] sm:$0xff] %v582_v9  ;;  %v585_v10 = vmax.f32 %v577_v12, 0.0  ;;  %v576_v16 = vadd.f32 %v551_v31, %v520_v50  ;;  %v523_v2 = vmul.f32 %v1284_v11, %v461_v13 }
 0x122   :  { %594 = vst [vmem:[%s1320_s4 + $0x28] sm:$0xff] %v586_v14  ;;  %589 = vst [vmem:[%s1320_s4] sm:$0xff] %v581_v58  ;;  %v580_v45 = vadd.f32 %v571_v62, %v524_v38  ;;  %v575_v37 = vadd.f32 %v546_v36, %v519_v15 }
 0x123   :  { %593 = vst [vmem:[%s1320_s4 + $0x20] sm:$0xff] %v585_v10  ;;  %v584_v6 = vmax.f32 %v576_v16, 0.0  ;;  %v579_v18 = vadd.f32 %v566_v17, %v523_v2 }
 0x124   :  { %v588_v19 = vmax.f32 %v580_v45, 0.0  ;;  %v583_v20 = vmax.f32 %v575_v37, 0.0 }
 0x125   :  { %592 = vst [vmem:[%s1320_s4 + $0x18] sm:$0xff] %v584_v6  ;;  %v587_v11 = vmax.f32 %v579_v18, 0.0 }
 0x126   :  { %596 = vst [vmem:[%s1320_s4 + $0x38] sm:$0xff] %v588_v19  ;;  %591 = vst [vmem:[%s1320_s4 + $0x10] sm:$0xff] %v583_v20 }
 0x127   :  { %595 = vst [vmem:[%s1320_s4 + $0x30] sm:$0xff] %v587_v11 }

// kernel: forward.31
= control target key start
LH: loop header
LB: loop body
LE: loop exit
PB: predicated region body
PF: predicated region fallthrough
CT: control target
= control target key end

     0   :  { %vm160_vm0 = vcmask 523264   ;;  %v399_v33 = vmov 0   ;;  %vm244_vm1 = vcmask 9216   ;;  %vm242_vm2 = vcmask 15360   ;;  %s517_s1 = inlined_call_operand.vmem [shape: f32[128,2], index: 1, kind: input, shape index: {}]   ;;  %s518_s0 = inlined_call_operand.vmem [shape: f32[64,128], index: 0, kind: input, shape index: {}]   ;;  %s519_s2 = inlined_call_operand.vmem [shape: f32[10,64], index: 2, kind: input, shape index: {}]   ;;  %s520_s3 = inlined_call_operand.vmem [shape: f32[10,1], index: 3, kind: input, shape index: {}]   ;;  %s521_s4 = inlined_call_operand.vmem [shape: f32[10,2], index: 4, kind: output, shape index: {}]  }
   0x1   :  { %v25_v0 = vld [vmem:[%s517_s1] sm:$0xff]  ;;  %v26_v1 = vld [vmem:[%s517_s1 + $0x8] sm:$0xff]  ;;  %v27_v2 = vld [vmem:[%s517_s1 + $0x10] sm:$0xff]  ;;  %398 = vset.pattern.permute.xlu0 %v399_v33 }
   0x2   :  { %v349_v3 = vpack.c.bf16 %v26_v1, %v25_v0  ;;  %v28_v4 = vld [vmem:[%s517_s1 + $0x18] sm:$0xff]  ;;  %v29_v6 = vld [vmem:[%s517_s1 + $0x20] sm:$0xff]  ;;  %v30_v7 = vld [vmem:[%s517_s1 + $0x28] sm:$0xff] }
   0x3   :  { %v353_v5 = vpack.c.bf16 %v28_v4, %v27_v2  ;;  %v357_v8 = vpack.c.bf16 %v30_v7, %v29_v6  ;;  %v17_v9 = vld [vmem:[%s518_s0] sm:$0xff]  ;;  %v31_v10 = vld [vmem:[%s517_s1 + $0x30] sm:$0xff]  ;;  %v32_v11 = vld [vmem:[%s517_s1 + $0x38] sm:$0xff] }
   0x4   :  { %350 = vmatprep.subr.bf16.mxu0 %v349_v3  ;;  %318 = vmatprep.mubr.f32.mxu0 %v17_v9  ;;  %v361_v12 = vpack.c.bf16 %v32_v11, %v31_v10  ;;  %v33_v13 = vld [vmem:[%s517_s1 + $0x40] sm:$0xff]  ;;  %v34_v14 = vld [vmem:[%s517_s1 + $0x48] sm:$0xff]  ;;  %v35_v16 = vld [vmem:[%s517_s1 + $0x50] sm:$0xff] }
   0x5   :  { %352 = vmatpush3.bf16.msra.mxu0 %v349_v3  ;;  %v365_v15 = vpack.c.bf16 %v34_v14, %v33_v13  ;;  %v36_v17 = vld [vmem:[%s517_s1 + $0x58] sm:$0xff]  ;;  %v37_v19 = vld [vmem:[%s517_s1 + $0x60] sm:$0xff]  ;;  %v38_v20 = vld [vmem:[%s517_s1 + $0x68] sm:$0xff] }
   0x6   :  { %354 = vmatprep.subr.bf16.mxu0 %v353_v5  ;;  %v369_v18 = vpack.c.bf16 %v36_v17, %v35_v16  ;;  %v373_v21 = vpack.c.bf16 %v38_v20, %v37_v19  ;;  %v39_v22 = vld [vmem:[%s517_s1 + $0x70] sm:$0xff]  ;;  %v40_v23 = vld [vmem:[%s517_s1 + $0x78] sm:$0xff]  ;;  %v18_v25 = vld [vmem:[%s518_s0 + $0x8] sm:$0xff] }
   0x7   :  { %v377_v24 = vpack.c.bf16 %v40_v23, %v39_v22  ;;  %v19_v26 = vld [vmem:[%s518_s0 + $0x10] sm:$0xff]  ;;  %v20_v27 = vld [vmem:[%s518_s0 + $0x18] sm:$0xff]  ;;  %v21_v28 = vld [vmem:[%s518_s0 + $0x20] sm:$0xff] }
   0x8   :  { %v22_v29 = vld [vmem:[%s518_s0 + $0x28] sm:$0xff]  ;;  %v23_v30 = vld [vmem:[%s518_s0 + $0x30] sm:$0xff]  ;;  %v24_v31 = vld [vmem:[%s518_s0 + $0x38] sm:$0xff] }
   0x9   :  { %356 = vmatpush3.bf16.msra.mxu0 %v353_v5  ;;  %v146_v32 = vld [vmem:[%s519_s2] sm:$0xff]  ;;  %v149_v35 = vld [vmem:[%s520_s3 + $0x8] sm:$0x3] }
   0xa   :  { %358 = vmatprep.subr.bf16.mxu0 %v357_v8  ;;  %346 = vmatprep.mubr.msk.f32.mxu1 %vm160_vm0, %v146_v32  ;;  %v148_v34 = vld [vmem:[%s520_s3] sm:$0xff]  ;;  %v147_v48 = vld [vmem:[%s519_s2 + $0x8] sm:$0x3] }
   0xb   :  { %152 = vperm.xlu0 %398, %v148_v34  }
   0xd   :  { %360 = vmatpush3.bf16.msra.mxu0 %v357_v8 }
   0xe   :  { %362 = vmatprep.subr.bf16.mxu0 %v361_v12 }
   0xf   :  { %157 = vperm.xlu0 %398, %v149_v35  }
  0x11   :  { %364 = vmatpush3.bf16.msra.mxu0 %v361_v12 }
  0x12   :  { %366 = vmatprep.subr.bf16.mxu0 %v365_v15 }
  0x15   :  { %368 = vmatpush3.bf16.msra.mxu0 %v365_v15 }
  0x16   :  { %370 = vmatprep.subr.bf16.mxu0 %v369_v18 }
  0x19   :  { %372 = vmatpush3.bf16.msra.mxu0 %v369_v18 }
  0x1a   :  { %374 = vmatprep.subr.bf16.mxu0 %v373_v21 }
  0x1d   :  { %376 = vmatpush3.bf16.msra.mxu0 %v373_v21 }
  0x1e   :  { %378 = vmatprep.subr.bf16.mxu0 %v377_v24 }
  0x21   :  { %380 = vmatpush3.bf16.msra.mxu0 %v377_v24 }
  0x24   :  { %319 = vmatmul.mubr.f32.vlgmr.msra.gmra.mrb[0].mxu0 %v18_v25 }
  0x25   :  { %321 = vmatprep.mubr.f32.mxu0 %v19_v26 }
  0x28   :  { %322 = vmatmul.mubr.f32.gmra.mrb[2].mxu0 %v20_v27 }
  0x29   :  { %324 = vmatprep.mubr.f32.mxu0 %v21_v28 }
  0x2c   :  { %325 = vmatmul.mubr.f32.gmra.mrb[4].mxu0 %v22_v29 }
  0x2d   :  { %327 = vmatprep.mubr.f32.mxu0 %v23_v30 }
  0x30   :  { %328 = vmatmul.mubr.f32.gmra.mrb[6].mxu0 %v24_v31 }
  0x8a   :  { %v153_v49 = vpop.permute.xlu0 %152 }
  0x8e   :  { %v158_v50 = vpop.permute.xlu0 %157 }
  0xf7   :  { %v320_v36 = vpop.f32.mrb[0].mxu0 }
  0xf8   :  { %v107_v37 = vpop.f32.mrb[1].mxu0 }
  0xf9   :  { %v381_v38 = vpack.c.bf16 %v320_v36, %v107_v37 }
  0xfb   :  { %v323_v39 = vpop.f32.mrb[2].mxu0  ;;  %382 = vmatprep.subr.bf16.mxu1 %v381_v38 }
  0xfc   :  { %v117_v40 = vpop.f32.mrb[3].mxu0  ;;  %384 = vmatpush3.bf16.msra.mxu1 %v381_v38 }
  0xfd   :  { %v385_v41 = vpack.c.bf16 %v323_v39, %v117_v40 }
  0xff   :  { %v326_v42 = vpop.f32.mrb[4].mxu0  ;;  %386 = vmatprep.subr.bf16.mxu1 %v385_v41 }
 0x100   :  { %v127_v43 = vpop.f32.mrb[5].mxu0  ;;  %388 = vmatpush3.bf16.msra.mxu1 %v385_v41 }
 0x101   :  { %v389_v44 = vpack.c.bf16 %v326_v42, %v127_v43 }
 0x103   :  { %v329_v45 = vpop.f32.mrb[6].mxu0  ;;  %390 = vmatprep.subr.bf16.mxu1 %v389_v44 }
 0x104   :  { %v137_v46 = vpop.f32.mrb[7].mxu0  ;;  %392 = vmatpush3.bf16.msra.mxu1 %v389_v44 }
 0x105   :  { %v393_v47 = vpack.c.bf16 %v329_v45, %v137_v46 }
 0x107   :  { %394 = vmatprep.subr.bf16.mxu1 %v393_v47 }
 0x108   :  { %396 = vmatpush3.bf16.msra.mxu1 %v393_v47 }
 0x10b   :  { %347 = vmatmul.mubr.msk.f32.vlgmr.msra.gmra.mrb[0].mxu1 %vm160_vm0, %v147_v48 }
 0x1de   :  { %v348_v51 = vpop.f32.mrb[0].mxu1 }
 0x1df   :  { %v239_v52 = vadd.f32 %v348_v51, %v158_v50  ;;  %v233_v53 = vpop.f32.mrb[1].mxu1 }
 0x1e0   :  { %v234_v54 = vadd.f32 %v233_v53, %v153_v49 }
 0x1e1   :  { %245 = vst.msk [vmem:[%s521_s4 + $0x8] sm:$0x3] %vm244_vm1, %v239_v52 }
 0x1e2   :  { %243 = vst.msk [vmem:[%s521_s4] sm:$0xff] %vm242_vm2, %v234_v54 }

</bundles_post_ra>
